<compile_context>
chip_gen: v7x
topology: tpu7x:2x2x1
jax: 0.10.0
libtpu: 0.0.40
codegen_flags: <defaults>
</compile_context>

<pallas_src>
import jax
import jax.numpy as jnp
from jax.experimental import pallas as pl
from jax.experimental.pallas import tpu as pltpu

BN_EPS = 1e-5
CMAX = 32     # widest channel count in the stack (latent layer), padded width
LANES = 128   # lane axis: F interior + zero halo lives here


def make_fused_kernel(layer_defs, F, PAD):
    """Single kernel running the whole 10-layer conv+BN+ReLU stack per batch."""

    def kernel(x_ref, w_ref, s_ref, b_ref, o_ref):
        # x_ref: [1, CMAX, LANES]   (this batch, channels on sublanes, F on lanes)
        # w_ref: [NL, KHMAX, CMAX(cout), CMAX(cin)]  (zero padded)
        # s_ref / b_ref: [NL, CMAX, LANES]           (BN scale / folded bias)
        # o_ref: [1, 8, LANES]                       (channel 0 lives in row 0)

        # Interior-lane mask: keeps the zero halo exact after bias/ReLU so the
        # next layer's 'same' padding stays correct (computed once, VPU-cheap).
        lane = jax.lax.broadcasted_iota(jnp.int32, (CMAX, LANES), 1)
        interior = ((lane >= PAD) & (lane < PAD + F)).astype(jnp.float32)

        act = x_ref[0]                                        # [CMAX, LANES]
        for i, (cin, cout, kh) in enumerate(layer_defs):
            pad = (kh - 1) // 2
            acc = None
            for dh in range(kh):
                # out[f] needs in[f + dh - pad]  ->  roll lanes by (pad - dh).
                shift = (pad - dh) % LANES
                src = act if shift == 0 else pltpu.roll(act, shift, 1)
                part = jnp.dot(w_ref[i, dh], src,
                               preferred_element_type=jnp.float32)  # [CMAX, LANES]
                acc = part if acc is None else acc + part
            # Folded BatchNorm + ReLU, then re-zero halo lanes & padded channels.
            act = jnp.maximum(acc * s_ref[i] + b_ref[i], 0.0) * interior

        o_ref[0] = act[:8, :]                                 # full aligned tile store

    return kernel


def init_params(key, layer_defs):
    """Deterministic synthetic parameters (conv weight/bias + BN stats) per layer."""
    params = []
    for i, (cin, cout, kh) in enumerate(layer_defs):
        key, k1, k2 = jax.random.split(key, 3)
        fan_in = cin * kh
        w = jax.random.normal(k1, (kh, cin, cout), jnp.float32) / jnp.sqrt(fan_in)
        b = 0.1 * jax.random.normal(k2, (cout,), jnp.float32)
        idx = jnp.arange(cout, dtype=jnp.float32)
        gamma = 1.0 + 0.05 * jnp.cos(idx + i)
        beta = 0.02 * jnp.sin(idx - i)
        mean = 0.01 * idx
        var = 1.0 + 0.1 * idx / max(cout, 1)
        params.append(dict(w=w, b=b, gamma=gamma, beta=beta, mean=mean, var=var))
    return params


def prepare_params(params, layer_defs):
    """One-time packing: BN folded into (scale, bias); everything stacked & padded.

    Returns 3 arrays total (instead of 31 separate kernel inputs):
      w     [NL, KHMAX, CMAX, CMAX]   (tap, cout, cin) zero-padded
      scale [NL, CMAX, LANES]         lane-broadcast, zero for padded channels
      bias  [NL, CMAX, LANES]         lane-broadcast, zero for padded channels
    """
    NL = len(layer_defs)
    KHMAX = max(kh for _, _, kh in layer_defs)
    w_stack = jnp.zeros((NL, KHMAX, CMAX, CMAX), jnp.float32)
    s_stack = jnp.zeros((NL, CMAX, LANES), jnp.float32)
    b_stack = jnp.zeros((NL, CMAX, LANES), jnp.float32)
    for i, (p, (cin, cout, kh)) in enumerate(zip(params, layer_defs)):
        scale = (p["gamma"] / jnp.sqrt(p["var"] + BN_EPS)).astype(jnp.float32)
        bias = ((p["b"] - p["mean"]) * scale + p["beta"]).astype(jnp.float32)
        w_t = jnp.transpose(p["w"], (0, 2, 1)).astype(jnp.float32)   # [kh, cout, cin]
        w_stack = w_stack.at[i, :kh, :cout, :cin].set(w_t)
        s_stack = s_stack.at[i, :cout, :].set(
            jnp.broadcast_to(scale[:, None], (cout, LANES)))
        b_stack = b_stack.at[i, :cout, :].set(
            jnp.broadcast_to(bias[:, None], (cout, LANES)))
    return dict(w=w_stack, scale=s_stack, bias=b_stack)


def mycnn_forward(x_nchw, prep, layer_defs):
    """Fused Pallas forward.  x_nchw: [B, 1, F, T] -> [B, 1, F, 1] (matches PyTorch)."""
    B, _, F, T = x_nchw.shape
    NL = len(layer_defs)
    KHMAX = max(kh for _, _, kh in layer_defs)
    PAD = max((kh - 1) // 2 for _, _, kh in layer_defs)
    assert PAD + F + PAD <= LANES

    # Lane-dense input: conv1's width axis T folds into the channel (sublane)
    # dim, F sits on lanes PAD..PAD+F, everything else is zero halo.
    xt = jnp.transpose(x_nchw[:, 0, :, :], (0, 2, 1)).astype(jnp.float32)  # [B, T, F]
    x_in = jnp.zeros((B, CMAX, LANES), jnp.float32).at[:, :T, PAD:PAD + F].set(xt)

    flops = sum(2 * B * LANES * CMAX * CMAX * kh for _, _, kh in layer_defs)
    bytes_accessed = 4 * (x_in.size + int(prep["w"].size) + int(prep["scale"].size)
                          + int(prep["bias"].size) + B * 8 * LANES)

    kernel = make_fused_kernel(layer_defs, F, PAD)
    out = pl.pallas_call(
        kernel,
        grid=(B,),
        out_shape=jax.ShapeDtypeStruct((B, 8, LANES), jnp.float32),
        in_specs=[
            pl.BlockSpec((1, CMAX, LANES), lambda b: (b, 0, 0)),
            pl.BlockSpec((NL, KHMAX, CMAX, CMAX), lambda b: (0, 0, 0, 0)),
            pl.BlockSpec((NL, CMAX, LANES), lambda b: (0, 0, 0)),
            pl.BlockSpec((NL, CMAX, LANES), lambda b: (0, 0, 0)),
        ],
        out_specs=pl.BlockSpec((1, 8, LANES), lambda b: (b, 0, 0)),
        compiler_params=pltpu.CompilerParams(dimension_semantics=("parallel",)),
        cost_estimate=pl.CostEstimate(flops=flops, transcendentals=0,
                                      bytes_accessed=bytes_accessed),
    )(x_in, prep["w"], prep["scale"], prep["bias"])

    # Channel 0, interior lanes -> NCHW [B, 1, F, 1].
    return out[:, 0, PAD:PAD + F][:, None, :, None]


def reference_forward(x_nchw, params, layer_defs):
    """Pure-JAX (lax.conv) reference with identical semantics, for validation."""
    x = x_nchw
    for i, (p, (cin, cout, kh)) in enumerate(zip(params, layer_defs)):
        w = p["w"]  # [kh, cin_eff, cout]
        if i == 0:
            w_oihw = jnp.transpose(w, (2, 0, 1))[:, None, :, :]   # [cout, 1, kh, T]
        else:
            w_oihw = jnp.transpose(w, (2, 1, 0))[:, :, :, None]   # [cout, cin, kh, 1]
        pad = (kh - 1) // 2
        y = jax.lax.conv_general_dilated(
            x, w_oihw, window_strides=(1, 1), padding=((pad, pad), (0, 0)),
            dimension_numbers=("NCHW", "OIHW", "NCHW"),
            precision=jax.lax.Precision.HIGHEST)
        y = y + p["b"][None, :, None, None]
        y = (y - p["mean"][None, :, None, None]) / jnp.sqrt(
            p["var"][None, :, None, None] + BN_EPS)
        y = y * p["gamma"][None, :, None, None] + p["beta"][None, :, None, None]
        x = jnp.maximum(y, 0.0)
    return x


if __name__ == "__main__":
    # Small shapes implied by the module: n_fft=32 -> F = 17 freq bins, n_frames = 8.
    B, F, T = 2, 17, 8
    key = jax.random.PRNGKey(0)
    kx, kp = jax.random.split(key)
    x_nchw = jax.random.normal(kx, (B, 1, F, T), dtype=jnp.float32)

    # (cin_effective, cout, kernel_height) per ConvLayer.  Layer 1 folds T into cin.
    layer_defs = (
        (T, 12, 13), (12, 16, 11), (16, 20, 9), (20, 24, 7), (24, 32, 7),
        (32, 24, 7), (24, 20, 9), (20, 16, 11), (16, 12, 13), (12, 1, F),
    )
    params = init_params(kp, layer_defs)
    prep = prepare_params(params, layer_defs)       # BN folding / packing done once

    forward = jax.jit(lambda x, p: mycnn_forward(x, p, layer_defs))
    out = jax.block_until_ready(forward(x_nchw, prep))
    assert out.shape == (B, 1, F, 1), out.shape

    ref = reference_forward(x_nchw, params, layer_defs)
    err = float(jnp.max(jnp.abs(out - ref)))
    assert jnp.allclose(out, ref, rtol=1e-2, atol=1e-3), err

    print("KERNEL_OK")
</pallas_src>

<mosaic_0001>
module attributes {stable_mosaic.version = 11 : i64} {
  func.func @kernel(%arg0: i32, %arg1: memref<1x32x128xf32, #tpu.memory_space<vmem>>, %arg2: memref<10x17x32x32xf32, #tpu.memory_space<vmem>>, %arg3: memref<10x32x128xf32, #tpu.memory_space<vmem>>, %arg4: memref<10x32x128xf32, #tpu.memory_space<vmem>>, %arg5: memref<1x8x128xf32, #tpu.memory_space<vmem>>) attributes {dimension_semantics = [#tpu.dimension_semantics<parallel>], iteration_bounds = array<i64: 2>, scalar_prefetch = 0 : i64, scratch_operands = 0 : i64, tpu.core_type = #tpu.core_type<tc>, window_params = [{transform_indices = @transform_0, window_bounds = array<i64: 1, 32, 128>}, {pipeline_mode = #tpu.pipeline_mode<synchronous>, transform_indices = @transform_1, window_bounds = array<i64: 10, 17, 32, 32>}, {pipeline_mode = #tpu.pipeline_mode<synchronous>, transform_indices = @transform_2, window_bounds = array<i64: 10, 32, 128>}, {pipeline_mode = #tpu.pipeline_mode<synchronous>, transform_indices = @transform_3, window_bounds = array<i64: 10, 32, 128>}, {transform_indices = @transform_4, window_bounds = array<i64: 1, 8, 128>}]} {
    %0 = tpu.iota {dimensions = array<i32: 1>} : vector<32x128xi32>
    %c8_i32 = arith.constant 8 : i32
    %1 = vector.broadcast %c8_i32 : i32 to vector<32x128xi32>
    %2 = arith.cmpi sge, %0, %1 : vector<32x128xi32>
    %c25_i32 = arith.constant 25 : i32
    %3 = vector.broadcast %c25_i32 : i32 to vector<32x128xi32>
    %4 = arith.cmpi slt, %0, %3 : vector<32x128xi32>
    %5 = arith.andi %2, %4 : vector<32x128xi1>
    %6 = arith.extui %5 : vector<32x128xi1> to vector<32x128xi32>
    %7 = arith.sitofp %6 : vector<32x128xi32> to vector<32x128xf32>
    %c0 = arith.constant 0 : index
    %c0_0 = arith.constant 0 : index
    %c0_1 = arith.constant 0 : index
    %8 = vector.load %arg1[%c0, %c0_0, %c0_1] : memref<1x32x128xf32, #tpu.memory_space<vmem>>, vector<1x32x128xf32>
    %9 = vector.shape_cast %8 : vector<1x32x128xf32> to vector<32x128xf32>
    %c6_i32 = arith.constant 6 : i32
    %10 = tpu.dynamic_rotate %9 by %c6_i32 dim 1 : vector<32x128xf32>, i32 -> vector<32x128xf32>
    %c0_2 = arith.constant 0 : index
    %c0_3 = arith.constant 0 : index
    %c0_4 = arith.constant 0 : index
    %c0_5 = arith.constant 0 : index
    %11 = vector.load %arg2[%c0_2, %c0_3, %c0_4, %c0_5] : memref<10x17x32x32xf32, #tpu.memory_space<vmem>>, vector<1x1x32x32xf32>
    %12 = vector.shape_cast %11 : vector<1x1x32x32xf32> to vector<32x32xf32>
    %cst = arith.constant dense<0.000000e+00> : vector<32x128xf32>
    %13 = tpu.matmul %12, %10, %cst {dimension_numbers = #tpu.dot_dimension_numbers<[1], [0], [0], [1], [0, 0, 1, 1], [], []>} : vector<32x32xf32>, vector<32x128xf32>, vector<32x128xf32> -> vector<32x128xf32>
    %c5_i32 = arith.constant 5 : i32
    %14 = tpu.dynamic_rotate %9 by %c5_i32 dim 1 : vector<32x128xf32>, i32 -> vector<32x128xf32>
    %c0_6 = arith.constant 0 : index
    %c1 = arith.constant 1 : index
    %c0_7 = arith.constant 0 : index
    %c0_8 = arith.constant 0 : index
    %15 = vector.load %arg2[%c0_6, %c1, %c0_7, %c0_8] : memref<10x17x32x32xf32, #tpu.memory_space<vmem>>, vector<1x1x32x32xf32>
    %16 = vector.shape_cast %15 : vector<1x1x32x32xf32> to vector<32x32xf32>
    %cst_9 = arith.constant dense<0.000000e+00> : vector<32x128xf32>
    %17 = tpu.matmul %16, %14, %cst_9 {dimension_numbers = #tpu.dot_dimension_numbers<[1], [0], [0], [1], [0, 0, 1, 1], [], []>} : vector<32x32xf32>, vector<32x128xf32>, vector<32x128xf32> -> vector<32x128xf32>
    %18 = arith.addf %13, %17 : vector<32x128xf32>
    %c4_i32 = arith.constant 4 : i32
    %19 = tpu.dynamic_rotate %9 by %c4_i32 dim 1 : vector<32x128xf32>, i32 -> vector<32x128xf32>
    %c0_10 = arith.constant 0 : index
    %c2 = arith.constant 2 : index
    %c0_11 = arith.constant 0 : index
    %c0_12 = arith.constant 0 : index
    %20 = vector.load %arg2[%c0_10, %c2, %c0_11, %c0_12] : memref<10x17x32x32xf32, #tpu.memory_space<vmem>>, vector<1x1x32x32xf32>
    %21 = vector.shape_cast %20 : vector<1x1x32x32xf32> to vector<32x32xf32>
    %cst_13 = arith.constant dense<0.000000e+00> : vector<32x128xf32>
    %22 = tpu.matmul %21, %19, %cst_13 {dimension_numbers = #tpu.dot_dimension_numbers<[1], [0], [0], [1], [0, 0, 1, 1], [], []>} : vector<32x32xf32>, vector<32x128xf32>, vector<32x128xf32> -> vector<32x128xf32>
    %23 = arith.addf %18, %22 : vector<32x128xf32>
    %c3_i32 = arith.constant 3 : i32
    %24 = tpu.dynamic_rotate %9 by %c3_i32 dim 1 : vector<32x128xf32>, i32 -> vector<32x128xf32>
    %c0_14 = arith.constant 0 : index
    %c3 = arith.constant 3 : index
    %c0_15 = arith.constant 0 : index
    %c0_16 = arith.constant 0 : index
    %25 = vector.load %arg2[%c0_14, %c3, %c0_15, %c0_16] : memref<10x17x32x32xf32, #tpu.memory_space<vmem>>, vector<1x1x32x32xf32>
    %26 = vector.shape_cast %25 : vector<1x1x32x32xf32> to vector<32x32xf32>
    %cst_17 = arith.constant dense<0.000000e+00> : vector<32x128xf32>
    %27 = tpu.matmul %26, %24, %cst_17 {dimension_numbers = #tpu.dot_dimension_numbers<[1], [0], [0], [1], [0, 0, 1, 1], [], []>} : vector<32x32xf32>, vector<32x128xf32>, vector<32x128xf32> -> vector<32x128xf32>
    %28 = arith.addf %23, %27 : vector<32x128xf32>
    %c2_i32 = arith.constant 2 : i32
    %29 = tpu.dynamic_rotate %9 by %c2_i32 dim 1 : vector<32x128xf32>, i32 -> vector<32x128xf32>
    %c0_18 = arith.constant 0 : index
    %c4 = arith.constant 4 : index
    %c0_19 = arith.constant 0 : index
    %c0_20 = arith.constant 0 : index
    %30 = vector.load %arg2[%c0_18, %c4, %c0_19, %c0_20] : memref<10x17x32x32xf32, #tpu.memory_space<vmem>>, vector<1x1x32x32xf32>
    %31 = vector.shape_cast %30 : vector<1x1x32x32xf32> to vector<32x32xf32>
    %cst_21 = arith.constant dense<0.000000e+00> : vector<32x128xf32>
    %32 = tpu.matmul %31, %29, %cst_21 {dimension_numbers = #tpu.dot_dimension_numbers<[1], [0], [0], [1], [0, 0, 1, 1], [], []>} : vector<32x32xf32>, vector<32x128xf32>, vector<32x128xf32> -> vector<32x128xf32>
    %33 = arith.addf %28, %32 : vector<32x128xf32>
    %c1_i32 = arith.constant 1 : i32
    %34 = tpu.dynamic_rotate %9 by %c1_i32 dim 1 : vector<32x128xf32>, i32 -> vector<32x128xf32>
    %c0_22 = arith.constant 0 : index
    %c5 = arith.constant 5 : index
    %c0_23 = arith.constant 0 : index
    %c0_24 = arith.constant 0 : index
    %35 = vector.load %arg2[%c0_22, %c5, %c0_23, %c0_24] : memref<10x17x32x32xf32, #tpu.memory_space<vmem>>, vector<1x1x32x32xf32>
    %36 = vector.shape_cast %35 : vector<1x1x32x32xf32> to vector<32x32xf32>
    %cst_25 = arith.constant dense<0.000000e+00> : vector<32x128xf32>
    %37 = tpu.matmul %36, %34, %cst_25 {dimension_numbers = #tpu.dot_dimension_numbers<[1], [0], [0], [1], [0, 0, 1, 1], [], []>} : vector<32x32xf32>, vector<32x128xf32>, vector<32x128xf32> -> vector<32x128xf32>
    %38 = arith.addf %33, %37 : vector<32x128xf32>
    %c0_26 = arith.constant 0 : index
    %c6 = arith.constant 6 : index
    %c0_27 = arith.constant 0 : index
    %c0_28 = arith.constant 0 : index
    %39 = vector.load %arg2[%c0_26, %c6, %c0_27, %c0_28] : memref<10x17x32x32xf32, #tpu.memory_space<vmem>>, vector<1x1x32x32xf32>
    %40 = vector.shape_cast %39 : vector<1x1x32x32xf32> to vector<32x32xf32>
    %cst_29 = arith.constant dense<0.000000e+00> : vector<32x128xf32>
    %41 = tpu.matmul %40, %9, %cst_29 {dimension_numbers = #tpu.dot_dimension_numbers<[1], [0], [0], [1], [0, 0, 1, 1], [], []>} : vector<32x32xf32>, vector<32x128xf32>, vector<32x128xf32> -> vector<32x128xf32>
    %42 = arith.addf %38, %41 : vector<32x128xf32>
    %c127_i32 = arith.constant 127 : i32
    %43 = tpu.dynamic_rotate %9 by %c127_i32 dim 1 : vector<32x128xf32>, i32 -> vector<32x128xf32>
    %c0_30 = arith.constant 0 : index
    %c7 = arith.constant 7 : index
    %c0_31 = arith.constant 0 : index
    %c0_32 = arith.constant 0 : index
    %44 = vector.load %arg2[%c0_30, %c7, %c0_31, %c0_32] : memref<10x17x32x32xf32, #tpu.memory_space<vmem>>, vector<1x1x32x32xf32>
    %45 = vector.shape_cast %44 : vector<1x1x32x32xf32> to vector<32x32xf32>
    %cst_33 = arith.constant dense<0.000000e+00> : vector<32x128xf32>
    %46 = tpu.matmul %45, %43, %cst_33 {dimension_numbers = #tpu.dot_dimension_numbers<[1], [0], [0], [1], [0, 0, 1, 1], [], []>} : vector<32x32xf32>, vector<32x128xf32>, vector<32x128xf32> -> vector<32x128xf32>
    %47 = arith.addf %42, %46 : vector<32x128xf32>
    %c126_i32 = arith.constant 126 : i32
    %48 = tpu.dynamic_rotate %9 by %c126_i32 dim 1 : vector<32x128xf32>, i32 -> vector<32x128xf32>
    %c0_34 = arith.constant 0 : index
    %c8 = arith.constant 8 : index
    %c0_35 = arith.constant 0 : index
    %c0_36 = arith.constant 0 : index
    %49 = vector.load %arg2[%c0_34, %c8, %c0_35, %c0_36] : memref<10x17x32x32xf32, #tpu.memory_space<vmem>>, vector<1x1x32x32xf32>
    %50 = vector.shape_cast %49 : vector<1x1x32x32xf32> to vector<32x32xf32>
    %cst_37 = arith.constant dense<0.000000e+00> : vector<32x128xf32>
    %51 = tpu.matmul %50, %48, %cst_37 {dimension_numbers = #tpu.dot_dimension_numbers<[1], [0], [0], [1], [0, 0, 1, 1], [], []>} : vector<32x32xf32>, vector<32x128xf32>, vector<32x128xf32> -> vector<32x128xf32>
    %52 = arith.addf %47, %51 : vector<32x128xf32>
    %c125_i32 = arith.constant 125 : i32
    %53 = tpu.dynamic_rotate %9 by %c125_i32 dim 1 : vector<32x128xf32>, i32 -> vector<32x128xf32>
    %c0_38 = arith.constant 0 : index
    %c9 = arith.constant 9 : index
    %c0_39 = arith.constant 0 : index
    %c0_40 = arith.constant 0 : index
    %54 = vector.load %arg2[%c0_38, %c9, %c0_39, %c0_40] : memref<10x17x32x32xf32, #tpu.memory_space<vmem>>, vector<1x1x32x32xf32>
    %55 = vector.shape_cast %54 : vector<1x1x32x32xf32> to vector<32x32xf32>
    %cst_41 = arith.constant dense<0.000000e+00> : vector<32x128xf32>
    %56 = tpu.matmul %55, %53, %cst_41 {dimension_numbers = #tpu.dot_dimension_numbers<[1], [0], [0], [1], [0, 0, 1, 1], [], []>} : vector<32x32xf32>, vector<32x128xf32>, vector<32x128xf32> -> vector<32x128xf32>
    %57 = arith.addf %52, %56 : vector<32x128xf32>
    %c124_i32 = arith.constant 124 : i32
    %58 = tpu.dynamic_rotate %9 by %c124_i32 dim 1 : vector<32x128xf32>, i32 -> vector<32x128xf32>
    %c0_42 = arith.constant 0 : index
    %c10 = arith.constant 10 : index
    %c0_43 = arith.constant 0 : index
    %c0_44 = arith.constant 0 : index
    %59 = vector.load %arg2[%c0_42, %c10, %c0_43, %c0_44] : memref<10x17x32x32xf32, #tpu.memory_space<vmem>>, vector<1x1x32x32xf32>
    %60 = vector.shape_cast %59 : vector<1x1x32x32xf32> to vector<32x32xf32>
    %cst_45 = arith.constant dense<0.000000e+00> : vector<32x128xf32>
    %61 = tpu.matmul %60, %58, %cst_45 {dimension_numbers = #tpu.dot_dimension_numbers<[1], [0], [0], [1], [0, 0, 1, 1], [], []>} : vector<32x32xf32>, vector<32x128xf32>, vector<32x128xf32> -> vector<32x128xf32>
    %62 = arith.addf %57, %61 : vector<32x128xf32>
    %c123_i32 = arith.constant 123 : i32
    %63 = tpu.dynamic_rotate %9 by %c123_i32 dim 1 : vector<32x128xf32>, i32 -> vector<32x128xf32>
    %c0_46 = arith.constant 0 : index
    %c11 = arith.constant 11 : index
    %c0_47 = arith.constant 0 : index
    %c0_48 = arith.constant 0 : index
    %64 = vector.load %arg2[%c0_46, %c11, %c0_47, %c0_48] : memref<10x17x32x32xf32, #tpu.memory_space<vmem>>, vector<1x1x32x32xf32>
    %65 = vector.shape_cast %64 : vector<1x1x32x32xf32> to vector<32x32xf32>
    %cst_49 = arith.constant dense<0.000000e+00> : vector<32x128xf32>
    %66 = tpu.matmul %65, %63, %cst_49 {dimension_numbers = #tpu.dot_dimension_numbers<[1], [0], [0], [1], [0, 0, 1, 1], [], []>} : vector<32x32xf32>, vector<32x128xf32>, vector<32x128xf32> -> vector<32x128xf32>
    %67 = arith.addf %62, %66 : vector<32x128xf32>
    %c122_i32 = arith.constant 122 : i32
    %68 = tpu.dynamic_rotate %9 by %c122_i32 dim 1 : vector<32x128xf32>, i32 -> vector<32x128xf32>
    %c0_50 = arith.constant 0 : index
    %c12 = arith.constant 12 : index
    %c0_51 = arith.constant 0 : index
    %c0_52 = arith.constant 0 : index
    %69 = vector.load %arg2[%c0_50, %c12, %c0_51, %c0_52] : memref<10x17x32x32xf32, #tpu.memory_space<vmem>>, vector<1x1x32x32xf32>
    %70 = vector.shape_cast %69 : vector<1x1x32x32xf32> to vector<32x32xf32>
    %cst_53 = arith.constant dense<0.000000e+00> : vector<32x128xf32>
    %71 = tpu.matmul %70, %68, %cst_53 {dimension_numbers = #tpu.dot_dimension_numbers<[1], [0], [0], [1], [0, 0, 1, 1], [], []>} : vector<32x32xf32>, vector<32x128xf32>, vector<32x128xf32> -> vector<32x128xf32>
    %72 = arith.addf %67, %71 : vector<32x128xf32>
    %c0_54 = arith.constant 0 : index
    %c0_55 = arith.constant 0 : index
    %c0_56 = arith.constant 0 : index
    %73 = vector.load %arg3[%c0_54, %c0_55, %c0_56] : memref<10x32x128xf32, #tpu.memory_space<vmem>>, vector<1x32x128xf32>
    %74 = vector.shape_cast %73 : vector<1x32x128xf32> to vector<32x128xf32>
    %75 = arith.mulf %72, %74 : vector<32x128xf32>
    %c0_57 = arith.constant 0 : index
    %c0_58 = arith.constant 0 : index
    %c0_59 = arith.constant 0 : index
    %76 = vector.load %arg4[%c0_57, %c0_58, %c0_59] : memref<10x32x128xf32, #tpu.memory_space<vmem>>, vector<1x32x128xf32>
    %77 = vector.shape_cast %76 : vector<1x32x128xf32> to vector<32x128xf32>
    %78 = arith.addf %75, %77 : vector<32x128xf32>
    %cst_60 = arith.constant 0.000000e+00 : f32
    %79 = vector.broadcast %cst_60 : f32 to vector<32x128xf32>
    %80 = arith.maximumf %78, %79 : vector<32x128xf32>
    %81 = arith.mulf %80, %7 : vector<32x128xf32>
    %c5_i32_61 = arith.constant 5 : i32
    %82 = tpu.dynamic_rotate %81 by %c5_i32_61 dim 1 : vector<32x128xf32>, i32 -> vector<32x128xf32>
    %c1_62 = arith.constant 1 : index
    %c0_63 = arith.constant 0 : index
    %c0_64 = arith.constant 0 : index
    %c0_65 = arith.constant 0 : index
    %83 = vector.load %arg2[%c1_62, %c0_63, %c0_64, %c0_65] : memref<10x17x32x32xf32, #tpu.memory_space<vmem>>, vector<1x1x32x32xf32>
    %84 = vector.shape_cast %83 : vector<1x1x32x32xf32> to vector<32x32xf32>
    %cst_66 = arith.constant dense<0.000000e+00> : vector<32x128xf32>
    %85 = tpu.matmul %84, %82, %cst_66 {dimension_numbers = #tpu.dot_dimension_numbers<[1], [0], [0], [1], [0, 0, 1, 1], [], []>} : vector<32x32xf32>, vector<32x128xf32>, vector<32x128xf32> -> vector<32x128xf32>
    %c4_i32_67 = arith.constant 4 : i32
    %86 = tpu.dynamic_rotate %81 by %c4_i32_67 dim 1 : vector<32x128xf32>, i32 -> vector<32x128xf32>
    %c1_68 = arith.constant 1 : index
    %c1_69 = arith.constant 1 : index
    %c0_70 = arith.constant 0 : index
    %c0_71 = arith.constant 0 : index
    %87 = vector.load %arg2[%c1_68, %c1_69, %c0_70, %c0_71] : memref<10x17x32x32xf32, #tpu.memory_space<vmem>>, vector<1x1x32x32xf32>
    %88 = vector.shape_cast %87 : vector<1x1x32x32xf32> to vector<32x32xf32>
    %cst_72 = arith.constant dense<0.000000e+00> : vector<32x128xf32>
    %89 = tpu.matmul %88, %86, %cst_72 {dimension_numbers = #tpu.dot_dimension_numbers<[1], [0], [0], [1], [0, 0, 1, 1], [], []>} : vector<32x32xf32>, vector<32x128xf32>, vector<32x128xf32> -> vector<32x128xf32>
    %90 = arith.addf %85, %89 : vector<32x128xf32>
    %c3_i32_73 = arith.constant 3 : i32
    %91 = tpu.dynamic_rotate %81 by %c3_i32_73 dim 1 : vector<32x128xf32>, i32 -> vector<32x128xf32>
    %c1_74 = arith.constant 1 : index
    %c2_75 = arith.constant 2 : index
    %c0_76 = arith.constant 0 : index
    %c0_77 = arith.constant 0 : index
    %92 = vector.load %arg2[%c1_74, %c2_75, %c0_76, %c0_77] : memref<10x17x32x32xf32, #tpu.memory_space<vmem>>, vector<1x1x32x32xf32>
    %93 = vector.shape_cast %92 : vector<1x1x32x32xf32> to vector<32x32xf32>
    %cst_78 = arith.constant dense<0.000000e+00> : vector<32x128xf32>
    %94 = tpu.matmul %93, %91, %cst_78 {dimension_numbers = #tpu.dot_dimension_numbers<[1], [0], [0], [1], [0, 0, 1, 1], [], []>} : vector<32x32xf32>, vector<32x128xf32>, vector<32x128xf32> -> vector<32x128xf32>
    %95 = arith.addf %90, %94 : vector<32x128xf32>
    %c2_i32_79 = arith.constant 2 : i32
    %96 = tpu.dynamic_rotate %81 by %c2_i32_79 dim 1 : vector<32x128xf32>, i32 -> vector<32x128xf32>
    %c1_80 = arith.constant 1 : index
    %c3_81 = arith.constant 3 : index
    %c0_82 = arith.constant 0 : index
    %c0_83 = arith.constant 0 : index
    %97 = vector.load %arg2[%c1_80, %c3_81, %c0_82, %c0_83] : memref<10x17x32x32xf32, #tpu.memory_space<vmem>>, vector<1x1x32x32xf32>
    %98 = vector.shape_cast %97 : vector<1x1x32x32xf32> to vector<32x32xf32>
    %cst_84 = arith.constant dense<0.000000e+00> : vector<32x128xf32>
    %99 = tpu.matmul %98, %96, %cst_84 {dimension_numbers = #tpu.dot_dimension_numbers<[1], [0], [0], [1], [0, 0, 1, 1], [], []>} : vector<32x32xf32>, vector<32x128xf32>, vector<32x128xf32> -> vector<32x128xf32>
    %100 = arith.addf %95, %99 : vector<32x128xf32>
    %c1_i32_85 = arith.constant 1 : i32
    %101 = tpu.dynamic_rotate %81 by %c1_i32_85 dim 1 : vector<32x128xf32>, i32 -> vector<32x128xf32>
    %c1_86 = arith.constant 1 : index
    %c4_87 = arith.constant 4 : index
    %c0_88 = arith.constant 0 : index
    %c0_89 = arith.constant 0 : index
    %102 = vector.load %arg2[%c1_86, %c4_87, %c0_88, %c0_89] : memref<10x17x32x32xf32, #tpu.memory_space<vmem>>, vector<1x1x32x32xf32>
    %103 = vector.shape_cast %102 : vector<1x1x32x32xf32> to vector<32x32xf32>
    %cst_90 = arith.constant dense<0.000000e+00> : vector<32x128xf32>
    %104 = tpu.matmul %103, %101, %cst_90 {dimension_numbers = #tpu.dot_dimension_numbers<[1], [0], [0], [1], [0, 0, 1, 1], [], []>} : vector<32x32xf32>, vector<32x128xf32>, vector<32x128xf32> -> vector<32x128xf32>
    %105 = arith.addf %100, %104 : vector<32x128xf32>
    %c1_91 = arith.constant 1 : index
    %c5_92 = arith.constant 5 : index
    %c0_93 = arith.constant 0 : index
    %c0_94 = arith.constant 0 : index
    %106 = vector.load %arg2[%c1_91, %c5_92, %c0_93, %c0_94] : memref<10x17x32x32xf32, #tpu.memory_space<vmem>>, vector<1x1x32x32xf32>
    %107 = vector.shape_cast %106 : vector<1x1x32x32xf32> to vector<32x32xf32>
    %cst_95 = arith.constant dense<0.000000e+00> : vector<32x128xf32>
    %108 = tpu.matmul %107, %81, %cst_95 {dimension_numbers = #tpu.dot_dimension_numbers<[1], [0], [0], [1], [0, 0, 1, 1], [], []>} : vector<32x32xf32>, vector<32x128xf32>, vector<32x128xf32> -> vector<32x128xf32>
    %109 = arith.addf %105, %108 : vector<32x128xf32>
    %c127_i32_96 = arith.constant 127 : i32
    %110 = tpu.dynamic_rotate %81 by %c127_i32_96 dim 1 : vector<32x128xf32>, i32 -> vector<32x128xf32>
    %c1_97 = arith.constant 1 : index
    %c6_98 = arith.constant 6 : index
    %c0_99 = arith.constant 0 : index
    %c0_100 = arith.constant 0 : index
    %111 = vector.load %arg2[%c1_97, %c6_98, %c0_99, %c0_100] : memref<10x17x32x32xf32, #tpu.memory_space<vmem>>, vector<1x1x32x32xf32>
    %112 = vector.shape_cast %111 : vector<1x1x32x32xf32> to vector<32x32xf32>
    %cst_101 = arith.constant dense<0.000000e+00> : vector<32x128xf32>
    %113 = tpu.matmul %112, %110, %cst_101 {dimension_numbers = #tpu.dot_dimension_numbers<[1], [0], [0], [1], [0, 0, 1, 1], [], []>} : vector<32x32xf32>, vector<32x128xf32>, vector<32x128xf32> -> vector<32x128xf32>
    %114 = arith.addf %109, %113 : vector<32x128xf32>
    %c126_i32_102 = arith.constant 126 : i32
    %115 = tpu.dynamic_rotate %81 by %c126_i32_102 dim 1 : vector<32x128xf32>, i32 -> vector<32x128xf32>
    %c1_103 = arith.constant 1 : index
    %c7_104 = arith.constant 7 : index
    %c0_105 = arith.constant 0 : index
    %c0_106 = arith.constant 0 : index
    %116 = vector.load %arg2[%c1_103, %c7_104, %c0_105, %c0_106] : memref<10x17x32x32xf32, #tpu.memory_space<vmem>>, vector<1x1x32x32xf32>
    %117 = vector.shape_cast %116 : vector<1x1x32x32xf32> to vector<32x32xf32>
    %cst_107 = arith.constant dense<0.000000e+00> : vector<32x128xf32>
    %118 = tpu.matmul %117, %115, %cst_107 {dimension_numbers = #tpu.dot_dimension_numbers<[1], [0], [0], [1], [0, 0, 1, 1], [], []>} : vector<32x32xf32>, vector<32x128xf32>, vector<32x128xf32> -> vector<32x128xf32>
    %119 = arith.addf %114, %118 : vector<32x128xf32>
    %c125_i32_108 = arith.constant 125 : i32
    %120 = tpu.dynamic_rotate %81 by %c125_i32_108 dim 1 : vector<32x128xf32>, i32 -> vector<32x128xf32>
    %c1_109 = arith.constant 1 : index
    %c8_110 = arith.constant 8 : index
    %c0_111 = arith.constant 0 : index
    %c0_112 = arith.constant 0 : index
    %121 = vector.load %arg2[%c1_109, %c8_110, %c0_111, %c0_112] : memref<10x17x32x32xf32, #tpu.memory_space<vmem>>, vector<1x1x32x32xf32>
    %122 = vector.shape_cast %121 : vector<1x1x32x32xf32> to vector<32x32xf32>
    %cst_113 = arith.constant dense<0.000000e+00> : vector<32x128xf32>
    %123 = tpu.matmul %122, %120, %cst_113 {dimension_numbers = #tpu.dot_dimension_numbers<[1], [0], [0], [1], [0, 0, 1, 1], [], []>} : vector<32x32xf32>, vector<32x128xf32>, vector<32x128xf32> -> vector<32x128xf32>
    %124 = arith.addf %119, %123 : vector<32x128xf32>
    %c124_i32_114 = arith.constant 124 : i32
    %125 = tpu.dynamic_rotate %81 by %c124_i32_114 dim 1 : vector<32x128xf32>, i32 -> vector<32x128xf32>
    %c1_115 = arith.constant 1 : index
    %c9_116 = arith.constant 9 : index
    %c0_117 = arith.constant 0 : index
    %c0_118 = arith.constant 0 : index
    %126 = vector.load %arg2[%c1_115, %c9_116, %c0_117, %c0_118] : memref<10x17x32x32xf32, #tpu.memory_space<vmem>>, vector<1x1x32x32xf32>
    %127 = vector.shape_cast %126 : vector<1x1x32x32xf32> to vector<32x32xf32>
    %cst_119 = arith.constant dense<0.000000e+00> : vector<32x128xf32>
    %128 = tpu.matmul %127, %125, %cst_119 {dimension_numbers = #tpu.dot_dimension_numbers<[1], [0], [0], [1], [0, 0, 1, 1], [], []>} : vector<32x32xf32>, vector<32x128xf32>, vector<32x128xf32> -> vector<32x128xf32>
    %129 = arith.addf %124, %128 : vector<32x128xf32>
    %c123_i32_120 = arith.constant 123 : i32
    %130 = tpu.dynamic_rotate %81 by %c123_i32_120 dim 1 : vector<32x128xf32>, i32 -> vector<32x128xf32>
    %c1_121 = arith.constant 1 : index
    %c10_122 = arith.constant 10 : index
    %c0_123 = arith.constant 0 : index
    %c0_124 = arith.constant 0 : index
    %131 = vector.load %arg2[%c1_121, %c10_122, %c0_123, %c0_124] : memref<10x17x32x32xf32, #tpu.memory_space<vmem>>, vector<1x1x32x32xf32>
    %132 = vector.shape_cast %131 : vector<1x1x32x32xf32> to vector<32x32xf32>
    %cst_125 = arith.constant dense<0.000000e+00> : vector<32x128xf32>
    %133 = tpu.matmul %132, %130, %cst_125 {dimension_numbers = #tpu.dot_dimension_numbers<[1], [0], [0], [1], [0, 0, 1, 1], [], []>} : vector<32x32xf32>, vector<32x128xf32>, vector<32x128xf32> -> vector<32x128xf32>
    %134 = arith.addf %129, %133 : vector<32x128xf32>
    %c1_126 = arith.constant 1 : index
    %c0_127 = arith.constant 0 : index
    %c0_128 = arith.constant 0 : index
    %135 = vector.load %arg3[%c1_126, %c0_127, %c0_128] : memref<10x32x128xf32, #tpu.memory_space<vmem>>, vector<1x32x128xf32>
    %136 = vector.shape_cast %135 : vector<1x32x128xf32> to vector<32x128xf32>
    %137 = arith.mulf %134, %136 : vector<32x128xf32>
    %c1_129 = arith.constant 1 : index
    %c0_130 = arith.constant 0 : index
    %c0_131 = arith.constant 0 : index
    %138 = vector.load %arg4[%c1_129, %c0_130, %c0_131] : memref<10x32x128xf32, #tpu.memory_space<vmem>>, vector<1x32x128xf32>
    %139 = vector.shape_cast %138 : vector<1x32x128xf32> to vector<32x128xf32>
    %140 = arith.addf %137, %139 : vector<32x128xf32>
    %cst_132 = arith.constant 0.000000e+00 : f32
    %141 = vector.broadcast %cst_132 : f32 to vector<32x128xf32>
    %142 = arith.maximumf %140, %141 : vector<32x128xf32>
    %143 = arith.mulf %142, %7 : vector<32x128xf32>
    %c4_i32_133 = arith.constant 4 : i32
    %144 = tpu.dynamic_rotate %143 by %c4_i32_133 dim 1 : vector<32x128xf32>, i32 -> vector<32x128xf32>
    %c2_134 = arith.constant 2 : index
    %c0_135 = arith.constant 0 : index
    %c0_136 = arith.constant 0 : index
    %c0_137 = arith.constant 0 : index
    %145 = vector.load %arg2[%c2_134, %c0_135, %c0_136, %c0_137] : memref<10x17x32x32xf32, #tpu.memory_space<vmem>>, vector<1x1x32x32xf32>
    %146 = vector.shape_cast %145 : vector<1x1x32x32xf32> to vector<32x32xf32>
    %cst_138 = arith.constant dense<0.000000e+00> : vector<32x128xf32>
    %147 = tpu.matmul %146, %144, %cst_138 {dimension_numbers = #tpu.dot_dimension_numbers<[1], [0], [0], [1], [0, 0, 1, 1], [], []>} : vector<32x32xf32>, vector<32x128xf32>, vector<32x128xf32> -> vector<32x128xf32>
    %c3_i32_139 = arith.constant 3 : i32
    %148 = tpu.dynamic_rotate %143 by %c3_i32_139 dim 1 : vector<32x128xf32>, i32 -> vector<32x128xf32>
    %c2_140 = arith.constant 2 : index
    %c1_141 = arith.constant 1 : index
    %c0_142 = arith.constant 0 : index
    %c0_143 = arith.constant 0 : index
    %149 = vector.load %arg2[%c2_140, %c1_141, %c0_142, %c0_143] : memref<10x17x32x32xf32, #tpu.memory_space<vmem>>, vector<1x1x32x32xf32>
    %150 = vector.shape_cast %149 : vector<1x1x32x32xf32> to vector<32x32xf32>
    %cst_144 = arith.constant dense<0.000000e+00> : vector<32x128xf32>
    %151 = tpu.matmul %150, %148, %cst_144 {dimension_numbers = #tpu.dot_dimension_numbers<[1], [0], [0], [1], [0, 0, 1, 1], [], []>} : vector<32x32xf32>, vector<32x128xf32>, vector<32x128xf32> -> vector<32x128xf32>
    %152 = arith.addf %147, %151 : vector<32x128xf32>
    %c2_i32_145 = arith.constant 2 : i32
    %153 = tpu.dynamic_rotate %143 by %c2_i32_145 dim 1 : vector<32x128xf32>, i32 -> vector<32x128xf32>
    %c2_146 = arith.constant 2 : index
    %c2_147 = arith.constant 2 : index
    %c0_148 = arith.constant 0 : index
    %c0_149 = arith.constant 0 : index
    %154 = vector.load %arg2[%c2_146, %c2_147, %c0_148, %c0_149] : memref<10x17x32x32xf32, #tpu.memory_space<vmem>>, vector<1x1x32x32xf32>
    %155 = vector.shape_cast %154 : vector<1x1x32x32xf32> to vector<32x32xf32>
    %cst_150 = arith.constant dense<0.000000e+00> : vector<32x128xf32>
    %156 = tpu.matmul %155, %153, %cst_150 {dimension_numbers = #tpu.dot_dimension_numbers<[1], [0], [0], [1], [0, 0, 1, 1], [], []>} : vector<32x32xf32>, vector<32x128xf32>, vector<32x128xf32> -> vector<32x128xf32>
    %157 = arith.addf %152, %156 : vector<32x128xf32>
    %c1_i32_151 = arith.constant 1 : i32
    %158 = tpu.dynamic_rotate %143 by %c1_i32_151 dim 1 : vector<32x128xf32>, i32 -> vector<32x128xf32>
    %c2_152 = arith.constant 2 : index
    %c3_153 = arith.constant 3 : index
    %c0_154 = arith.constant 0 : index
    %c0_155 = arith.constant 0 : index
    %159 = vector.load %arg2[%c2_152, %c3_153, %c0_154, %c0_155] : memref<10x17x32x32xf32, #tpu.memory_space<vmem>>, vector<1x1x32x32xf32>
    %160 = vector.shape_cast %159 : vector<1x1x32x32xf32> to vector<32x32xf32>
    %cst_156 = arith.constant dense<0.000000e+00> : vector<32x128xf32>
    %161 = tpu.matmul %160, %158, %cst_156 {dimension_numbers = #tpu.dot_dimension_numbers<[1], [0], [0], [1], [0, 0, 1, 1], [], []>} : vector<32x32xf32>, vector<32x128xf32>, vector<32x128xf32> -> vector<32x128xf32>
    %162 = arith.addf %157, %161 : vector<32x128xf32>
    %c2_157 = arith.constant 2 : index
    %c4_158 = arith.constant 4 : index
    %c0_159 = arith.constant 0 : index
    %c0_160 = arith.constant 0 : index
    %163 = vector.load %arg2[%c2_157, %c4_158, %c0_159, %c0_160] : memref<10x17x32x32xf32, #tpu.memory_space<vmem>>, vector<1x1x32x32xf32>
    %164 = vector.shape_cast %163 : vector<1x1x32x32xf32> to vector<32x32xf32>
    %cst_161 = arith.constant dense<0.000000e+00> : vector<32x128xf32>
    %165 = tpu.matmul %164, %143, %cst_161 {dimension_numbers = #tpu.dot_dimension_numbers<[1], [0], [0], [1], [0, 0, 1, 1], [], []>} : vector<32x32xf32>, vector<32x128xf32>, vector<32x128xf32> -> vector<32x128xf32>
    %166 = arith.addf %162, %165 : vector<32x128xf32>
    %c127_i32_162 = arith.constant 127 : i32
    %167 = tpu.dynamic_rotate %143 by %c127_i32_162 dim 1 : vector<32x128xf32>, i32 -> vector<32x128xf32>
    %c2_163 = arith.constant 2 : index
    %c5_164 = arith.constant 5 : index
    %c0_165 = arith.constant 0 : index
    %c0_166 = arith.constant 0 : index
    %168 = vector.load %arg2[%c2_163, %c5_164, %c0_165, %c0_166] : memref<10x17x32x32xf32, #tpu.memory_space<vmem>>, vector<1x1x32x32xf32>
    %169 = vector.shape_cast %168 : vector<1x1x32x32xf32> to vector<32x32xf32>
    %cst_167 = arith.constant dense<0.000000e+00> : vector<32x128xf32>
    %170 = tpu.matmul %169, %167, %cst_167 {dimension_numbers = #tpu.dot_dimension_numbers<[1], [0], [0], [1], [0, 0, 1, 1], [], []>} : vector<32x32xf32>, vector<32x128xf32>, vector<32x128xf32> -> vector<32x128xf32>
    %171 = arith.addf %166, %170 : vector<32x128xf32>
    %c126_i32_168 = arith.constant 126 : i32
    %172 = tpu.dynamic_rotate %143 by %c126_i32_168 dim 1 : vector<32x128xf32>, i32 -> vector<32x128xf32>
    %c2_169 = arith.constant 2 : index
    %c6_170 = arith.constant 6 : index
    %c0_171 = arith.constant 0 : index
    %c0_172 = arith.constant 0 : index
    %173 = vector.load %arg2[%c2_169, %c6_170, %c0_171, %c0_172] : memref<10x17x32x32xf32, #tpu.memory_space<vmem>>, vector<1x1x32x32xf32>
    %174 = vector.shape_cast %173 : vector<1x1x32x32xf32> to vector<32x32xf32>
    %cst_173 = arith.constant dense<0.000000e+00> : vector<32x128xf32>
    %175 = tpu.matmul %174, %172, %cst_173 {dimension_numbers = #tpu.dot_dimension_numbers<[1], [0], [0], [1], [0, 0, 1, 1], [], []>} : vector<32x32xf32>, vector<32x128xf32>, vector<32x128xf32> -> vector<32x128xf32>
    %176 = arith.addf %171, %175 : vector<32x128xf32>
    %c125_i32_174 = arith.constant 125 : i32
    %177 = tpu.dynamic_rotate %143 by %c125_i32_174 dim 1 : vector<32x128xf32>, i32 -> vector<32x128xf32>
    %c2_175 = arith.constant 2 : index
    %c7_176 = arith.constant 7 : index
    %c0_177 = arith.constant 0 : index
    %c0_178 = arith.constant 0 : index
    %178 = vector.load %arg2[%c2_175, %c7_176, %c0_177, %c0_178] : memref<10x17x32x32xf32, #tpu.memory_space<vmem>>, vector<1x1x32x32xf32>
    %179 = vector.shape_cast %178 : vector<1x1x32x32xf32> to vector<32x32xf32>
    %cst_179 = arith.constant dense<0.000000e+00> : vector<32x128xf32>
    %180 = tpu.matmul %179, %177, %cst_179 {dimension_numbers = #tpu.dot_dimension_numbers<[1], [0], [0], [1], [0, 0, 1, 1], [], []>} : vector<32x32xf32>, vector<32x128xf32>, vector<32x128xf32> -> vector<32x128xf32>
    %181 = arith.addf %176, %180 : vector<32x128xf32>
    %c124_i32_180 = arith.constant 124 : i32
    %182 = tpu.dynamic_rotate %143 by %c124_i32_180 dim 1 : vector<32x128xf32>, i32 -> vector<32x128xf32>
    %c2_181 = arith.constant 2 : index
    %c8_182 = arith.constant 8 : index
    %c0_183 = arith.constant 0 : index
    %c0_184 = arith.constant 0 : index
    %183 = vector.load %arg2[%c2_181, %c8_182, %c0_183, %c0_184] : memref<10x17x32x32xf32, #tpu.memory_space<vmem>>, vector<1x1x32x32xf32>
    %184 = vector.shape_cast %183 : vector<1x1x32x32xf32> to vector<32x32xf32>
    %cst_185 = arith.constant dense<0.000000e+00> : vector<32x128xf32>
    %185 = tpu.matmul %184, %182, %cst_185 {dimension_numbers = #tpu.dot_dimension_numbers<[1], [0], [0], [1], [0, 0, 1, 1], [], []>} : vector<32x32xf32>, vector<32x128xf32>, vector<32x128xf32> -> vector<32x128xf32>
    %186 = arith.addf %181, %185 : vector<32x128xf32>
    %c2_186 = arith.constant 2 : index
    %c0_187 = arith.constant 0 : index
    %c0_188 = arith.constant 0 : index
    %187 = vector.load %arg3[%c2_186, %c0_187, %c0_188] : memref<10x32x128xf32, #tpu.memory_space<vmem>>, vector<1x32x128xf32>
    %188 = vector.shape_cast %187 : vector<1x32x128xf32> to vector<32x128xf32>
    %189 = arith.mulf %186, %188 : vector<32x128xf32>
    %c2_189 = arith.constant 2 : index
    %c0_190 = arith.constant 0 : index
    %c0_191 = arith.constant 0 : index
    %190 = vector.load %arg4[%c2_189, %c0_190, %c0_191] : memref<10x32x128xf32, #tpu.memory_space<vmem>>, vector<1x32x128xf32>
    %191 = vector.shape_cast %190 : vector<1x32x128xf32> to vector<32x128xf32>
    %192 = arith.addf %189, %191 : vector<32x128xf32>
    %cst_192 = arith.constant 0.000000e+00 : f32
    %193 = vector.broadcast %cst_192 : f32 to vector<32x128xf32>
    %194 = arith.maximumf %192, %193 : vector<32x128xf32>
    %195 = arith.mulf %194, %7 : vector<32x128xf32>
    %c3_i32_193 = arith.constant 3 : i32
    %196 = tpu.dynamic_rotate %195 by %c3_i32_193 dim 1 : vector<32x128xf32>, i32 -> vector<32x128xf32>
    %c3_194 = arith.constant 3 : index
    %c0_195 = arith.constant 0 : index
    %c0_196 = arith.constant 0 : index
    %c0_197 = arith.constant 0 : index
    %197 = vector.load %arg2[%c3_194, %c0_195, %c0_196, %c0_197] : memref<10x17x32x32xf32, #tpu.memory_space<vmem>>, vector<1x1x32x32xf32>
    %198 = vector.shape_cast %197 : vector<1x1x32x32xf32> to vector<32x32xf32>
    %cst_198 = arith.constant dense<0.000000e+00> : vector<32x128xf32>
    %199 = tpu.matmul %198, %196, %cst_198 {dimension_numbers = #tpu.dot_dimension_numbers<[1], [0], [0], [1], [0, 0, 1, 1], [], []>} : vector<32x32xf32>, vector<32x128xf32>, vector<32x128xf32> -> vector<32x128xf32>
    %c2_i32_199 = arith.constant 2 : i32
    %200 = tpu.dynamic_rotate %195 by %c2_i32_199 dim 1 : vector<32x128xf32>, i32 -> vector<32x128xf32>
    %c3_200 = arith.constant 3 : index
    %c1_201 = arith.constant 1 : index
    %c0_202 = arith.constant 0 : index
    %c0_203 = arith.constant 0 : index
    %201 = vector.load %arg2[%c3_200, %c1_201, %c0_202, %c0_203] : memref<10x17x32x32xf32, #tpu.memory_space<vmem>>, vector<1x1x32x32xf32>
    %202 = vector.shape_cast %201 : vector<1x1x32x32xf32> to vector<32x32xf32>
    %cst_204 = arith.constant dense<0.000000e+00> : vector<32x128xf32>
    %203 = tpu.matmul %202, %200, %cst_204 {dimension_numbers = #tpu.dot_dimension_numbers<[1], [0], [0], [1], [0, 0, 1, 1], [], []>} : vector<32x32xf32>, vector<32x128xf32>, vector<32x128xf32> -> vector<32x128xf32>
    %204 = arith.addf %199, %203 : vector<32x128xf32>
    %c1_i32_205 = arith.constant 1 : i32
    %205 = tpu.dynamic_rotate %195 by %c1_i32_205 dim 1 : vector<32x128xf32>, i32 -> vector<32x128xf32>
    %c3_206 = arith.constant 3 : index
    %c2_207 = arith.constant 2 : index
    %c0_208 = arith.constant 0 : index
    %c0_209 = arith.constant 0 : index
    %206 = vector.load %arg2[%c3_206, %c2_207, %c0_208, %c0_209] : memref<10x17x32x32xf32, #tpu.memory_space<vmem>>, vector<1x1x32x32xf32>
    %207 = vector.shape_cast %206 : vector<1x1x32x32xf32> to vector<32x32xf32>
    %cst_210 = arith.constant dense<0.000000e+00> : vector<32x128xf32>
    %208 = tpu.matmul %207, %205, %cst_210 {dimension_numbers = #tpu.dot_dimension_numbers<[1], [0], [0], [1], [0, 0, 1, 1], [], []>} : vector<32x32xf32>, vector<32x128xf32>, vector<32x128xf32> -> vector<32x128xf32>
    %209 = arith.addf %204, %208 : vector<32x128xf32>
    %c3_211 = arith.constant 3 : index
    %c3_212 = arith.constant 3 : index
    %c0_213 = arith.constant 0 : index
    %c0_214 = arith.constant 0 : index
    %210 = vector.load %arg2[%c3_211, %c3_212, %c0_213, %c0_214] : memref<10x17x32x32xf32, #tpu.memory_space<vmem>>, vector<1x1x32x32xf32>
    %211 = vector.shape_cast %210 : vector<1x1x32x32xf32> to vector<32x32xf32>
    %cst_215 = arith.constant dense<0.000000e+00> : vector<32x128xf32>
    %212 = tpu.matmul %211, %195, %cst_215 {dimension_numbers = #tpu.dot_dimension_numbers<[1], [0], [0], [1], [0, 0, 1, 1], [], []>} : vector<32x32xf32>, vector<32x128xf32>, vector<32x128xf32> -> vector<32x128xf32>
    %213 = arith.addf %209, %212 : vector<32x128xf32>
    %c127_i32_216 = arith.constant 127 : i32
    %214 = tpu.dynamic_rotate %195 by %c127_i32_216 dim 1 : vector<32x128xf32>, i32 -> vector<32x128xf32>
    %c3_217 = arith.constant 3 : index
    %c4_218 = arith.constant 4 : index
    %c0_219 = arith.constant 0 : index
    %c0_220 = arith.constant 0 : index
    %215 = vector.load %arg2[%c3_217, %c4_218, %c0_219, %c0_220] : memref<10x17x32x32xf32, #tpu.memory_space<vmem>>, vector<1x1x32x32xf32>
    %216 = vector.shape_cast %215 : vector<1x1x32x32xf32> to vector<32x32xf32>
    %cst_221 = arith.constant dense<0.000000e+00> : vector<32x128xf32>
    %217 = tpu.matmul %216, %214, %cst_221 {dimension_numbers = #tpu.dot_dimension_numbers<[1], [0], [0], [1], [0, 0, 1, 1], [], []>} : vector<32x32xf32>, vector<32x128xf32>, vector<32x128xf32> -> vector<32x128xf32>
    %218 = arith.addf %213, %217 : vector<32x128xf32>
    %c126_i32_222 = arith.constant 126 : i32
    %219 = tpu.dynamic_rotate %195 by %c126_i32_222 dim 1 : vector<32x128xf32>, i32 -> vector<32x128xf32>
    %c3_223 = arith.constant 3 : index
    %c5_224 = arith.constant 5 : index
    %c0_225 = arith.constant 0 : index
    %c0_226 = arith.constant 0 : index
    %220 = vector.load %arg2[%c3_223, %c5_224, %c0_225, %c0_226] : memref<10x17x32x32xf32, #tpu.memory_space<vmem>>, vector<1x1x32x32xf32>
    %221 = vector.shape_cast %220 : vector<1x1x32x32xf32> to vector<32x32xf32>
    %cst_227 = arith.constant dense<0.000000e+00> : vector<32x128xf32>
    %222 = tpu.matmul %221, %219, %cst_227 {dimension_numbers = #tpu.dot_dimension_numbers<[1], [0], [0], [1], [0, 0, 1, 1], [], []>} : vector<32x32xf32>, vector<32x128xf32>, vector<32x128xf32> -> vector<32x128xf32>
    %223 = arith.addf %218, %222 : vector<32x128xf32>
    %c125_i32_228 = arith.constant 125 : i32
    %224 = tpu.dynamic_rotate %195 by %c125_i32_228 dim 1 : vector<32x128xf32>, i32 -> vector<32x128xf32>
    %c3_229 = arith.constant 3 : index
    %c6_230 = arith.constant 6 : index
    %c0_231 = arith.constant 0 : index
    %c0_232 = arith.constant 0 : index
    %225 = vector.load %arg2[%c3_229, %c6_230, %c0_231, %c0_232] : memref<10x17x32x32xf32, #tpu.memory_space<vmem>>, vector<1x1x32x32xf32>
    %226 = vector.shape_cast %225 : vector<1x1x32x32xf32> to vector<32x32xf32>
    %cst_233 = arith.constant dense<0.000000e+00> : vector<32x128xf32>
    %227 = tpu.matmul %226, %224, %cst_233 {dimension_numbers = #tpu.dot_dimension_numbers<[1], [0], [0], [1], [0, 0, 1, 1], [], []>} : vector<32x32xf32>, vector<32x128xf32>, vector<32x128xf32> -> vector<32x128xf32>
    %228 = arith.addf %223, %227 : vector<32x128xf32>
    %c3_234 = arith.constant 3 : index
    %c0_235 = arith.constant 0 : index
    %c0_236 = arith.constant 0 : index
    %229 = vector.load %arg3[%c3_234, %c0_235, %c0_236] : memref<10x32x128xf32, #tpu.memory_space<vmem>>, vector<1x32x128xf32>
    %230 = vector.shape_cast %229 : vector<1x32x128xf32> to vector<32x128xf32>
    %231 = arith.mulf %228, %230 : vector<32x128xf32>
    %c3_237 = arith.constant 3 : index
    %c0_238 = arith.constant 0 : index
    %c0_239 = arith.constant 0 : index
    %232 = vector.load %arg4[%c3_237, %c0_238, %c0_239] : memref<10x32x128xf32, #tpu.memory_space<vmem>>, vector<1x32x128xf32>
    %233 = vector.shape_cast %232 : vector<1x32x128xf32> to vector<32x128xf32>
    %234 = arith.addf %231, %233 : vector<32x128xf32>
    %cst_240 = arith.constant 0.000000e+00 : f32
    %235 = vector.broadcast %cst_240 : f32 to vector<32x128xf32>
    %236 = arith.maximumf %234, %235 : vector<32x128xf32>
    %237 = arith.mulf %236, %7 : vector<32x128xf32>
    %c3_i32_241 = arith.constant 3 : i32
    %238 = tpu.dynamic_rotate %237 by %c3_i32_241 dim 1 : vector<32x128xf32>, i32 -> vector<32x128xf32>
    %c4_242 = arith.constant 4 : index
    %c0_243 = arith.constant 0 : index
    %c0_244 = arith.constant 0 : index
    %c0_245 = arith.constant 0 : index
    %239 = vector.load %arg2[%c4_242, %c0_243, %c0_244, %c0_245] : memref<10x17x32x32xf32, #tpu.memory_space<vmem>>, vector<1x1x32x32xf32>
    %240 = vector.shape_cast %239 : vector<1x1x32x32xf32> to vector<32x32xf32>
    %cst_246 = arith.constant dense<0.000000e+00> : vector<32x128xf32>
    %241 = tpu.matmul %240, %238, %cst_246 {dimension_numbers = #tpu.dot_dimension_numbers<[1], [0], [0], [1], [0, 0, 1, 1], [], []>} : vector<32x32xf32>, vector<32x128xf32>, vector<32x128xf32> -> vector<32x128xf32>
    %c2_i32_247 = arith.constant 2 : i32
    %242 = tpu.dynamic_rotate %237 by %c2_i32_247 dim 1 : vector<32x128xf32>, i32 -> vector<32x128xf32>
    %c4_248 = arith.constant 4 : index
    %c1_249 = arith.constant 1 : index
    %c0_250 = arith.constant 0 : index
    %c0_251 = arith.constant 0 : index
    %243 = vector.load %arg2[%c4_248, %c1_249, %c0_250, %c0_251] : memref<10x17x32x32xf32, #tpu.memory_space<vmem>>, vector<1x1x32x32xf32>
    %244 = vector.shape_cast %243 : vector<1x1x32x32xf32> to vector<32x32xf32>
    %cst_252 = arith.constant dense<0.000000e+00> : vector<32x128xf32>
    %245 = tpu.matmul %244, %242, %cst_252 {dimension_numbers = #tpu.dot_dimension_numbers<[1], [0], [0], [1], [0, 0, 1, 1], [], []>} : vector<32x32xf32>, vector<32x128xf32>, vector<32x128xf32> -> vector<32x128xf32>
    %246 = arith.addf %241, %245 : vector<32x128xf32>
    %c1_i32_253 = arith.constant 1 : i32
    %247 = tpu.dynamic_rotate %237 by %c1_i32_253 dim 1 : vector<32x128xf32>, i32 -> vector<32x128xf32>
    %c4_254 = arith.constant 4 : index
    %c2_255 = arith.constant 2 : index
    %c0_256 = arith.constant 0 : index
    %c0_257 = arith.constant 0 : index
    %248 = vector.load %arg2[%c4_254, %c2_255, %c0_256, %c0_257] : memref<10x17x32x32xf32, #tpu.memory_space<vmem>>, vector<1x1x32x32xf32>
    %249 = vector.shape_cast %248 : vector<1x1x32x32xf32> to vector<32x32xf32>
    %cst_258 = arith.constant dense<0.000000e+00> : vector<32x128xf32>
    %250 = tpu.matmul %249, %247, %cst_258 {dimension_numbers = #tpu.dot_dimension_numbers<[1], [0], [0], [1], [0, 0, 1, 1], [], []>} : vector<32x32xf32>, vector<32x128xf32>, vector<32x128xf32> -> vector<32x128xf32>
    %251 = arith.addf %246, %250 : vector<32x128xf32>
    %c4_259 = arith.constant 4 : index
    %c3_260 = arith.constant 3 : index
    %c0_261 = arith.constant 0 : index
    %c0_262 = arith.constant 0 : index
    %252 = vector.load %arg2[%c4_259, %c3_260, %c0_261, %c0_262] : memref<10x17x32x32xf32, #tpu.memory_space<vmem>>, vector<1x1x32x32xf32>
    %253 = vector.shape_cast %252 : vector<1x1x32x32xf32> to vector<32x32xf32>
    %cst_263 = arith.constant dense<0.000000e+00> : vector<32x128xf32>
    %254 = tpu.matmul %253, %237, %cst_263 {dimension_numbers = #tpu.dot_dimension_numbers<[1], [0], [0], [1], [0, 0, 1, 1], [], []>} : vector<32x32xf32>, vector<32x128xf32>, vector<32x128xf32> -> vector<32x128xf32>
    %255 = arith.addf %251, %254 : vector<32x128xf32>
    %c127_i32_264 = arith.constant 127 : i32
    %256 = tpu.dynamic_rotate %237 by %c127_i32_264 dim 1 : vector<32x128xf32>, i32 -> vector<32x128xf32>
    %c4_265 = arith.constant 4 : index
    %c4_266 = arith.constant 4 : index
    %c0_267 = arith.constant 0 : index
    %c0_268 = arith.constant 0 : index
    %257 = vector.load %arg2[%c4_265, %c4_266, %c0_267, %c0_268] : memref<10x17x32x32xf32, #tpu.memory_space<vmem>>, vector<1x1x32x32xf32>
    %258 = vector.shape_cast %257 : vector<1x1x32x32xf32> to vector<32x32xf32>
    %cst_269 = arith.constant dense<0.000000e+00> : vector<32x128xf32>
    %259 = tpu.matmul %258, %256, %cst_269 {dimension_numbers = #tpu.dot_dimension_numbers<[1], [0], [0], [1], [0, 0, 1, 1], [], []>} : vector<32x32xf32>, vector<32x128xf32>, vector<32x128xf32> -> vector<32x128xf32>
    %260 = arith.addf %255, %259 : vector<32x128xf32>
    %c126_i32_270 = arith.constant 126 : i32
    %261 = tpu.dynamic_rotate %237 by %c126_i32_270 dim 1 : vector<32x128xf32>, i32 -> vector<32x128xf32>
    %c4_271 = arith.constant 4 : index
    %c5_272 = arith.constant 5 : index
    %c0_273 = arith.constant 0 : index
    %c0_274 = arith.constant 0 : index
    %262 = vector.load %arg2[%c4_271, %c5_272, %c0_273, %c0_274] : memref<10x17x32x32xf32, #tpu.memory_space<vmem>>, vector<1x1x32x32xf32>
    %263 = vector.shape_cast %262 : vector<1x1x32x32xf32> to vector<32x32xf32>
    %cst_275 = arith.constant dense<0.000000e+00> : vector<32x128xf32>
    %264 = tpu.matmul %263, %261, %cst_275 {dimension_numbers = #tpu.dot_dimension_numbers<[1], [0], [0], [1], [0, 0, 1, 1], [], []>} : vector<32x32xf32>, vector<32x128xf32>, vector<32x128xf32> -> vector<32x128xf32>
    %265 = arith.addf %260, %264 : vector<32x128xf32>
    %c125_i32_276 = arith.constant 125 : i32
    %266 = tpu.dynamic_rotate %237 by %c125_i32_276 dim 1 : vector<32x128xf32>, i32 -> vector<32x128xf32>
    %c4_277 = arith.constant 4 : index
    %c6_278 = arith.constant 6 : index
    %c0_279 = arith.constant 0 : index
    %c0_280 = arith.constant 0 : index
    %267 = vector.load %arg2[%c4_277, %c6_278, %c0_279, %c0_280] : memref<10x17x32x32xf32, #tpu.memory_space<vmem>>, vector<1x1x32x32xf32>
    %268 = vector.shape_cast %267 : vector<1x1x32x32xf32> to vector<32x32xf32>
    %cst_281 = arith.constant dense<0.000000e+00> : vector<32x128xf32>
    %269 = tpu.matmul %268, %266, %cst_281 {dimension_numbers = #tpu.dot_dimension_numbers<[1], [0], [0], [1], [0, 0, 1, 1], [], []>} : vector<32x32xf32>, vector<32x128xf32>, vector<32x128xf32> -> vector<32x128xf32>
    %270 = arith.addf %265, %269 : vector<32x128xf32>
    %c4_282 = arith.constant 4 : index
    %c0_283 = arith.constant 0 : index
    %c0_284 = arith.constant 0 : index
    %271 = vector.load %arg3[%c4_282, %c0_283, %c0_284] : memref<10x32x128xf32, #tpu.memory_space<vmem>>, vector<1x32x128xf32>
    %272 = vector.shape_cast %271 : vector<1x32x128xf32> to vector<32x128xf32>
    %273 = arith.mulf %270, %272 : vector<32x128xf32>
    %c4_285 = arith.constant 4 : index
    %c0_286 = arith.constant 0 : index
    %c0_287 = arith.constant 0 : index
    %274 = vector.load %arg4[%c4_285, %c0_286, %c0_287] : memref<10x32x128xf32, #tpu.memory_space<vmem>>, vector<1x32x128xf32>
    %275 = vector.shape_cast %274 : vector<1x32x128xf32> to vector<32x128xf32>
    %276 = arith.addf %273, %275 : vector<32x128xf32>
    %cst_288 = arith.constant 0.000000e+00 : f32
    %277 = vector.broadcast %cst_288 : f32 to vector<32x128xf32>
    %278 = arith.maximumf %276, %277 : vector<32x128xf32>
    %279 = arith.mulf %278, %7 : vector<32x128xf32>
    %c3_i32_289 = arith.constant 3 : i32
    %280 = tpu.dynamic_rotate %279 by %c3_i32_289 dim 1 : vector<32x128xf32>, i32 -> vector<32x128xf32>
    %c5_290 = arith.constant 5 : index
    %c0_291 = arith.constant 0 : index
    %c0_292 = arith.constant 0 : index
    %c0_293 = arith.constant 0 : index
    %281 = vector.load %arg2[%c5_290, %c0_291, %c0_292, %c0_293] : memref<10x17x32x32xf32, #tpu.memory_space<vmem>>, vector<1x1x32x32xf32>
    %282 = vector.shape_cast %281 : vector<1x1x32x32xf32> to vector<32x32xf32>
    %cst_294 = arith.constant dense<0.000000e+00> : vector<32x128xf32>
    %283 = tpu.matmul %282, %280, %cst_294 {dimension_numbers = #tpu.dot_dimension_numbers<[1], [0], [0], [1], [0, 0, 1, 1], [], []>} : vector<32x32xf32>, vector<32x128xf32>, vector<32x128xf32> -> vector<32x128xf32>
    %c2_i32_295 = arith.constant 2 : i32
    %284 = tpu.dynamic_rotate %279 by %c2_i32_295 dim 1 : vector<32x128xf32>, i32 -> vector<32x128xf32>
    %c5_296 = arith.constant 5 : index
    %c1_297 = arith.constant 1 : index
    %c0_298 = arith.constant 0 : index
    %c0_299 = arith.constant 0 : index
    %285 = vector.load %arg2[%c5_296, %c1_297, %c0_298, %c0_299] : memref<10x17x32x32xf32, #tpu.memory_space<vmem>>, vector<1x1x32x32xf32>
    %286 = vector.shape_cast %285 : vector<1x1x32x32xf32> to vector<32x32xf32>
    %cst_300 = arith.constant dense<0.000000e+00> : vector<32x128xf32>
    %287 = tpu.matmul %286, %284, %cst_300 {dimension_numbers = #tpu.dot_dimension_numbers<[1], [0], [0], [1], [0, 0, 1, 1], [], []>} : vector<32x32xf32>, vector<32x128xf32>, vector<32x128xf32> -> vector<32x128xf32>
    %288 = arith.addf %283, %287 : vector<32x128xf32>
    %c1_i32_301 = arith.constant 1 : i32
    %289 = tpu.dynamic_rotate %279 by %c1_i32_301 dim 1 : vector<32x128xf32>, i32 -> vector<32x128xf32>
    %c5_302 = arith.constant 5 : index
    %c2_303 = arith.constant 2 : index
    %c0_304 = arith.constant 0 : index
    %c0_305 = arith.constant 0 : index
    %290 = vector.load %arg2[%c5_302, %c2_303, %c0_304, %c0_305] : memref<10x17x32x32xf32, #tpu.memory_space<vmem>>, vector<1x1x32x32xf32>
    %291 = vector.shape_cast %290 : vector<1x1x32x32xf32> to vector<32x32xf32>
    %cst_306 = arith.constant dense<0.000000e+00> : vector<32x128xf32>
    %292 = tpu.matmul %291, %289, %cst_306 {dimension_numbers = #tpu.dot_dimension_numbers<[1], [0], [0], [1], [0, 0, 1, 1], [], []>} : vector<32x32xf32>, vector<32x128xf32>, vector<32x128xf32> -> vector<32x128xf32>
    %293 = arith.addf %288, %292 : vector<32x128xf32>
    %c5_307 = arith.constant 5 : index
    %c3_308 = arith.constant 3 : index
    %c0_309 = arith.constant 0 : index
    %c0_310 = arith.constant 0 : index
    %294 = vector.load %arg2[%c5_307, %c3_308, %c0_309, %c0_310] : memref<10x17x32x32xf32, #tpu.memory_space<vmem>>, vector<1x1x32x32xf32>
    %295 = vector.shape_cast %294 : vector<1x1x32x32xf32> to vector<32x32xf32>
    %cst_311 = arith.constant dense<0.000000e+00> : vector<32x128xf32>
    %296 = tpu.matmul %295, %279, %cst_311 {dimension_numbers = #tpu.dot_dimension_numbers<[1], [0], [0], [1], [0, 0, 1, 1], [], []>} : vector<32x32xf32>, vector<32x128xf32>, vector<32x128xf32> -> vector<32x128xf32>
    %297 = arith.addf %293, %296 : vector<32x128xf32>
    %c127_i32_312 = arith.constant 127 : i32
    %298 = tpu.dynamic_rotate %279 by %c127_i32_312 dim 1 : vector<32x128xf32>, i32 -> vector<32x128xf32>
    %c5_313 = arith.constant 5 : index
    %c4_314 = arith.constant 4 : index
    %c0_315 = arith.constant 0 : index
    %c0_316 = arith.constant 0 : index
    %299 = vector.load %arg2[%c5_313, %c4_314, %c0_315, %c0_316] : memref<10x17x32x32xf32, #tpu.memory_space<vmem>>, vector<1x1x32x32xf32>
    %300 = vector.shape_cast %299 : vector<1x1x32x32xf32> to vector<32x32xf32>
    %cst_317 = arith.constant dense<0.000000e+00> : vector<32x128xf32>
    %301 = tpu.matmul %300, %298, %cst_317 {dimension_numbers = #tpu.dot_dimension_numbers<[1], [0], [0], [1], [0, 0, 1, 1], [], []>} : vector<32x32xf32>, vector<32x128xf32>, vector<32x128xf32> -> vector<32x128xf32>
    %302 = arith.addf %297, %301 : vector<32x128xf32>
    %c126_i32_318 = arith.constant 126 : i32
    %303 = tpu.dynamic_rotate %279 by %c126_i32_318 dim 1 : vector<32x128xf32>, i32 -> vector<32x128xf32>
    %c5_319 = arith.constant 5 : index
    %c5_320 = arith.constant 5 : index
    %c0_321 = arith.constant 0 : index
    %c0_322 = arith.constant 0 : index
    %304 = vector.load %arg2[%c5_319, %c5_320, %c0_321, %c0_322] : memref<10x17x32x32xf32, #tpu.memory_space<vmem>>, vector<1x1x32x32xf32>
    %305 = vector.shape_cast %304 : vector<1x1x32x32xf32> to vector<32x32xf32>
    %cst_323 = arith.constant dense<0.000000e+00> : vector<32x128xf32>
    %306 = tpu.matmul %305, %303, %cst_323 {dimension_numbers = #tpu.dot_dimension_numbers<[1], [0], [0], [1], [0, 0, 1, 1], [], []>} : vector<32x32xf32>, vector<32x128xf32>, vector<32x128xf32> -> vector<32x128xf32>
    %307 = arith.addf %302, %306 : vector<32x128xf32>
    %c125_i32_324 = arith.constant 125 : i32
    %308 = tpu.dynamic_rotate %279 by %c125_i32_324 dim 1 : vector<32x128xf32>, i32 -> vector<32x128xf32>
    %c5_325 = arith.constant 5 : index
    %c6_326 = arith.constant 6 : index
    %c0_327 = arith.constant 0 : index
    %c0_328 = arith.constant 0 : index
    %309 = vector.load %arg2[%c5_325, %c6_326, %c0_327, %c0_328] : memref<10x17x32x32xf32, #tpu.memory_space<vmem>>, vector<1x1x32x32xf32>
    %310 = vector.shape_cast %309 : vector<1x1x32x32xf32> to vector<32x32xf32>
    %cst_329 = arith.constant dense<0.000000e+00> : vector<32x128xf32>
    %311 = tpu.matmul %310, %308, %cst_329 {dimension_numbers = #tpu.dot_dimension_numbers<[1], [0], [0], [1], [0, 0, 1, 1], [], []>} : vector<32x32xf32>, vector<32x128xf32>, vector<32x128xf32> -> vector<32x128xf32>
    %312 = arith.addf %307, %311 : vector<32x128xf32>
    %c5_330 = arith.constant 5 : index
    %c0_331 = arith.constant 0 : index
    %c0_332 = arith.constant 0 : index
    %313 = vector.load %arg3[%c5_330, %c0_331, %c0_332] : memref<10x32x128xf32, #tpu.memory_space<vmem>>, vector<1x32x128xf32>
    %314 = vector.shape_cast %313 : vector<1x32x128xf32> to vector<32x128xf32>
    %315 = arith.mulf %312, %314 : vector<32x128xf32>
    %c5_333 = arith.constant 5 : index
    %c0_334 = arith.constant 0 : index
    %c0_335 = arith.constant 0 : index
    %316 = vector.load %arg4[%c5_333, %c0_334, %c0_335] : memref<10x32x128xf32, #tpu.memory_space<vmem>>, vector<1x32x128xf32>
    %317 = vector.shape_cast %316 : vector<1x32x128xf32> to vector<32x128xf32>
    %318 = arith.addf %315, %317 : vector<32x128xf32>
    %cst_336 = arith.constant 0.000000e+00 : f32
    %319 = vector.broadcast %cst_336 : f32 to vector<32x128xf32>
    %320 = arith.maximumf %318, %319 : vector<32x128xf32>
    %321 = arith.mulf %320, %7 : vector<32x128xf32>
    %c4_i32_337 = arith.constant 4 : i32
    %322 = tpu.dynamic_rotate %321 by %c4_i32_337 dim 1 : vector<32x128xf32>, i32 -> vector<32x128xf32>
    %c6_338 = arith.constant 6 : index
    %c0_339 = arith.constant 0 : index
    %c0_340 = arith.constant 0 : index
    %c0_341 = arith.constant 0 : index
    %323 = vector.load %arg2[%c6_338, %c0_339, %c0_340, %c0_341] : memref<10x17x32x32xf32, #tpu.memory_space<vmem>>, vector<1x1x32x32xf32>
    %324 = vector.shape_cast %323 : vector<1x1x32x32xf32> to vector<32x32xf32>
    %cst_342 = arith.constant dense<0.000000e+00> : vector<32x128xf32>
    %325 = tpu.matmul %324, %322, %cst_342 {dimension_numbers = #tpu.dot_dimension_numbers<[1], [0], [0], [1], [0, 0, 1, 1], [], []>} : vector<32x32xf32>, vector<32x128xf32>, vector<32x128xf32> -> vector<32x128xf32>
    %c3_i32_343 = arith.constant 3 : i32
    %326 = tpu.dynamic_rotate %321 by %c3_i32_343 dim 1 : vector<32x128xf32>, i32 -> vector<32x128xf32>
    %c6_344 = arith.constant 6 : index
    %c1_345 = arith.constant 1 : index
    %c0_346 = arith.constant 0 : index
    %c0_347 = arith.constant 0 : index
    %327 = vector.load %arg2[%c6_344, %c1_345, %c0_346, %c0_347] : memref<10x17x32x32xf32, #tpu.memory_space<vmem>>, vector<1x1x32x32xf32>
    %328 = vector.shape_cast %327 : vector<1x1x32x32xf32> to vector<32x32xf32>
    %cst_348 = arith.constant dense<0.000000e+00> : vector<32x128xf32>
    %329 = tpu.matmul %328, %326, %cst_348 {dimension_numbers = #tpu.dot_dimension_numbers<[1], [0], [0], [1], [0, 0, 1, 1], [], []>} : vector<32x32xf32>, vector<32x128xf32>, vector<32x128xf32> -> vector<32x128xf32>
    %330 = arith.addf %325, %329 : vector<32x128xf32>
    %c2_i32_349 = arith.constant 2 : i32
    %331 = tpu.dynamic_rotate %321 by %c2_i32_349 dim 1 : vector<32x128xf32>, i32 -> vector<32x128xf32>
    %c6_350 = arith.constant 6 : index
    %c2_351 = arith.constant 2 : index
    %c0_352 = arith.constant 0 : index
    %c0_353 = arith.constant 0 : index
    %332 = vector.load %arg2[%c6_350, %c2_351, %c0_352, %c0_353] : memref<10x17x32x32xf32, #tpu.memory_space<vmem>>, vector<1x1x32x32xf32>
    %333 = vector.shape_cast %332 : vector<1x1x32x32xf32> to vector<32x32xf32>
    %cst_354 = arith.constant dense<0.000000e+00> : vector<32x128xf32>
    %334 = tpu.matmul %333, %331, %cst_354 {dimension_numbers = #tpu.dot_dimension_numbers<[1], [0], [0], [1], [0, 0, 1, 1], [], []>} : vector<32x32xf32>, vector<32x128xf32>, vector<32x128xf32> -> vector<32x128xf32>
    %335 = arith.addf %330, %334 : vector<32x128xf32>
    %c1_i32_355 = arith.constant 1 : i32
    %336 = tpu.dynamic_rotate %321 by %c1_i32_355 dim 1 : vector<32x128xf32>, i32 -> vector<32x128xf32>
    %c6_356 = arith.constant 6 : index
    %c3_357 = arith.constant 3 : index
    %c0_358 = arith.constant 0 : index
    %c0_359 = arith.constant 0 : index
    %337 = vector.load %arg2[%c6_356, %c3_357, %c0_358, %c0_359] : memref<10x17x32x32xf32, #tpu.memory_space<vmem>>, vector<1x1x32x32xf32>
    %338 = vector.shape_cast %337 : vector<1x1x32x32xf32> to vector<32x32xf32>
    %cst_360 = arith.constant dense<0.000000e+00> : vector<32x128xf32>
    %339 = tpu.matmul %338, %336, %cst_360 {dimension_numbers = #tpu.dot_dimension_numbers<[1], [0], [0], [1], [0, 0, 1, 1], [], []>} : vector<32x32xf32>, vector<32x128xf32>, vector<32x128xf32> -> vector<32x128xf32>
    %340 = arith.addf %335, %339 : vector<32x128xf32>
    %c6_361 = arith.constant 6 : index
    %c4_362 = arith.constant 4 : index
    %c0_363 = arith.constant 0 : index
    %c0_364 = arith.constant 0 : index
    %341 = vector.load %arg2[%c6_361, %c4_362, %c0_363, %c0_364] : memref<10x17x32x32xf32, #tpu.memory_space<vmem>>, vector<1x1x32x32xf32>
    %342 = vector.shape_cast %341 : vector<1x1x32x32xf32> to vector<32x32xf32>
    %cst_365 = arith.constant dense<0.000000e+00> : vector<32x128xf32>
    %343 = tpu.matmul %342, %321, %cst_365 {dimension_numbers = #tpu.dot_dimension_numbers<[1], [0], [0], [1], [0, 0, 1, 1], [], []>} : vector<32x32xf32>, vector<32x128xf32>, vector<32x128xf32> -> vector<32x128xf32>
    %344 = arith.addf %340, %343 : vector<32x128xf32>
    %c127_i32_366 = arith.constant 127 : i32
    %345 = tpu.dynamic_rotate %321 by %c127_i32_366 dim 1 : vector<32x128xf32>, i32 -> vector<32x128xf32>
    %c6_367 = arith.constant 6 : index
    %c5_368 = arith.constant 5 : index
    %c0_369 = arith.constant 0 : index
    %c0_370 = arith.constant 0 : index
    %346 = vector.load %arg2[%c6_367, %c5_368, %c0_369, %c0_370] : memref<10x17x32x32xf32, #tpu.memory_space<vmem>>, vector<1x1x32x32xf32>
    %347 = vector.shape_cast %346 : vector<1x1x32x32xf32> to vector<32x32xf32>
    %cst_371 = arith.constant dense<0.000000e+00> : vector<32x128xf32>
    %348 = tpu.matmul %347, %345, %cst_371 {dimension_numbers = #tpu.dot_dimension_numbers<[1], [0], [0], [1], [0, 0, 1, 1], [], []>} : vector<32x32xf32>, vector<32x128xf32>, vector<32x128xf32> -> vector<32x128xf32>
    %349 = arith.addf %344, %348 : vector<32x128xf32>
    %c126_i32_372 = arith.constant 126 : i32
    %350 = tpu.dynamic_rotate %321 by %c126_i32_372 dim 1 : vector<32x128xf32>, i32 -> vector<32x128xf32>
    %c6_373 = arith.constant 6 : index
    %c6_374 = arith.constant 6 : index
    %c0_375 = arith.constant 0 : index
    %c0_376 = arith.constant 0 : index
    %351 = vector.load %arg2[%c6_373, %c6_374, %c0_375, %c0_376] : memref<10x17x32x32xf32, #tpu.memory_space<vmem>>, vector<1x1x32x32xf32>
    %352 = vector.shape_cast %351 : vector<1x1x32x32xf32> to vector<32x32xf32>
    %cst_377 = arith.constant dense<0.000000e+00> : vector<32x128xf32>
    %353 = tpu.matmul %352, %350, %cst_377 {dimension_numbers = #tpu.dot_dimension_numbers<[1], [0], [0], [1], [0, 0, 1, 1], [], []>} : vector<32x32xf32>, vector<32x128xf32>, vector<32x128xf32> -> vector<32x128xf32>
    %354 = arith.addf %349, %353 : vector<32x128xf32>
    %c125_i32_378 = arith.constant 125 : i32
    %355 = tpu.dynamic_rotate %321 by %c125_i32_378 dim 1 : vector<32x128xf32>, i32 -> vector<32x128xf32>
    %c6_379 = arith.constant 6 : index
    %c7_380 = arith.constant 7 : index
    %c0_381 = arith.constant 0 : index
    %c0_382 = arith.constant 0 : index
    %356 = vector.load %arg2[%c6_379, %c7_380, %c0_381, %c0_382] : memref<10x17x32x32xf32, #tpu.memory_space<vmem>>, vector<1x1x32x32xf32>
    %357 = vector.shape_cast %356 : vector<1x1x32x32xf32> to vector<32x32xf32>
    %cst_383 = arith.constant dense<0.000000e+00> : vector<32x128xf32>
    %358 = tpu.matmul %357, %355, %cst_383 {dimension_numbers = #tpu.dot_dimension_numbers<[1], [0], [0], [1], [0, 0, 1, 1], [], []>} : vector<32x32xf32>, vector<32x128xf32>, vector<32x128xf32> -> vector<32x128xf32>
    %359 = arith.addf %354, %358 : vector<32x128xf32>
    %c124_i32_384 = arith.constant 124 : i32
    %360 = tpu.dynamic_rotate %321 by %c124_i32_384 dim 1 : vector<32x128xf32>, i32 -> vector<32x128xf32>
    %c6_385 = arith.constant 6 : index
    %c8_386 = arith.constant 8 : index
    %c0_387 = arith.constant 0 : index
    %c0_388 = arith.constant 0 : index
    %361 = vector.load %arg2[%c6_385, %c8_386, %c0_387, %c0_388] : memref<10x17x32x32xf32, #tpu.memory_space<vmem>>, vector<1x1x32x32xf32>
    %362 = vector.shape_cast %361 : vector<1x1x32x32xf32> to vector<32x32xf32>
    %cst_389 = arith.constant dense<0.000000e+00> : vector<32x128xf32>
    %363 = tpu.matmul %362, %360, %cst_389 {dimension_numbers = #tpu.dot_dimension_numbers<[1], [0], [0], [1], [0, 0, 1, 1], [], []>} : vector<32x32xf32>, vector<32x128xf32>, vector<32x128xf32> -> vector<32x128xf32>
    %364 = arith.addf %359, %363 : vector<32x128xf32>
    %c6_390 = arith.constant 6 : index
    %c0_391 = arith.constant 0 : index
    %c0_392 = arith.constant 0 : index
    %365 = vector.load %arg3[%c6_390, %c0_391, %c0_392] : memref<10x32x128xf32, #tpu.memory_space<vmem>>, vector<1x32x128xf32>
    %366 = vector.shape_cast %365 : vector<1x32x128xf32> to vector<32x128xf32>
    %367 = arith.mulf %364, %366 : vector<32x128xf32>
    %c6_393 = arith.constant 6 : index
    %c0_394 = arith.constant 0 : index
    %c0_395 = arith.constant 0 : index
    %368 = vector.load %arg4[%c6_393, %c0_394, %c0_395] : memref<10x32x128xf32, #tpu.memory_space<vmem>>, vector<1x32x128xf32>
    %369 = vector.shape_cast %368 : vector<1x32x128xf32> to vector<32x128xf32>
    %370 = arith.addf %367, %369 : vector<32x128xf32>
    %cst_396 = arith.constant 0.000000e+00 : f32
    %371 = vector.broadcast %cst_396 : f32 to vector<32x128xf32>
    %372 = arith.maximumf %370, %371 : vector<32x128xf32>
    %373 = arith.mulf %372, %7 : vector<32x128xf32>
    %c5_i32_397 = arith.constant 5 : i32
    %374 = tpu.dynamic_rotate %373 by %c5_i32_397 dim 1 : vector<32x128xf32>, i32 -> vector<32x128xf32>
    %c7_398 = arith.constant 7 : index
    %c0_399 = arith.constant 0 : index
    %c0_400 = arith.constant 0 : index
    %c0_401 = arith.constant 0 : index
    %375 = vector.load %arg2[%c7_398, %c0_399, %c0_400, %c0_401] : memref<10x17x32x32xf32, #tpu.memory_space<vmem>>, vector<1x1x32x32xf32>
    %376 = vector.shape_cast %375 : vector<1x1x32x32xf32> to vector<32x32xf32>
    %cst_402 = arith.constant dense<0.000000e+00> : vector<32x128xf32>
    %377 = tpu.matmul %376, %374, %cst_402 {dimension_numbers = #tpu.dot_dimension_numbers<[1], [0], [0], [1], [0, 0, 1, 1], [], []>} : vector<32x32xf32>, vector<32x128xf32>, vector<32x128xf32> -> vector<32x128xf32>
    %c4_i32_403 = arith.constant 4 : i32
    %378 = tpu.dynamic_rotate %373 by %c4_i32_403 dim 1 : vector<32x128xf32>, i32 -> vector<32x128xf32>
    %c7_404 = arith.constant 7 : index
    %c1_405 = arith.constant 1 : index
    %c0_406 = arith.constant 0 : index
    %c0_407 = arith.constant 0 : index
    %379 = vector.load %arg2[%c7_404, %c1_405, %c0_406, %c0_407] : memref<10x17x32x32xf32, #tpu.memory_space<vmem>>, vector<1x1x32x32xf32>
    %380 = vector.shape_cast %379 : vector<1x1x32x32xf32> to vector<32x32xf32>
    %cst_408 = arith.constant dense<0.000000e+00> : vector<32x128xf32>
    %381 = tpu.matmul %380, %378, %cst_408 {dimension_numbers = #tpu.dot_dimension_numbers<[1], [0], [0], [1], [0, 0, 1, 1], [], []>} : vector<32x32xf32>, vector<32x128xf32>, vector<32x128xf32> -> vector<32x128xf32>
    %382 = arith.addf %377, %381 : vector<32x128xf32>
    %c3_i32_409 = arith.constant 3 : i32
    %383 = tpu.dynamic_rotate %373 by %c3_i32_409 dim 1 : vector<32x128xf32>, i32 -> vector<32x128xf32>
    %c7_410 = arith.constant 7 : index
    %c2_411 = arith.constant 2 : index
    %c0_412 = arith.constant 0 : index
    %c0_413 = arith.constant 0 : index
    %384 = vector.load %arg2[%c7_410, %c2_411, %c0_412, %c0_413] : memref<10x17x32x32xf32, #tpu.memory_space<vmem>>, vector<1x1x32x32xf32>
    %385 = vector.shape_cast %384 : vector<1x1x32x32xf32> to vector<32x32xf32>
    %cst_414 = arith.constant dense<0.000000e+00> : vector<32x128xf32>
    %386 = tpu.matmul %385, %383, %cst_414 {dimension_numbers = #tpu.dot_dimension_numbers<[1], [0], [0], [1], [0, 0, 1, 1], [], []>} : vector<32x32xf32>, vector<32x128xf32>, vector<32x128xf32> -> vector<32x128xf32>
    %387 = arith.addf %382, %386 : vector<32x128xf32>
    %c2_i32_415 = arith.constant 2 : i32
    %388 = tpu.dynamic_rotate %373 by %c2_i32_415 dim 1 : vector<32x128xf32>, i32 -> vector<32x128xf32>
    %c7_416 = arith.constant 7 : index
    %c3_417 = arith.constant 3 : index
    %c0_418 = arith.constant 0 : index
    %c0_419 = arith.constant 0 : index
    %389 = vector.load %arg2[%c7_416, %c3_417, %c0_418, %c0_419] : memref<10x17x32x32xf32, #tpu.memory_space<vmem>>, vector<1x1x32x32xf32>
    %390 = vector.shape_cast %389 : vector<1x1x32x32xf32> to vector<32x32xf32>
    %cst_420 = arith.constant dense<0.000000e+00> : vector<32x128xf32>
    %391 = tpu.matmul %390, %388, %cst_420 {dimension_numbers = #tpu.dot_dimension_numbers<[1], [0], [0], [1], [0, 0, 1, 1], [], []>} : vector<32x32xf32>, vector<32x128xf32>, vector<32x128xf32> -> vector<32x128xf32>
    %392 = arith.addf %387, %391 : vector<32x128xf32>
    %c1_i32_421 = arith.constant 1 : i32
    %393 = tpu.dynamic_rotate %373 by %c1_i32_421 dim 1 : vector<32x128xf32>, i32 -> vector<32x128xf32>
    %c7_422 = arith.constant 7 : index
    %c4_423 = arith.constant 4 : index
    %c0_424 = arith.constant 0 : index
    %c0_425 = arith.constant 0 : index
    %394 = vector.load %arg2[%c7_422, %c4_423, %c0_424, %c0_425] : memref<10x17x32x32xf32, #tpu.memory_space<vmem>>, vector<1x1x32x32xf32>
    %395 = vector.shape_cast %394 : vector<1x1x32x32xf32> to vector<32x32xf32>
    %cst_426 = arith.constant dense<0.000000e+00> : vector<32x128xf32>
    %396 = tpu.matmul %395, %393, %cst_426 {dimension_numbers = #tpu.dot_dimension_numbers<[1], [0], [0], [1], [0, 0, 1, 1], [], []>} : vector<32x32xf32>, vector<32x128xf32>, vector<32x128xf32> -> vector<32x128xf32>
    %397 = arith.addf %392, %396 : vector<32x128xf32>
    %c7_427 = arith.constant 7 : index
    %c5_428 = arith.constant 5 : index
    %c0_429 = arith.constant 0 : index
    %c0_430 = arith.constant 0 : index
    %398 = vector.load %arg2[%c7_427, %c5_428, %c0_429, %c0_430] : memref<10x17x32x32xf32, #tpu.memory_space<vmem>>, vector<1x1x32x32xf32>
    %399 = vector.shape_cast %398 : vector<1x1x32x32xf32> to vector<32x32xf32>
    %cst_431 = arith.constant dense<0.000000e+00> : vector<32x128xf32>
    %400 = tpu.matmul %399, %373, %cst_431 {dimension_numbers = #tpu.dot_dimension_numbers<[1], [0], [0], [1], [0, 0, 1, 1], [], []>} : vector<32x32xf32>, vector<32x128xf32>, vector<32x128xf32> -> vector<32x128xf32>
    %401 = arith.addf %397, %400 : vector<32x128xf32>
    %c127_i32_432 = arith.constant 127 : i32
    %402 = tpu.dynamic_rotate %373 by %c127_i32_432 dim 1 : vector<32x128xf32>, i32 -> vector<32x128xf32>
    %c7_433 = arith.constant 7 : index
    %c6_434 = arith.constant 6 : index
    %c0_435 = arith.constant 0 : index
    %c0_436 = arith.constant 0 : index
    %403 = vector.load %arg2[%c7_433, %c6_434, %c0_435, %c0_436] : memref<10x17x32x32xf32, #tpu.memory_space<vmem>>, vector<1x1x32x32xf32>
    %404 = vector.shape_cast %403 : vector<1x1x32x32xf32> to vector<32x32xf32>
    %cst_437 = arith.constant dense<0.000000e+00> : vector<32x128xf32>
    %405 = tpu.matmul %404, %402, %cst_437 {dimension_numbers = #tpu.dot_dimension_numbers<[1], [0], [0], [1], [0, 0, 1, 1], [], []>} : vector<32x32xf32>, vector<32x128xf32>, vector<32x128xf32> -> vector<32x128xf32>
    %406 = arith.addf %401, %405 : vector<32x128xf32>
    %c126_i32_438 = arith.constant 126 : i32
    %407 = tpu.dynamic_rotate %373 by %c126_i32_438 dim 1 : vector<32x128xf32>, i32 -> vector<32x128xf32>
    %c7_439 = arith.constant 7 : index
    %c7_440 = arith.constant 7 : index
    %c0_441 = arith.constant 0 : index
    %c0_442 = arith.constant 0 : index
    %408 = vector.load %arg2[%c7_439, %c7_440, %c0_441, %c0_442] : memref<10x17x32x32xf32, #tpu.memory_space<vmem>>, vector<1x1x32x32xf32>
    %409 = vector.shape_cast %408 : vector<1x1x32x32xf32> to vector<32x32xf32>
    %cst_443 = arith.constant dense<0.000000e+00> : vector<32x128xf32>
    %410 = tpu.matmul %409, %407, %cst_443 {dimension_numbers = #tpu.dot_dimension_numbers<[1], [0], [0], [1], [0, 0, 1, 1], [], []>} : vector<32x32xf32>, vector<32x128xf32>, vector<32x128xf32> -> vector<32x128xf32>
    %411 = arith.addf %406, %410 : vector<32x128xf32>
    %c125_i32_444 = arith.constant 125 : i32
    %412 = tpu.dynamic_rotate %373 by %c125_i32_444 dim 1 : vector<32x128xf32>, i32 -> vector<32x128xf32>
    %c7_445 = arith.constant 7 : index
    %c8_446 = arith.constant 8 : index
    %c0_447 = arith.constant 0 : index
    %c0_448 = arith.constant 0 : index
    %413 = vector.load %arg2[%c7_445, %c8_446, %c0_447, %c0_448] : memref<10x17x32x32xf32, #tpu.memory_space<vmem>>, vector<1x1x32x32xf32>
    %414 = vector.shape_cast %413 : vector<1x1x32x32xf32> to vector<32x32xf32>
    %cst_449 = arith.constant dense<0.000000e+00> : vector<32x128xf32>
    %415 = tpu.matmul %414, %412, %cst_449 {dimension_numbers = #tpu.dot_dimension_numbers<[1], [0], [0], [1], [0, 0, 1, 1], [], []>} : vector<32x32xf32>, vector<32x128xf32>, vector<32x128xf32> -> vector<32x128xf32>
    %416 = arith.addf %411, %415 : vector<32x128xf32>
    %c124_i32_450 = arith.constant 124 : i32
    %417 = tpu.dynamic_rotate %373 by %c124_i32_450 dim 1 : vector<32x128xf32>, i32 -> vector<32x128xf32>
    %c7_451 = arith.constant 7 : index
    %c9_452 = arith.constant 9 : index
    %c0_453 = arith.constant 0 : index
    %c0_454 = arith.constant 0 : index
    %418 = vector.load %arg2[%c7_451, %c9_452, %c0_453, %c0_454] : memref<10x17x32x32xf32, #tpu.memory_space<vmem>>, vector<1x1x32x32xf32>
    %419 = vector.shape_cast %418 : vector<1x1x32x32xf32> to vector<32x32xf32>
    %cst_455 = arith.constant dense<0.000000e+00> : vector<32x128xf32>
    %420 = tpu.matmul %419, %417, %cst_455 {dimension_numbers = #tpu.dot_dimension_numbers<[1], [0], [0], [1], [0, 0, 1, 1], [], []>} : vector<32x32xf32>, vector<32x128xf32>, vector<32x128xf32> -> vector<32x128xf32>
    %421 = arith.addf %416, %420 : vector<32x128xf32>
    %c123_i32_456 = arith.constant 123 : i32
    %422 = tpu.dynamic_rotate %373 by %c123_i32_456 dim 1 : vector<32x128xf32>, i32 -> vector<32x128xf32>
    %c7_457 = arith.constant 7 : index
    %c10_458 = arith.constant 10 : index
    %c0_459 = arith.constant 0 : index
    %c0_460 = arith.constant 0 : index
    %423 = vector.load %arg2[%c7_457, %c10_458, %c0_459, %c0_460] : memref<10x17x32x32xf32, #tpu.memory_space<vmem>>, vector<1x1x32x32xf32>
    %424 = vector.shape_cast %423 : vector<1x1x32x32xf32> to vector<32x32xf32>
    %cst_461 = arith.constant dense<0.000000e+00> : vector<32x128xf32>
    %425 = tpu.matmul %424, %422, %cst_461 {dimension_numbers = #tpu.dot_dimension_numbers<[1], [0], [0], [1], [0, 0, 1, 1], [], []>} : vector<32x32xf32>, vector<32x128xf32>, vector<32x128xf32> -> vector<32x128xf32>
    %426 = arith.addf %421, %425 : vector<32x128xf32>
    %c7_462 = arith.constant 7 : index
    %c0_463 = arith.constant 0 : index
    %c0_464 = arith.constant 0 : index
    %427 = vector.load %arg3[%c7_462, %c0_463, %c0_464] : memref<10x32x128xf32, #tpu.memory_space<vmem>>, vector<1x32x128xf32>
    %428 = vector.shape_cast %427 : vector<1x32x128xf32> to vector<32x128xf32>
    %429 = arith.mulf %426, %428 : vector<32x128xf32>
    %c7_465 = arith.constant 7 : index
    %c0_466 = arith.constant 0 : index
    %c0_467 = arith.constant 0 : index
    %430 = vector.load %arg4[%c7_465, %c0_466, %c0_467] : memref<10x32x128xf32, #tpu.memory_space<vmem>>, vector<1x32x128xf32>
    %431 = vector.shape_cast %430 : vector<1x32x128xf32> to vector<32x128xf32>
    %432 = arith.addf %429, %431 : vector<32x128xf32>
    %cst_468 = arith.constant 0.000000e+00 : f32
    %433 = vector.broadcast %cst_468 : f32 to vector<32x128xf32>
    %434 = arith.maximumf %432, %433 : vector<32x128xf32>
    %435 = arith.mulf %434, %7 : vector<32x128xf32>
    %c6_i32_469 = arith.constant 6 : i32
    %436 = tpu.dynamic_rotate %435 by %c6_i32_469 dim 1 : vector<32x128xf32>, i32 -> vector<32x128xf32>
    %c8_470 = arith.constant 8 : index
    %c0_471 = arith.constant 0 : index
    %c0_472 = arith.constant 0 : index
    %c0_473 = arith.constant 0 : index
    %437 = vector.load %arg2[%c8_470, %c0_471, %c0_472, %c0_473] : memref<10x17x32x32xf32, #tpu.memory_space<vmem>>, vector<1x1x32x32xf32>
    %438 = vector.shape_cast %437 : vector<1x1x32x32xf32> to vector<32x32xf32>
    %cst_474 = arith.constant dense<0.000000e+00> : vector<32x128xf32>
    %439 = tpu.matmul %438, %436, %cst_474 {dimension_numbers = #tpu.dot_dimension_numbers<[1], [0], [0], [1], [0, 0, 1, 1], [], []>} : vector<32x32xf32>, vector<32x128xf32>, vector<32x128xf32> -> vector<32x128xf32>
    %c5_i32_475 = arith.constant 5 : i32
    %440 = tpu.dynamic_rotate %435 by %c5_i32_475 dim 1 : vector<32x128xf32>, i32 -> vector<32x128xf32>
    %c8_476 = arith.constant 8 : index
    %c1_477 = arith.constant 1 : index
    %c0_478 = arith.constant 0 : index
    %c0_479 = arith.constant 0 : index
    %441 = vector.load %arg2[%c8_476, %c1_477, %c0_478, %c0_479] : memref<10x17x32x32xf32, #tpu.memory_space<vmem>>, vector<1x1x32x32xf32>
    %442 = vector.shape_cast %441 : vector<1x1x32x32xf32> to vector<32x32xf32>
    %cst_480 = arith.constant dense<0.000000e+00> : vector<32x128xf32>
    %443 = tpu.matmul %442, %440, %cst_480 {dimension_numbers = #tpu.dot_dimension_numbers<[1], [0], [0], [1], [0, 0, 1, 1], [], []>} : vector<32x32xf32>, vector<32x128xf32>, vector<32x128xf32> -> vector<32x128xf32>
    %444 = arith.addf %439, %443 : vector<32x128xf32>
    %c4_i32_481 = arith.constant 4 : i32
    %445 = tpu.dynamic_rotate %435 by %c4_i32_481 dim 1 : vector<32x128xf32>, i32 -> vector<32x128xf32>
    %c8_482 = arith.constant 8 : index
    %c2_483 = arith.constant 2 : index
    %c0_484 = arith.constant 0 : index
    %c0_485 = arith.constant 0 : index
    %446 = vector.load %arg2[%c8_482, %c2_483, %c0_484, %c0_485] : memref<10x17x32x32xf32, #tpu.memory_space<vmem>>, vector<1x1x32x32xf32>
    %447 = vector.shape_cast %446 : vector<1x1x32x32xf32> to vector<32x32xf32>
    %cst_486 = arith.constant dense<0.000000e+00> : vector<32x128xf32>
    %448 = tpu.matmul %447, %445, %cst_486 {dimension_numbers = #tpu.dot_dimension_numbers<[1], [0], [0], [1], [0, 0, 1, 1], [], []>} : vector<32x32xf32>, vector<32x128xf32>, vector<32x128xf32> -> vector<32x128xf32>
    %449 = arith.addf %444, %448 : vector<32x128xf32>
    %c3_i32_487 = arith.constant 3 : i32
    %450 = tpu.dynamic_rotate %435 by %c3_i32_487 dim 1 : vector<32x128xf32>, i32 -> vector<32x128xf32>
    %c8_488 = arith.constant 8 : index
    %c3_489 = arith.constant 3 : index
    %c0_490 = arith.constant 0 : index
    %c0_491 = arith.constant 0 : index
    %451 = vector.load %arg2[%c8_488, %c3_489, %c0_490, %c0_491] : memref<10x17x32x32xf32, #tpu.memory_space<vmem>>, vector<1x1x32x32xf32>
    %452 = vector.shape_cast %451 : vector<1x1x32x32xf32> to vector<32x32xf32>
    %cst_492 = arith.constant dense<0.000000e+00> : vector<32x128xf32>
    %453 = tpu.matmul %452, %450, %cst_492 {dimension_numbers = #tpu.dot_dimension_numbers<[1], [0], [0], [1], [0, 0, 1, 1], [], []>} : vector<32x32xf32>, vector<32x128xf32>, vector<32x128xf32> -> vector<32x128xf32>
    %454 = arith.addf %449, %453 : vector<32x128xf32>
    %c2_i32_493 = arith.constant 2 : i32
    %455 = tpu.dynamic_rotate %435 by %c2_i32_493 dim 1 : vector<32x128xf32>, i32 -> vector<32x128xf32>
    %c8_494 = arith.constant 8 : index
    %c4_495 = arith.constant 4 : index
    %c0_496 = arith.constant 0 : index
    %c0_497 = arith.constant 0 : index
    %456 = vector.load %arg2[%c8_494, %c4_495, %c0_496, %c0_497] : memref<10x17x32x32xf32, #tpu.memory_space<vmem>>, vector<1x1x32x32xf32>
    %457 = vector.shape_cast %456 : vector<1x1x32x32xf32> to vector<32x32xf32>
    %cst_498 = arith.constant dense<0.000000e+00> : vector<32x128xf32>
    %458 = tpu.matmul %457, %455, %cst_498 {dimension_numbers = #tpu.dot_dimension_numbers<[1], [0], [0], [1], [0, 0, 1, 1], [], []>} : vector<32x32xf32>, vector<32x128xf32>, vector<32x128xf32> -> vector<32x128xf32>
    %459 = arith.addf %454, %458 : vector<32x128xf32>
    %c1_i32_499 = arith.constant 1 : i32
    %460 = tpu.dynamic_rotate %435 by %c1_i32_499 dim 1 : vector<32x128xf32>, i32 -> vector<32x128xf32>
    %c8_500 = arith.constant 8 : index
    %c5_501 = arith.constant 5 : index
    %c0_502 = arith.constant 0 : index
    %c0_503 = arith.constant 0 : index
    %461 = vector.load %arg2[%c8_500, %c5_501, %c0_502, %c0_503] : memref<10x17x32x32xf32, #tpu.memory_space<vmem>>, vector<1x1x32x32xf32>
    %462 = vector.shape_cast %461 : vector<1x1x32x32xf32> to vector<32x32xf32>
    %cst_504 = arith.constant dense<0.000000e+00> : vector<32x128xf32>
    %463 = tpu.matmul %462, %460, %cst_504 {dimension_numbers = #tpu.dot_dimension_numbers<[1], [0], [0], [1], [0, 0, 1, 1], [], []>} : vector<32x32xf32>, vector<32x128xf32>, vector<32x128xf32> -> vector<32x128xf32>
    %464 = arith.addf %459, %463 : vector<32x128xf32>
    %c8_505 = arith.constant 8 : index
    %c6_506 = arith.constant 6 : index
    %c0_507 = arith.constant 0 : index
    %c0_508 = arith.constant 0 : index
    %465 = vector.load %arg2[%c8_505, %c6_506, %c0_507, %c0_508] : memref<10x17x32x32xf32, #tpu.memory_space<vmem>>, vector<1x1x32x32xf32>
    %466 = vector.shape_cast %465 : vector<1x1x32x32xf32> to vector<32x32xf32>
    %cst_509 = arith.constant dense<0.000000e+00> : vector<32x128xf32>
    %467 = tpu.matmul %466, %435, %cst_509 {dimension_numbers = #tpu.dot_dimension_numbers<[1], [0], [0], [1], [0, 0, 1, 1], [], []>} : vector<32x32xf32>, vector<32x128xf32>, vector<32x128xf32> -> vector<32x128xf32>
    %468 = arith.addf %464, %467 : vector<32x128xf32>
    %c127_i32_510 = arith.constant 127 : i32
    %469 = tpu.dynamic_rotate %435 by %c127_i32_510 dim 1 : vector<32x128xf32>, i32 -> vector<32x128xf32>
    %c8_511 = arith.constant 8 : index
    %c7_512 = arith.constant 7 : index
    %c0_513 = arith.constant 0 : index
    %c0_514 = arith.constant 0 : index
    %470 = vector.load %arg2[%c8_511, %c7_512, %c0_513, %c0_514] : memref<10x17x32x32xf32, #tpu.memory_space<vmem>>, vector<1x1x32x32xf32>
    %471 = vector.shape_cast %470 : vector<1x1x32x32xf32> to vector<32x32xf32>
    %cst_515 = arith.constant dense<0.000000e+00> : vector<32x128xf32>
    %472 = tpu.matmul %471, %469, %cst_515 {dimension_numbers = #tpu.dot_dimension_numbers<[1], [0], [0], [1], [0, 0, 1, 1], [], []>} : vector<32x32xf32>, vector<32x128xf32>, vector<32x128xf32> -> vector<32x128xf32>
    %473 = arith.addf %468, %472 : vector<32x128xf32>
    %c126_i32_516 = arith.constant 126 : i32
    %474 = tpu.dynamic_rotate %435 by %c126_i32_516 dim 1 : vector<32x128xf32>, i32 -> vector<32x128xf32>
    %c8_517 = arith.constant 8 : index
    %c8_518 = arith.constant 8 : index
    %c0_519 = arith.constant 0 : index
    %c0_520 = arith.constant 0 : index
    %475 = vector.load %arg2[%c8_517, %c8_518, %c0_519, %c0_520] : memref<10x17x32x32xf32, #tpu.memory_space<vmem>>, vector<1x1x32x32xf32>
    %476 = vector.shape_cast %475 : vector<1x1x32x32xf32> to vector<32x32xf32>
    %cst_521 = arith.constant dense<0.000000e+00> : vector<32x128xf32>
    %477 = tpu.matmul %476, %474, %cst_521 {dimension_numbers = #tpu.dot_dimension_numbers<[1], [0], [0], [1], [0, 0, 1, 1], [], []>} : vector<32x32xf32>, vector<32x128xf32>, vector<32x128xf32> -> vector<32x128xf32>
    %478 = arith.addf %473, %477 : vector<32x128xf32>
    %c125_i32_522 = arith.constant 125 : i32
    %479 = tpu.dynamic_rotate %435 by %c125_i32_522 dim 1 : vector<32x128xf32>, i32 -> vector<32x128xf32>
    %c8_523 = arith.constant 8 : index
    %c9_524 = arith.constant 9 : index
    %c0_525 = arith.constant 0 : index
    %c0_526 = arith.constant 0 : index
    %480 = vector.load %arg2[%c8_523, %c9_524, %c0_525, %c0_526] : memref<10x17x32x32xf32, #tpu.memory_space<vmem>>, vector<1x1x32x32xf32>
    %481 = vector.shape_cast %480 : vector<1x1x32x32xf32> to vector<32x32xf32>
    %cst_527 = arith.constant dense<0.000000e+00> : vector<32x128xf32>
    %482 = tpu.matmul %481, %479, %cst_527 {dimension_numbers = #tpu.dot_dimension_numbers<[1], [0], [0], [1], [0, 0, 1, 1], [], []>} : vector<32x32xf32>, vector<32x128xf32>, vector<32x128xf32> -> vector<32x128xf32>
    %483 = arith.addf %478, %482 : vector<32x128xf32>
    %c124_i32_528 = arith.constant 124 : i32
    %484 = tpu.dynamic_rotate %435 by %c124_i32_528 dim 1 : vector<32x128xf32>, i32 -> vector<32x128xf32>
    %c8_529 = arith.constant 8 : index
    %c10_530 = arith.constant 10 : index
    %c0_531 = arith.constant 0 : index
    %c0_532 = arith.constant 0 : index
    %485 = vector.load %arg2[%c8_529, %c10_530, %c0_531, %c0_532] : memref<10x17x32x32xf32, #tpu.memory_space<vmem>>, vector<1x1x32x32xf32>
    %486 = vector.shape_cast %485 : vector<1x1x32x32xf32> to vector<32x32xf32>
    %cst_533 = arith.constant dense<0.000000e+00> : vector<32x128xf32>
    %487 = tpu.matmul %486, %484, %cst_533 {dimension_numbers = #tpu.dot_dimension_numbers<[1], [0], [0], [1], [0, 0, 1, 1], [], []>} : vector<32x32xf32>, vector<32x128xf32>, vector<32x128xf32> -> vector<32x128xf32>
    %488 = arith.addf %483, %487 : vector<32x128xf32>
    %c123_i32_534 = arith.constant 123 : i32
    %489 = tpu.dynamic_rotate %435 by %c123_i32_534 dim 1 : vector<32x128xf32>, i32 -> vector<32x128xf32>
    %c8_535 = arith.constant 8 : index
    %c11_536 = arith.constant 11 : index
    %c0_537 = arith.constant 0 : index
    %c0_538 = arith.constant 0 : index
    %490 = vector.load %arg2[%c8_535, %c11_536, %c0_537, %c0_538] : memref<10x17x32x32xf32, #tpu.memory_space<vmem>>, vector<1x1x32x32xf32>
    %491 = vector.shape_cast %490 : vector<1x1x32x32xf32> to vector<32x32xf32>
    %cst_539 = arith.constant dense<0.000000e+00> : vector<32x128xf32>
    %492 = tpu.matmul %491, %489, %cst_539 {dimension_numbers = #tpu.dot_dimension_numbers<[1], [0], [0], [1], [0, 0, 1, 1], [], []>} : vector<32x32xf32>, vector<32x128xf32>, vector<32x128xf32> -> vector<32x128xf32>
    %493 = arith.addf %488, %492 : vector<32x128xf32>
    %c122_i32_540 = arith.constant 122 : i32
    %494 = tpu.dynamic_rotate %435 by %c122_i32_540 dim 1 : vector<32x128xf32>, i32 -> vector<32x128xf32>
    %c8_541 = arith.constant 8 : index
    %c12_542 = arith.constant 12 : index
    %c0_543 = arith.constant 0 : index
    %c0_544 = arith.constant 0 : index
    %495 = vector.load %arg2[%c8_541, %c12_542, %c0_543, %c0_544] : memref<10x17x32x32xf32, #tpu.memory_space<vmem>>, vector<1x1x32x32xf32>
    %496 = vector.shape_cast %495 : vector<1x1x32x32xf32> to vector<32x32xf32>
    %cst_545 = arith.constant dense<0.000000e+00> : vector<32x128xf32>
    %497 = tpu.matmul %496, %494, %cst_545 {dimension_numbers = #tpu.dot_dimension_numbers<[1], [0], [0], [1], [0, 0, 1, 1], [], []>} : vector<32x32xf32>, vector<32x128xf32>, vector<32x128xf32> -> vector<32x128xf32>
    %498 = arith.addf %493, %497 : vector<32x128xf32>
    %c8_546 = arith.constant 8 : index
    %c0_547 = arith.constant 0 : index
    %c0_548 = arith.constant 0 : index
    %499 = vector.load %arg3[%c8_546, %c0_547, %c0_548] : memref<10x32x128xf32, #tpu.memory_space<vmem>>, vector<1x32x128xf32>
    %500 = vector.shape_cast %499 : vector<1x32x128xf32> to vector<32x128xf32>
    %501 = arith.mulf %498, %500 : vector<32x128xf32>
    %c8_549 = arith.constant 8 : index
    %c0_550 = arith.constant 0 : index
    %c0_551 = arith.constant 0 : index
    %502 = vector.load %arg4[%c8_549, %c0_550, %c0_551] : memref<10x32x128xf32, #tpu.memory_space<vmem>>, vector<1x32x128xf32>
    %503 = vector.shape_cast %502 : vector<1x32x128xf32> to vector<32x128xf32>
    %504 = arith.addf %501, %503 : vector<32x128xf32>
    %cst_552 = arith.constant 0.000000e+00 : f32
    %505 = vector.broadcast %cst_552 : f32 to vector<32x128xf32>
    %506 = arith.maximumf %504, %505 : vector<32x128xf32>
    %507 = arith.mulf %506, %7 : vector<32x128xf32>
    %c8_i32_553 = arith.constant 8 : i32
    %508 = tpu.dynamic_rotate %507 by %c8_i32_553 dim 1 : vector<32x128xf32>, i32 -> vector<32x128xf32>
    %c9_554 = arith.constant 9 : index
    %c0_555 = arith.constant 0 : index
    %c0_556 = arith.constant 0 : index
    %c0_557 = arith.constant 0 : index
    %509 = vector.load %arg2[%c9_554, %c0_555, %c0_556, %c0_557] : memref<10x17x32x32xf32, #tpu.memory_space<vmem>>, vector<1x1x32x32xf32>
    %510 = vector.shape_cast %509 : vector<1x1x32x32xf32> to vector<32x32xf32>
    %cst_558 = arith.constant dense<0.000000e+00> : vector<32x128xf32>
    %511 = tpu.matmul %510, %508, %cst_558 {dimension_numbers = #tpu.dot_dimension_numbers<[1], [0], [0], [1], [0, 0, 1, 1], [], []>} : vector<32x32xf32>, vector<32x128xf32>, vector<32x128xf32> -> vector<32x128xf32>
    %c7_i32 = arith.constant 7 : i32
    %512 = tpu.dynamic_rotate %507 by %c7_i32 dim 1 : vector<32x128xf32>, i32 -> vector<32x128xf32>
    %c9_559 = arith.constant 9 : index
    %c1_560 = arith.constant 1 : index
    %c0_561 = arith.constant 0 : index
    %c0_562 = arith.constant 0 : index
    %513 = vector.load %arg2[%c9_559, %c1_560, %c0_561, %c0_562] : memref<10x17x32x32xf32, #tpu.memory_space<vmem>>, vector<1x1x32x32xf32>
    %514 = vector.shape_cast %513 : vector<1x1x32x32xf32> to vector<32x32xf32>
    %cst_563 = arith.constant dense<0.000000e+00> : vector<32x128xf32>
    %515 = tpu.matmul %514, %512, %cst_563 {dimension_numbers = #tpu.dot_dimension_numbers<[1], [0], [0], [1], [0, 0, 1, 1], [], []>} : vector<32x32xf32>, vector<32x128xf32>, vector<32x128xf32> -> vector<32x128xf32>
    %516 = arith.addf %511, %515 : vector<32x128xf32>
    %c6_i32_564 = arith.constant 6 : i32
    %517 = tpu.dynamic_rotate %507 by %c6_i32_564 dim 1 : vector<32x128xf32>, i32 -> vector<32x128xf32>
    %c9_565 = arith.constant 9 : index
    %c2_566 = arith.constant 2 : index
    %c0_567 = arith.constant 0 : index
    %c0_568 = arith.constant 0 : index
    %518 = vector.load %arg2[%c9_565, %c2_566, %c0_567, %c0_568] : memref<10x17x32x32xf32, #tpu.memory_space<vmem>>, vector<1x1x32x32xf32>
    %519 = vector.shape_cast %518 : vector<1x1x32x32xf32> to vector<32x32xf32>
    %cst_569 = arith.constant dense<0.000000e+00> : vector<32x128xf32>
    %520 = tpu.matmul %519, %517, %cst_569 {dimension_numbers = #tpu.dot_dimension_numbers<[1], [0], [0], [1], [0, 0, 1, 1], [], []>} : vector<32x32xf32>, vector<32x128xf32>, vector<32x128xf32> -> vector<32x128xf32>
    %521 = arith.addf %516, %520 : vector<32x128xf32>
    %c5_i32_570 = arith.constant 5 : i32
    %522 = tpu.dynamic_rotate %507 by %c5_i32_570 dim 1 : vector<32x128xf32>, i32 -> vector<32x128xf32>
    %c9_571 = arith.constant 9 : index
    %c3_572 = arith.constant 3 : index
    %c0_573 = arith.constant 0 : index
    %c0_574 = arith.constant 0 : index
    %523 = vector.load %arg2[%c9_571, %c3_572, %c0_573, %c0_574] : memref<10x17x32x32xf32, #tpu.memory_space<vmem>>, vector<1x1x32x32xf32>
    %524 = vector.shape_cast %523 : vector<1x1x32x32xf32> to vector<32x32xf32>
    %cst_575 = arith.constant dense<0.000000e+00> : vector<32x128xf32>
    %525 = tpu.matmul %524, %522, %cst_575 {dimension_numbers = #tpu.dot_dimension_numbers<[1], [0], [0], [1], [0, 0, 1, 1], [], []>} : vector<32x32xf32>, vector<32x128xf32>, vector<32x128xf32> -> vector<32x128xf32>
    %526 = arith.addf %521, %525 : vector<32x128xf32>
    %c4_i32_576 = arith.constant 4 : i32
    %527 = tpu.dynamic_rotate %507 by %c4_i32_576 dim 1 : vector<32x128xf32>, i32 -> vector<32x128xf32>
    %c9_577 = arith.constant 9 : index
    %c4_578 = arith.constant 4 : index
    %c0_579 = arith.constant 0 : index
    %c0_580 = arith.constant 0 : index
    %528 = vector.load %arg2[%c9_577, %c4_578, %c0_579, %c0_580] : memref<10x17x32x32xf32, #tpu.memory_space<vmem>>, vector<1x1x32x32xf32>
    %529 = vector.shape_cast %528 : vector<1x1x32x32xf32> to vector<32x32xf32>
    %cst_581 = arith.constant dense<0.000000e+00> : vector<32x128xf32>
    %530 = tpu.matmul %529, %527, %cst_581 {dimension_numbers = #tpu.dot_dimension_numbers<[1], [0], [0], [1], [0, 0, 1, 1], [], []>} : vector<32x32xf32>, vector<32x128xf32>, vector<32x128xf32> -> vector<32x128xf32>
    %531 = arith.addf %526, %530 : vector<32x128xf32>
    %c3_i32_582 = arith.constant 3 : i32
    %532 = tpu.dynamic_rotate %507 by %c3_i32_582 dim 1 : vector<32x128xf32>, i32 -> vector<32x128xf32>
    %c9_583 = arith.constant 9 : index
    %c5_584 = arith.constant 5 : index
    %c0_585 = arith.constant 0 : index
    %c0_586 = arith.constant 0 : index
    %533 = vector.load %arg2[%c9_583, %c5_584, %c0_585, %c0_586] : memref<10x17x32x32xf32, #tpu.memory_space<vmem>>, vector<1x1x32x32xf32>
    %534 = vector.shape_cast %533 : vector<1x1x32x32xf32> to vector<32x32xf32>
    %cst_587 = arith.constant dense<0.000000e+00> : vector<32x128xf32>
    %535 = tpu.matmul %534, %532, %cst_587 {dimension_numbers = #tpu.dot_dimension_numbers<[1], [0], [0], [1], [0, 0, 1, 1], [], []>} : vector<32x32xf32>, vector<32x128xf32>, vector<32x128xf32> -> vector<32x128xf32>
    %536 = arith.addf %531, %535 : vector<32x128xf32>
    %c2_i32_588 = arith.constant 2 : i32
    %537 = tpu.dynamic_rotate %507 by %c2_i32_588 dim 1 : vector<32x128xf32>, i32 -> vector<32x128xf32>
    %c9_589 = arith.constant 9 : index
    %c6_590 = arith.constant 6 : index
    %c0_591 = arith.constant 0 : index
    %c0_592 = arith.constant 0 : index
    %538 = vector.load %arg2[%c9_589, %c6_590, %c0_591, %c0_592] : memref<10x17x32x32xf32, #tpu.memory_space<vmem>>, vector<1x1x32x32xf32>
    %539 = vector.shape_cast %538 : vector<1x1x32x32xf32> to vector<32x32xf32>
    %cst_593 = arith.constant dense<0.000000e+00> : vector<32x128xf32>
    %540 = tpu.matmul %539, %537, %cst_593 {dimension_numbers = #tpu.dot_dimension_numbers<[1], [0], [0], [1], [0, 0, 1, 1], [], []>} : vector<32x32xf32>, vector<32x128xf32>, vector<32x128xf32> -> vector<32x128xf32>
    %541 = arith.addf %536, %540 : vector<32x128xf32>
    %c1_i32_594 = arith.constant 1 : i32
    %542 = tpu.dynamic_rotate %507 by %c1_i32_594 dim 1 : vector<32x128xf32>, i32 -> vector<32x128xf32>
    %c9_595 = arith.constant 9 : index
    %c7_596 = arith.constant 7 : index
    %c0_597 = arith.constant 0 : index
    %c0_598 = arith.constant 0 : index
    %543 = vector.load %arg2[%c9_595, %c7_596, %c0_597, %c0_598] : memref<10x17x32x32xf32, #tpu.memory_space<vmem>>, vector<1x1x32x32xf32>
    %544 = vector.shape_cast %543 : vector<1x1x32x32xf32> to vector<32x32xf32>
    %cst_599 = arith.constant dense<0.000000e+00> : vector<32x128xf32>
    %545 = tpu.matmul %544, %542, %cst_599 {dimension_numbers = #tpu.dot_dimension_numbers<[1], [0], [0], [1], [0, 0, 1, 1], [], []>} : vector<32x32xf32>, vector<32x128xf32>, vector<32x128xf32> -> vector<32x128xf32>
    %546 = arith.addf %541, %545 : vector<32x128xf32>
    %c9_600 = arith.constant 9 : index
    %c8_601 = arith.constant 8 : index
    %c0_602 = arith.constant 0 : index
    %c0_603 = arith.constant 0 : index
    %547 = vector.load %arg2[%c9_600, %c8_601, %c0_602, %c0_603] : memref<10x17x32x32xf32, #tpu.memory_space<vmem>>, vector<1x1x32x32xf32>
    %548 = vector.shape_cast %547 : vector<1x1x32x32xf32> to vector<32x32xf32>
    %cst_604 = arith.constant dense<0.000000e+00> : vector<32x128xf32>
    %549 = tpu.matmul %548, %507, %cst_604 {dimension_numbers = #tpu.dot_dimension_numbers<[1], [0], [0], [1], [0, 0, 1, 1], [], []>} : vector<32x32xf32>, vector<32x128xf32>, vector<32x128xf32> -> vector<32x128xf32>
    %550 = arith.addf %546, %549 : vector<32x128xf32>
    %c127_i32_605 = arith.constant 127 : i32
    %551 = tpu.dynamic_rotate %507 by %c127_i32_605 dim 1 : vector<32x128xf32>, i32 -> vector<32x128xf32>
    %c9_606 = arith.constant 9 : index
    %c9_607 = arith.constant 9 : index
    %c0_608 = arith.constant 0 : index
    %c0_609 = arith.constant 0 : index
    %552 = vector.load %arg2[%c9_606, %c9_607, %c0_608, %c0_609] : memref<10x17x32x32xf32, #tpu.memory_space<vmem>>, vector<1x1x32x32xf32>
    %553 = vector.shape_cast %552 : vector<1x1x32x32xf32> to vector<32x32xf32>
    %cst_610 = arith.constant dense<0.000000e+00> : vector<32x128xf32>
    %554 = tpu.matmul %553, %551, %cst_610 {dimension_numbers = #tpu.dot_dimension_numbers<[1], [0], [0], [1], [0, 0, 1, 1], [], []>} : vector<32x32xf32>, vector<32x128xf32>, vector<32x128xf32> -> vector<32x128xf32>
    %555 = arith.addf %550, %554 : vector<32x128xf32>
    %c126_i32_611 = arith.constant 126 : i32
    %556 = tpu.dynamic_rotate %507 by %c126_i32_611 dim 1 : vector<32x128xf32>, i32 -> vector<32x128xf32>
    %c9_612 = arith.constant 9 : index
    %c10_613 = arith.constant 10 : index
    %c0_614 = arith.constant 0 : index
    %c0_615 = arith.constant 0 : index
    %557 = vector.load %arg2[%c9_612, %c10_613, %c0_614, %c0_615] : memref<10x17x32x32xf32, #tpu.memory_space<vmem>>, vector<1x1x32x32xf32>
    %558 = vector.shape_cast %557 : vector<1x1x32x32xf32> to vector<32x32xf32>
    %cst_616 = arith.constant dense<0.000000e+00> : vector<32x128xf32>
    %559 = tpu.matmul %558, %556, %cst_616 {dimension_numbers = #tpu.dot_dimension_numbers<[1], [0], [0], [1], [0, 0, 1, 1], [], []>} : vector<32x32xf32>, vector<32x128xf32>, vector<32x128xf32> -> vector<32x128xf32>
    %560 = arith.addf %555, %559 : vector<32x128xf32>
    %c125_i32_617 = arith.constant 125 : i32
    %561 = tpu.dynamic_rotate %507 by %c125_i32_617 dim 1 : vector<32x128xf32>, i32 -> vector<32x128xf32>
    %c9_618 = arith.constant 9 : index
    %c11_619 = arith.constant 11 : index
    %c0_620 = arith.constant 0 : index
    %c0_621 = arith.constant 0 : index
    %562 = vector.load %arg2[%c9_618, %c11_619, %c0_620, %c0_621] : memref<10x17x32x32xf32, #tpu.memory_space<vmem>>, vector<1x1x32x32xf32>
    %563 = vector.shape_cast %562 : vector<1x1x32x32xf32> to vector<32x32xf32>
    %cst_622 = arith.constant dense<0.000000e+00> : vector<32x128xf32>
    %564 = tpu.matmul %563, %561, %cst_622 {dimension_numbers = #tpu.dot_dimension_numbers<[1], [0], [0], [1], [0, 0, 1, 1], [], []>} : vector<32x32xf32>, vector<32x128xf32>, vector<32x128xf32> -> vector<32x128xf32>
    %565 = arith.addf %560, %564 : vector<32x128xf32>
    %c124_i32_623 = arith.constant 124 : i32
    %566 = tpu.dynamic_rotate %507 by %c124_i32_623 dim 1 : vector<32x128xf32>, i32 -> vector<32x128xf32>
    %c9_624 = arith.constant 9 : index
    %c12_625 = arith.constant 12 : index
    %c0_626 = arith.constant 0 : index
    %c0_627 = arith.constant 0 : index
    %567 = vector.load %arg2[%c9_624, %c12_625, %c0_626, %c0_627] : memref<10x17x32x32xf32, #tpu.memory_space<vmem>>, vector<1x1x32x32xf32>
    %568 = vector.shape_cast %567 : vector<1x1x32x32xf32> to vector<32x32xf32>
    %cst_628 = arith.constant dense<0.000000e+00> : vector<32x128xf32>
    %569 = tpu.matmul %568, %566, %cst_628 {dimension_numbers = #tpu.dot_dimension_numbers<[1], [0], [0], [1], [0, 0, 1, 1], [], []>} : vector<32x32xf32>, vector<32x128xf32>, vector<32x128xf32> -> vector<32x128xf32>
    %570 = arith.addf %565, %569 : vector<32x128xf32>
    %c123_i32_629 = arith.constant 123 : i32
    %571 = tpu.dynamic_rotate %507 by %c123_i32_629 dim 1 : vector<32x128xf32>, i32 -> vector<32x128xf32>
    %c9_630 = arith.constant 9 : index
    %c13 = arith.constant 13 : index
    %c0_631 = arith.constant 0 : index
    %c0_632 = arith.constant 0 : index
    %572 = vector.load %arg2[%c9_630, %c13, %c0_631, %c0_632] : memref<10x17x32x32xf32, #tpu.memory_space<vmem>>, vector<1x1x32x32xf32>
    %573 = vector.shape_cast %572 : vector<1x1x32x32xf32> to vector<32x32xf32>
    %cst_633 = arith.constant dense<0.000000e+00> : vector<32x128xf32>
    %574 = tpu.matmul %573, %571, %cst_633 {dimension_numbers = #tpu.dot_dimension_numbers<[1], [0], [0], [1], [0, 0, 1, 1], [], []>} : vector<32x32xf32>, vector<32x128xf32>, vector<32x128xf32> -> vector<32x128xf32>
    %575 = arith.addf %570, %574 : vector<32x128xf32>
    %c122_i32_634 = arith.constant 122 : i32
    %576 = tpu.dynamic_rotate %507 by %c122_i32_634 dim 1 : vector<32x128xf32>, i32 -> vector<32x128xf32>
    %c9_635 = arith.constant 9 : index
    %c14 = arith.constant 14 : index
    %c0_636 = arith.constant 0 : index
    %c0_637 = arith.constant 0 : index
    %577 = vector.load %arg2[%c9_635, %c14, %c0_636, %c0_637] : memref<10x17x32x32xf32, #tpu.memory_space<vmem>>, vector<1x1x32x32xf32>
    %578 = vector.shape_cast %577 : vector<1x1x32x32xf32> to vector<32x32xf32>
    %cst_638 = arith.constant dense<0.000000e+00> : vector<32x128xf32>
    %579 = tpu.matmul %578, %576, %cst_638 {dimension_numbers = #tpu.dot_dimension_numbers<[1], [0], [0], [1], [0, 0, 1, 1], [], []>} : vector<32x32xf32>, vector<32x128xf32>, vector<32x128xf32> -> vector<32x128xf32>
    %580 = arith.addf %575, %579 : vector<32x128xf32>
    %c121_i32 = arith.constant 121 : i32
    %581 = tpu.dynamic_rotate %507 by %c121_i32 dim 1 : vector<32x128xf32>, i32 -> vector<32x128xf32>
    %c9_639 = arith.constant 9 : index
    %c15 = arith.constant 15 : index
    %c0_640 = arith.constant 0 : index
    %c0_641 = arith.constant 0 : index
    %582 = vector.load %arg2[%c9_639, %c15, %c0_640, %c0_641] : memref<10x17x32x32xf32, #tpu.memory_space<vmem>>, vector<1x1x32x32xf32>
    %583 = vector.shape_cast %582 : vector<1x1x32x32xf32> to vector<32x32xf32>
    %cst_642 = arith.constant dense<0.000000e+00> : vector<32x128xf32>
    %584 = tpu.matmul %583, %581, %cst_642 {dimension_numbers = #tpu.dot_dimension_numbers<[1], [0], [0], [1], [0, 0, 1, 1], [], []>} : vector<32x32xf32>, vector<32x128xf32>, vector<32x128xf32> -> vector<32x128xf32>
    %585 = arith.addf %580, %584 : vector<32x128xf32>
    %c120_i32 = arith.constant 120 : i32
    %586 = tpu.dynamic_rotate %507 by %c120_i32 dim 1 : vector<32x128xf32>, i32 -> vector<32x128xf32>
    %c9_643 = arith.constant 9 : index
    %c16 = arith.constant 16 : index
    %c0_644 = arith.constant 0 : index
    %c0_645 = arith.constant 0 : index
    %587 = vector.load %arg2[%c9_643, %c16, %c0_644, %c0_645] : memref<10x17x32x32xf32, #tpu.memory_space<vmem>>, vector<1x1x32x32xf32>
    %588 = vector.shape_cast %587 : vector<1x1x32x32xf32> to vector<32x32xf32>
    %cst_646 = arith.constant dense<0.000000e+00> : vector<32x128xf32>
    %589 = tpu.matmul %588, %586, %cst_646 {dimension_numbers = #tpu.dot_dimension_numbers<[1], [0], [0], [1], [0, 0, 1, 1], [], []>} : vector<32x32xf32>, vector<32x128xf32>, vector<32x128xf32> -> vector<32x128xf32>
    %590 = arith.addf %585, %589 : vector<32x128xf32>
    %c9_647 = arith.constant 9 : index
    %c0_648 = arith.constant 0 : index
    %c0_649 = arith.constant 0 : index
    %591 = vector.load %arg3[%c9_647, %c0_648, %c0_649] : memref<10x32x128xf32, #tpu.memory_space<vmem>>, vector<1x32x128xf32>
    %592 = vector.shape_cast %591 : vector<1x32x128xf32> to vector<32x128xf32>
    %593 = arith.mulf %590, %592 : vector<32x128xf32>
    %c9_650 = arith.constant 9 : index
    %c0_651 = arith.constant 0 : index
    %c0_652 = arith.constant 0 : index
    %594 = vector.load %arg4[%c9_650, %c0_651, %c0_652] : memref<10x32x128xf32, #tpu.memory_space<vmem>>, vector<1x32x128xf32>
    %595 = vector.shape_cast %594 : vector<1x32x128xf32> to vector<32x128xf32>
    %596 = arith.addf %593, %595 : vector<32x128xf32>
    %cst_653 = arith.constant 0.000000e+00 : f32
    %597 = vector.broadcast %cst_653 : f32 to vector<32x128xf32>
    %598 = arith.maximumf %596, %597 : vector<32x128xf32>
    %599 = arith.mulf %598, %7 : vector<32x128xf32>
    %600 = vector.extract_strided_slice %599 {offsets = [0, 0], sizes = [8, 128], strides = [1, 1]} : vector<32x128xf32> to vector<8x128xf32>
    %c0_654 = arith.constant 0 : index
    %c0_655 = arith.constant 0 : index
    %c0_656 = arith.constant 0 : index
    %601 = vector.load %arg5[%c0_654, %c0_655, %c0_656] : memref<1x8x128xf32, #tpu.memory_space<vmem>>, vector<1x8x128xf32>
    %602 = vector.shape_cast %601 : vector<1x8x128xf32> to vector<8x128xf32>
    %603 = vector.shape_cast %600 : vector<8x128xf32> to vector<1x8x128xf32>
    tpu.vector_store %arg5[%c0_654, %c0_655, %c0_656], %603 {strides = array<i32>} : memref<1x8x128xf32, #tpu.memory_space<vmem>>, vector<1x8x128xf32>,
    return
  }
  func.func @transform_0(%arg0: i32) -> (i32, i32, i32) {
    %c0_i32 = arith.constant 0 : i32
    %c0_i32_0 = arith.constant 0 : i32
    %c0_i32_1 = arith.constant 0 : i32
    return %arg0, %c0_i32, %c0_i32_0 : i32, i32, i32
  }
  func.func @transform_1(%arg0: i32) -> (i32, i32, i32, i32) {
    %c0_i32 = arith.constant 0 : i32
    %c0_i32_0 = arith.constant 0 : i32
    %c0_i32_1 = arith.constant 0 : i32
    %c0_i32_2 = arith.constant 0 : i32
    %c0_i32_3 = arith.constant 0 : i32
    return %c0_i32, %c0_i32_0, %c0_i32_1, %c0_i32_2 : i32, i32, i32, i32
  }
  func.func @transform_2(%arg0: i32) -> (i32, i32, i32) {
    %c0_i32 = arith.constant 0 : i32
    %c0_i32_0 = arith.constant 0 : i32
    %c0_i32_1 = arith.constant 0 : i32
    %c0_i32_2 = arith.constant 0 : i32
    return %c0_i32, %c0_i32_0, %c0_i32_1 : i32, i32, i32
  }
  func.func @transform_3(%arg0: i32) -> (i32, i32, i32) {
    %c0_i32 = arith.constant 0 : i32
    %c0_i32_0 = arith.constant 0 : i32
    %c0_i32_1 = arith.constant 0 : i32
    %c0_i32_2 = arith.constant 0 : i32
    return %c0_i32, %c0_i32_0, %c0_i32_1 : i32, i32, i32
  }
  func.func @transform_4(%arg0: i32) -> (i32, i32, i32) {
    %c0_i32 = arith.constant 0 : i32
    %c0_i32_0 = arith.constant 0 : i32
    %c0_i32_1 = arith.constant 0 : i32
    return %arg0, %c0_i32, %c0_i32_0 : i32, i32, i32
  }
}

</mosaic_0001>

<bundles_post_ra>
// kernel: _lambda_.1
= control target key start
LH: loop header
LB: loop body
LE: loop exit
PB: predicated region body
PF: predicated region fallthrough
CT: control target
= control target key end

     0   :  { %9 = vsyncpa [#allocation3], 0  ;;  %s18081_s0 = inlined_call_operand.vmem [shape: f32[2,32,128], index: 0, kind: input, shape index: {}]   ;;  %s18082_s1 = inlined_call_operand.hbm [shape: f32[10,17,32,32], index: 1, kind: input, shape index: {}]   ;;  %s18083_s2 = inlined_call_operand.hbm [shape: f32[10,32,128], index: 2, kind: input, shape index: {}]   ;;  %s18084_s3 = inlined_call_operand.hbm [shape: f32[10,32,128], index: 3, kind: input, shape index: {}]   ;;  %s18085_s4 = inlined_call_operand.vmem [shape: f32[2,8,128], index: 4, kind: output, shape index: {}]  }
   0x1   :  { %10 = vsyncpa [#allocation5], 0  ;;  %s17219_s15 = smov 0  }
   0x2 LB: > { %s17225_s16 = sadd.s32 4294967295, %s17170_s15   ;;  %p12178_p0 = scmp.ge.s32.totalorder %s17170_s15, 1  ;;  %s17170_s15 = sphi %s17219_s15, %s16_s15  }
   0x3   : > { %p136_p1 = scmp.lt.s32.totalorder %s17170_s15, 3  ;;  %p18086_p2 = scmp.eq.s32.totalorder %s17225_s16, 0 }
   0x4   : > { %s17172_s18 = smov [#allocation4]   ;;  %s17173_s20 = smov [#allocation2]  }
   0x5   : > { %p17230_p3 = pnand %p12178_p0, %p136_p1  ;;  %s161_s19 = sshll.u32 %s17172_s18, 4  ;;  %s162_s19 = int_to_ptr.vmem [resolvable:$true] %s161_s19 }
   0x6   : > { %s148_s21 = sshll.u32 %s17173_s20, 4  ;;  %s17174_s23 = smov [#allocation6]   ;;  %s17242_s21 = int_to_ptr.vmem [resolvable:$true] %s148_s21 }
   0x7   : > { %s18088_s17 = scalar_select %p17230_p3, 1, 0 }
   0x8   : > { %p16086_p4 = pneg %p17230_p3  ;;  %s174_s24 = sshll.u32 %s17174_s23, 4  ;;  %s17244_s24 = int_to_ptr.vmem [resolvable:$true] %s174_s24 }
   0x9   : > { %s17072_s27 = scalar_lea.hbm %s18083_s2, 5120 }
   0xa   : > { %p17238_p5 = pnand %p18086_p2, %p16086_p4  ;;  %p17073_p6 = scmp.ne.s32.totalorder %s18083_s2, %s17072_s27 }
   0xb   : > { %p17079_p10 = scmp.lt.u32.totalorder %s17072_s27, %s18083_s2 }
   0xc   : > { %p17254_p7 = pneg %p17238_p5 }
   0xe   : > { %p17075_p8 = pnand %p17254_p7, %p17073_p6 }
  0x10   : > { %p17076_p9 = pneg %p17075_p8 }
  0x12   : > { %p17081_p11 = pnand %p17079_p10, %p17076_p9 }
  0x14   : > { %17084 = shalt.err (!%p17081_p11)
}
  0x15   : > { %s17085_s7 = scalar_lea.vmem %s162_s19, 5120  ;;  %p17093_p1 = scmp.lt.s32.totalorder %s162_s19, %s162_s19 }
  0x16   : > { %p17086_p12 = scmp.ne.s32.totalorder %s162_s19, %s17085_s7  ;;  %p17094_p4 = scmp.lt.s32.totalorder %s17085_s7, %s17085_s7 }
  0x18   : > { %p17088_p13 = pnand %p17086_p12, %p17254_p7  ;;  %p17095_p2 = por %p17094_p4, %p17093_p1 }
  0x1a   : > { %p17089_p0 = pneg %p17088_p13 }
  0x1c   : > { %p17096_p3 = pnand %p17095_p2, %p17089_p0 }
  0x1e   : > { %17099 = shalt.err (!%p17096_p3)
}
  0x1f   : > { %s17175_s8 = smov 128   ;;  %s17176_s9 = smov 8  }
  0x20   : > { %16092 = dma.hbm_to_vmem [thread:$0]  (!%p17238_p5), %s18083_s2, 5120, %s162_s19, [#allocation5], %s17175_s8, %s17175_s8, %s17176_s9  }
  0x21   : > { %s17100_s14 = scalar_lea.hbm %s18082_s1, 87040 }
  0x22   : > { %p17101_p2 = scmp.ne.s32.totalorder %s18082_s1, %s17100_s14  ;;  %p17107_p8 = scmp.lt.u32.totalorder %s17100_s14, %s18082_s1 }
  0x24   : > { %p17103_p3 = pnand %p17101_p2, %p17254_p7 }
  0x26   : > { %p17104_p6 = pneg %p17103_p3 }
  0x28   : > { %p17109_p9 = pnand %p17107_p8, %p17104_p6 }
  0x2a   : > { %17112 = shalt.err (!%p17109_p9)
}
  0x2b   : > { %s17113_s19 = scalar_lea.vmem %s17242_s21, 87040  ;;  %p17121_p13 = scmp.lt.s32.totalorder %s17242_s21, %s17242_s21 }
  0x2c   : > { %p17114_p10 = scmp.ne.s32.totalorder %s17242_s21, %s17113_s19  ;;  %p17122_p0 = scmp.lt.s32.totalorder %s17113_s19, %s17113_s19 }
  0x2e   : > { %p17116_p11 = pnand %p17114_p10, %p17254_p7  ;;  %p17123_p1 = por %p17122_p0, %p17121_p13 }
  0x30   : > { %p17117_p12 = pneg %p17116_p11 }
  0x32   : > { %p17124_p4 = pnand %p17123_p1, %p17117_p12 }
  0x34   : > { %17127 = shalt.err (!%p17124_p4)
}
  0x35   : > { %16089 = dma.hbm_to_vmem [thread:$0]  (!%p17238_p5), %s18082_s1, 87040, %s17242_s21, [#allocation3], %s17175_s8, %s17175_s8, %s17176_s9  }
  0x36   : > { %s17128_s5 = scalar_lea.hbm %s18084_s3, 5120 }
  0x37   : > { %p17129_p2 = scmp.ne.s32.totalorder %s18084_s3, %s17128_s5  ;;  %p17135_p8 = scmp.lt.u32.totalorder %s17128_s5, %s18084_s3 }
  0x39   : > { %p17131_p3 = pnand %p17129_p2, %p17254_p7 }
  0x3b   : > { %p17132_p6 = pneg %p17131_p3 }
  0x3d   : > { %p17137_p9 = pnand %p17135_p8, %p17132_p6 }
  0x3f   : > { %17140 = shalt.err (!%p17137_p9)
}
  0x40   : > { %s17141_s21 = scalar_lea.vmem %s17244_s24, 5120  ;;  %p17149_p13 = scmp.lt.s32.totalorder %s17244_s24, %s17244_s24 }
  0x41   : > { %p17142_p10 = scmp.ne.s32.totalorder %s17244_s24, %s17141_s21  ;;  %p17150_p0 = scmp.lt.s32.totalorder %s17141_s21, %s17141_s21 }
  0x43   : > { %p17144_p11 = pnand %p17142_p10, %p17254_p7  ;;  %p17151_p1 = por %p17150_p0, %p17149_p13 }
  0x45   : > { %p17145_p12 = pneg %p17144_p11 }
  0x47   : > { %p17152_p4 = pnand %p17151_p1, %p17145_p12 }
  0x49   : > { %17155 = shalt.err (!%p17152_p4)
}
  0x4a   : > { %16095 = dma.hbm_to_vmem [thread:$0]  (!%p17238_p5), %s18084_s3, 5120, %s17244_s24, [#allocation5], %s17175_s8, %s17175_s8, %s17176_s9  }
  0x4b   : > { %p18091_p2 = scmp.ne.s32.totalorder %s18088_s17, 0 }
  0x4c   : > { %p18092_p7 = scmp.eq.s32.totalorder (!%p18091_p2), %s17225_s16, 0 }
  0x4d   : > { %198 = sbr.rel (%p18091_p2) target bundleno = 4326 (0x10e6), region = 36 }
  0x54   : > { %17161 = dma.done.wait (%p18092_p7), [#allocation3], 87040   ;;  %p18093_p3 = pmov %p18092_p7 }
  0x56   : > { %17163 = vsyncadd (%p18093_p3), [#allocation3], 4294880256  ;;  %p18094_p6 = pmov %p18093_p3 }
  0x57   : > { %p18095_p8 = pmov %p18093_p3 }
  0x58   : > { %17165 = dma.done.wait (%p18094_p6), [#allocation5], 10240  }
  0x59   : > { %17167 = vsyncadd (%p18095_p8), [#allocation5], 4294957056  ;;  %p231_p9 = scmp.lt.s32.totalorder %s17225_s16, 1  ;;  %vm276_vm0 = vcmask 261120   ;;  %v272_v5 = vld [vmem:[#allocation2 + $0x20] sm:$0xff]  ;;  %s17177_s8 = smov 5  }
  0x5a   : > { %13450 = vmatprep.mubr.msk.f32.mxu0 %vm276_vm0, %v272_v5  ;;  %s17178_s9 = smov 6   ;;  %s17179_s14 = smov 4   ;;  %v273_v25 = vld [vmem:[#allocation2 + $0x28] sm:$0xff]  ;;  %v274_v28 = vld [vmem:[#allocation2 + $0x30] sm:$0xff]  ;;  %v275_v31 = vld [vmem:[#allocation2 + $0x38] sm:$0xff] }
  0x5b   : > { %s18097_s16 = smov (!%p231_p9, %s17225_s16), 1  ;;  %s17180_s18 = smov 3   ;;  %v259_v34 = vld [vmem:[#allocation2] sm:$0xff]  ;;  %v260_v37 = vld [vmem:[#allocation2 + $0x8] sm:$0xff]  ;;  %v261_v40 = vld [vmem:[#allocation2 + $0x10] sm:$0xff] }
  0x5c   : > { %s12609_s17 = sshll.u32 %s18097_s16, 5  ;;  %s17181_s20 = smov 2   ;;  %v262_v43 = vld [vmem:[#allocation2 + $0x18] sm:$0xff]  ;;  %v480_v46 = vld [vmem:[#allocation2 + $0x40] sm:$0xff]  ;;  %v481_v49 = vld [vmem:[#allocation2 + $0x48] sm:$0xff] }
  0x5d   : > { %s235_s30 = scalar_lea.vmem %s18081_s0, %s12609_s17  ;;  %s17182_s23 = smov 1   ;;  %v482_v52 = vld [vmem:[#allocation2 + $0x50] sm:$0xff]  ;;  %v483_v55 = vld [vmem:[#allocation2 + $0x58] sm:$0xff]  ;;  %v594_v58 = vld [vmem:[#allocation2 + $0x60] sm:$0xff] }
  0x5e   : > { %v247_v0 = vld [vmem:[%s235_s30] sm:$0xff]  ;;  %v248_v1 = vld [vmem:[%s235_s30 + $0x8] sm:$0xff]  ;;  %v249_v2 = vld [vmem:[%s235_s30 + $0x10] sm:$0xff]  ;;  %s17183_s25 = smov 127   ;;  %s17184_s19 = smov 126  }
  0x5f   : > { %v16132_v3 = vpack.i.bf16 %v248_v1, %v247_v0  ;;  %v250_v4 = vld [vmem:[%s235_s30 + $0x18] sm:$0xff]  ;;  %s17185_s26 = smov 125   ;;  %s17186_s27 = smov 124   ;;  %v17364_v7 = vpack.c.bf16 %v248_v1, %v247_v0  ;;  %v595_v61 = vld [vmem:[#allocation2 + $0x68] sm:$0xff]  ;;  %v596_v0 = vld [vmem:[#allocation2 + $0x70] sm:$0xff] }
  0x60   : > { %v16137_v6 = vpack.i.bf16 %v250_v4, %v249_v2  ;;  %s17187_s28 = smov 123   ;;  %v17368_v8 = vpack.c.bf16 %v250_v4, %v249_v2  ;;  %s17188_s29 = smov 122  }
  0x61   : > { %16133 = vrot.lane.b32.xlu0 %v16132_v3, %s17177_s8  ;;  %16143 = vrot.lane.b32.xlu1 %v16132_v3, %s17178_s9  ;;  %s17190_s5 = smov 7   ;;  %s17191_s6 = smov 8  }
  0x62   : > { %s17192_s7 = smov 121   ;;  %s17193_s10 = smov 120  }
  0x63   : > { %s12189_s11 = sshll.u32 %s18097_s16, 3 }
  0x64   : > { %s239_s13 = scalar_lea.vmem %s18085_s4, %s12189_s11 }
  0x65   : > { %16138 = vrot.lane.b32.xlu0 %v16137_v6, %s17177_s8  ;;  %16148 = vrot.lane.b32.xlu1 %v16137_v6, %s17178_s9 }
  0x69   : > { %16153 = vrot.lane.b32.xlu0 %v16132_v3, %s17179_s14  ;;  %16158 = vrot.lane.b32.xlu1 %v16137_v6, %s17179_s14 }
  0x6d   : > { %16163 = vrot.lane.b32.xlu0 %v16132_v3, %s17180_s18  ;;  %16168 = vrot.lane.b32.xlu1 %v16137_v6, %s17180_s18 }
  0x71   : > { %16173 = vrot.lane.b32.xlu0 %v16132_v3, %s17181_s20  ;;  %16178 = vrot.lane.b32.xlu1 %v16137_v6, %s17181_s20 }
  0x75   : > { %16183 = vrot.lane.b32.xlu0 %v16132_v3, %s17182_s23  ;;  %16188 = vrot.lane.b32.xlu1 %v16137_v6, %s17182_s23 }
  0x79   : > { %16193 = vrot.lane.b32.xlu0 %v16132_v3, %s17183_s25  ;;  %16198 = vrot.lane.b32.xlu1 %v16137_v6, %s17183_s25 }
  0x7d   : > { %16203 = vrot.lane.b32.xlu0 %v16132_v3, %s17184_s19  ;;  %16208 = vrot.lane.b32.xlu1 %v16137_v6, %s17184_s19 }
  0x81   : > { %16213 = vrot.lane.b32.xlu0 %v16132_v3, %s17185_s26  ;;  %16218 = vrot.lane.b32.xlu1 %v16137_v6, %s17185_s26 }
  0x85   : > { %16223 = vrot.lane.b32.xlu0 %v16132_v3, %s17186_s27  ;;  %16228 = vrot.lane.b32.xlu1 %v16137_v6, %s17186_s27 }
  0x89   : > { %16233 = vrot.lane.b32.xlu0 %v16132_v3, %s17187_s28  ;;  %16238 = vrot.lane.b32.xlu1 %v16137_v6, %s17187_s28 }
  0x8d   : > { %16243 = vrot.lane.b32.xlu0 %v16132_v3, %s17188_s29  ;;  %16248 = vrot.lane.b32.xlu1 %v16137_v6, %s17188_s29  ;;  %v597_v3 = vld [vmem:[#allocation2 + $0x78] sm:$0xff]  ;;  %v708_v6 = vld [vmem:[#allocation2 + $0x80] sm:$0xff] }
  0xd3   : > { %v16134_v9 = vpop.permute.xlu0 %16133  ;;  %v16144_v10 = vpop.permute.xlu1 %16143 }
  0xd4   : > { %v16136_v11 = vunpack.i.h.bf16 %v16134_v9  ;;  %v16135_v12 = vunpack.i.l.bf16 %v16134_v9  ;;  %v16146_v14 = vunpack.i.h.bf16 %v16144_v10  ;;  %v16145_v15 = vunpack.i.l.bf16 %v16144_v10  ;;  %v709_v10 = vld [vmem:[#allocation2 + $0x88] sm:$0xff] }
  0xd6   : > { %v14898_v13 = vpack.c.bf16 %v16136_v11, %v16135_v12  ;;  %v14906_v23 = vpack.c.bf16 %v16146_v14, %v16145_v15  ;;  %v710_v11 = vld [vmem:[#allocation2 + $0x90] sm:$0xff]  ;;  %v822_v14 = vld [vmem:[#allocation2 + $0xa0] sm:$0xff] }
  0xd7   : > { %v16139_v16 = vpop.permute.xlu0 %16138  ;;  %v16149_v17 = vpop.permute.xlu1 %16148 }
  0xd8   : > { %v16141_v18 = vunpack.i.h.bf16 %v16139_v16  ;;  %v16140_v19 = vunpack.i.l.bf16 %v16139_v16  ;;  %14899 = vmatprep.subr.bf16.mxu0 %v14898_v13  ;;  %v16151_v21 = vunpack.i.h.bf16 %v16149_v17  ;;  %v16150_v22 = vunpack.i.l.bf16 %v16149_v17  ;;  %v823_v16 = vld [vmem:[#allocation2 + $0xa8] sm:$0xff] }
  0xd9   : > { %14901 = vmatpush3.bf16.msra.mxu0 %v14898_v13  ;;  %v711_v13 = vld [vmem:[#allocation2 + $0x98] sm:$0xff] }
  0xda   : > { %v14902_v20 = vpack.c.bf16 %v16141_v18, %v16140_v19  ;;  %v14910_v29 = vpack.c.bf16 %v16151_v21, %v16150_v22  ;;  %v824_v19 = vld [vmem:[#allocation2 + $0xb0] sm:$0xff]  ;;  %v825_v21 = vld [vmem:[#allocation2 + $0xb8] sm:$0xff] }
  0xdb   : > { %v16154_v24 = vpop.permute.xlu0 %16153  ;;  %v16159_v30 = vpop.permute.xlu1 %16158 }
  0xdc   : > { %14903 = vmatprep.subr.bf16.mxu0 %v14902_v20  ;;  %v16156_v26 = vunpack.i.h.bf16 %v16154_v24  ;;  %v16155_v27 = vunpack.i.l.bf16 %v16154_v24  ;;  %v16161_v32 = vunpack.i.h.bf16 %v16159_v30  ;;  %v16160_v33 = vunpack.i.l.bf16 %v16159_v30  ;;  %v928_v24 = vld [vmem:[#allocation2 + $0xc0] sm:$0xff] }
  0xdd   : > { %14905 = vmatpush3.bf16.msra.mxu0 %v14902_v20 }
  0xde   : > { %14907 = vmatprep.subr.bf16.mxu0 %v14906_v23  ;;  %v14914_v35 = vpack.c.bf16 %v16156_v26, %v16155_v27  ;;  %v14918_v41 = vpack.c.bf16 %v16161_v32, %v16160_v33  ;;  %v929_v27 = vld [vmem:[#allocation2 + $0xc8] sm:$0xff]  ;;  %v931_v32 = vld [vmem:[#allocation2 + $0xd8] sm:$0xff] }
  0xdf   : > { %v16164_v36 = vpop.permute.xlu0 %16163  ;;  %v16169_v42 = vpop.permute.xlu1 %16168 }
  0xe0   : > { %13451 = vmatmul.mubr.msk.f32.vlgmr.msra.gmra.mrb[0].mxu0 %vm276_vm0, %v273_v25  ;;  %v16166_v38 = vunpack.i.h.bf16 %v16164_v36  ;;  %v16165_v39 = vunpack.i.l.bf16 %v16164_v36  ;;  %v16171_v44 = vunpack.i.h.bf16 %v16169_v42  ;;  %v16170_v45 = vunpack.i.l.bf16 %v16169_v42 }
  0xe1   : > { %14909 = vmatpush3.bf16.msra.mxu0 %v14906_v23  ;;  %13453 = vmatprep.mubr.msk.f32.mxu0 %vm276_vm0, %v274_v28 }
  0xe2   : > { %14911 = vmatprep.subr.bf16.mxu0 %v14910_v29  ;;  %v14922_v47 = vpack.c.bf16 %v16166_v38, %v16165_v39  ;;  %v14926_v53 = vpack.c.bf16 %v16171_v44, %v16170_v45 }
  0xe3   : > { %v16174_v48 = vpop.permute.xlu0 %16173  ;;  %v16179_v54 = vpop.permute.xlu1 %16178 }
  0xe4   : > { %13454 = vmatmul.mubr.msk.f32.gmra.mrb[2].mxu0 %vm276_vm0, %v275_v31  ;;  %v16176_v50 = vunpack.i.h.bf16 %v16174_v48  ;;  %v16175_v51 = vunpack.i.l.bf16 %v16174_v48  ;;  %v16181_v56 = vunpack.i.h.bf16 %v16179_v54  ;;  %v16180_v57 = vunpack.i.l.bf16 %v16179_v54 }
  0xe5   : > { %14913 = vmatpush3.bf16.msra.mxu0 %v14910_v29  ;;  %13464 = vmatprep.mubr.msk.f32.mxu0 %vm276_vm0, %v259_v34  ;;  %v930_v29 = vld [vmem:[#allocation2 + $0xd0] sm:$0xff] }
  0xe6   : > { %14915 = vmatprep.subr.bf16.mxu0 %v14914_v35  ;;  %v14930_v59 = vpack.c.bf16 %v16176_v50, %v16175_v51  ;;  %v14934_v1 = vpack.c.bf16 %v16181_v56, %v16180_v57 }
  0xe7   : > { %v16184_v60 = vpop.permute.xlu0 %16183  ;;  %v16189_v2 = vpop.permute.xlu1 %16188 }
  0xe8   : > { %13465 = vmatmul.mubr.msk.f32.vlgmr.msra.gmra.mrb[0].mxu0 %vm276_vm0, %v260_v37  ;;  %v16186_v62 = vunpack.i.h.bf16 %v16184_v60  ;;  %v16185_v63 = vunpack.i.l.bf16 %v16184_v60  ;;  %v16191_v4 = vunpack.i.h.bf16 %v16189_v2  ;;  %v16190_v5 = vunpack.i.l.bf16 %v16189_v2  ;;  %v1043_v37 = vld [vmem:[#allocation2 + $0xe8] sm:$0xff] }
  0xe9   : > { %14917 = vmatpush3.bf16.msra.mxu0 %v14914_v35  ;;  %13467 = vmatprep.mubr.msk.f32.mxu0 %vm276_vm0, %v261_v40  ;;  %v1042_v35 = vld [vmem:[#allocation2 + $0xe0] sm:$0xff]  ;;  %v1044_v40 = vld [vmem:[#allocation2 + $0xf0] sm:$0xff] }
  0xea   : > { %14919 = vmatprep.subr.bf16.mxu0 %v14918_v41  ;;  %v14938_v9 = vpack.c.bf16 %v16186_v62, %v16185_v63  ;;  %v14942_v12 = vpack.c.bf16 %v16191_v4, %v16190_v5 }
  0xeb   : > { %v16194_v15 = vpop.permute.xlu0 %16193  ;;  %v16199_v20 = vpop.permute.xlu1 %16198 }
  0xec   : > { %13468 = vmatmul.mubr.msk.f32.gmra.mrb[2].mxu0 %vm276_vm0, %v262_v43  ;;  %v16196_v17 = vunpack.i.h.bf16 %v16194_v15  ;;  %v16195_v18 = vunpack.i.l.bf16 %v16194_v15  ;;  %v16201_v22 = vunpack.i.h.bf16 %v16199_v20  ;;  %v16200_v23 = vunpack.i.l.bf16 %v16199_v20  ;;  %v1045_v43 = vld [vmem:[#allocation2 + $0xf8] sm:$0xff]  ;;  %v1498_v20 = vld [vmem:[#allocation2 + $0x160] sm:$0xff] }
  0xed   : > { %14921 = vmatpush3.bf16.msra.mxu0 %v14918_v41  ;;  %13478 = vmatprep.mubr.msk.f32.mxu0 %vm276_vm0, %v480_v46  ;;  %v1156_v46 = vld [vmem:[#allocation2 + $0x100] sm:$0xff] }
  0xee   : > { %14923 = vmatprep.subr.bf16.mxu0 %v14922_v47  ;;  %v14954_v25 = vpack.c.bf16 %v16196_v17, %v16195_v18  ;;  %v14958_v30 = vpack.c.bf16 %v16201_v22, %v16200_v23  ;;  %v1387_v17 = vld [vmem:[#allocation2 + $0x158] sm:$0xff]  ;;  %v1499_v22 = vld [vmem:[#allocation2 + $0x168] sm:$0xff]  ;;  %v1500_v23 = vld [vmem:[#allocation2 + $0x170] sm:$0xff] }
  0xef   : > { %v16204_v26 = vpop.permute.xlu0 %16203  ;;  %v16209_v31 = vpop.permute.xlu1 %16208 }
  0xf0   : > { %13479 = vmatmul.mubr.msk.f32.vlgmr.msra.gmra.mrb[0].mxu0 %vm276_vm0, %v481_v49  ;;  %v16206_v28 = vunpack.i.h.bf16 %v16204_v26  ;;  %v16211_v33 = vunpack.i.h.bf16 %v16209_v31  ;;  %v16210_v34 = vunpack.i.l.bf16 %v16209_v31  ;;  %v1157_v49 = vld [vmem:[#allocation2 + $0x108] sm:$0xff] }
  0xf1   : > { %14925 = vmatpush3.bf16.msra.mxu0 %v14922_v47  ;;  %13481 = vmatprep.mubr.msk.f32.mxu0 %vm276_vm0, %v482_v52  ;;  %v1158_v52 = vld [vmem:[#allocation2 + $0x110] sm:$0xff]  ;;  %v1718_v31 = vld [vmem:[#allocation4 + $0x8] sm:$0xff] }
  0xf2   : > { %14927 = vmatprep.subr.bf16.mxu0 %v14926_v53  ;;  %v14966_v41 = vpack.c.bf16 %v16211_v33, %v16210_v34  ;;  %v1726_v34 = vld [vmem:[#allocation6 + $0x8] sm:$0xff] }
  0xf3   : > { %v16214_v36 = vpop.permute.xlu0 %16213  ;;  %v16219_v42 = vpop.permute.xlu1 %16218 }
  0xf4   : > { %13482 = vmatmul.mubr.msk.f32.gmra.mrb[2].mxu0 %vm276_vm0, %v483_v55  ;;  %v16216_v38 = vunpack.i.h.bf16 %v16214_v36  ;;  %v16215_v39 = vunpack.i.l.bf16 %v16214_v36  ;;  %v16221_v44 = vunpack.i.h.bf16 %v16219_v42  ;;  %v16220_v45 = vunpack.i.l.bf16 %v16219_v42  ;;  %v1159_v55 = vld [vmem:[#allocation2 + $0x118] sm:$0xff]  ;;  %v1725_v36 = vld [vmem:[#allocation6] sm:$0xff] }
  0xf5   : > { %14929 = vmatpush3.bf16.msra.mxu0 %v14926_v53  ;;  %13492 = vmatprep.mubr.msk.f32.mxu0 %vm276_vm0, %v594_v58  ;;  %v1270_v58 = vld [vmem:[#allocation2 + $0x120] sm:$0xff] }
  0xf6   : > { %14931 = vmatprep.subr.bf16.mxu0 %v14930_v59  ;;  %v14970_v47 = vpack.c.bf16 %v16216_v38, %v16215_v39  ;;  %v14974_v53 = vpack.c.bf16 %v16221_v44, %v16220_v45  ;;  %v1720_v38 = vld [vmem:[#allocation4 + $0x18] sm:$0xff] }
  0xf7   : > { %v16224_v48 = vpop.permute.xlu0 %16223  ;;  %v16229_v54 = vpop.permute.xlu1 %16228  ;;  %v1728_v45 = vld [vmem:[#allocation6 + $0x18] sm:$0xff] }
  0xf8   : > { %13493 = vmatmul.mubr.msk.f32.vlgmr.msra.gmra.mrb[0].mxu0 %vm276_vm0, %v595_v61  ;;  %v16226_v50 = vunpack.i.h.bf16 %v16224_v48  ;;  %v16225_v51 = vunpack.i.l.bf16 %v16224_v48  ;;  %v16231_v56 = vunpack.i.h.bf16 %v16229_v54  ;;  %v16230_v57 = vunpack.i.l.bf16 %v16229_v54  ;;  %v1271_v61 = vld [vmem:[#allocation2 + $0x128] sm:$0xff] }
  0xf9   : > { %14933 = vmatpush3.bf16.msra.mxu0 %v14930_v59  ;;  %13495 = vmatprep.mubr.msk.f32.mxu0 %vm276_vm0, %v596_v0  ;;  %v1272_v0 = vld [vmem:[#allocation2 + $0x130] sm:$0xff] }
  0xfa   : > { %14935 = vmatprep.subr.bf16.mxu0 %v14934_v1  ;;  %v14978_v59 = vpack.c.bf16 %v16226_v50, %v16225_v51 }
  0xfb   : > { %v16234_v60 = vpop.permute.xlu0 %16233  ;;  %v16239_v2 = vpop.permute.xlu1 %16238 }
  0xfc   : > { %13496 = vmatmul.mubr.msk.f32.gmra.mrb[2].mxu0 %vm276_vm0, %v597_v3  ;;  %v16236_v62 = vunpack.i.h.bf16 %v16234_v60  ;;  %v16235_v63 = vunpack.i.l.bf16 %v16234_v60  ;;  %v1273_v3 = vld [vmem:[#allocation2 + $0x138] sm:$0xff]  ;;  %v16241_v4 = vunpack.i.h.bf16 %v16239_v2  ;;  %v16240_v5 = vunpack.i.l.bf16 %v16239_v2 }
  0xfd   : > { %14937 = vmatpush3.bf16.msra.mxu0 %v14934_v1  ;;  %13506 = vmatprep.mubr.msk.f32.mxu0 %vm276_vm0, %v708_v6  ;;  %v14982_v1 = vpack.c.bf16 %v16231_v56, %v16230_v57  ;;  %v1384_v6 = vld [vmem:[#allocation2 + $0x140] sm:$0xff] }
  0xfe   : > { %14939 = vmatprep.subr.bf16.mxu0 %v14938_v9  ;;  %v14990_v15 = vpack.c.bf16 %v16241_v4, %v16240_v5  ;;  %v2084_v57 = vld [vmem:[#allocation2 + $0x280] sm:$0xff] }
  0xff   : > { %13674 = vmatprep.mubr.msk.f32.mxu1 %vm276_vm0, %v2084_v57  ;;  %v2306_v57 = vld [vmem:[#allocation2 + $0x2d0] sm:$0xff] }
 0x100   : > { %13507 = vmatmul.mubr.msk.f32.vlgmr.msra.gmra.mrb[0].mxu0 %vm276_vm0, %v709_v10  ;;  %v16244_v10 = vpop.permute.xlu0 %16243 }
 0x101   : > { %14941 = vmatpush3.bf16.msra.mxu0 %v14938_v9  ;;  %13509 = vmatprep.mubr.msk.f32.mxu0 %vm276_vm0, %v710_v11  ;;  %v14986_v9 = vpack.c.bf16 %v16236_v62, %v16235_v63  ;;  %v1385_v11 = vld [vmem:[#allocation2 + $0x148] sm:$0xff] }
 0x102   : > { %14943 = vmatprep.subr.bf16.mxu0 %v14942_v12 }
 0x104   : > { %13510 = vmatmul.mubr.msk.f32.gmra.mrb[2].mxu0 %vm276_vm0, %v711_v13  ;;  %v16245_v13 = vunpack.i.l.bf16 %v16244_v10 }
 0x105   : > { %14945 = vmatpush3.bf16.msra.mxu0 %v14942_v12  ;;  %13520 = vmatprep.mubr.msk.f32.mxu0 %vm276_vm0, %v822_v14  ;;  %v16246_v12 = vunpack.i.h.bf16 %v16244_v10  ;;  %v1386_v14 = vld [vmem:[#allocation2 + $0x150] sm:$0xff] }
 0x106   : > { %14947 = vmatprep.subr.bf16.mxu0 %v17364_v7 }
 0x108   : > { %13521 = vmatmul.mubr.msk.f32.vlgmr.msra.gmra.mrb[0].mxu0 %vm276_vm0, %v823_v16  ;;  %v16249_v16 = vpop.permute.xlu1 %16248 }
 0x109   : > { %14949 = vmatpush3.bf16.msra.mxu0 %v17364_v7  ;;  %13523 = vmatprep.mubr.msk.f32.mxu0 %vm276_vm0, %v824_v19  ;;  %v16205_v7 = vunpack.i.l.bf16 %v16204_v26  ;;  %v16251_v18 = vunpack.i.h.bf16 %v16249_v16  ;;  %v16250_v19 = vunpack.i.l.bf16 %v16249_v16  ;;  %v1612_v26 = vld [vmem:[#allocation2 + $0x180] sm:$0xff] }
 0x10a   : > { %14951 = vmatprep.subr.bf16.mxu0 %v17368_v8 }
 0x10c   : > { %13524 = vmatmul.mubr.msk.f32.gmra.mrb[2].mxu0 %vm276_vm0, %v825_v21  ;;  %v14994_v21 = vpack.c.bf16 %v16246_v12, %v16245_v13 }
 0x10d   : > { %14953 = vmatpush3.bf16.msra.mxu0 %v17368_v8  ;;  %13534 = vmatprep.mubr.msk.f32.mxu0 %vm276_vm0, %v928_v24  ;;  %v14962_v8 = vpack.c.bf16 %v16206_v28, %v16205_v7  ;;  %v14998_v24 = vpack.c.bf16 %v16251_v18, %v16250_v19  ;;  %v1614_v28 = vld [vmem:[#allocation2 + $0x190] sm:$0xff]  ;;  %v1615_v7 = vld [vmem:[#allocation2 + $0x198] sm:$0xff] }
 0x10e   : > { %14955 = vmatprep.subr.bf16.mxu0 %v14954_v25 }
 0x110   : > { %13535 = vmatmul.mubr.msk.f32.vlgmr.msra.gmra.mrb[0].mxu0 %vm276_vm0, %v929_v27  ;;  %v1613_v27 = vld [vmem:[#allocation2 + $0x188] sm:$0xff] }
 0x111   : > { %14957 = vmatpush3.bf16.msra.mxu0 %v14954_v25  ;;  %13537 = vmatprep.mubr.msk.f32.mxu0 %vm276_vm0, %v930_v29  ;;  %v1501_v25 = vld [vmem:[#allocation2 + $0x178] sm:$0xff]  ;;  %v240_v29 = vlaneseq }
 0x112   : > { %14959 = vmatprep.subr.bf16.mxu0 %v14958_v30 }
 0x114   : > { %13538 = vmatmul.mubr.msk.f32.gmra.mrb[2].mxu0 %vm276_vm0, %v931_v32  ;;  %v1717_v32 = vld [vmem:[#allocation4] sm:$0xff] }
 0x115   : > { %14961 = vmatpush3.bf16.msra.mxu0 %v14958_v30  ;;  %13548 = vmatprep.mubr.msk.f32.mxu0 %vm276_vm0, %v1042_v35  ;;  %v241_v30 = vand.u32 127, %v240_v29 }
 0x116   : > { %14963 = vmatprep.subr.bf16.mxu0 %v14962_v8 }
 0x117   : > { %vm242_vm1 = vcmp.ge.s32.totalorder %v241_v30, 8  ;;  %vm243_vm2 = vcmp.lt.s32.totalorder %v241_v30, 25  ;;  %v2199_v30 = vld [vmem:[#allocation2 + $0x2a8] sm:$0xff] }
 0x118   : > { %13549 = vmatmul.mubr.msk.f32.vlgmr.msra.gmra.mrb[0].mxu0 %vm276_vm0, %v1043_v37  ;;  %vm244_vm3 = vmand %vm242_vm1, %vm243_vm2 }
 0x119   : > { %14965 = vmatpush3.bf16.msra.mxu0 %v14962_v8  ;;  %13551 = vmatprep.mubr.msk.f32.mxu0 %vm276_vm0, %v1044_v40  ;;  %v1719_v40 = vld [vmem:[#allocation4 + $0x10] sm:$0xff] }
 0x11a   : > { %14967 = vmatprep.subr.bf16.mxu0 %v14966_v41 }
 0x11c   : > { %13552 = vmatmul.mubr.msk.f32.gmra.mrb[2].mxu0 %vm276_vm0, %v1045_v43 }
 0x11d   : > { %14969 = vmatpush3.bf16.msra.mxu0 %v14966_v41  ;;  %13562 = vmatprep.mubr.msk.f32.mxu0 %vm276_vm0, %v1156_v46  ;;  %v17189_v41 = vmov 0.0  }
 0x11e   : > { %14971 = vmatprep.subr.bf16.mxu0 %v14970_v47  ;;  %v17427_v42 = vsel %vm244_vm3, 1.0, %v17189_v41 }
 0x120   : > { %13563 = vmatmul.mubr.msk.f32.vlgmr.msra.gmra.mrb[0].mxu0 %vm276_vm0, %v1157_v49  ;;  %v1727_v49 = vld [vmem:[#allocation6 + $0x10] sm:$0xff] }
 0x121   : > { %14973 = vmatpush3.bf16.msra.mxu0 %v14970_v47  ;;  %13565 = vmatprep.mubr.msk.f32.mxu0 %vm276_vm0, %v1158_v52 }
 0x122   : > { %14975 = vmatprep.subr.bf16.mxu0 %v14974_v53 }
 0x124   : > { %13566 = vmatmul.mubr.msk.f32.gmra.mrb[2].mxu0 %vm276_vm0, %v1159_v55 }
 0x125   : > { %14977 = vmatpush3.bf16.msra.mxu0 %v14974_v53  ;;  %13576 = vmatprep.mubr.msk.f32.mxu0 %vm276_vm0, %v1270_v58 }
 0x126   : > { %14979 = vmatprep.subr.bf16.mxu0 %v14978_v59 }
 0x128   : > { %13577 = vmatmul.mubr.msk.f32.vlgmr.msra.gmra.mrb[0].mxu0 %vm276_vm0, %v1271_v61 }
 0x129   : > { %14981 = vmatpush3.bf16.msra.mxu0 %v14978_v59  ;;  %13579 = vmatprep.mubr.msk.f32.mxu0 %vm276_vm0, %v1272_v0 }
 0x12a   : > { %14983 = vmatprep.subr.bf16.mxu0 %v14982_v1 }
 0x12c   : > { %13580 = vmatmul.mubr.msk.f32.gmra.mrb[2].mxu0 %vm276_vm0, %v1273_v3 }
 0x12d   : > { %14985 = vmatpush3.bf16.msra.mxu0 %v14982_v1  ;;  %13590 = vmatprep.mubr.msk.f32.mxu0 %vm276_vm0, %v1384_v6  ;;  %v1763_v1 = vld [vmem:[#allocation2 + $0x240] sm:$0xff] }
 0x12e   : > { %14987 = vmatprep.subr.bf16.mxu0 %v14986_v9 }
 0x130   : > { %13591 = vmatmul.mubr.msk.f32.vlgmr.msra.gmra.mrb[0].mxu0 %vm276_vm0, %v1385_v11 }
 0x131   : > { %14989 = vmatpush3.bf16.msra.mxu0 %v14986_v9  ;;  %13593 = vmatprep.mubr.msk.f32.mxu0 %vm276_vm0, %v1386_v14 }
 0x132   : > { %14991 = vmatprep.subr.bf16.mxu0 %v14990_v15 }
 0x134   : > { %13594 = vmatmul.mubr.msk.f32.gmra.mrb[2].mxu0 %vm276_vm0, %v1387_v17 }
 0x135   : > { %14993 = vmatpush3.bf16.msra.mxu0 %v14990_v15  ;;  %13604 = vmatprep.mubr.msk.f32.mxu0 %vm276_vm0, %v1498_v20  ;;  %v2085_v20 = vld [vmem:[#allocation2 + $0x288] sm:$0xff] }
 0x136   : > { %14995 = vmatprep.subr.bf16.mxu0 %v14994_v21 }
 0x138   : > { %13605 = vmatmul.mubr.msk.f32.vlgmr.msra.gmra.mrb[0].mxu0 %vm276_vm0, %v1499_v22 }
 0x139   : > { %14997 = vmatpush3.bf16.msra.mxu0 %v14994_v21  ;;  %13607 = vmatprep.mubr.msk.f32.mxu0 %vm276_vm0, %v1500_v23  ;;  %v2086_v21 = vld [vmem:[#allocation2 + $0x290] sm:$0xff] }
 0x13a   : > { %14999 = vmatprep.subr.bf16.mxu0 %v14998_v24 }
 0x13c   : > { %13608 = vmatmul.mubr.msk.f32.gmra.mrb[2].mxu0 %vm276_vm0, %v1501_v25  ;;  %v2087_v25 = vld [vmem:[#allocation2 + $0x298] sm:$0xff] }
 0x13d   : > { %15001 = vmatpush3.bf16.msra.mxu0 %v14998_v24  ;;  %13618 = vmatprep.mubr.msk.f32.mxu0 %vm276_vm0, %v1612_v26  ;;  %v2198_v26 = vld [vmem:[#allocation2 + $0x2a0] sm:$0xff] }
 0x140   : > { %13619 = vmatmul.mubr.msk.f32.vlgmr.msra.gmra.mrb[0].mxu0 %vm276_vm0, %v1613_v27 }
 0x141   : > { %13621 = vmatprep.mubr.msk.f32.mxu0 %vm276_vm0, %v1614_v28 }
 0x144   : > { %13622 = vmatmul.mubr.msk.f32.gmra.mrb[2].mxu0 %vm276_vm0, %v1615_v7 }
 0x145   : > { %13632 = vmatprep.mubr.msk.f32.mxu0 %vm276_vm0, %v1763_v1 }
 0x213   : > { %v13620_v33 = vpop.f32.mrb[0].mxu0 }
 0x214   : > { %v1722_v35 = vmul.f32 %v13620_v33, %v1718_v31  ;;  %v1694_v8 = vpop.f32.mrb[1].mxu0 }
 0x215   : > { %v1721_v37 = vmul.f32 %v1717_v32, %v1694_v8 }
 0x216   : > { %v1730_v39 = vadd.f32 %v1726_v34, %v1722_v35  ;;  %v2200_v35 = vld [vmem:[#allocation2 + $0x2b0] sm:$0xff] }
 0x217   : > { %v1729_v43 = vadd.f32 %v1725_v36, %v1721_v37  ;;  %v13623_v44 = vpop.f32.mrb[2].mxu0  ;;  %v2201_v37 = vld [vmem:[#allocation2 + $0x2b8] sm:$0xff] }
 0x218   : > { %v1734_v46 = vmax.f32 %v1730_v39, 0.0  ;;  %v1724_v47 = vmul.f32 %v13623_v44, %v1720_v38  ;;  %v1704_v48 = vpop.f32.mrb[3].mxu0 }
 0x219   : > { %v1733_v50 = vmax.f32 %v1729_v43, 0.0  ;;  %v1723_v51 = vmul.f32 %v1719_v40, %v1704_v48  ;;  %v2304_v43 = vld [vmem:[#allocation2 + $0x2c0] sm:$0xff]  ;;  %v2305_v48 = vld [vmem:[#allocation2 + $0x2c8] sm:$0xff] }
 0x21a   : > { %v1738_v52 = vmul.f32 %v17427_v42, %v1734_v46  ;;  %v1732_v53 = vadd.f32 %v1728_v45, %v1724_v47 }
 0x21b   : > { %v1737_v54 = vmul.f32 %v17427_v42, %v1733_v50  ;;  %v1731_v55 = vadd.f32 %v1727_v49, %v1723_v51  ;;  %v1764_v50 = vld [vmem:[#allocation2 + $0x248] sm:$0xff] }
 0x21c   : > { %v1736_v56 = vmax.f32 %v1732_v53, 0.0 }
 0x21d   : > { %v1735_v58 = vmax.f32 %v1731_v55, 0.0  ;;  %v16252_v59 = vpack.i.bf16 %v1738_v52, %v1737_v54  ;;  %v17435_v62 = vpack.c.bf16 %v1738_v52, %v1737_v54 }
 0x21e   : > { %v1740_v60 = vmul.f32 %v17427_v42, %v1736_v56 }
 0x21f   : > { %v1739_v61 = vmul.f32 %v17427_v42, %v1735_v58  ;;  %16253 = vrot.lane.b32.xlu0 %v16252_v59, %s17181_s20  ;;  %v1765_v58 = vld [vmem:[#allocation2 + $0x250] sm:$0xff] }
 0x221   : > { %v16257_v63 = vpack.i.bf16 %v1740_v60, %v1739_v61  ;;  %v17439_v0 = vpack.c.bf16 %v1740_v60, %v1739_v61  ;;  %v2307_v60 = vld [vmem:[#allocation2 + $0x2d8] sm:$0xff] }
 0x223   : > { %16263 = vrot.lane.b32.xlu0 %v16252_v59, %s17182_s23  ;;  %16258 = vrot.lane.b32.xlu1 %v16257_v63, %s17181_s20 }
 0x227   : > { %16273 = vrot.lane.b32.xlu0 %v16252_v59, %s17183_s25  ;;  %16268 = vrot.lane.b32.xlu1 %v16257_v63, %s17182_s23 }
 0x22b   : > { %16283 = vrot.lane.b32.xlu0 %v16252_v59, %s17184_s19  ;;  %16278 = vrot.lane.b32.xlu1 %v16257_v63, %s17183_s25 }
 0x22f   : > { %16288 = vrot.lane.b32.xlu0 %v16252_v59, %s17179_s14  ;;  %16293 = vrot.lane.b32.xlu1 %v16257_v63, %s17184_s19 }
 0x233   : > { %16303 = vrot.lane.b32.xlu0 %v16257_v63, %s17179_s14  ;;  %16298 = vrot.lane.b32.xlu1 %v16252_v59, %s17185_s26 }
 0x237   : > { %16308 = vrot.lane.b32.xlu0 %v16252_v59, %s17177_s8  ;;  %16313 = vrot.lane.b32.xlu1 %v16257_v63, %s17185_s26 }
 0x23b   : > { %16323 = vrot.lane.b32.xlu0 %v16257_v63, %s17177_s8  ;;  %16318 = vrot.lane.b32.xlu1 %v16252_v59, %s17186_s27 }
 0x23f   : > { %16328 = vrot.lane.b32.xlu0 %v16252_v59, %s17180_s18  ;;  %16333 = vrot.lane.b32.xlu1 %v16257_v63, %s17186_s27 }
 0x243   : > { %16343 = vrot.lane.b32.xlu0 %v16257_v63, %s17180_s18  ;;  %16338 = vrot.lane.b32.xlu1 %v16252_v59, %s17187_s28 }
 0x247   : > { %16348 = vrot.lane.b32.xlu1 %v16257_v63, %s17187_s28 }
 0x291   : > { %v16254_v2 = vpop.permute.xlu0 %16253 }
 0x292   : > { %v16256_v3 = vunpack.i.h.bf16 %v16254_v2  ;;  %v16255_v4 = vunpack.i.l.bf16 %v16254_v2 }
 0x294   : > { %v15026_v5 = vpack.c.bf16 %v16256_v3, %v16255_v4 }
 0x295   : > { %v16264_v6 = vpop.permute.xlu0 %16263  ;;  %v16259_v9 = vpop.permute.xlu1 %16258 }
 0x296   : > { %v16266_v10 = vunpack.i.h.bf16 %v16264_v6  ;;  %v16265_v11 = vunpack.i.l.bf16 %v16264_v6  ;;  %v16261_v12 = vunpack.i.h.bf16 %v16259_v9  ;;  %v16260_v13 = vunpack.i.l.bf16 %v16259_v9  ;;  %15027 = vmatprep.subr.bf16.mxu1 %v15026_v5  ;;  %v1750_v6 = vld [vmem:[#allocation2 + $0x220] sm:$0xff]  ;;  %v2419_v9 = vld [vmem:[#allocation2 + $0x2e8] sm:$0xff] }
 0x297   : > { %15029 = vmatpush3.bf16.msra.mxu1 %v15026_v5  ;;  %v2418_v5 = vld [vmem:[#allocation2 + $0x2e0] sm:$0xff] }
 0x298   : > { %v15030_v14 = vpack.c.bf16 %v16261_v12, %v16260_v13  ;;  %v15034_v19 = vpack.c.bf16 %v16266_v10, %v16265_v11  ;;  %v1751_v11 = vld [vmem:[#allocation2 + $0x228] sm:$0xff] }
 0x299   : > { %v16274_v15 = vpop.permute.xlu0 %16273  ;;  %v16269_v16 = vpop.permute.xlu1 %16268 }
 0x29a   : > { %v16271_v17 = vunpack.i.h.bf16 %v16269_v16  ;;  %v16270_v18 = vunpack.i.l.bf16 %v16269_v16  ;;  %15031 = vmatprep.subr.bf16.mxu1 %v15030_v14  ;;  %v16276_v32 = vunpack.i.h.bf16 %v16274_v15  ;;  %v16275_v33 = vunpack.i.l.bf16 %v16274_v15 }
 0x29b   : > { %15033 = vmatpush3.bf16.msra.mxu1 %v15030_v14 }
 0x29c   : > { %15035 = vmatprep.subr.bf16.mxu1 %v15034_v19  ;;  %v15038_v24 = vpack.c.bf16 %v16271_v17, %v16270_v18  ;;  %v15050_v41 = vpack.c.bf16 %v16276_v32, %v16275_v33 }
 0x29d   : > { %v17459_v22 = vpop.permute.xlu0 %16283  ;;  %v16279_v23 = vpop.permute.xlu1 %16278 }
 0x29e   : > { %13675 = vmatmul.mubr.msk.f32.vlgmr.msra.gmra.mrb[0].mxu1 %vm276_vm0, %v2085_v20  ;;  %v16281_v44 = vunpack.i.h.bf16 %v16279_v23  ;;  %v16280_v45 = vunpack.i.l.bf16 %v16279_v23  ;;  %v16286_v51 = vunpack.i.h.bf16 %v17459_v22  ;;  %v16285_v53 = vunpack.i.l.bf16 %v17459_v22  ;;  %v1752_v20 = vld [vmem:[#allocation2 + $0x230] sm:$0xff]  ;;  %v2532_v23 = vld [vmem:[#allocation2 + $0x300] sm:$0xff] }
 0x29f   : > { %15037 = vmatpush3.bf16.msra.mxu1 %v15034_v19  ;;  %13677 = vmatprep.mubr.msk.f32.mxu1 %vm276_vm0, %v2086_v21  ;;  %v2420_v19 = vld [vmem:[#allocation2 + $0x2f0] sm:$0xff]  ;;  %v2421_v21 = vld [vmem:[#allocation2 + $0x2f8] sm:$0xff] }
 0x2a0   : > { %15039 = vmatprep.subr.bf16.mxu1 %v15038_v24  ;;  %v15054_v56 = vpack.c.bf16 %v16281_v44, %v16280_v45  ;;  %v15058_v4 = vpack.c.bf16 %v16286_v51, %v16285_v53  ;;  %v2648_v44 = vld [vmem:[#allocation2 + $0x330] sm:$0xff] }
 0x2a1   : > { %v16289_v27 = vpop.permute.xlu0 %16288  ;;  %v17464_v29 = vpop.permute.xlu1 %16293 }
 0x2a2   : > { %v16291_v28 = vunpack.i.h.bf16 %v16289_v27  ;;  %v16290_v7 = vunpack.i.l.bf16 %v16289_v27  ;;  %13678 = vmatmul.mubr.msk.f32.gmra.mrb[2].mxu1 %vm276_vm0, %v2087_v25  ;;  %v16296_v63 = vunpack.i.h.bf16 %v17464_v29  ;;  %v1753_v27 = vld [vmem:[#allocation2 + $0x238] sm:$0xff] }
 0x2a3   : > { %15041 = vmatpush3.bf16.msra.mxu1 %v15038_v24  ;;  %13688 = vmatprep.mubr.msk.f32.mxu1 %vm276_vm0, %v2198_v26 }
 0x2a4   : > { %15043 = vmatprep.subr.bf16.mxu1 %v17435_v62  ;;  %v15002_v31 = vpack.c.bf16 %v16291_v28, %v16290_v7  ;;  %v2533_v7 = vld [vmem:[#allocation2 + $0x308] sm:$0xff] }
 0x2a5   : > { %v16304_v34 = vpop.permute.xlu0 %16303  ;;  %v17472_v39 = vpop.permute.xlu1 %16298 }
 0x2a6   : > { %v16306_v8 = vunpack.i.h.bf16 %v16304_v34  ;;  %v16305_v36 = vunpack.i.l.bf16 %v16304_v34  ;;  %15003 = vmatprep.subr.bf16.mxu0 %v15002_v31  ;;  %13689 = vmatmul.mubr.msk.f32.vlgmr.msra.gmra.mrb[0].mxu1 %vm276_vm0, %v2199_v30  ;;  %v16301_v15 = vunpack.i.h.bf16 %v17472_v39  ;;  %v16300_v16 = vunpack.i.l.bf16 %v17472_v39  ;;  %v2534_v30 = vld [vmem:[#allocation2 + $0x310] sm:$0xff]  ;;  %v1971_v34 = vld [vmem:[#allocation2 + $0x268] sm:$0xff] }
 0x2a7   : > { %15005 = vmatpush3.bf16.msra.mxu0 %v15002_v31  ;;  %15045 = vmatpush3.bf16.msra.mxu1 %v17435_v62  ;;  %v1766_v62 = vld [vmem:[#allocation2 + $0x258] sm:$0xff] }
 0x2a8   : > { %15047 = vmatprep.subr.bf16.mxu1 %v17439_v0  ;;  %13691 = vmatprep.mubr.msk.f32.mxu1 %vm276_vm0, %v2200_v35  ;;  %v15006_v38 = vpack.c.bf16 %v16306_v8, %v16305_v36  ;;  %v15066_v26 = vpack.c.bf16 %v16301_v15, %v16300_v16  ;;  %v2535_v35 = vld [vmem:[#allocation2 + $0x318] sm:$0xff]  ;;  %v1972_v8 = vld [vmem:[#allocation2 + $0x270] sm:$0xff]  ;;  %v2646_v36 = vld [vmem:[#allocation2 + $0x320] sm:$0xff] }
 0x2a9   : > { %v16309_v40 = vpop.permute.xlu0 %16308  ;;  %v17480_v59 = vpop.permute.xlu1 %16313  ;;  %v2983_v15 = vld [vmem:[#allocation4 + $0x38] sm:$0xff] }
 0x2aa   : > { %v16311_v46 = vunpack.i.h.bf16 %v16309_v40  ;;  %v16310_v47 = vunpack.i.l.bf16 %v16309_v40  ;;  %15007 = vmatprep.subr.bf16.mxu0 %v15006_v38  ;;  %13692 = vmatmul.mubr.msk.f32.gmra.mrb[2].mxu1 %vm276_vm0, %v2201_v37  ;;  %v16316_v24 = vunpack.i.h.bf16 %v17480_v59  ;;  %v16315_v25 = vunpack.i.l.bf16 %v17480_v59  ;;  %v2875_v59 = vld [vmem:[#allocation2 + $0x368] sm:$0xff] }
 0x2ab   : > { %15009 = vmatpush3.bf16.msra.mxu0 %v15006_v38  ;;  %15049 = vmatpush3.bf16.msra.mxu1 %v17439_v0  ;;  %v16295_v0 = vunpack.i.l.bf16 %v17464_v29  ;;  %v1970_v29 = vld [vmem:[#allocation2 + $0x260] sm:$0xff] }
 0x2ac   : > { %15051 = vmatprep.subr.bf16.mxu1 %v15050_v41  ;;  %13702 = vmatprep.mubr.msk.f32.mxu1 %vm276_vm0, %v2304_v43  ;;  %v15010_v49 = vpack.c.bf16 %v16311_v46, %v16310_v47  ;;  %v15070_v33 = vpack.c.bf16 %v16316_v24, %v16315_v25  ;;  %v2647_v43 = vld [vmem:[#allocation2 + $0x328] sm:$0xff]  ;;  %v2991_v25 = vld [vmem:[#allocation6 + $0x30] sm:$0xff] }
 0x2ad   : > { %v16324_v52 = vpop.permute.xlu0 %16323  ;;  %v16319_v12 = vpop.permute.xlu1 %16318  ;;  %v15062_v14 = vpack.c.bf16 %v16296_v63, %v16295_v0 }
 0x2ae   : > { %v16326_v54 = vunpack.i.h.bf16 %v16324_v52  ;;  %v16325_v55 = vunpack.i.l.bf16 %v16324_v52  ;;  %15011 = vmatprep.subr.bf16.mxu0 %v15010_v49  ;;  %13703 = vmatmul.mubr.msk.f32.vlgmr.msra.gmra.mrb[0].mxu1 %vm276_vm0, %v2305_v48  ;;  %v16321_v31 = vunpack.i.h.bf16 %v16319_v12  ;;  %v16320_v32 = vunpack.i.l.bf16 %v16319_v12  ;;  %v2989_v12 = vld [vmem:[#allocation6 + $0x20] sm:$0xff] }
 0x2af   : > { %13633 = vmatmul.mubr.msk.f32.vlgmr.msra.gmra.mrb[4].mxu0 %vm276_vm0, %v1764_v50  ;;  %15053 = vmatpush3.bf16.msra.mxu1 %v15050_v41  ;;  %v1973_v41 = vld [vmem:[#allocation2 + $0x278] sm:$0xff]  ;;  %v2760_v50 = vld [vmem:[#allocation2 + $0x340] sm:$0xff] }
 0x2b0   : > { %15013 = vmatpush3.bf16.msra.mxu0 %v15010_v49  ;;  %15055 = vmatprep.subr.bf16.mxu1 %v15054_v56  ;;  %v15014_v61 = vpack.c.bf16 %v16326_v54, %v16325_v55  ;;  %v15074_v40 = vpack.c.bf16 %v16321_v31, %v16320_v32  ;;  %v2649_v49 = vld [vmem:[#allocation2 + $0x338] sm:$0xff]  ;;  %v2761_v54 = vld [vmem:[#allocation2 + $0x348] sm:$0xff]  ;;  %v2762_v55 = vld [vmem:[#allocation2 + $0x350] sm:$0xff] }
 0x2b1   : > { %v16329_v1 = vpop.permute.xlu0 %16328  ;;  %13705 = vmatprep.mubr.msk.f32.mxu1 %vm276_vm0, %v2306_v57  ;;  %13635 = vmatprep.mubr.msk.f32.mxu0 %vm276_vm0, %v1765_v58  ;;  %v16334_v28 = vpop.permute.xlu1 %16333  ;;  %v2763_v57 = vld [vmem:[#allocation2 + $0x358] sm:$0xff]  ;;  %v2874_v58 = vld [vmem:[#allocation2 + $0x360] sm:$0xff] }
 0x2b2   : > { %v16331_v2 = vunpack.i.h.bf16 %v16329_v1  ;;  %v16330_v3 = vunpack.i.l.bf16 %v16329_v1  ;;  %15015 = vmatprep.subr.bf16.mxu0 %v15014_v61  ;;  %13706 = vmatmul.mubr.msk.f32.gmra.mrb[2].mxu1 %vm276_vm0, %v2307_v60  ;;  %v16336_v38 = vunpack.i.h.bf16 %v16334_v28  ;;  %v16335_v39 = vunpack.i.l.bf16 %v16334_v28  ;;  %v2876_v60 = vld [vmem:[#allocation2 + $0x370] sm:$0xff]  ;;  %v3027_v32 = vld [vmem:[#allocation2 + $0x460] sm:$0xff] }
 0x2b3   : > { %13636 = vmatmul.mubr.msk.f32.gmra.mrb[6].mxu0 %vm276_vm0, %v1766_v62  ;;  %15057 = vmatpush3.bf16.msra.mxu1 %v15054_v56 }
 0x2b4   : > { %15017 = vmatpush3.bf16.msra.mxu0 %v15014_v61  ;;  %15059 = vmatprep.subr.bf16.mxu1 %v15058_v4  ;;  %v15018_v10 = vpack.c.bf16 %v16331_v2, %v16330_v3  ;;  %v15078_v47 = vpack.c.bf16 %v16336_v38, %v16335_v39  ;;  %v2877_v61 = vld [vmem:[#allocation2 + $0x378] sm:$0xff]  ;;  %v2981_v3 = vld [vmem:[#allocation4 + $0x28] sm:$0xff] }
 0x2b5   : > { %v16344_v13 = vpop.permute.xlu0 %16343  ;;  %13716 = vmatprep.mubr.msk.f32.mxu1 %vm276_vm0, %v2418_v5  ;;  %13646 = vmatprep.mubr.msk.f32.mxu0 %vm276_vm0, %v1750_v6  ;;  %v16339_v37 = vpop.permute.xlu1 %16338  ;;  %v2980_v6 = vld [vmem:[#allocation4 + $0x20] sm:$0xff] }
 0x2b6   : > { %v16346_v17 = vunpack.i.h.bf16 %v16344_v13  ;;  %v16345_v18 = vunpack.i.l.bf16 %v16344_v13  ;;  %15019 = vmatprep.subr.bf16.mxu0 %v15018_v10  ;;  %13717 = vmatmul.mubr.msk.f32.vlgmr.msra.gmra.mrb[0].mxu1 %vm276_vm0, %v2419_v9  ;;  %v16341_v45 = vunpack.i.h.bf16 %v16339_v37  ;;  %v16340_v46 = vunpack.i.l.bf16 %v16339_v37  ;;  %v2990_v9 = vld [vmem:[#allocation6 + $0x28] sm:$0xff] }
 0x2b7   : > { %13647 = vmatmul.mubr.msk.f32.vlgmr.msra.gmra.mrb[4].mxu0 %vm276_vm0, %v1751_v11  ;;  %15061 = vmatpush3.bf16.msra.mxu1 %v15058_v4 }
 0x2b8   : > { %15021 = vmatpush3.bf16.msra.mxu0 %v15018_v10  ;;  %15063 = vmatprep.subr.bf16.mxu1 %v15062_v14  ;;  %v15022_v22 = vpack.c.bf16 %v16346_v17, %v16345_v18  ;;  %v15082_v53 = vpack.c.bf16 %v16341_v45, %v16340_v46 }
 0x2b9   : > { %13719 = vmatprep.mubr.msk.f32.mxu1 %vm276_vm0, %v2420_v19  ;;  %13649 = vmatprep.mubr.msk.f32.mxu0 %vm276_vm0, %v1752_v20  ;;  %v16349_v48 = vpop.permute.xlu1 %16348  ;;  %v2982_v19 = vld [vmem:[#allocation4 + $0x30] sm:$0xff] }
 0x2ba   : > { %15023 = vmatprep.subr.bf16.mxu0 %v15022_v22  ;;  %13720 = vmatmul.mubr.msk.f32.gmra.mrb[2].mxu1 %vm276_vm0, %v2421_v21  ;;  %v16351_v51 = vunpack.i.h.bf16 %v16349_v48  ;;  %v16350_v52 = vunpack.i.l.bf16 %v16349_v48  ;;  %v2992_v21 = vld [vmem:[#allocation6 + $0x38] sm:$0xff] }
 0x2bb   : > { %15065 = vmatpush3.bf16.msra.mxu1 %v15062_v14  ;;  %13730 = vmatprep.mubr.msk.f32.mxu1 %vm276_vm0, %v2532_v23 }
 0x2bc   : > { %15025 = vmatpush3.bf16.msra.mxu0 %v15022_v22  ;;  %15067 = vmatprep.subr.bf16.mxu1 %v15066_v26  ;;  %v15086_v56 = vpack.c.bf16 %v16351_v51, %v16350_v52 }
 0x2bd   : > { %13650 = vmatmul.mubr.msk.f32.gmra.mrb[6].mxu0 %vm276_vm0, %v1753_v27 }
 0x2be   : > { %13731 = vmatmul.mubr.msk.f32.vlgmr.msra.gmra.mrb[0].mxu1 %vm276_vm0, %v2533_v7  ;;  %13660 = vmatprep.mubr.msk.f32.mxu0 %vm276_vm0, %v1970_v29 }
 0x2bf   : > { %15069 = vmatpush3.bf16.msra.mxu1 %v15066_v26  ;;  %13733 = vmatprep.mubr.msk.f32.mxu1 %vm276_vm0, %v2534_v30 }
 0x2c0   : > { %15071 = vmatprep.subr.bf16.mxu1 %v15070_v33 }
 0x2c1   : > { %13661 = vmatmul.mubr.msk.f32.vlgmr.msra.gmra.mrb[4].mxu0 %vm276_vm0, %v1971_v34 }
 0x2c2   : > { %13734 = vmatmul.mubr.msk.f32.gmra.mrb[2].mxu1 %vm276_vm0, %v2535_v35  ;;  %13663 = vmatprep.mubr.msk.f32.mxu0 %vm276_vm0, %v1972_v8 }
 0x2c3   : > { %15073 = vmatpush3.bf16.msra.mxu1 %v15070_v33  ;;  %13744 = vmatprep.mubr.msk.f32.mxu1 %vm276_vm0, %v2646_v36 }
 0x2c4   : > { %15075 = vmatprep.subr.bf16.mxu1 %v15074_v40 }
 0x2c5   : > { %13664 = vmatmul.mubr.msk.f32.gmra.mrb[6].mxu0 %vm276_vm0, %v1973_v41 }
 0x2c6   : > { %13745 = vmatmul.mubr.msk.f32.vlgmr.msra.gmra.mrb[0].mxu1 %vm276_vm0, %v2647_v43 }
 0x2c7   : > { %15077 = vmatpush3.bf16.msra.mxu1 %v15074_v40  ;;  %13747 = vmatprep.mubr.msk.f32.mxu1 %vm276_vm0, %v2648_v44 }
 0x2c8   : > { %15079 = vmatprep.subr.bf16.mxu1 %v15078_v47 }
 0x2ca   : > { %13748 = vmatmul.mubr.msk.f32.gmra.mrb[2].mxu1 %vm276_vm0, %v2649_v49 }
 0x2cb   : > { %15081 = vmatpush3.bf16.msra.mxu1 %v15078_v47  ;;  %13758 = vmatprep.mubr.msk.f32.mxu1 %vm276_vm0, %v2760_v50 }
 0x2cc   : > { %15083 = vmatprep.subr.bf16.mxu1 %v15082_v53 }
 0x2ce   : > { %13759 = vmatmul.mubr.msk.f32.vlgmr.msra.gmra.mrb[0].mxu1 %vm276_vm0, %v2761_v54 }
 0x2cf   : > { %15085 = vmatpush3.bf16.msra.mxu1 %v15082_v53  ;;  %13761 = vmatprep.mubr.msk.f32.mxu1 %vm276_vm0, %v2762_v55 }
 0x2d0   : > { %15087 = vmatprep.subr.bf16.mxu1 %v15086_v56 }
 0x2d2   : > { %13762 = vmatmul.mubr.msk.f32.gmra.mrb[2].mxu1 %vm276_vm0, %v2763_v57  ;;  %v3029_v57 = vld [vmem:[#allocation2 + $0x470] sm:$0xff] }
 0x2d3   : > { %15089 = vmatpush3.bf16.msra.mxu1 %v15086_v56  ;;  %13772 = vmatprep.mubr.msk.f32.mxu1 %vm276_vm0, %v2874_v58  ;;  %v3028_v56 = vld [vmem:[#allocation2 + $0x468] sm:$0xff] }
 0x2d6   : > { %13773 = vmatmul.mubr.msk.f32.vlgmr.msra.gmra.mrb[0].mxu1 %vm276_vm0, %v2875_v59 }
 0x2d7   : > { %13775 = vmatprep.mubr.msk.f32.mxu1 %vm276_vm0, %v2876_v60 }
 0x2da   : > { %13776 = vmatmul.mubr.msk.f32.gmra.mrb[2].mxu1 %vm276_vm0, %v2877_v61 }
 0x2db   : > { %13786 = vmatprep.mubr.msk.f32.mxu1 %vm276_vm0, %v3027_v32 }
 0x394   : > { %v13662_v62 = vpop.f32.mrb[4].mxu0 }
 0x395   : > { %v2052_v63 = vpop.f32.mrb[5].mxu0 }
 0x398   : > { %v13665_v0 = vpop.f32.mrb[6].mxu0 }
 0x399   : > { %v2062_v1 = vpop.f32.mrb[7].mxu0 }
 0x3a9   : > { %v13774_v2 = vpop.f32.mrb[0].mxu1 }
 0x3aa   : > { %v15730_v4 = vadd.f32 %v13774_v2, %v13662_v62  ;;  %v2956_v5 = vpop.f32.mrb[1].mxu1  ;;  %v3030_v62 = vld [vmem:[#allocation2 + $0x478] sm:$0xff] }
 0x3ab   : > { %v15731_v10 = vadd.f32 %v2956_v5, %v2052_v63  ;;  %v3014_v63 = vld [vmem:[#allocation2 + $0x440] sm:$0xff]  ;;  %v3016_v5 = vld [vmem:[#allocation2 + $0x450] sm:$0xff] }
 0x3ac   : > { %v2985_v11 = vmul.f32 %v15730_v4, %v2981_v3  ;;  %v3015_v4 = vld [vmem:[#allocation2 + $0x448] sm:$0xff] }
 0x3ad   : > { %v2984_v13 = vmul.f32 %v15731_v10, %v2980_v6  ;;  %v13777_v14 = vpop.f32.mrb[2].mxu1 }
 0x3ae   : > { %v2994_v16 = vadd.f32 %v2990_v9, %v2985_v11  ;;  %v15732_v17 = vadd.f32 %v13777_v14, %v13665_v0  ;;  %v2966_v18 = vpop.f32.mrb[3].mxu1 }
 0x3af   : > { %v2993_v20 = vadd.f32 %v2989_v12, %v2984_v13  ;;  %v15733_v22 = vadd.f32 %v2966_v18, %v2062_v1  ;;  %v3017_v12 = vld [vmem:[#allocation2 + $0x458] sm:$0xff]  ;;  %v3234_v13 = vld [vmem:[#allocation2 + $0x480] sm:$0xff]  ;;  %v3236_v18 = vld [vmem:[#allocation2 + $0x490] sm:$0xff] }
 0x3b0   : > { %v2998_v23 = vmax.f32 %v2994_v16, 0.0  ;;  %v2987_v24 = vmul.f32 %v15732_v17, %v2983_v15  ;;  %v3235_v17 = vld [vmem:[#allocation2 + $0x488] sm:$0xff] }
 0x3b1   : > { %v2997_v26 = vmax.f32 %v2993_v20, 0.0  ;;  %v2986_v27 = vmul.f32 %v15733_v22, %v2982_v19  ;;  %v3237_v20 = vld [vmem:[#allocation2 + $0x498] sm:$0xff] }
 0x3b2   : > { %v3002_v28 = vmul.f32 %v17427_v42, %v2998_v23  ;;  %v2996_v7 = vadd.f32 %v2992_v21, %v2987_v24  ;;  %v3348_v21 = vld [vmem:[#allocation2 + $0x4a0] sm:$0xff]  ;;  %v3349_v23 = vld [vmem:[#allocation2 + $0x4a8] sm:$0xff]  ;;  %v3350_v24 = vld [vmem:[#allocation2 + $0x4b0] sm:$0xff] }
 0x3b3   : > { %v3001_v29 = vmul.f32 %v17427_v42, %v2997_v26  ;;  %v2995_v30 = vadd.f32 %v2991_v25, %v2986_v27 }
 0x3b4   : > { %v3000_v31 = vmax.f32 %v2996_v7, 0.0  ;;  %v3454_v7 = vld [vmem:[#allocation2 + $0x4c0] sm:$0xff] }
 0x3b5   : > { %v2999_v33 = vmax.f32 %v2995_v30, 0.0  ;;  %v16352_v34 = vpack.i.bf16 %v3002_v28, %v3001_v29  ;;  %v17527_v36 = vpack.c.bf16 %v3002_v28, %v3001_v29  ;;  %v3351_v28 = vld [vmem:[#allocation2 + $0x4b8] sm:$0xff] }
 0x3b6   : > { %v3004_v35 = vmul.f32 %v17427_v42, %v3000_v31 }
 0x3b7   : > { %v3003_v8 = vmul.f32 %v17427_v42, %v2999_v33  ;;  %16353 = vrot.lane.b32.xlu0 %v16352_v34, %s17180_s18  ;;  %v3455_v33 = vld [vmem:[#allocation2 + $0x4c8] sm:$0xff] }
 0x3b9   : > { %v16357_v37 = vpack.i.bf16 %v3004_v35, %v3003_v8  ;;  %v17531_v38 = vpack.c.bf16 %v3004_v35, %v3003_v8 }
 0x3bb   : > { %16363 = vrot.lane.b32.xlu0 %v16352_v34, %s17179_s14  ;;  %16358 = vrot.lane.b32.xlu1 %v16357_v37, %s17180_s18 }
 0x3bf   : > { %16373 = vrot.lane.b32.xlu0 %v16352_v34, %s17181_s20  ;;  %16368 = vrot.lane.b32.xlu1 %v16357_v37, %s17179_s14 }
 0x3c3   : > { %16383 = vrot.lane.b32.xlu0 %v16352_v34, %s17182_s23  ;;  %16378 = vrot.lane.b32.xlu1 %v16357_v37, %s17181_s20 }
 0x3c7   : > { %16393 = vrot.lane.b32.xlu0 %v16352_v34, %s17183_s25  ;;  %16388 = vrot.lane.b32.xlu1 %v16357_v37, %s17182_s23 }
 0x3cb   : > { %16403 = vrot.lane.b32.xlu0 %v16352_v34, %s17184_s19  ;;  %16398 = vrot.lane.b32.xlu1 %v16357_v37, %s17183_s25 }
 0x3cf   : > { %16413 = vrot.lane.b32.xlu0 %v16352_v34, %s17185_s26  ;;  %16408 = vrot.lane.b32.xlu1 %v16357_v37, %s17184_s19 }
 0x3d3   : > { %16423 = vrot.lane.b32.xlu0 %v16352_v34, %s17186_s27  ;;  %16418 = vrot.lane.b32.xlu1 %v16357_v37, %s17185_s26  ;;  %v3456_v34 = vld [vmem:[#allocation2 + $0x4d0] sm:$0xff] }
 0x3d7   : > { %16428 = vrot.lane.b32.xlu1 %v16357_v37, %s17186_s27 }
 0x429   : > { %v16354_v39 = vpop.permute.xlu0 %16353 }
 0x42a   : > { %v16356_v40 = vunpack.i.h.bf16 %v16354_v39  ;;  %v16355_v41 = vunpack.i.l.bf16 %v16354_v39  ;;  %v3457_v39 = vld [vmem:[#allocation2 + $0x4d8] sm:$0xff] }
 0x42c   : > { %v15090_v43 = vpack.c.bf16 %v16356_v40, %v16355_v41  ;;  %v3568_v40 = vld [vmem:[#allocation2 + $0x4e0] sm:$0xff] }
 0x42d   : > { %v16364_v44 = vpop.permute.xlu0 %16363  ;;  %v16359_v45 = vpop.permute.xlu1 %16358 }
 0x42e   : > { %v16366_v46 = vunpack.i.h.bf16 %v16364_v44  ;;  %v16365_v47 = vunpack.i.l.bf16 %v16364_v44  ;;  %v16361_v48 = vunpack.i.h.bf16 %v16359_v45  ;;  %v16360_v49 = vunpack.i.l.bf16 %v16359_v45  ;;  %15091 = vmatprep.subr.bf16.mxu1 %v15090_v43  ;;  %v3569_v45 = vld [vmem:[#allocation2 + $0x4e8] sm:$0xff] }
 0x42f   : > { %15093 = vmatpush3.bf16.msra.mxu1 %v15090_v43 }
 0x430   : > { %v15094_v50 = vpack.c.bf16 %v16361_v48, %v16360_v49  ;;  %v15098_v54 = vpack.c.bf16 %v16366_v46, %v16365_v47  ;;  %v3570_v46 = vld [vmem:[#allocation2 + $0x4f0] sm:$0xff] }
 0x431   : > { %v16369_v51 = vpop.permute.xlu1 %16368  ;;  %v16374_v55 = vpop.permute.xlu0 %16373 }
 0x432   : > { %v16371_v52 = vunpack.i.h.bf16 %v16369_v51  ;;  %v16370_v53 = vunpack.i.l.bf16 %v16369_v51  ;;  %15095 = vmatprep.subr.bf16.mxu1 %v15094_v50  ;;  %v16376_v58 = vunpack.i.h.bf16 %v16374_v55  ;;  %v16375_v59 = vunpack.i.l.bf16 %v16374_v55  ;;  %v3571_v51 = vld [vmem:[#allocation2 + $0x4f8] sm:$0xff] }
 0x433   : > { %15097 = vmatpush3.bf16.msra.mxu1 %v15094_v50 }
 0x434   : > { %15099 = vmatprep.subr.bf16.mxu1 %v15098_v54  ;;  %v15102_v60 = vpack.c.bf16 %v16371_v52, %v16370_v53  ;;  %v15106_v2 = vpack.c.bf16 %v16376_v58, %v16375_v59  ;;  %v3682_v52 = vld [vmem:[#allocation2 + $0x500] sm:$0xff]  ;;  %v3684_v58 = vld [vmem:[#allocation2 + $0x510] sm:$0xff] }
 0x435   : > { %v16379_v61 = vpop.permute.xlu1 %16378  ;;  %v16384_v3 = vpop.permute.xlu0 %16383 }
 0x436   : > { %13787 = vmatmul.mubr.msk.f32.vlgmr.msra.gmra.mrb[4].mxu1 %vm276_vm0, %v3028_v56  ;;  %v16381_v0 = vunpack.i.h.bf16 %v16379_v61  ;;  %v16380_v1 = vunpack.i.l.bf16 %v16379_v61  ;;  %v16386_v6 = vunpack.i.h.bf16 %v16384_v3  ;;  %v16385_v9 = vunpack.i.l.bf16 %v16384_v3 }
 0x437   : > { %15101 = vmatpush3.bf16.msra.mxu1 %v15098_v54  ;;  %13789 = vmatprep.mubr.msk.f32.mxu1 %vm276_vm0, %v3029_v57  ;;  %v3683_v57 = vld [vmem:[#allocation2 + $0x508] sm:$0xff] }
 0x438   : > { %15103 = vmatprep.subr.bf16.mxu1 %v15102_v60  ;;  %v15110_v10 = vpack.c.bf16 %v16381_v0, %v16380_v1  ;;  %v15114_v16 = vpack.c.bf16 %v16386_v6, %v16385_v9  ;;  %v3796_v0 = vld [vmem:[#allocation2 + $0x520] sm:$0xff]  ;;  %v3799_v9 = vld [vmem:[#allocation2 + $0x538] sm:$0xff] }
 0x439   : > { %v16389_v11 = vpop.permute.xlu1 %16388  ;;  %v16394_v22 = vpop.permute.xlu0 %16393 }
 0x43a   : > { %13790 = vmatmul.mubr.msk.f32.gmra.mrb[6].mxu1 %vm276_vm0, %v3030_v62  ;;  %v16391_v14 = vunpack.i.h.bf16 %v16389_v11  ;;  %v16390_v15 = vunpack.i.l.bf16 %v16389_v11  ;;  %v16396_v25 = vunpack.i.h.bf16 %v16394_v22  ;;  %v16395_v26 = vunpack.i.l.bf16 %v16394_v22  ;;  %v3911_v11 = vld [vmem:[#allocation2 + $0x548] sm:$0xff]  ;;  %v4019_v22 = vld [vmem:[#allocation4 + $0x58] sm:$0xff] }
 0x43b   : > { %15105 = vmatpush3.bf16.msra.mxu1 %v15102_v60  ;;  %13800 = vmatprep.mubr.msk.f32.mxu1 %vm276_vm0, %v3014_v63  ;;  %v3685_v63 = vld [vmem:[#allocation2 + $0x518] sm:$0xff] }
 0x43c   : > { %15107 = vmatprep.subr.bf16.mxu1 %v15106_v2  ;;  %v15118_v19 = vpack.c.bf16 %v16391_v14, %v16390_v15  ;;  %v15130_v31 = vpack.c.bf16 %v16396_v25, %v16395_v26  ;;  %v4017_v14 = vld [vmem:[#allocation4 + $0x48] sm:$0xff]  ;;  %v4016_v15 = vld [vmem:[#allocation4 + $0x40] sm:$0xff] }
 0x43d   : > { %v16399_v27 = vpop.permute.xlu1 %16398  ;;  %v16404_v32 = vpop.permute.xlu0 %16403 }
 0x43e   : > { %13801 = vmatmul.mubr.msk.f32.vlgmr.msra.gmra.mrb[4].mxu1 %vm276_vm0, %v3015_v4  ;;  %v16401_v29 = vunpack.i.h.bf16 %v16399_v27  ;;  %v16400_v30 = vunpack.i.l.bf16 %v16399_v27  ;;  %v16406_v35 = vunpack.i.h.bf16 %v16404_v32  ;;  %v16405_v8 = vunpack.i.l.bf16 %v16404_v32  ;;  %v3797_v4 = vld [vmem:[#allocation2 + $0x528] sm:$0xff]  ;;  %v4028_v27 = vld [vmem:[#allocation6 + $0x58] sm:$0xff] }
 0x43f   : > { %15109 = vmatpush3.bf16.msra.mxu1 %v15106_v2  ;;  %13803 = vmatprep.mubr.msk.f32.mxu1 %vm276_vm0, %v3016_v5  ;;  %v3798_v5 = vld [vmem:[#allocation2 + $0x530] sm:$0xff] }
 0x440   : > { %15111 = vmatprep.subr.bf16.mxu1 %v15110_v10 }
 0x441   : > { %v16409_v37 = vpop.permute.xlu1 %16408  ;;  %v16414_v44 = vpop.permute.xlu0 %16413 }
 0x442   : > { %13804 = vmatmul.mubr.msk.f32.gmra.mrb[6].mxu1 %vm276_vm0, %v3017_v12  ;;  %v16411_v41 = vunpack.i.h.bf16 %v16409_v37  ;;  %v16410_v43 = vunpack.i.l.bf16 %v16409_v37  ;;  %v16416_v47 = vunpack.i.h.bf16 %v16414_v44  ;;  %v16415_v48 = vunpack.i.l.bf16 %v16414_v44  ;;  %v3912_v12 = vld [vmem:[#allocation2 + $0x550] sm:$0xff]  ;;  %v4063_v37 = vld [vmem:[#allocation2 + $0x680] sm:$0xff] }
 0x443   : > { %15113 = vmatpush3.bf16.msra.mxu1 %v15110_v10  ;;  %13814 = vmatprep.mubr.msk.f32.mxu1 %vm276_vm0, %v3234_v13  ;;  %v3910_v10 = vld [vmem:[#allocation2 + $0x540] sm:$0xff]  ;;  %v3913_v13 = vld [vmem:[#allocation2 + $0x558] sm:$0xff] }
 0x444   : > { %15115 = vmatprep.subr.bf16.mxu1 %v15114_v16  ;;  %v15142_v49 = vpack.c.bf16 %v16411_v41, %v16410_v43  ;;  %v15146_v55 = vpack.c.bf16 %v16416_v47, %v16415_v48  ;;  %13912 = vmatprep.mubr.msk.f32.mxu0 %vm276_vm0, %v4063_v37 }
 0x445   : > { %v16419_v50 = vpop.permute.xlu1 %16418  ;;  %v16424_v56 = vpop.permute.xlu0 %16423 }
 0x446   : > { %13815 = vmatmul.mubr.msk.f32.vlgmr.msra.gmra.mrb[4].mxu1 %vm276_vm0, %v3235_v17  ;;  %v16421_v53 = vunpack.i.h.bf16 %v16419_v50  ;;  %v16420_v54 = vunpack.i.l.bf16 %v16419_v50  ;;  %v16426_v59 = vunpack.i.h.bf16 %v16424_v56  ;;  %v16425_v60 = vunpack.i.l.bf16 %v16424_v56  ;;  %v4026_v17 = vld [vmem:[#allocation6 + $0x48] sm:$0xff] }
 0x447   : > { %15117 = vmatpush3.bf16.msra.mxu1 %v15114_v16  ;;  %13817 = vmatprep.mubr.msk.f32.mxu1 %vm276_vm0, %v3236_v18 }
 0x448   : > { %15119 = vmatprep.subr.bf16.mxu1 %v15118_v19  ;;  %v15150_v61 = vpack.c.bf16 %v16421_v53, %v16420_v54  ;;  %v15154_v3 = vpack.c.bf16 %v16426_v59, %v16425_v60 }
 0x449   : > { %v16429_v62 = vpop.permute.xlu1 %16428 }
 0x44a   : > { %13818 = vmatmul.mubr.msk.f32.gmra.mrb[6].mxu1 %vm276_vm0, %v3237_v20  ;;  %v16431_v1 = vunpack.i.h.bf16 %v16429_v62  ;;  %v16430_v2 = vunpack.i.l.bf16 %v16429_v62  ;;  %v4025_v20 = vld [vmem:[#allocation6 + $0x40] sm:$0xff]  ;;  %v4064_v62 = vld [vmem:[#allocation2 + $0x688] sm:$0xff] }
 0x44b   : > { %15121 = vmatpush3.bf16.msra.mxu1 %v15118_v19  ;;  %13828 = vmatprep.mubr.msk.f32.mxu1 %vm276_vm0, %v3348_v21 }
 0x44c   : > { %15123 = vmatprep.subr.bf16.mxu1 %v17527_v36  ;;  %v15158_v6 = vpack.c.bf16 %v16431_v1, %v16430_v2 }
 0x44e   : > { %13829 = vmatmul.mubr.msk.f32.vlgmr.msra.gmra.mrb[4].mxu1 %vm276_vm0, %v3349_v23 }
 0x44f   : > { %15125 = vmatpush3.bf16.msra.mxu1 %v17527_v36  ;;  %13831 = vmatprep.mubr.msk.f32.mxu1 %vm276_vm0, %v3350_v24  ;;  %v15134_v36 = vpack.c.bf16 %v16401_v29, %v16400_v30  ;;  %v4018_v24 = vld [vmem:[#allocation4 + $0x50] sm:$0xff] }
 0x450   : > { %15127 = vmatprep.subr.bf16.mxu1 %v17531_v38  ;;  %v4027_v30 = vld [vmem:[#allocation6 + $0x50] sm:$0xff] }
 0x452   : > { %13832 = vmatmul.mubr.msk.f32.gmra.mrb[6].mxu1 %vm276_vm0, %v3351_v28 }
 0x453   : > { %15129 = vmatpush3.bf16.msra.mxu1 %v17531_v38  ;;  %13842 = vmatprep.mubr.msk.f32.mxu1 %vm276_vm0, %v3454_v7  ;;  %v15138_v38 = vpack.c.bf16 %v16406_v35, %v16405_v8 }
 0x454   : > { %15131 = vmatprep.subr.bf16.mxu1 %v15130_v31 }
 0x456   : > { %13843 = vmatmul.mubr.msk.f32.vlgmr.msra.gmra.mrb[4].mxu1 %vm276_vm0, %v3455_v33 }
 0x457   : > { %15133 = vmatpush3.bf16.msra.mxu1 %v15130_v31  ;;  %13845 = vmatprep.mubr.msk.f32.mxu1 %vm276_vm0, %v3456_v34 }
 0x458   : > { %15135 = vmatprep.subr.bf16.mxu1 %v15134_v36 }
 0x45a   : > { %13846 = vmatmul.mubr.msk.f32.gmra.mrb[6].mxu1 %vm276_vm0, %v3457_v39 }
 0x45b   : > { %15137 = vmatpush3.bf16.msra.mxu1 %v15134_v36  ;;  %13856 = vmatprep.mubr.msk.f32.mxu1 %vm276_vm0, %v3568_v40 }
 0x45c   : > { %15139 = vmatprep.subr.bf16.mxu1 %v15138_v38 }
 0x45e   : > { %13857 = vmatmul.mubr.msk.f32.vlgmr.msra.gmra.mrb[4].mxu1 %vm276_vm0, %v3569_v45 }
 0x45f   : > { %15141 = vmatpush3.bf16.msra.mxu1 %v15138_v38  ;;  %13859 = vmatprep.mubr.msk.f32.mxu1 %vm276_vm0, %v3570_v46 }
 0x460   : > { %15143 = vmatprep.subr.bf16.mxu1 %v15142_v49 }
 0x462   : > { %13860 = vmatmul.mubr.msk.f32.gmra.mrb[6].mxu1 %vm276_vm0, %v3571_v51 }
 0x463   : > { %15145 = vmatpush3.bf16.msra.mxu1 %v15142_v49  ;;  %13870 = vmatprep.mubr.msk.f32.mxu1 %vm276_vm0, %v3682_v52 }
 0x464   : > { %15147 = vmatprep.subr.bf16.mxu1 %v15146_v55 }
 0x466   : > { %13871 = vmatmul.mubr.msk.f32.vlgmr.msra.gmra.mrb[4].mxu1 %vm276_vm0, %v3683_v57 }
 0x467   : > { %15149 = vmatpush3.bf16.msra.mxu1 %v15146_v55  ;;  %13873 = vmatprep.mubr.msk.f32.mxu1 %vm276_vm0, %v3684_v58 }
 0x468   : > { %15151 = vmatprep.subr.bf16.mxu1 %v15150_v61 }
 0x46a   : > { %13874 = vmatmul.mubr.msk.f32.gmra.mrb[6].mxu1 %vm276_vm0, %v3685_v63  ;;  %v4065_v63 = vld [vmem:[#allocation2 + $0x690] sm:$0xff] }
 0x46b   : > { %15153 = vmatpush3.bf16.msra.mxu1 %v15150_v61  ;;  %13884 = vmatprep.mubr.msk.f32.mxu1 %vm276_vm0, %v3796_v0 }
 0x46c   : > { %15155 = vmatprep.subr.bf16.mxu1 %v15154_v3 }
 0x46e   : > { %13885 = vmatmul.mubr.msk.f32.vlgmr.msra.gmra.mrb[4].mxu1 %vm276_vm0, %v3797_v4  ;;  %v4066_v4 = vld [vmem:[#allocation2 + $0x698] sm:$0xff] }
 0x46f   : > { %15157 = vmatpush3.bf16.msra.mxu1 %v15154_v3  ;;  %13887 = vmatprep.mubr.msk.f32.mxu1 %vm276_vm0, %v3798_v5  ;;  %v4050_v5 = vld [vmem:[#allocation2 + $0x660] sm:$0xff] }
 0x470   : > { %15159 = vmatprep.subr.bf16.mxu1 %v15158_v6 }
 0x472   : > { %13888 = vmatmul.mubr.msk.f32.gmra.mrb[6].mxu1 %vm276_vm0, %v3799_v9 }
 0x473   : > { %15161 = vmatpush3.bf16.msra.mxu1 %v15158_v6  ;;  %13898 = vmatprep.mubr.msk.f32.mxu1 %vm276_vm0, %v3910_v10 }
 0x476   : > { %13899 = vmatmul.mubr.msk.f32.vlgmr.msra.gmra.mrb[4].mxu1 %vm276_vm0, %v3911_v11  ;;  %v4051_v11 = vld [vmem:[#allocation2 + $0x668] sm:$0xff] }
 0x477   : > { %13901 = vmatprep.mubr.msk.f32.mxu1 %vm276_vm0, %v3912_v12  ;;  %v4052_v12 = vld [vmem:[#allocation2 + $0x670] sm:$0xff] }
 0x47a   : > { %13902 = vmatmul.mubr.msk.f32.gmra.mrb[6].mxu1 %vm276_vm0, %v3913_v13 }
 0x549   : > { %v13900_v16 = vpop.f32.mrb[4].mxu1 }
 0x54a   : > { %v4021_v18 = vmul.f32 %v13900_v16, %v4017_v14  ;;  %v3992_v19 = vpop.f32.mrb[5].mxu1  ;;  %v4053_v14 = vld [vmem:[#allocation2 + $0x678] sm:$0xff] }
 0x54b   : > { %v4020_v21 = vmul.f32 %v4016_v15, %v3992_v19  ;;  %v4270_v15 = vld [vmem:[#allocation2 + $0x6a0] sm:$0xff] }
 0x54c   : > { %v4030_v23 = vadd.f32 %v4026_v17, %v4021_v18  ;;  %v4271_v17 = vld [vmem:[#allocation2 + $0x6a8] sm:$0xff]  ;;  %v4272_v18 = vld [vmem:[#allocation2 + $0x6b0] sm:$0xff] }
 0x54d   : > { %v4029_v25 = vadd.f32 %v4025_v20, %v4020_v21  ;;  %v13903_v26 = vpop.f32.mrb[6].mxu1 }
 0x54e   : > { %v4034_v28 = vmax.f32 %v4030_v23, 0.0  ;;  %v4023_v7 = vmul.f32 %v13903_v26, %v4019_v22  ;;  %v4002_v29 = vpop.f32.mrb[7].mxu1  ;;  %v4273_v22 = vld [vmem:[#allocation2 + $0x6b8] sm:$0xff]  ;;  %v4376_v23 = vld [vmem:[#allocation2 + $0x6c0] sm:$0xff] }
 0x54f   : > { %v4033_v31 = vmax.f32 %v4029_v25, 0.0  ;;  %v4022_v32 = vmul.f32 %v4018_v24, %v4002_v29 }
 0x550   : > { %v4038_v33 = vmul.f32 %v17427_v42, %v4034_v28  ;;  %v4032_v34 = vadd.f32 %v4028_v27, %v4023_v7  ;;  %v4377_v28 = vld [vmem:[#allocation2 + $0x6c8] sm:$0xff]  ;;  %v4378_v7 = vld [vmem:[#allocation2 + $0x6d0] sm:$0xff] }
 0x551   : > { %v4037_v35 = vmul.f32 %v17427_v42, %v4033_v31  ;;  %v4031_v8 = vadd.f32 %v4027_v30, %v4022_v32 }
 0x552   : > { %v4036_v36 = vmax.f32 %v4032_v34, 0.0  ;;  %v4490_v34 = vld [vmem:[#allocation2 + $0x6e0] sm:$0xff] }
 0x553   : > { %v4035_v39 = vmax.f32 %v4031_v8, 0.0  ;;  %v16432_v40 = vpack.i.bf16 %v4038_v33, %v4037_v35  ;;  %v17591_v38 = vpack.c.bf16 %v4038_v33, %v4037_v35  ;;  %v4379_v33 = vld [vmem:[#allocation2 + $0x6d8] sm:$0xff] }
 0x554   : > { %v4040_v41 = vmul.f32 %v17427_v42, %v4036_v36 }
 0x555   : > { %v4039_v43 = vmul.f32 %v17427_v42, %v4035_v39  ;;  %16433 = vrot.lane.b32.xlu0 %v16432_v40, %s17181_s20  ;;  %v4491_v39 = vld [vmem:[#allocation2 + $0x6e8] sm:$0xff] }
 0x557   : > { %v16437_v44 = vpack.i.bf16 %v4040_v41, %v4039_v43  ;;  %v17593_v45 = vpack.c.bf16 %v4040_v41, %v4039_v43 }
 0x559   : > { %16443 = vrot.lane.b32.xlu0 %v16432_v40, %s17180_s18  ;;  %16438 = vrot.lane.b32.xlu1 %v16437_v44, %s17181_s20 }
 0x55d   : > { %16453 = vrot.lane.b32.xlu0 %v16432_v40, %s17182_s23  ;;  %16448 = vrot.lane.b32.xlu1 %v16437_v44, %s17180_s18 }
 0x561   : > { %16463 = vrot.lane.b32.xlu0 %v16432_v40, %s17183_s25  ;;  %16458 = vrot.lane.b32.xlu1 %v16437_v44, %s17182_s23 }
 0x565   : > { %16473 = vrot.lane.b32.xlu0 %v16432_v40, %s17184_s19  ;;  %16468 = vrot.lane.b32.xlu1 %v16437_v44, %s17183_s25 }
 0x569   : > { %16483 = vrot.lane.b32.xlu0 %v16432_v40, %s17185_s26  ;;  %16478 = vrot.lane.b32.xlu1 %v16437_v44, %s17184_s19  ;;  %v4492_v40 = vld [vmem:[#allocation2 + $0x6f0] sm:$0xff] }
 0x56d   : > { %16488 = vrot.lane.b32.xlu1 %v16437_v44, %s17185_s26 }
 0x5c7   : > { %v16434_v46 = vpop.permute.xlu0 %16433 }
 0x5c8   : > { %v16436_v47 = vunpack.i.h.bf16 %v16434_v46  ;;  %v16435_v48 = vunpack.i.l.bf16 %v16434_v46  ;;  %v4604_v46 = vld [vmem:[#allocation2 + $0x700] sm:$0xff] }
 0x5ca   : > { %v15162_v49 = vpack.c.bf16 %v16436_v47, %v16435_v48 }
 0x5cb   : > { %v16444_v50 = vpop.permute.xlu0 %16443  ;;  %v16439_v51 = vpop.permute.xlu1 %16438 }
 0x5cc   : > { %v16446_v52 = vunpack.i.h.bf16 %v16444_v50  ;;  %v16445_v53 = vunpack.i.l.bf16 %v16444_v50  ;;  %v16441_v54 = vunpack.i.h.bf16 %v16439_v51  ;;  %v16440_v55 = vunpack.i.l.bf16 %v16439_v51  ;;  %15163 = vmatprep.subr.bf16.mxu0 %v15162_v49  ;;  %v4605_v50 = vld [vmem:[#allocation2 + $0x708] sm:$0xff]  ;;  %v4606_v51 = vld [vmem:[#allocation2 + $0x710] sm:$0xff] }
 0x5cd   : > { %15165 = vmatpush3.bf16.msra.mxu0 %v15162_v49 }
 0x5ce   : > { %v15166_v56 = vpack.c.bf16 %v16441_v54, %v16440_v55  ;;  %v15170_v60 = vpack.c.bf16 %v16446_v52, %v16445_v53  ;;  %v4607_v53 = vld [vmem:[#allocation2 + $0x718] sm:$0xff]  ;;  %v4718_v54 = vld [vmem:[#allocation2 + $0x720] sm:$0xff]  ;;  %v4719_v55 = vld [vmem:[#allocation2 + $0x728] sm:$0xff] }
 0x5cf   : > { %v16449_v57 = vpop.permute.xlu1 %16448  ;;  %v16454_v61 = vpop.permute.xlu0 %16453 }
 0x5d0   : > { %v16451_v58 = vunpack.i.h.bf16 %v16449_v57  ;;  %v16450_v59 = vunpack.i.l.bf16 %v16449_v57  ;;  %15167 = vmatprep.subr.bf16.mxu0 %v15166_v56  ;;  %v16456_v0 = vunpack.i.h.bf16 %v16454_v61  ;;  %v16455_v1 = vunpack.i.l.bf16 %v16454_v61  ;;  %v4721_v57 = vld [vmem:[#allocation2 + $0x738] sm:$0xff]  ;;  %v4834_v61 = vld [vmem:[#allocation6 + $0x68] sm:$0xff] }
 0x5d1   : > { %15169 = vmatpush3.bf16.msra.mxu0 %v15166_v56  ;;  %v4720_v56 = vld [vmem:[#allocation2 + $0x730] sm:$0xff] }
 0x5d2   : > { %15171 = vmatprep.subr.bf16.mxu0 %v15170_v60  ;;  %v15174_v2 = vpack.c.bf16 %v16451_v58, %v16450_v59  ;;  %v15178_v10 = vpack.c.bf16 %v16456_v0, %v16455_v1  ;;  %v4825_v58 = vld [vmem:[#allocation4 + $0x68] sm:$0xff]  ;;  %v4824_v59 = vld [vmem:[#allocation4 + $0x60] sm:$0xff] }
 0x5d3   : > { %v16459_v3 = vpop.permute.xlu1 %16458  ;;  %v16464_v16 = vpop.permute.xlu0 %16463  ;;  %v4833_v0 = vld [vmem:[#allocation6 + $0x60] sm:$0xff] }
 0x5d4   : > { %13913 = vmatmul.mubr.msk.f32.vlgmr.msra.gmra.mrb[8].mxu0 %vm276_vm0, %v4064_v62  ;;  %v16461_v6 = vunpack.i.h.bf16 %v16459_v3  ;;  %v16460_v9 = vunpack.i.l.bf16 %v16459_v3  ;;  %v16466_v19 = vunpack.i.h.bf16 %v16464_v16  ;;  %v16465_v20 = vunpack.i.l.bf16 %v16464_v16 }
 0x5d5   : > { %15173 = vmatpush3.bf16.msra.mxu0 %v15170_v60  ;;  %13915 = vmatprep.mubr.msk.f32.mxu0 %vm276_vm0, %v4065_v63 }
 0x5d6   : > { %15175 = vmatprep.subr.bf16.mxu0 %v15174_v2  ;;  %v15182_v13 = vpack.c.bf16 %v16461_v6, %v16460_v9  ;;  %v15194_v26 = vpack.c.bf16 %v16466_v19, %v16465_v20  ;;  %v4836_v9 = vld [vmem:[#allocation6 + $0x78] sm:$0xff] }
 0x5d7   : > { %v16469_v21 = vpop.permute.xlu1 %16468  ;;  %v16474_v27 = vpop.permute.xlu0 %16473 }
 0x5d8   : > { %13916 = vmatmul.mubr.msk.f32.gmra.mrb[10].mxu0 %vm276_vm0, %v4066_v4  ;;  %v16471_v24 = vunpack.i.h.bf16 %v16469_v21  ;;  %v16470_v25 = vunpack.i.l.bf16 %v16469_v21  ;;  %v16476_v29 = vunpack.i.h.bf16 %v16474_v27  ;;  %v16475_v30 = vunpack.i.l.bf16 %v16474_v27  ;;  %v4826_v4 = vld [vmem:[#allocation4 + $0x70] sm:$0xff]  ;;  %v4871_v21 = vld [vmem:[#allocation2 + $0x8a0] sm:$0xff] }
 0x5d9   : > { %15177 = vmatpush3.bf16.msra.mxu0 %v15174_v2  ;;  %13926 = vmatprep.mubr.msk.f32.mxu0 %vm276_vm0, %v4050_v5  ;;  %v4827_v2 = vld [vmem:[#allocation4 + $0x78] sm:$0xff] }
 0x5da   : > { %15179 = vmatprep.subr.bf16.mxu0 %v15178_v10  ;;  %v15198_v31 = vpack.c.bf16 %v16471_v24, %v16470_v25  ;;  %v15202_v36 = vpack.c.bf16 %v16476_v29, %v16475_v30 }
 0x5db   : > { %v16479_v32 = vpop.permute.xlu1 %16478  ;;  %v16484_v37 = vpop.permute.xlu0 %16483 }
 0x5dc   : > { %13927 = vmatmul.mubr.msk.f32.vlgmr.msra.gmra.mrb[8].mxu0 %vm276_vm0, %v4051_v11  ;;  %v16481_v35 = vunpack.i.h.bf16 %v16479_v32  ;;  %v16480_v8 = vunpack.i.l.bf16 %v16479_v32  ;;  %v16486_v41 = vunpack.i.h.bf16 %v16484_v37  ;;  %v16485_v43 = vunpack.i.l.bf16 %v16484_v37 }
 0x5dd   : > { %15181 = vmatpush3.bf16.msra.mxu0 %v15178_v10  ;;  %13929 = vmatprep.mubr.msk.f32.mxu0 %vm276_vm0, %v4052_v12 }
 0x5de   : > { %15183 = vmatprep.subr.bf16.mxu0 %v15182_v13  ;;  %v15210_v49 = vpack.c.bf16 %v16486_v41, %v16485_v43 }
 0x5df   : > { %v16489_v44 = vpop.permute.xlu1 %16488 }
 0x5e0   : > { %13930 = vmatmul.mubr.msk.f32.gmra.mrb[10].mxu0 %vm276_vm0, %v4053_v14  ;;  %v16491_v47 = vunpack.i.h.bf16 %v16489_v44  ;;  %v16490_v48 = vunpack.i.l.bf16 %v16489_v44  ;;  %v4872_v44 = vld [vmem:[#allocation2 + $0x8a8] sm:$0xff] }
 0x5e1   : > { %15185 = vmatpush3.bf16.msra.mxu0 %v15182_v13  ;;  %13940 = vmatprep.mubr.msk.f32.mxu0 %vm276_vm0, %v4270_v15  ;;  %v4835_v13 = vld [vmem:[#allocation6 + $0x70] sm:$0xff] }
 0x5e2   : > { %15187 = vmatprep.subr.bf16.mxu0 %v17591_v38  ;;  %v15214_v52 = vpack.c.bf16 %v16491_v47, %v16490_v48 }
 0x5e4   : > { %13941 = vmatmul.mubr.msk.f32.vlgmr.msra.gmra.mrb[8].mxu0 %vm276_vm0, %v4271_v17 }
 0x5e5   : > { %15189 = vmatpush3.bf16.msra.mxu0 %v17591_v38  ;;  %13943 = vmatprep.mubr.msk.f32.mxu0 %vm276_vm0, %v4272_v18  ;;  %v15206_v38 = vpack.c.bf16 %v16481_v35, %v16480_v8 }
 0x5e6   : > { %15191 = vmatprep.subr.bf16.mxu0 %v17593_v45 }
 0x5e8   : > { %13944 = vmatmul.mubr.msk.f32.gmra.mrb[10].mxu0 %vm276_vm0, %v4273_v22 }
 0x5e9   : > { %15193 = vmatpush3.bf16.msra.mxu0 %v17593_v45  ;;  %13954 = vmatprep.mubr.msk.f32.mxu0 %vm276_vm0, %v4376_v23  ;;  %v4493_v45 = vld [vmem:[#allocation2 + $0x6f8] sm:$0xff] }
 0x5ea   : > { %15195 = vmatprep.subr.bf16.mxu0 %v15194_v26 }
 0x5ec   : > { %13955 = vmatmul.mubr.msk.f32.vlgmr.msra.gmra.mrb[8].mxu0 %vm276_vm0, %v4377_v28 }
 0x5ed   : > { %15197 = vmatpush3.bf16.msra.mxu0 %v15194_v26  ;;  %13957 = vmatprep.mubr.msk.f32.mxu0 %vm276_vm0, %v4378_v7 }
 0x5ee   : > { %15199 = vmatprep.subr.bf16.mxu0 %v15198_v31 }
 0x5f0   : > { %13958 = vmatmul.mubr.msk.f32.gmra.mrb[10].mxu0 %vm276_vm0, %v4379_v33 }
 0x5f1   : > { %15201 = vmatpush3.bf16.msra.mxu0 %v15198_v31  ;;  %13968 = vmatprep.mubr.msk.f32.mxu0 %vm276_vm0, %v4490_v34 }
 0x5f2   : > { %15203 = vmatprep.subr.bf16.mxu0 %v15202_v36 }
 0x5f4   : > { %13969 = vmatmul.mubr.msk.f32.vlgmr.msra.gmra.mrb[8].mxu0 %vm276_vm0, %v4491_v39 }
 0x5f5   : > { %15205 = vmatpush3.bf16.msra.mxu0 %v15202_v36  ;;  %13971 = vmatprep.mubr.msk.f32.mxu0 %vm276_vm0, %v4492_v40 }
 0x5f6   : > { %15207 = vmatprep.subr.bf16.mxu0 %v15206_v38 }
 0x5f8   : > { %13972 = vmatmul.mubr.msk.f32.gmra.mrb[10].mxu0 %vm276_vm0, %v4493_v45  ;;  %v4873_v45 = vld [vmem:[#allocation2 + $0x8b0] sm:$0xff] }
 0x5f9   : > { %15209 = vmatpush3.bf16.msra.mxu0 %v15206_v38  ;;  %13982 = vmatprep.mubr.msk.f32.mxu0 %vm276_vm0, %v4604_v46 }
 0x5fa   : > { %15211 = vmatprep.subr.bf16.mxu0 %v15210_v49 }
 0x5fc   : > { %13983 = vmatmul.mubr.msk.f32.vlgmr.msra.gmra.mrb[8].mxu0 %vm276_vm0, %v4605_v50  ;;  %v4874_v50 = vld [vmem:[#allocation2 + $0x8b8] sm:$0xff] }
 0x5fd   : > { %15213 = vmatpush3.bf16.msra.mxu0 %v15210_v49  ;;  %13985 = vmatprep.mubr.msk.f32.mxu0 %vm276_vm0, %v4606_v51  ;;  %v4858_v51 = vld [vmem:[#allocation2 + $0x880] sm:$0xff] }
 0x5fe   : > { %15215 = vmatprep.subr.bf16.mxu0 %v15214_v52 }
 0x600   : > { %13986 = vmatmul.mubr.msk.f32.gmra.mrb[10].mxu0 %vm276_vm0, %v4607_v53 }
 0x601   : > { %15217 = vmatpush3.bf16.msra.mxu0 %v15214_v52  ;;  %13996 = vmatprep.mubr.msk.f32.mxu0 %vm276_vm0, %v4718_v54 }
 0x604   : > { %13997 = vmatmul.mubr.msk.f32.vlgmr.msra.gmra.mrb[8].mxu0 %vm276_vm0, %v4719_v55  ;;  %v4859_v55 = vld [vmem:[#allocation2 + $0x888] sm:$0xff] }
 0x605   : > { %13999 = vmatprep.mubr.msk.f32.mxu0 %vm276_vm0, %v4720_v56  ;;  %v4860_v56 = vld [vmem:[#allocation2 + $0x890] sm:$0xff] }
 0x608   : > { %14000 = vmatmul.mubr.msk.f32.gmra.mrb[10].mxu0 %vm276_vm0, %v4721_v57 }
 0x609   : > { %14010 = vmatprep.mubr.msk.f32.mxu0 %vm276_vm0, %v4871_v21 }
 0x6d7   : > { %v13998_v60 = vpop.f32.mrb[8].mxu0 }
 0x6d8   : > { %v4829_v62 = vmul.f32 %v13998_v60, %v4825_v58  ;;  %v4800_v63 = vpop.f32.mrb[9].mxu0  ;;  %v4861_v58 = vld [vmem:[#allocation2 + $0x898] sm:$0xff] }
 0x6d9   : > { %v4828_v1 = vmul.f32 %v4824_v59, %v4800_v63  ;;  %v5078_v59 = vld [vmem:[#allocation2 + $0x8c0] sm:$0xff] }
 0x6da   : > { %v4838_v3 = vadd.f32 %v4834_v61, %v4829_v62  ;;  %v5079_v61 = vld [vmem:[#allocation2 + $0x8c8] sm:$0xff]  ;;  %v5080_v62 = vld [vmem:[#allocation2 + $0x8d0] sm:$0xff] }
 0x6db   : > { %v4837_v5 = vadd.f32 %v4833_v0, %v4828_v1  ;;  %v14001_v6 = vpop.f32.mrb[10].mxu0 }
 0x6dc   : > { %v4842_v10 = vmax.f32 %v4838_v3, 0.0  ;;  %v4831_v11 = vmul.f32 %v14001_v6, %v4827_v2  ;;  %v4810_v12 = vpop.f32.mrb[11].mxu0  ;;  %v5081_v2 = vld [vmem:[#allocation2 + $0x8d8] sm:$0xff]  ;;  %v5184_v3 = vld [vmem:[#allocation2 + $0x8e0] sm:$0xff] }
 0x6dd   : > { %v4841_v14 = vmax.f32 %v4837_v5, 0.0  ;;  %v4830_v15 = vmul.f32 %v4826_v4, %v4810_v12 }
 0x6de   : > { %v4846_v16 = vmul.f32 %v17427_v42, %v4842_v10  ;;  %v4840_v17 = vadd.f32 %v4836_v9, %v4831_v11  ;;  %v5185_v10 = vld [vmem:[#allocation2 + $0x8e8] sm:$0xff]  ;;  %v5186_v11 = vld [vmem:[#allocation2 + $0x8f0] sm:$0xff] }
 0x6df   : > { %v4845_v18 = vmul.f32 %v17427_v42, %v4841_v14  ;;  %v4839_v19 = vadd.f32 %v4835_v13, %v4830_v15 }
 0x6e0   : > { %v4844_v20 = vmax.f32 %v4840_v17, 0.0  ;;  %v5298_v17 = vld [vmem:[#allocation2 + $0x900] sm:$0xff] }
 0x6e1   : > { %v4843_v22 = vmax.f32 %v4839_v19, 0.0  ;;  %v16492_v23 = vpack.i.bf16 %v4846_v16, %v4845_v18  ;;  %v17643_v26 = vpack.c.bf16 %v4846_v16, %v4845_v18  ;;  %v5187_v16 = vld [vmem:[#allocation2 + $0x8f8] sm:$0xff] }
 0x6e2   : > { %v4848_v24 = vmul.f32 %v17427_v42, %v4844_v20 }
 0x6e3   : > { %v4847_v25 = vmul.f32 %v17427_v42, %v4843_v22  ;;  %16493 = vrot.lane.b32.xlu0 %v16492_v23, %s17181_s20  ;;  %v5299_v22 = vld [vmem:[#allocation2 + $0x908] sm:$0xff] }
 0x6e5   : > { %v16497_v27 = vpack.i.bf16 %v4848_v24, %v4847_v25  ;;  %v17645_v28 = vpack.c.bf16 %v4848_v24, %v4847_v25 }
 0x6e7   : > { %16503 = vrot.lane.b32.xlu0 %v16492_v23, %s17180_s18  ;;  %16498 = vrot.lane.b32.xlu1 %v16497_v27, %s17181_s20 }
 0x6eb   : > { %16513 = vrot.lane.b32.xlu0 %v16492_v23, %s17182_s23  ;;  %16508 = vrot.lane.b32.xlu1 %v16497_v27, %s17180_s18 }
 0x6ef   : > { %16523 = vrot.lane.b32.xlu0 %v16492_v23, %s17183_s25  ;;  %16518 = vrot.lane.b32.xlu1 %v16497_v27, %s17182_s23 }
 0x6f3   : > { %16533 = vrot.lane.b32.xlu0 %v16492_v23, %s17184_s19  ;;  %16528 = vrot.lane.b32.xlu1 %v16497_v27, %s17183_s25 }
 0x6f7   : > { %16543 = vrot.lane.b32.xlu0 %v16492_v23, %s17185_s26  ;;  %16538 = vrot.lane.b32.xlu1 %v16497_v27, %s17184_s19  ;;  %v5300_v23 = vld [vmem:[#allocation2 + $0x910] sm:$0xff] }
 0x6fb   : > { %16548 = vrot.lane.b32.xlu1 %v16497_v27, %s17185_s26 }
 0x755   : > { %v16494_v7 = vpop.permute.xlu0 %16493 }
 0x756   : > { %v16496_v29 = vunpack.i.h.bf16 %v16494_v7  ;;  %v16495_v30 = vunpack.i.l.bf16 %v16494_v7  ;;  %v5412_v7 = vld [vmem:[#allocation2 + $0x920] sm:$0xff] }
 0x758   : > { %v15218_v31 = vpack.c.bf16 %v16496_v29, %v16495_v30 }
 0x759   : > { %v16504_v32 = vpop.permute.xlu0 %16503  ;;  %v16499_v33 = vpop.permute.xlu1 %16498 }
 0x75a   : > { %v16506_v34 = vunpack.i.h.bf16 %v16504_v32  ;;  %v16505_v35 = vunpack.i.l.bf16 %v16504_v32  ;;  %v16501_v8 = vunpack.i.h.bf16 %v16499_v33  ;;  %v16500_v36 = vunpack.i.l.bf16 %v16499_v33  ;;  %15219 = vmatprep.subr.bf16.mxu0 %v15218_v31  ;;  %v5413_v32 = vld [vmem:[#allocation2 + $0x928] sm:$0xff]  ;;  %v5414_v33 = vld [vmem:[#allocation2 + $0x930] sm:$0xff] }
 0x75b   : > { %15221 = vmatpush3.bf16.msra.mxu0 %v15218_v31 }
 0x75c   : > { %v15222_v37 = vpack.c.bf16 %v16501_v8, %v16500_v36  ;;  %v15226_v43 = vpack.c.bf16 %v16506_v34, %v16505_v35  ;;  %v5415_v35 = vld [vmem:[#allocation2 + $0x938] sm:$0xff]  ;;  %v5526_v8 = vld [vmem:[#allocation2 + $0x940] sm:$0xff]  ;;  %v5527_v36 = vld [vmem:[#allocation2 + $0x948] sm:$0xff] }
 0x75d   : > { %v16509_v39 = vpop.permute.xlu1 %16508  ;;  %v16514_v38 = vpop.permute.xlu0 %16513 }
 0x75e   : > { %v16511_v40 = vunpack.i.h.bf16 %v16509_v39  ;;  %v16510_v41 = vunpack.i.l.bf16 %v16509_v39  ;;  %15223 = vmatprep.subr.bf16.mxu0 %v15222_v37  ;;  %v16516_v46 = vunpack.i.h.bf16 %v16514_v38  ;;  %v16515_v47 = vunpack.i.l.bf16 %v16514_v38  ;;  %v5529_v39 = vld [vmem:[#allocation2 + $0x958] sm:$0xff]  ;;  %v5642_v38 = vld [vmem:[#allocation6 + $0x88] sm:$0xff] }
 0x75f   : > { %15225 = vmatpush3.bf16.msra.mxu0 %v15222_v37  ;;  %v5528_v37 = vld [vmem:[#allocation2 + $0x950] sm:$0xff] }
 0x760   : > { %15227 = vmatprep.subr.bf16.mxu0 %v15226_v43  ;;  %v15230_v48 = vpack.c.bf16 %v16511_v40, %v16510_v41  ;;  %v15234_v54 = vpack.c.bf16 %v16516_v46, %v16515_v47  ;;  %v5633_v40 = vld [vmem:[#allocation4 + $0x88] sm:$0xff]  ;;  %v5632_v41 = vld [vmem:[#allocation4 + $0x80] sm:$0xff] }
 0x761   : > { %v16519_v49 = vpop.permute.xlu1 %16518  ;;  %v16524_v60 = vpop.permute.xlu0 %16523  ;;  %v5641_v46 = vld [vmem:[#allocation6 + $0x80] sm:$0xff] }
 0x762   : > { %14011 = vmatmul.mubr.msk.f32.vlgmr.msra.gmra.mrb[12].mxu0 %vm276_vm0, %v4872_v44  ;;  %v16521_v52 = vunpack.i.h.bf16 %v16519_v49  ;;  %v16520_v53 = vunpack.i.l.bf16 %v16519_v49  ;;  %v16526_v63 = vunpack.i.h.bf16 %v16524_v60  ;;  %v16525_v0 = vunpack.i.l.bf16 %v16524_v60 }
 0x763   : > { %15229 = vmatpush3.bf16.msra.mxu0 %v15226_v43  ;;  %14013 = vmatprep.mubr.msk.f32.mxu0 %vm276_vm0, %v4873_v45 }
 0x764   : > { %15231 = vmatprep.subr.bf16.mxu0 %v15230_v48  ;;  %v15238_v57 = vpack.c.bf16 %v16521_v52, %v16520_v53  ;;  %v15250_v6 = vpack.c.bf16 %v16526_v63, %v16525_v0  ;;  %v5644_v53 = vld [vmem:[#allocation6 + $0x98] sm:$0xff] }
 0x765   : > { %v16529_v1 = vpop.permute.xlu1 %16528  ;;  %v16534_v9 = vpop.permute.xlu0 %16533 }
 0x766   : > { %14014 = vmatmul.mubr.msk.f32.gmra.mrb[14].mxu0 %vm276_vm0, %v4874_v50  ;;  %v16531_v4 = vunpack.i.h.bf16 %v16529_v1  ;;  %v16530_v5 = vunpack.i.l.bf16 %v16529_v1  ;;  %v16536_v12 = vunpack.i.h.bf16 %v16534_v9  ;;  %v16535_v13 = vunpack.i.l.bf16 %v16534_v9  ;;  %v5634_v50 = vld [vmem:[#allocation4 + $0x90] sm:$0xff]  ;;  %v5679_v1 = vld [vmem:[#allocation2 + $0xac0] sm:$0xff] }
 0x767   : > { %15233 = vmatpush3.bf16.msra.mxu0 %v15230_v48  ;;  %14024 = vmatprep.mubr.msk.f32.mxu0 %vm276_vm0, %v4858_v51  ;;  %v5635_v48 = vld [vmem:[#allocation4 + $0x98] sm:$0xff] }
 0x768   : > { %15235 = vmatprep.subr.bf16.mxu0 %v15234_v54  ;;  %v15254_v14 = vpack.c.bf16 %v16531_v4, %v16530_v5  ;;  %v15258_v20 = vpack.c.bf16 %v16536_v12, %v16535_v13  ;;  %14108 = vmatprep.mubr.msk.f32.mxu1 %vm276_vm0, %v5679_v1 }
 0x769   : > { %v16539_v15 = vpop.permute.xlu1 %16538  ;;  %v16544_v21 = vpop.permute.xlu0 %16543 }
 0x76a   : > { %14025 = vmatmul.mubr.msk.f32.vlgmr.msra.gmra.mrb[12].mxu0 %vm276_vm0, %v4859_v55  ;;  %v16541_v18 = vunpack.i.h.bf16 %v16539_v15  ;;  %v16540_v19 = vunpack.i.l.bf16 %v16539_v15  ;;  %v16546_v24 = vunpack.i.h.bf16 %v16544_v21  ;;  %v16545_v25 = vunpack.i.l.bf16 %v16544_v21 }
 0x76b   : > { %15237 = vmatpush3.bf16.msra.mxu0 %v15234_v54  ;;  %14027 = vmatprep.mubr.msk.f32.mxu0 %vm276_vm0, %v4860_v56 }
 0x76c   : > { %15239 = vmatprep.subr.bf16.mxu0 %v15238_v57  ;;  %v15266_v31 = vpack.c.bf16 %v16546_v24, %v16545_v25 }
 0x76d   : > { %v16549_v27 = vpop.permute.xlu1 %16548 }
 0x76e   : > { %14028 = vmatmul.mubr.msk.f32.gmra.mrb[14].mxu0 %vm276_vm0, %v4861_v58  ;;  %v16551_v29 = vunpack.i.h.bf16 %v16549_v27  ;;  %v16550_v30 = vunpack.i.l.bf16 %v16549_v27  ;;  %v5680_v27 = vld [vmem:[#allocation2 + $0xac8] sm:$0xff] }
 0x76f   : > { %15241 = vmatpush3.bf16.msra.mxu0 %v15238_v57  ;;  %14038 = vmatprep.mubr.msk.f32.mxu0 %vm276_vm0, %v5078_v59  ;;  %v5643_v57 = vld [vmem:[#allocation6 + $0x90] sm:$0xff] }
 0x770   : > { %15243 = vmatprep.subr.bf16.mxu0 %v17643_v26  ;;  %v15270_v34 = vpack.c.bf16 %v16551_v29, %v16550_v30 }
 0x772   : > { %14039 = vmatmul.mubr.msk.f32.vlgmr.msra.gmra.mrb[12].mxu0 %vm276_vm0, %v5079_v61 }
 0x773   : > { %15245 = vmatpush3.bf16.msra.mxu0 %v17643_v26  ;;  %14041 = vmatprep.mubr.msk.f32.mxu0 %vm276_vm0, %v5080_v62  ;;  %v15262_v26 = vpack.c.bf16 %v16541_v18, %v16540_v19 }
 0x774   : > { %15247 = vmatprep.subr.bf16.mxu0 %v17645_v28 }
 0x776   : > { %14042 = vmatmul.mubr.msk.f32.gmra.mrb[14].mxu0 %vm276_vm0, %v5081_v2 }
 0x777   : > { %15249 = vmatpush3.bf16.msra.mxu0 %v17645_v28  ;;  %14052 = vmatprep.mubr.msk.f32.mxu0 %vm276_vm0, %v5184_v3  ;;  %v5301_v28 = vld [vmem:[#allocation2 + $0x918] sm:$0xff] }
 0x778   : > { %15251 = vmatprep.subr.bf16.mxu0 %v15250_v6 }
 0x77a   : > { %14053 = vmatmul.mubr.msk.f32.vlgmr.msra.gmra.mrb[12].mxu0 %vm276_vm0, %v5185_v10 }
 0x77b   : > { %15253 = vmatpush3.bf16.msra.mxu0 %v15250_v6  ;;  %14055 = vmatprep.mubr.msk.f32.mxu0 %vm276_vm0, %v5186_v11 }
 0x77c   : > { %15255 = vmatprep.subr.bf16.mxu0 %v15254_v14 }
 0x77e   : > { %14056 = vmatmul.mubr.msk.f32.gmra.mrb[14].mxu0 %vm276_vm0, %v5187_v16 }
 0x77f   : > { %15257 = vmatpush3.bf16.msra.mxu0 %v15254_v14  ;;  %14066 = vmatprep.mubr.msk.f32.mxu0 %vm276_vm0, %v5298_v17 }
 0x780   : > { %15259 = vmatprep.subr.bf16.mxu0 %v15258_v20 }
 0x782   : > { %14067 = vmatmul.mubr.msk.f32.vlgmr.msra.gmra.mrb[12].mxu0 %vm276_vm0, %v5299_v22 }
 0x783   : > { %15261 = vmatpush3.bf16.msra.mxu0 %v15258_v20  ;;  %14069 = vmatprep.mubr.msk.f32.mxu0 %vm276_vm0, %v5300_v23 }
 0x784   : > { %15263 = vmatprep.subr.bf16.mxu0 %v15262_v26 }
 0x786   : > { %14070 = vmatmul.mubr.msk.f32.gmra.mrb[14].mxu0 %vm276_vm0, %v5301_v28  ;;  %v5681_v28 = vld [vmem:[#allocation2 + $0xad0] sm:$0xff] }
 0x787   : > { %15265 = vmatpush3.bf16.msra.mxu0 %v15262_v26  ;;  %14080 = vmatprep.mubr.msk.f32.mxu0 %vm276_vm0, %v5412_v7 }
 0x788   : > { %15267 = vmatprep.subr.bf16.mxu0 %v15266_v31 }
 0x78a   : > { %14081 = vmatmul.mubr.msk.f32.vlgmr.msra.gmra.mrb[12].mxu0 %vm276_vm0, %v5413_v32  ;;  %v5682_v32 = vld [vmem:[#allocation2 + $0xad8] sm:$0xff] }
 0x78b   : > { %15269 = vmatpush3.bf16.msra.mxu0 %v15266_v31  ;;  %14083 = vmatprep.mubr.msk.f32.mxu0 %vm276_vm0, %v5414_v33  ;;  %v5666_v33 = vld [vmem:[#allocation2 + $0xaa0] sm:$0xff] }
 0x78c   : > { %15271 = vmatprep.subr.bf16.mxu0 %v15270_v34 }
 0x78e   : > { %14084 = vmatmul.mubr.msk.f32.gmra.mrb[14].mxu0 %vm276_vm0, %v5415_v35 }
 0x78f   : > { %15273 = vmatpush3.bf16.msra.mxu0 %v15270_v34  ;;  %14094 = vmatprep.mubr.msk.f32.mxu0 %vm276_vm0, %v5526_v8 }
 0x792   : > { %14095 = vmatmul.mubr.msk.f32.vlgmr.msra.gmra.mrb[12].mxu0 %vm276_vm0, %v5527_v36  ;;  %v5667_v36 = vld [vmem:[#allocation2 + $0xaa8] sm:$0xff] }
 0x793   : > { %14097 = vmatprep.mubr.msk.f32.mxu0 %vm276_vm0, %v5528_v37  ;;  %v5668_v37 = vld [vmem:[#allocation2 + $0xab0] sm:$0xff] }
 0x796   : > { %14098 = vmatmul.mubr.msk.f32.gmra.mrb[14].mxu0 %vm276_vm0, %v5529_v39 }
 0x865   : > { %v14096_v43 = vpop.f32.mrb[12].mxu0 }
 0x866   : > { %v5637_v44 = vmul.f32 %v14096_v43, %v5633_v40  ;;  %v5608_v45 = vpop.f32.mrb[13].mxu0  ;;  %v5669_v40 = vld [vmem:[#allocation2 + $0xab8] sm:$0xff] }
 0x867   : > { %v5636_v47 = vmul.f32 %v5632_v41, %v5608_v45  ;;  %v5886_v41 = vld [vmem:[#allocation2 + $0xae0] sm:$0xff] }
 0x868   : > { %v5646_v49 = vadd.f32 %v5642_v38, %v5637_v44  ;;  %v5887_v38 = vld [vmem:[#allocation2 + $0xae8] sm:$0xff]  ;;  %v5888_v44 = vld [vmem:[#allocation2 + $0xaf0] sm:$0xff] }
 0x869   : > { %v5645_v51 = vadd.f32 %v5641_v46, %v5636_v47  ;;  %v14099_v52 = vpop.f32.mrb[14].mxu0 }
 0x86a   : > { %v5650_v54 = vmax.f32 %v5646_v49, 0.0  ;;  %v5639_v55 = vmul.f32 %v14099_v52, %v5635_v48  ;;  %v5618_v56 = vpop.f32.mrb[15].mxu0  ;;  %v5889_v48 = vld [vmem:[#allocation2 + $0xaf8] sm:$0xff]  ;;  %v5992_v49 = vld [vmem:[#allocation2 + $0xb00] sm:$0xff] }
 0x86b   : > { %v5649_v58 = vmax.f32 %v5645_v51, 0.0  ;;  %v5638_v59 = vmul.f32 %v5634_v50, %v5618_v56 }
 0x86c   : > { %v5654_v60 = vmul.f32 %v17427_v42, %v5650_v54  ;;  %v5648_v61 = vadd.f32 %v5644_v53, %v5639_v55  ;;  %v5993_v54 = vld [vmem:[#allocation2 + $0xb08] sm:$0xff]  ;;  %v5994_v55 = vld [vmem:[#allocation2 + $0xb10] sm:$0xff] }
 0x86d   : > { %v5653_v62 = vmul.f32 %v17427_v42, %v5649_v58  ;;  %v5647_v63 = vadd.f32 %v5643_v57, %v5638_v59 }
 0x86e   : > { %v5652_v0 = vmax.f32 %v5648_v61, 0.0  ;;  %v6106_v61 = vld [vmem:[#allocation2 + $0xb20] sm:$0xff] }
 0x86f   : > { %v5651_v2 = vmax.f32 %v5647_v63, 0.0  ;;  %v16552_v3 = vpack.i.bf16 %v5654_v60, %v5653_v62  ;;  %v17695_v6 = vpack.c.bf16 %v5654_v60, %v5653_v62  ;;  %v5995_v60 = vld [vmem:[#allocation2 + $0xb18] sm:$0xff] }
 0x870   : > { %v5656_v4 = vmul.f32 %v17427_v42, %v5652_v0 }
 0x871   : > { %v5655_v5 = vmul.f32 %v17427_v42, %v5651_v2  ;;  %16553 = vrot.lane.b32.xlu0 %v16552_v3, %s17181_s20  ;;  %v6107_v2 = vld [vmem:[#allocation2 + $0xb28] sm:$0xff] }
 0x873   : > { %v16557_v9 = vpack.i.bf16 %v5656_v4, %v5655_v5  ;;  %v17697_v10 = vpack.c.bf16 %v5656_v4, %v5655_v5 }
 0x875   : > { %16563 = vrot.lane.b32.xlu0 %v16552_v3, %s17180_s18  ;;  %16558 = vrot.lane.b32.xlu1 %v16557_v9, %s17181_s20 }
 0x879   : > { %16573 = vrot.lane.b32.xlu0 %v16552_v3, %s17182_s23  ;;  %16568 = vrot.lane.b32.xlu1 %v16557_v9, %s17180_s18 }
 0x87d   : > { %16583 = vrot.lane.b32.xlu0 %v16552_v3, %s17183_s25  ;;  %16578 = vrot.lane.b32.xlu1 %v16557_v9, %s17182_s23 }
 0x881   : > { %16593 = vrot.lane.b32.xlu0 %v16552_v3, %s17184_s19  ;;  %16588 = vrot.lane.b32.xlu1 %v16557_v9, %s17183_s25 }
 0x885   : > { %16603 = vrot.lane.b32.xlu0 %v16552_v3, %s17185_s26  ;;  %16598 = vrot.lane.b32.xlu1 %v16557_v9, %s17184_s19  ;;  %v6108_v3 = vld [vmem:[#allocation2 + $0xb30] sm:$0xff] }
 0x889   : > { %16608 = vrot.lane.b32.xlu1 %v16557_v9, %s17185_s26 }
 0x8e3   : > { %v16554_v11 = vpop.permute.xlu0 %16553 }
 0x8e4   : > { %v16556_v12 = vunpack.i.h.bf16 %v16554_v11  ;;  %v16555_v13 = vunpack.i.l.bf16 %v16554_v11  ;;  %v6220_v11 = vld [vmem:[#allocation2 + $0xb40] sm:$0xff] }
 0x8e6   : > { %v15274_v14 = vpack.c.bf16 %v16556_v12, %v16555_v13 }
 0x8e7   : > { %v16564_v15 = vpop.permute.xlu0 %16563  ;;  %v16559_v16 = vpop.permute.xlu1 %16558 }
 0x8e8   : > { %v16566_v17 = vunpack.i.h.bf16 %v16564_v15  ;;  %v16565_v18 = vunpack.i.l.bf16 %v16564_v15  ;;  %v16561_v19 = vunpack.i.h.bf16 %v16559_v16  ;;  %v16560_v20 = vunpack.i.l.bf16 %v16559_v16  ;;  %15275 = vmatprep.subr.bf16.mxu1 %v15274_v14  ;;  %v6221_v15 = vld [vmem:[#allocation2 + $0xb48] sm:$0xff]  ;;  %v6222_v16 = vld [vmem:[#allocation2 + $0xb50] sm:$0xff] }
 0x8e9   : > { %15277 = vmatpush3.bf16.msra.mxu1 %v15274_v14 }
 0x8ea   : > { %v15278_v21 = vpack.c.bf16 %v16561_v19, %v16560_v20  ;;  %v15282_v25 = vpack.c.bf16 %v16566_v17, %v16565_v18  ;;  %v6223_v18 = vld [vmem:[#allocation2 + $0xb58] sm:$0xff]  ;;  %v6334_v19 = vld [vmem:[#allocation2 + $0xb60] sm:$0xff]  ;;  %v6335_v20 = vld [vmem:[#allocation2 + $0xb68] sm:$0xff] }
 0x8eb   : > { %v16569_v22 = vpop.permute.xlu1 %16568  ;;  %v16574_v26 = vpop.permute.xlu0 %16573 }
 0x8ec   : > { %v16571_v23 = vunpack.i.h.bf16 %v16569_v22  ;;  %v16570_v24 = vunpack.i.l.bf16 %v16569_v22  ;;  %15279 = vmatprep.subr.bf16.mxu1 %v15278_v21  ;;  %v16576_v7 = vunpack.i.h.bf16 %v16574_v26  ;;  %v16575_v29 = vunpack.i.l.bf16 %v16574_v26  ;;  %v6337_v22 = vld [vmem:[#allocation2 + $0xb78] sm:$0xff]  ;;  %v6450_v26 = vld [vmem:[#allocation6 + $0xa8] sm:$0xff] }
 0x8ed   : > { %15281 = vmatpush3.bf16.msra.mxu1 %v15278_v21  ;;  %v6336_v21 = vld [vmem:[#allocation2 + $0xb70] sm:$0xff] }
 0x8ee   : > { %15283 = vmatprep.subr.bf16.mxu1 %v15282_v25  ;;  %v15286_v30 = vpack.c.bf16 %v16571_v23, %v16570_v24  ;;  %v15290_v8 = vpack.c.bf16 %v16576_v7, %v16575_v29  ;;  %v6441_v23 = vld [vmem:[#allocation4 + $0xa8] sm:$0xff]  ;;  %v6440_v24 = vld [vmem:[#allocation4 + $0xa0] sm:$0xff] }
 0x8ef   : > { %v16579_v31 = vpop.permute.xlu1 %16578  ;;  %v16584_v43 = vpop.permute.xlu0 %16583  ;;  %v6449_v7 = vld [vmem:[#allocation6 + $0xa0] sm:$0xff] }
 0x8f0   : > { %14109 = vmatmul.mubr.msk.f32.vlgmr.msra.gmra.mrb[8].mxu1 %vm276_vm0, %v5680_v27  ;;  %v16581_v34 = vunpack.i.h.bf16 %v16579_v31  ;;  %v16580_v35 = vunpack.i.l.bf16 %v16579_v31  ;;  %v16586_v45 = vunpack.i.h.bf16 %v16584_v43  ;;  %v16585_v46 = vunpack.i.l.bf16 %v16584_v43 }
 0x8f1   : > { %15285 = vmatpush3.bf16.msra.mxu1 %v15282_v25  ;;  %14111 = vmatprep.mubr.msk.f32.mxu1 %vm276_vm0, %v5681_v28 }
 0x8f2   : > { %15287 = vmatprep.subr.bf16.mxu1 %v15286_v30  ;;  %v15294_v39 = vpack.c.bf16 %v16581_v34, %v16580_v35  ;;  %v15306_v50 = vpack.c.bf16 %v16586_v45, %v16585_v46  ;;  %v6452_v35 = vld [vmem:[#allocation6 + $0xb8] sm:$0xff] }
 0x8f3   : > { %v16589_v47 = vpop.permute.xlu1 %16588  ;;  %v16594_v53 = vpop.permute.xlu0 %16593 }
 0x8f4   : > { %14112 = vmatmul.mubr.msk.f32.gmra.mrb[10].mxu1 %vm276_vm0, %v5682_v32  ;;  %v16591_v51 = vunpack.i.h.bf16 %v16589_v47  ;;  %v16590_v52 = vunpack.i.l.bf16 %v16589_v47  ;;  %v16596_v56 = vunpack.i.h.bf16 %v16594_v53  ;;  %v16595_v57 = vunpack.i.l.bf16 %v16594_v53  ;;  %v6442_v32 = vld [vmem:[#allocation4 + $0xb0] sm:$0xff]  ;;  %v6487_v47 = vld [vmem:[#allocation2 + $0xce0] sm:$0xff] }
 0x8f5   : > { %15289 = vmatpush3.bf16.msra.mxu1 %v15286_v30  ;;  %14122 = vmatprep.mubr.msk.f32.mxu1 %vm276_vm0, %v5666_v33  ;;  %v6443_v30 = vld [vmem:[#allocation4 + $0xb8] sm:$0xff] }
 0x8f6   : > { %15291 = vmatprep.subr.bf16.mxu1 %v15290_v8  ;;  %v15310_v58 = vpack.c.bf16 %v16591_v51, %v16590_v52  ;;  %v15314_v62 = vpack.c.bf16 %v16596_v56, %v16595_v57  ;;  %14206 = vmatprep.mubr.msk.f32.mxu0 %vm276_vm0, %v6487_v47 }
 0x8f7   : > { %v16599_v59 = vpop.permute.xlu1 %16598  ;;  %v16604_v1 = vpop.permute.xlu0 %16603 }
 0x8f8   : > { %14123 = vmatmul.mubr.msk.f32.vlgmr.msra.gmra.mrb[8].mxu1 %vm276_vm0, %v5667_v36  ;;  %v16601_v63 = vunpack.i.h.bf16 %v16599_v59  ;;  %v16600_v0 = vunpack.i.l.bf16 %v16599_v59  ;;  %v16606_v4 = vunpack.i.h.bf16 %v16604_v1  ;;  %v16605_v5 = vunpack.i.l.bf16 %v16604_v1 }
 0x8f9   : > { %15293 = vmatpush3.bf16.msra.mxu1 %v15290_v8  ;;  %14125 = vmatprep.mubr.msk.f32.mxu1 %vm276_vm0, %v5668_v37 }
 0x8fa   : > { %15295 = vmatprep.subr.bf16.mxu1 %v15294_v39  ;;  %v15322_v12 = vpack.c.bf16 %v16606_v4, %v16605_v5 }
 0x8fb   : > { %v16609_v9 = vpop.permute.xlu1 %16608 }
 0x8fc   : > { %14126 = vmatmul.mubr.msk.f32.gmra.mrb[10].mxu1 %vm276_vm0, %v5669_v40  ;;  %v16611_v13 = vunpack.i.h.bf16 %v16609_v9  ;;  %v16610_v14 = vunpack.i.l.bf16 %v16609_v9  ;;  %v6488_v9 = vld [vmem:[#allocation2 + $0xce8] sm:$0xff] }
 0x8fd   : > { %15297 = vmatpush3.bf16.msra.mxu1 %v15294_v39  ;;  %14136 = vmatprep.mubr.msk.f32.mxu1 %vm276_vm0, %v5886_v41  ;;  %v6451_v39 = vld [vmem:[#allocation6 + $0xb0] sm:$0xff] }
 0x8fe   : > { %15299 = vmatprep.subr.bf16.mxu1 %v17695_v6  ;;  %v15326_v17 = vpack.c.bf16 %v16611_v13, %v16610_v14 }
 0x900   : > { %14137 = vmatmul.mubr.msk.f32.vlgmr.msra.gmra.mrb[8].mxu1 %vm276_vm0, %v5887_v38 }
 0x901   : > { %15301 = vmatpush3.bf16.msra.mxu1 %v17695_v6  ;;  %14139 = vmatprep.mubr.msk.f32.mxu1 %vm276_vm0, %v5888_v44  ;;  %v15318_v6 = vpack.c.bf16 %v16601_v63, %v16600_v0 }
 0x902   : > { %15303 = vmatprep.subr.bf16.mxu1 %v17697_v10 }
 0x904   : > { %14140 = vmatmul.mubr.msk.f32.gmra.mrb[10].mxu1 %vm276_vm0, %v5889_v48 }
 0x905   : > { %15305 = vmatpush3.bf16.msra.mxu1 %v17697_v10  ;;  %14150 = vmatprep.mubr.msk.f32.mxu1 %vm276_vm0, %v5992_v49  ;;  %v6109_v10 = vld [vmem:[#allocation2 + $0xb38] sm:$0xff] }
 0x906   : > { %15307 = vmatprep.subr.bf16.mxu1 %v15306_v50 }
 0x908   : > { %14151 = vmatmul.mubr.msk.f32.vlgmr.msra.gmra.mrb[8].mxu1 %vm276_vm0, %v5993_v54 }
 0x909   : > { %15309 = vmatpush3.bf16.msra.mxu1 %v15306_v50  ;;  %14153 = vmatprep.mubr.msk.f32.mxu1 %vm276_vm0, %v5994_v55 }
 0x90a   : > { %15311 = vmatprep.subr.bf16.mxu1 %v15310_v58 }
 0x90c   : > { %14154 = vmatmul.mubr.msk.f32.gmra.mrb[10].mxu1 %vm276_vm0, %v5995_v60 }
 0x90d   : > { %15313 = vmatpush3.bf16.msra.mxu1 %v15310_v58  ;;  %14164 = vmatprep.mubr.msk.f32.mxu1 %vm276_vm0, %v6106_v61 }
 0x90e   : > { %15315 = vmatprep.subr.bf16.mxu1 %v15314_v62 }
 0x910   : > { %14165 = vmatmul.mubr.msk.f32.vlgmr.msra.gmra.mrb[8].mxu1 %vm276_vm0, %v6107_v2 }
 0x911   : > { %15317 = vmatpush3.bf16.msra.mxu1 %v15314_v62  ;;  %14167 = vmatprep.mubr.msk.f32.mxu1 %vm276_vm0, %v6108_v3 }
 0x912   : > { %15319 = vmatprep.subr.bf16.mxu1 %v15318_v6 }
 0x914   : > { %14168 = vmatmul.mubr.msk.f32.gmra.mrb[10].mxu1 %vm276_vm0, %v6109_v10  ;;  %v6489_v10 = vld [vmem:[#allocation2 + $0xcf0] sm:$0xff] }
 0x915   : > { %15321 = vmatpush3.bf16.msra.mxu1 %v15318_v6  ;;  %14178 = vmatprep.mubr.msk.f32.mxu1 %vm276_vm0, %v6220_v11 }
 0x916   : > { %15323 = vmatprep.subr.bf16.mxu1 %v15322_v12 }
 0x918   : > { %14179 = vmatmul.mubr.msk.f32.vlgmr.msra.gmra.mrb[8].mxu1 %vm276_vm0, %v6221_v15  ;;  %v6490_v15 = vld [vmem:[#allocation2 + $0xcf8] sm:$0xff] }
 0x919   : > { %15325 = vmatpush3.bf16.msra.mxu1 %v15322_v12  ;;  %14181 = vmatprep.mubr.msk.f32.mxu1 %vm276_vm0, %v6222_v16  ;;  %v6474_v16 = vld [vmem:[#allocation2 + $0xcc0] sm:$0xff] }
 0x91a   : > { %15327 = vmatprep.subr.bf16.mxu1 %v15326_v17 }
 0x91c   : > { %14182 = vmatmul.mubr.msk.f32.gmra.mrb[10].mxu1 %vm276_vm0, %v6223_v18 }
 0x91d   : > { %15329 = vmatpush3.bf16.msra.mxu1 %v15326_v17  ;;  %14192 = vmatprep.mubr.msk.f32.mxu1 %vm276_vm0, %v6334_v19 }
 0x920   : > { %14193 = vmatmul.mubr.msk.f32.vlgmr.msra.gmra.mrb[8].mxu1 %vm276_vm0, %v6335_v20 }
 0x921   : > { %14195 = vmatprep.mubr.msk.f32.mxu1 %vm276_vm0, %v6336_v21  ;;  %v6475_v21 = vld [vmem:[#allocation2 + $0xcc8] sm:$0xff] }
 0x924   : > { %14196 = vmatmul.mubr.msk.f32.gmra.mrb[10].mxu1 %vm276_vm0, %v6337_v22  ;;  %v6476_v22 = vld [vmem:[#allocation2 + $0xcd0] sm:$0xff] }
 0x9f3   : > { %v14194_v25 = vpop.f32.mrb[8].mxu1 }
 0x9f4   : > { %v6445_v27 = vmul.f32 %v14194_v25, %v6441_v23  ;;  %v6416_v28 = vpop.f32.mrb[9].mxu1 }
 0x9f5   : > { %v6444_v29 = vmul.f32 %v6440_v24, %v6416_v28  ;;  %v6694_v28 = vld [vmem:[#allocation2 + $0xd00] sm:$0xff] }
 0x9f6   : > { %v6454_v31 = vadd.f32 %v6450_v26, %v6445_v27  ;;  %v6477_v27 = vld [vmem:[#allocation2 + $0xcd8] sm:$0xff] }
 0x9f7   : > { %v6453_v33 = vadd.f32 %v6449_v7, %v6444_v29  ;;  %v14197_v34 = vpop.f32.mrb[10].mxu1 }
 0x9f8   : > { %v6458_v8 = vmax.f32 %v6454_v31, 0.0  ;;  %v6447_v36 = vmul.f32 %v14197_v34, %v6443_v30  ;;  %v6426_v37 = vpop.f32.mrb[11].mxu1  ;;  %v6695_v31 = vld [vmem:[#allocation2 + $0xd08] sm:$0xff]  ;;  %v6697_v34 = vld [vmem:[#allocation2 + $0xd18] sm:$0xff] }
 0x9f9   : > { %v6457_v40 = vmax.f32 %v6453_v33, 0.0  ;;  %v6446_v41 = vmul.f32 %v6442_v32, %v6426_v37  ;;  %v6696_v32 = vld [vmem:[#allocation2 + $0xd10] sm:$0xff] }
 0x9fa   : > { %v6462_v43 = vmul.f32 %v17427_v42, %v6458_v8  ;;  %v6456_v38 = vadd.f32 %v6452_v35, %v6447_v36  ;;  %v6808_v35 = vld [vmem:[#allocation2 + $0xd20] sm:$0xff]  ;;  %v6809_v36 = vld [vmem:[#allocation2 + $0xd28] sm:$0xff]  ;;  %v6810_v37 = vld [vmem:[#allocation2 + $0xd30] sm:$0xff] }
 0x9fb   : > { %v6461_v44 = vmul.f32 %v17427_v42, %v6457_v40  ;;  %v6455_v45 = vadd.f32 %v6451_v39, %v6446_v41 }
 0x9fc   : > { %v6460_v46 = vmax.f32 %v6456_v38, 0.0  ;;  %v6914_v38 = vld [vmem:[#allocation2 + $0xd40] sm:$0xff] }
 0x9fd   : > { %v6459_v48 = vmax.f32 %v6455_v45, 0.0  ;;  %v16612_v49 = vpack.i.bf16 %v6462_v43, %v6461_v44  ;;  %v17747_v52 = vpack.c.bf16 %v6462_v43, %v6461_v44  ;;  %v6811_v43 = vld [vmem:[#allocation2 + $0xd38] sm:$0xff] }
 0x9fe   : > { %v6464_v50 = vmul.f32 %v17427_v42, %v6460_v46 }
 0x9ff   : > { %v6463_v51 = vmul.f32 %v17427_v42, %v6459_v48  ;;  %16613 = vrot.lane.b32.xlu0 %v16612_v49, %s17180_s18  ;;  %v6915_v48 = vld [vmem:[#allocation2 + $0xd48] sm:$0xff] }
 0xa01   : > { %v16617_v53 = vpack.i.bf16 %v6464_v50, %v6463_v51  ;;  %v17751_v54 = vpack.c.bf16 %v6464_v50, %v6463_v51 }
 0xa03   : > { %16623 = vrot.lane.b32.xlu0 %v16612_v49, %s17179_s14  ;;  %16618 = vrot.lane.b32.xlu1 %v16617_v53, %s17180_s18 }
 0xa07   : > { %16633 = vrot.lane.b32.xlu0 %v16612_v49, %s17181_s20  ;;  %16628 = vrot.lane.b32.xlu1 %v16617_v53, %s17179_s14 }
 0xa0b   : > { %16643 = vrot.lane.b32.xlu0 %v16612_v49, %s17182_s23  ;;  %16638 = vrot.lane.b32.xlu1 %v16617_v53, %s17181_s20 }
 0xa0f   : > { %16653 = vrot.lane.b32.xlu0 %v16612_v49, %s17183_s25  ;;  %16648 = vrot.lane.b32.xlu1 %v16617_v53, %s17182_s23 }
 0xa13   : > { %16663 = vrot.lane.b32.xlu0 %v16612_v49, %s17184_s19  ;;  %16658 = vrot.lane.b32.xlu1 %v16617_v53, %s17183_s25 }
 0xa17   : > { %16673 = vrot.lane.b32.xlu0 %v16612_v49, %s17185_s26  ;;  %16668 = vrot.lane.b32.xlu1 %v16617_v53, %s17184_s19 }
 0xa1b   : > { %16683 = vrot.lane.b32.xlu0 %v16612_v49, %s17186_s27  ;;  %16678 = vrot.lane.b32.xlu1 %v16617_v53, %s17185_s26  ;;  %v6916_v49 = vld [vmem:[#allocation2 + $0xd50] sm:$0xff] }
 0xa1f   : > { %16688 = vrot.lane.b32.xlu1 %v16617_v53, %s17186_s27 }
 0xa71   : > { %v16614_v55 = vpop.permute.xlu0 %16613 }
 0xa72   : > { %v16616_v56 = vunpack.i.h.bf16 %v16614_v55  ;;  %v16615_v57 = vunpack.i.l.bf16 %v16614_v55  ;;  %v6917_v55 = vld [vmem:[#allocation2 + $0xd58] sm:$0xff] }
 0xa74   : > { %v15330_v58 = vpack.c.bf16 %v16616_v56, %v16615_v57  ;;  %v7028_v56 = vld [vmem:[#allocation2 + $0xd60] sm:$0xff] }
 0xa75   : > { %v16624_v59 = vpop.permute.xlu0 %16623  ;;  %v16619_v60 = vpop.permute.xlu1 %16618 }
 0xa76   : > { %v16626_v61 = vunpack.i.h.bf16 %v16624_v59  ;;  %v16625_v62 = vunpack.i.l.bf16 %v16624_v59  ;;  %v16621_v63 = vunpack.i.h.bf16 %v16619_v60  ;;  %v16620_v0 = vunpack.i.l.bf16 %v16619_v60  ;;  %15331 = vmatprep.subr.bf16.mxu0 %v15330_v58  ;;  %v7029_v60 = vld [vmem:[#allocation2 + $0xd68] sm:$0xff] }
 0xa77   : > { %15333 = vmatpush3.bf16.msra.mxu0 %v15330_v58 }
 0xa78   : > { %v15334_v1 = vpack.c.bf16 %v16621_v63, %v16620_v0  ;;  %v15338_v3 = vpack.c.bf16 %v16626_v61, %v16625_v62  ;;  %v7030_v61 = vld [vmem:[#allocation2 + $0xd70] sm:$0xff] }
 0xa79   : > { %v16629_v2 = vpop.permute.xlu1 %16628  ;;  %v16634_v6 = vpop.permute.xlu0 %16633 }
 0xa7a   : > { %v16631_v4 = vunpack.i.h.bf16 %v16629_v2  ;;  %v16630_v5 = vunpack.i.l.bf16 %v16629_v2  ;;  %15335 = vmatprep.subr.bf16.mxu0 %v15334_v1  ;;  %v16636_v11 = vunpack.i.h.bf16 %v16634_v6  ;;  %v16635_v12 = vunpack.i.l.bf16 %v16634_v6  ;;  %v7031_v2 = vld [vmem:[#allocation2 + $0xd78] sm:$0xff] }
 0xa7b   : > { %15337 = vmatpush3.bf16.msra.mxu0 %v15334_v1 }
 0xa7c   : > { %15339 = vmatprep.subr.bf16.mxu0 %v15338_v3  ;;  %v15342_v13 = vpack.c.bf16 %v16631_v4, %v16630_v5  ;;  %v15346_v17 = vpack.c.bf16 %v16636_v11, %v16635_v12  ;;  %v7144_v11 = vld [vmem:[#allocation2 + $0xd90] sm:$0xff] }
 0xa7d   : > { %v16639_v14 = vpop.permute.xlu1 %16638  ;;  %v16644_v20 = vpop.permute.xlu0 %16643 }
 0xa7e   : > { %14207 = vmatmul.mubr.msk.f32.vlgmr.msra.gmra.mrb[16].mxu0 %vm276_vm0, %v6488_v9  ;;  %v16641_v18 = vunpack.i.h.bf16 %v16639_v14  ;;  %v16640_v19 = vunpack.i.l.bf16 %v16639_v14  ;;  %v16646_v23 = vunpack.i.h.bf16 %v16644_v20  ;;  %v16645_v24 = vunpack.i.l.bf16 %v16644_v20 }
 0xa7f   : > { %15341 = vmatpush3.bf16.msra.mxu0 %v15338_v3  ;;  %14209 = vmatprep.mubr.msk.f32.mxu0 %vm276_vm0, %v6489_v10  ;;  %v7142_v3 = vld [vmem:[#allocation2 + $0xd80] sm:$0xff]  ;;  %v7143_v10 = vld [vmem:[#allocation2 + $0xd88] sm:$0xff] }
 0xa80   : > { %15343 = vmatprep.subr.bf16.mxu0 %v15342_v13  ;;  %v15350_v25 = vpack.c.bf16 %v16641_v18, %v16640_v19  ;;  %v15354_v7 = vpack.c.bf16 %v16646_v23, %v16645_v24  ;;  %v7259_v24 = vld [vmem:[#allocation2 + $0xdb8] sm:$0xff] }
 0xa81   : > { %v16649_v26 = vpop.permute.xlu1 %16648  ;;  %v16654_v8 = vpop.permute.xlu0 %16653 }
 0xa82   : > { %14210 = vmatmul.mubr.msk.f32.gmra.mrb[18].mxu0 %vm276_vm0, %v6490_v15  ;;  %v16651_v29 = vunpack.i.h.bf16 %v16649_v26  ;;  %v16650_v30 = vunpack.i.l.bf16 %v16649_v26  ;;  %v16656_v39 = vunpack.i.h.bf16 %v16654_v8  ;;  %v16655_v40 = vunpack.i.l.bf16 %v16654_v8  ;;  %v7371_v26 = vld [vmem:[#allocation2 + $0xdc8] sm:$0xff]  ;;  %v7479_v8 = vld [vmem:[#allocation4 + $0xd8] sm:$0xff] }
 0xa83   : > { %15345 = vmatpush3.bf16.msra.mxu0 %v15342_v13  ;;  %14220 = vmatprep.mubr.msk.f32.mxu0 %vm276_vm0, %v6474_v16  ;;  %v7145_v16 = vld [vmem:[#allocation2 + $0xd98] sm:$0xff] }
 0xa84   : > { %15347 = vmatprep.subr.bf16.mxu0 %v15346_v17  ;;  %v15358_v33 = vpack.c.bf16 %v16651_v29, %v16650_v30  ;;  %v15370_v44 = vpack.c.bf16 %v16656_v39, %v16655_v40  ;;  %v7476_v29 = vld [vmem:[#allocation4 + $0xc0] sm:$0xff] }
 0xa85   : > { %v16659_v41 = vpop.permute.xlu1 %16658  ;;  %v16664_v47 = vpop.permute.xlu0 %16663 }
 0xa86   : > { %14221 = vmatmul.mubr.msk.f32.vlgmr.msra.gmra.mrb[16].mxu0 %vm276_vm0, %v6475_v21  ;;  %v16661_v45 = vunpack.i.h.bf16 %v16659_v41  ;;  %v16660_v46 = vunpack.i.l.bf16 %v16659_v41  ;;  %v16666_v50 = vunpack.i.h.bf16 %v16664_v47  ;;  %v16665_v51 = vunpack.i.l.bf16 %v16664_v47  ;;  %v7257_v21 = vld [vmem:[#allocation2 + $0xda8] sm:$0xff]  ;;  %v7488_v41 = vld [vmem:[#allocation6 + $0xd8] sm:$0xff] }
 0xa87   : > { %15349 = vmatpush3.bf16.msra.mxu0 %v15346_v17  ;;  %14223 = vmatprep.mubr.msk.f32.mxu0 %vm276_vm0, %v6476_v22  ;;  %v7256_v17 = vld [vmem:[#allocation2 + $0xda0] sm:$0xff]  ;;  %v7258_v22 = vld [vmem:[#allocation2 + $0xdb0] sm:$0xff] }
 0xa88   : > { %15351 = vmatprep.subr.bf16.mxu0 %v15350_v25  ;;  %v15378_v57 = vpack.c.bf16 %v16666_v50, %v16665_v51 }
 0xa89   : > { %v16669_v53 = vpop.permute.xlu1 %16668  ;;  %v16674_v59 = vpop.permute.xlu0 %16673 }
 0xa8a   : > { %14224 = vmatmul.mubr.msk.f32.gmra.mrb[18].mxu0 %vm276_vm0, %v6477_v27  ;;  %v16671_v58 = vunpack.i.h.bf16 %v16669_v53  ;;  %v16676_v62 = vunpack.i.h.bf16 %v16674_v59  ;;  %v16675_v63 = vunpack.i.l.bf16 %v16674_v59  ;;  %v7372_v27 = vld [vmem:[#allocation2 + $0xdd0] sm:$0xff] }
 0xa8b   : > { %15353 = vmatpush3.bf16.msra.mxu0 %v15350_v25  ;;  %14234 = vmatprep.mubr.msk.f32.mxu0 %vm276_vm0, %v6694_v28  ;;  %v7370_v25 = vld [vmem:[#allocation2 + $0xdc0] sm:$0xff]  ;;  %v7373_v28 = vld [vmem:[#allocation2 + $0xdd8] sm:$0xff] }
 0xa8c   : > { %15355 = vmatprep.subr.bf16.mxu0 %v15354_v7  ;;  %v15386_v4 = vpack.c.bf16 %v16676_v62, %v16675_v63 }
 0xa8d   : > { %v16679_v1 = vpop.permute.xlu1 %16678  ;;  %v16684_v9 = vpop.permute.xlu0 %16683 }
 0xa8e   : > { %14235 = vmatmul.mubr.msk.f32.vlgmr.msra.gmra.mrb[16].mxu0 %vm276_vm0, %v6695_v31  ;;  %v16681_v5 = vunpack.i.h.bf16 %v16679_v1  ;;  %v16680_v6 = vunpack.i.l.bf16 %v16679_v1  ;;  %v16686_v12 = vunpack.i.h.bf16 %v16684_v9  ;;  %v16685_v13 = vunpack.i.l.bf16 %v16684_v9  ;;  %v7486_v31 = vld [vmem:[#allocation6 + $0xc8] sm:$0xff] }
 0xa8f   : > { %15357 = vmatpush3.bf16.msra.mxu0 %v15354_v7  ;;  %14237 = vmatprep.mubr.msk.f32.mxu0 %vm276_vm0, %v6696_v32  ;;  %v7477_v7 = vld [vmem:[#allocation4 + $0xc8] sm:$0xff] }
 0xa90   : > { %15359 = vmatprep.subr.bf16.mxu0 %v15358_v33  ;;  %v15390_v14 = vpack.c.bf16 %v16681_v5, %v16680_v6  ;;  %v15394_v18 = vpack.c.bf16 %v16686_v12, %v16685_v13 }
 0xa91   : > { %v16689_v15 = vpop.permute.xlu1 %16688 }
 0xa92   : > { %14238 = vmatmul.mubr.msk.f32.gmra.mrb[18].mxu0 %vm276_vm0, %v6697_v34  ;;  %v16691_v19 = vunpack.i.h.bf16 %v16689_v15  ;;  %v16690_v20 = vunpack.i.l.bf16 %v16689_v15  ;;  %v7485_v34 = vld [vmem:[#allocation6 + $0xc0] sm:$0xff]  ;;  %v7524_v15 = vld [vmem:[#allocation2 + $0xf08] sm:$0xff] }
 0xa93   : > { %15361 = vmatpush3.bf16.msra.mxu0 %v15358_v33  ;;  %14248 = vmatprep.mubr.msk.f32.mxu0 %vm276_vm0, %v6808_v35 }
 0xa94   : > { %15363 = vmatprep.subr.bf16.mxu0 %v17747_v52  ;;  %v15398_v23 = vpack.c.bf16 %v16691_v19, %v16690_v20 }
 0xa96   : > { %14249 = vmatmul.mubr.msk.f32.vlgmr.msra.gmra.mrb[16].mxu0 %vm276_vm0, %v6809_v36 }
 0xa97   : > { %15365 = vmatpush3.bf16.msra.mxu0 %v17747_v52  ;;  %14251 = vmatprep.mubr.msk.f32.mxu0 %vm276_vm0, %v6810_v37  ;;  %v15374_v52 = vpack.c.bf16 %v16661_v45, %v16660_v46  ;;  %v7478_v37 = vld [vmem:[#allocation4 + $0xd0] sm:$0xff] }
 0xa98   : > { %15367 = vmatprep.subr.bf16.mxu0 %v17751_v54  ;;  %v7487_v45 = vld [vmem:[#allocation6 + $0xd0] sm:$0xff] }
 0xa9a   : > { %14252 = vmatmul.mubr.msk.f32.gmra.mrb[18].mxu0 %vm276_vm0, %v6811_v43 }
 0xa9b   : > { %15369 = vmatpush3.bf16.msra.mxu0 %v17751_v54  ;;  %14262 = vmatprep.mubr.msk.f32.mxu0 %vm276_vm0, %v6914_v38  ;;  %v16670_v54 = vunpack.i.l.bf16 %v16669_v53  ;;  %v7523_v53 = vld [vmem:[#allocation2 + $0xf00] sm:$0xff] }
 0xa9c   : > { %15371 = vmatprep.subr.bf16.mxu0 %v15370_v44  ;;  %14332 = vmatprep.mubr.msk.f32.mxu1 %vm276_vm0, %v7523_v53  ;;  %v7958_v53 = vld [vmem:[#allocation2 + $0xf60] sm:$0xff] }
 0xa9d   : > { %v15382_v0 = vpack.c.bf16 %v16671_v58, %v16670_v54 }
 0xa9e   : > { %14263 = vmatmul.mubr.msk.f32.vlgmr.msra.gmra.mrb[16].mxu0 %vm276_vm0, %v6915_v48 }
 0xa9f   : > { %15373 = vmatpush3.bf16.msra.mxu0 %v15370_v44  ;;  %14265 = vmatprep.mubr.msk.f32.mxu0 %vm276_vm0, %v6916_v49 }
 0xaa0   : > { %15375 = vmatprep.subr.bf16.mxu0 %v15374_v52 }
 0xaa2   : > { %14266 = vmatmul.mubr.msk.f32.gmra.mrb[18].mxu0 %vm276_vm0, %v6917_v55 }
 0xaa3   : > { %15377 = vmatpush3.bf16.msra.mxu0 %v15374_v52  ;;  %14276 = vmatprep.mubr.msk.f32.mxu0 %vm276_vm0, %v7028_v56 }
 0xaa4   : > { %15379 = vmatprep.subr.bf16.mxu0 %v15378_v57 }
 0xaa6   : > { %14277 = vmatmul.mubr.msk.f32.vlgmr.msra.gmra.mrb[16].mxu0 %vm276_vm0, %v7029_v60 }
 0xaa7   : > { %15381 = vmatpush3.bf16.msra.mxu0 %v15378_v57  ;;  %14279 = vmatprep.mubr.msk.f32.mxu0 %vm276_vm0, %v7030_v61 }
 0xaa8   : > { %15383 = vmatprep.subr.bf16.mxu0 %v15382_v0 }
 0xaaa   : > { %14280 = vmatmul.mubr.msk.f32.gmra.mrb[18].mxu0 %vm276_vm0, %v7031_v2 }
 0xaab   : > { %15385 = vmatpush3.bf16.msra.mxu0 %v15382_v0  ;;  %14290 = vmatprep.mubr.msk.f32.mxu0 %vm276_vm0, %v7142_v3 }
 0xaac   : > { %15387 = vmatprep.subr.bf16.mxu0 %v15386_v4 }
 0xaae   : > { %14291 = vmatmul.mubr.msk.f32.vlgmr.msra.gmra.mrb[16].mxu0 %vm276_vm0, %v7143_v10 }
 0xaaf   : > { %15389 = vmatpush3.bf16.msra.mxu0 %v15386_v4  ;;  %14293 = vmatprep.mubr.msk.f32.mxu0 %vm276_vm0, %v7144_v11 }
 0xab0   : > { %15391 = vmatprep.subr.bf16.mxu0 %v15390_v14 }
 0xab2   : > { %14294 = vmatmul.mubr.msk.f32.gmra.mrb[18].mxu0 %vm276_vm0, %v7145_v16  ;;  %v7525_v16 = vld [vmem:[#allocation2 + $0xf10] sm:$0xff] }
 0xab3   : > { %15393 = vmatpush3.bf16.msra.mxu0 %v15390_v14  ;;  %14304 = vmatprep.mubr.msk.f32.mxu0 %vm276_vm0, %v7256_v17 }
 0xab4   : > { %15395 = vmatprep.subr.bf16.mxu0 %v15394_v18 }
 0xab6   : > { %14305 = vmatmul.mubr.msk.f32.vlgmr.msra.gmra.mrb[16].mxu0 %vm276_vm0, %v7257_v21  ;;  %v7526_v21 = vld [vmem:[#allocation2 + $0xf18] sm:$0xff] }
 0xab7   : > { %15397 = vmatpush3.bf16.msra.mxu0 %v15394_v18  ;;  %14307 = vmatprep.mubr.msk.f32.mxu0 %vm276_vm0, %v7258_v22  ;;  %v7510_v22 = vld [vmem:[#allocation2 + $0xee0] sm:$0xff] }
 0xab8   : > { %15399 = vmatprep.subr.bf16.mxu0 %v15398_v23 }
 0xaba   : > { %14308 = vmatmul.mubr.msk.f32.gmra.mrb[18].mxu0 %vm276_vm0, %v7259_v24 }
 0xabb   : > { %15401 = vmatpush3.bf16.msra.mxu0 %v15398_v23  ;;  %14318 = vmatprep.mubr.msk.f32.mxu0 %vm276_vm0, %v7370_v25 }
 0xabe   : > { %14319 = vmatmul.mubr.msk.f32.vlgmr.msra.gmra.mrb[16].mxu0 %vm276_vm0, %v7371_v26 }
 0xabf   : > { %14321 = vmatprep.mubr.msk.f32.mxu0 %vm276_vm0, %v7372_v27  ;;  %v7511_v27 = vld [vmem:[#allocation2 + $0xee8] sm:$0xff] }
 0xac2   : > { %14322 = vmatmul.mubr.msk.f32.gmra.mrb[18].mxu0 %vm276_vm0, %v7373_v28  ;;  %v7512_v28 = vld [vmem:[#allocation2 + $0xef0] sm:$0xff] }
 0xb91   : > { %v14320_v30 = vpop.f32.mrb[16].mxu0 }
 0xb92   : > { %v7481_v32 = vmul.f32 %v14320_v30, %v7477_v7  ;;  %v7452_v33 = vpop.f32.mrb[17].mxu0 }
 0xb93   : > { %v7480_v35 = vmul.f32 %v7476_v29, %v7452_v33  ;;  %v7730_v33 = vld [vmem:[#allocation2 + $0xf20] sm:$0xff] }
 0xb94   : > { %v7490_v36 = vadd.f32 %v7486_v31, %v7481_v32  ;;  %v7513_v32 = vld [vmem:[#allocation2 + $0xef8] sm:$0xff] }
 0xb95   : > { %v7489_v39 = vadd.f32 %v7485_v34, %v7480_v35  ;;  %v14323_v40 = vpop.f32.mrb[18].mxu0 }
 0xb96   : > { %v7494_v43 = vmax.f32 %v7490_v36, 0.0  ;;  %v7483_v38 = vmul.f32 %v14323_v40, %v7479_v8  ;;  %v7462_v44 = vpop.f32.mrb[19].mxu0 }
 0xb97   : > { %v7493_v46 = vmax.f32 %v7489_v39, 0.0  ;;  %v7482_v47 = vmul.f32 %v7478_v37, %v7462_v44  ;;  %v7731_v37 = vld [vmem:[#allocation2 + $0xf28] sm:$0xff]  ;;  %v7732_v39 = vld [vmem:[#allocation2 + $0xf30] sm:$0xff]  ;;  %v7733_v44 = vld [vmem:[#allocation2 + $0xf38] sm:$0xff] }
 0xb98   : > { %v7498_v48 = vmul.f32 %v17427_v42, %v7494_v43  ;;  %v7492_v49 = vadd.f32 %v7488_v41, %v7483_v38 }
 0xb99   : > { %v7497_v50 = vmul.f32 %v17427_v42, %v7493_v46  ;;  %v7491_v51 = vadd.f32 %v7487_v45, %v7482_v47  ;;  %v7844_v45 = vld [vmem:[#allocation2 + $0xf40] sm:$0xff] }
 0xb9a   : > { %v7496_v52 = vmax.f32 %v7492_v49, 0.0  ;;  %v7845_v49 = vld [vmem:[#allocation2 + $0xf48] sm:$0xff] }
 0xb9b   : > { %v7495_v55 = vmax.f32 %v7491_v51, 0.0  ;;  %v16692_v56 = vpack.i.bf16 %v7498_v48, %v7497_v50  ;;  %v17811_v54 = vpack.c.bf16 %v7498_v48, %v7497_v50  ;;  %v7846_v50 = vld [vmem:[#allocation2 + $0xf50] sm:$0xff] }
 0xb9c   : > { %v7500_v57 = vmul.f32 %v17427_v42, %v7496_v52  ;;  %v7847_v52 = vld [vmem:[#allocation2 + $0xf58] sm:$0xff] }
 0xb9d   : > { %v7499_v58 = vmul.f32 %v17427_v42, %v7495_v55  ;;  %16693 = vrot.lane.b32.xlu0 %v16692_v56, %s17179_s14 }
 0xb9f   : > { %v16697_v59 = vpack.i.bf16 %v7500_v57, %v7499_v58  ;;  %v17815_v60 = vpack.c.bf16 %v7500_v57, %v7499_v58  ;;  %v7960_v57 = vld [vmem:[#allocation2 + $0xf70] sm:$0xff] }
 0xba1   : > { %16703 = vrot.lane.b32.xlu0 %v16692_v56, %s17177_s8  ;;  %16698 = vrot.lane.b32.xlu1 %v16697_v59, %s17179_s14 }
 0xba5   : > { %16713 = vrot.lane.b32.xlu0 %v16692_v56, %s17180_s18  ;;  %16708 = vrot.lane.b32.xlu1 %v16697_v59, %s17177_s8 }
 0xba9   : > { %16723 = vrot.lane.b32.xlu0 %v16692_v56, %s17181_s20  ;;  %16718 = vrot.lane.b32.xlu1 %v16697_v59, %s17180_s18 }
 0xbad   : > { %16733 = vrot.lane.b32.xlu0 %v16692_v56, %s17182_s23  ;;  %16728 = vrot.lane.b32.xlu1 %v16697_v59, %s17181_s20 }
 0xbb1   : > { %16743 = vrot.lane.b32.xlu0 %v16692_v56, %s17183_s25  ;;  %16738 = vrot.lane.b32.xlu1 %v16697_v59, %s17182_s23 }
 0xbb5   : > { %16753 = vrot.lane.b32.xlu0 %v16692_v56, %s17184_s19  ;;  %16748 = vrot.lane.b32.xlu1 %v16697_v59, %s17183_s25 }
 0xbb9   : > { %16763 = vrot.lane.b32.xlu0 %v16692_v56, %s17185_s26  ;;  %16758 = vrot.lane.b32.xlu1 %v16697_v59, %s17184_s19 }
 0xbbd   : > { %16773 = vrot.lane.b32.xlu0 %v16692_v56, %s17186_s27  ;;  %16768 = vrot.lane.b32.xlu1 %v16697_v59, %s17185_s26 }
 0xbc1   : > { %16783 = vrot.lane.b32.xlu0 %v16692_v56, %s17187_s28  ;;  %16778 = vrot.lane.b32.xlu1 %v16697_v59, %s17186_s27  ;;  %v7959_v56 = vld [vmem:[#allocation2 + $0xf68] sm:$0xff] }
 0xbc5   : > { %16788 = vrot.lane.b32.xlu1 %v16697_v59, %s17187_s28 }
 0xc0f   : > { %v16694_v61 = vpop.permute.xlu0 %16693 }
 0xc10   : > { %v16696_v62 = vunpack.i.h.bf16 %v16694_v61  ;;  %v16695_v63 = vunpack.i.l.bf16 %v16694_v61 }
 0xc12   : > { %v15402_v0 = vpack.c.bf16 %v16696_v62, %v16695_v63  ;;  %v7961_v62 = vld [vmem:[#allocation2 + $0xf78] sm:$0xff]  ;;  %v8064_v63 = vld [vmem:[#allocation2 + $0xf80] sm:$0xff] }
 0xc13   : > { %v16704_v1 = vpop.permute.xlu0 %16703  ;;  %v16699_v2 = vpop.permute.xlu1 %16698 }
 0xc14   : > { %v16706_v3 = vunpack.i.h.bf16 %v16704_v1  ;;  %v16705_v4 = vunpack.i.l.bf16 %v16704_v1  ;;  %v16701_v5 = vunpack.i.h.bf16 %v16699_v2  ;;  %v16700_v6 = vunpack.i.l.bf16 %v16699_v2  ;;  %15403 = vmatprep.subr.bf16.mxu1 %v15402_v0 }
 0xc15   : > { %15405 = vmatpush3.bf16.msra.mxu1 %v15402_v0 }
 0xc16   : > { %v15406_v9 = vpack.c.bf16 %v16701_v5, %v16700_v6  ;;  %v15410_v11 = vpack.c.bf16 %v16706_v3, %v16705_v4  ;;  %v8065_v4 = vld [vmem:[#allocation2 + $0xf88] sm:$0xff]  ;;  %v8066_v5 = vld [vmem:[#allocation2 + $0xf90] sm:$0xff] }
 0xc17   : > { %v16709_v10 = vpop.permute.xlu1 %16708  ;;  %v16714_v14 = vpop.permute.xlu0 %16713 }
 0xc18   : > { %v16711_v12 = vunpack.i.h.bf16 %v16709_v10  ;;  %v16710_v13 = vunpack.i.l.bf16 %v16709_v10  ;;  %15407 = vmatprep.subr.bf16.mxu1 %v15406_v9  ;;  %v16716_v17 = vunpack.i.h.bf16 %v16714_v14  ;;  %v16715_v18 = vunpack.i.l.bf16 %v16714_v14 }
 0xc19   : > { %15409 = vmatpush3.bf16.msra.mxu1 %v15406_v9 }
 0xc1a   : > { %15411 = vmatprep.subr.bf16.mxu1 %v15410_v11  ;;  %v15414_v19 = vpack.c.bf16 %v16711_v12, %v16710_v13  ;;  %v15418_v23 = vpack.c.bf16 %v16716_v17, %v16715_v18  ;;  %v8178_v12 = vld [vmem:[#allocation2 + $0xfa0] sm:$0xff]  ;;  %v8180_v17 = vld [vmem:[#allocation2 + $0xfb0] sm:$0xff] }
 0xc1b   : > { %v16719_v20 = vpop.permute.xlu1 %16718  ;;  %v16724_v26 = vpop.permute.xlu0 %16723 }
 0xc1c   : > { %14333 = vmatmul.mubr.msk.f32.vlgmr.msra.gmra.mrb[12].mxu1 %vm276_vm0, %v7524_v15  ;;  %v16721_v24 = vunpack.i.h.bf16 %v16719_v20  ;;  %v16720_v25 = vunpack.i.l.bf16 %v16719_v20  ;;  %v16726_v7 = vunpack.i.h.bf16 %v16724_v26  ;;  %v16725_v29 = vunpack.i.l.bf16 %v16724_v26 }
 0xc1d   : > { %15413 = vmatpush3.bf16.msra.mxu1 %v15410_v11  ;;  %14335 = vmatprep.mubr.msk.f32.mxu1 %vm276_vm0, %v7525_v16  ;;  %v8067_v11 = vld [vmem:[#allocation2 + $0xf98] sm:$0xff]  ;;  %v8179_v16 = vld [vmem:[#allocation2 + $0xfa8] sm:$0xff] }
 0xc1e   : > { %15415 = vmatprep.subr.bf16.mxu1 %v15414_v19  ;;  %v15422_v30 = vpack.c.bf16 %v16721_v24, %v16720_v25  ;;  %v15426_v34 = vpack.c.bf16 %v16726_v7, %v16725_v29  ;;  %v8294_v7 = vld [vmem:[#allocation2 + $0xfd0] sm:$0xff] }
 0xc1f   : > { %v16729_v31 = vpop.permute.xlu1 %16728  ;;  %v16734_v36 = vpop.permute.xlu0 %16733 }
 0xc20   : > { %14336 = vmatmul.mubr.msk.f32.gmra.mrb[14].mxu1 %vm276_vm0, %v7526_v21  ;;  %v16731_v35 = vunpack.i.h.bf16 %v16729_v31  ;;  %v16730_v8 = vunpack.i.l.bf16 %v16729_v31  ;;  %v16736_v40 = vunpack.i.h.bf16 %v16734_v36  ;;  %v16735_v41 = vunpack.i.l.bf16 %v16734_v36 }
 0xc21   : > { %15417 = vmatpush3.bf16.msra.mxu1 %v15414_v19  ;;  %14346 = vmatprep.mubr.msk.f32.mxu1 %vm276_vm0, %v7510_v22  ;;  %v8181_v22 = vld [vmem:[#allocation2 + $0xfb8] sm:$0xff] }
 0xc22   : > { %15419 = vmatprep.subr.bf16.mxu1 %v15418_v23  ;;  %v15430_v43 = vpack.c.bf16 %v16731_v35, %v16730_v8  ;;  %v15434_v46 = vpack.c.bf16 %v16736_v40, %v16735_v41  ;;  %v8408_v40 = vld [vmem:[#allocation2 + $0xff0] sm:$0xff] }
 0xc23   : > { %v16739_v38 = vpop.permute.xlu1 %16738  ;;  %v16744_v55 = vpop.permute.xlu0 %16743 }
 0xc24   : > { %14347 = vmatmul.mubr.msk.f32.vlgmr.msra.gmra.mrb[12].mxu1 %vm276_vm0, %v7511_v27  ;;  %v16741_v47 = vunpack.i.h.bf16 %v16739_v38  ;;  %v16740_v48 = vunpack.i.l.bf16 %v16739_v38  ;;  %v16746_v58 = vunpack.i.h.bf16 %v16744_v55  ;;  %v16745_v59 = vunpack.i.l.bf16 %v16744_v55  ;;  %v8634_v55 = vld [vmem:[#allocation2 + $0x1020] sm:$0xff] }
 0xc25   : > { %15421 = vmatpush3.bf16.msra.mxu1 %v15418_v23  ;;  %14349 = vmatprep.mubr.msk.f32.mxu1 %vm276_vm0, %v7512_v28  ;;  %v8292_v23 = vld [vmem:[#allocation2 + $0xfc0] sm:$0xff]  ;;  %v8293_v28 = vld [vmem:[#allocation2 + $0xfc8] sm:$0xff] }
 0xc26   : > { %15423 = vmatprep.subr.bf16.mxu1 %v15422_v30  ;;  %v15438_v51 = vpack.c.bf16 %v16741_v47, %v16740_v48  ;;  %v15450_v0 = vpack.c.bf16 %v16746_v58, %v16745_v59  ;;  %v8637_v58 = vld [vmem:[#allocation2 + $0x1038] sm:$0xff]  ;;  %v8741_v59 = vld [vmem:[#allocation4 + $0xe8] sm:$0xff] }
 0xc27   : > { %v16749_v61 = vpop.permute.xlu1 %16748  ;;  %v16754_v3 = vpop.permute.xlu0 %16753 }
 0xc28   : > { %14350 = vmatmul.mubr.msk.f32.gmra.mrb[14].mxu1 %vm276_vm0, %v7513_v32  ;;  %v16751_v1 = vunpack.i.h.bf16 %v16749_v61  ;;  %v16750_v2 = vunpack.i.l.bf16 %v16749_v61  ;;  %v16755_v6 = vunpack.i.l.bf16 %v16754_v3  ;;  %v8740_v61 = vld [vmem:[#allocation4 + $0xe0] sm:$0xff] }
 0xc29   : > { %15425 = vmatpush3.bf16.msra.mxu1 %v15422_v30  ;;  %14360 = vmatprep.mubr.msk.f32.mxu1 %vm276_vm0, %v7730_v33  ;;  %v8295_v33 = vld [vmem:[#allocation2 + $0xfd8] sm:$0xff] }
 0xc2a   : > { %15427 = vmatprep.subr.bf16.mxu1 %v15426_v34  ;;  %v15454_v9 = vpack.c.bf16 %v16751_v1, %v16750_v2  ;;  %v8749_v2 = vld [vmem:[#allocation6 + $0xe0] sm:$0xff] }
 0xc2b   : > { %v16759_v10 = vpop.permute.xlu1 %16758  ;;  %v16764_v15 = vpop.permute.xlu0 %16763 }
 0xc2c   : > { %14361 = vmatmul.mubr.msk.f32.vlgmr.msra.gmra.mrb[12].mxu1 %vm276_vm0, %v7731_v37  ;;  %v16761_v14 = vunpack.i.h.bf16 %v16759_v10  ;;  %v16766_v18 = vunpack.i.h.bf16 %v16764_v15  ;;  %v16765_v19 = vunpack.i.l.bf16 %v16764_v15 }
 0xc2d   : > { %15429 = vmatpush3.bf16.msra.mxu1 %v15426_v34  ;;  %14363 = vmatprep.mubr.msk.f32.mxu1 %vm276_vm0, %v7732_v39  ;;  %v8406_v34 = vld [vmem:[#allocation2 + $0xfe0] sm:$0xff]  ;;  %v8407_v39 = vld [vmem:[#allocation2 + $0xfe8] sm:$0xff] }
 0xc2e   : > { %15431 = vmatprep.subr.bf16.mxu1 %v15430_v43  ;;  %v15466_v24 = vpack.c.bf16 %v16766_v18, %v16765_v19 }
 0xc2f   : > { %v16769_v21 = vpop.permute.xlu1 %16768  ;;  %v16774_v27 = vpop.permute.xlu0 %16773 }
 0xc30   : > { %14364 = vmatmul.mubr.msk.f32.gmra.mrb[14].mxu1 %vm276_vm0, %v7733_v44  ;;  %v16771_v25 = vunpack.i.h.bf16 %v16769_v21  ;;  %v16770_v26 = vunpack.i.l.bf16 %v16769_v21  ;;  %v16776_v29 = vunpack.i.h.bf16 %v16774_v27  ;;  %v16775_v30 = vunpack.i.l.bf16 %v16774_v27  ;;  %v8787_v21 = vld [vmem:[#allocation2 + $0x1120] sm:$0xff] }
 0xc31   : > { %15433 = vmatpush3.bf16.msra.mxu1 %v15430_v43  ;;  %14374 = vmatprep.mubr.msk.f32.mxu1 %vm276_vm0, %v7844_v45  ;;  %v8409_v45 = vld [vmem:[#allocation2 + $0xff8] sm:$0xff] }
 0xc32   : > { %15435 = vmatprep.subr.bf16.mxu1 %v15434_v46  ;;  %v15470_v31 = vpack.c.bf16 %v16771_v25, %v16770_v26  ;;  %v15474_v35 = vpack.c.bf16 %v16776_v29, %v16775_v30  ;;  %14486 = vmatprep.mubr.msk.f32.mxu0 %vm276_vm0, %v8787_v21 }
 0xc33   : > { %v16779_v32 = vpop.permute.xlu1 %16778  ;;  %v16784_v37 = vpop.permute.xlu0 %16783 }
 0xc34   : > { %14375 = vmatmul.mubr.msk.f32.vlgmr.msra.gmra.mrb[12].mxu1 %vm276_vm0, %v7845_v49  ;;  %v16781_v8 = vunpack.i.h.bf16 %v16779_v32  ;;  %v16780_v36 = vunpack.i.l.bf16 %v16779_v32  ;;  %v16786_v41 = vunpack.i.h.bf16 %v16784_v37  ;;  %v16785_v43 = vunpack.i.l.bf16 %v16784_v37 }
 0xc35   : > { %15437 = vmatpush3.bf16.msra.mxu1 %v15434_v46  ;;  %14377 = vmatprep.mubr.msk.f32.mxu1 %vm276_vm0, %v7846_v50  ;;  %v8520_v46 = vld [vmem:[#allocation2 + $0x1000] sm:$0xff]  ;;  %v8521_v50 = vld [vmem:[#allocation2 + $0x1008] sm:$0xff] }
 0xc36   : > { %15439 = vmatprep.subr.bf16.mxu1 %v15438_v51  ;;  %v15478_v38 = vpack.c.bf16 %v16781_v8, %v16780_v36  ;;  %v15482_v47 = vpack.c.bf16 %v16786_v41, %v16785_v43 }
 0xc37   : > { %v16789_v44 = vpop.permute.xlu1 %16788 }
 0xc38   : > { %14378 = vmatmul.mubr.msk.f32.gmra.mrb[14].mxu1 %vm276_vm0, %v7847_v52  ;;  %v16791_v48 = vunpack.i.h.bf16 %v16789_v44  ;;  %v16790_v49 = vunpack.i.l.bf16 %v16789_v44  ;;  %v8788_v44 = vld [vmem:[#allocation2 + $0x1128] sm:$0xff] }
 0xc39   : > { %15441 = vmatpush3.bf16.msra.mxu1 %v15438_v51  ;;  %14388 = vmatprep.mubr.msk.f32.mxu1 %vm276_vm0, %v7958_v53  ;;  %v8522_v51 = vld [vmem:[#allocation2 + $0x1010] sm:$0xff]  ;;  %v8523_v53 = vld [vmem:[#allocation2 + $0x1018] sm:$0xff] }
 0xc3a   : > { %15443 = vmatprep.subr.bf16.mxu1 %v17811_v54  ;;  %v15486_v52 = vpack.c.bf16 %v16791_v48, %v16790_v49 }
 0xc3c   : > { %14389 = vmatmul.mubr.msk.f32.vlgmr.msra.gmra.mrb[12].mxu1 %vm276_vm0, %v7959_v56  ;;  %v8635_v56 = vld [vmem:[#allocation2 + $0x1028] sm:$0xff] }
 0xc3d   : > { %15445 = vmatpush3.bf16.msra.mxu1 %v17811_v54  ;;  %14391 = vmatprep.mubr.msk.f32.mxu1 %vm276_vm0, %v7960_v57  ;;  %v16756_v54 = vunpack.i.h.bf16 %v16754_v3  ;;  %v8636_v57 = vld [vmem:[#allocation2 + $0x1030] sm:$0xff] }
 0xc3e   : > { %15447 = vmatprep.subr.bf16.mxu1 %v17815_v60 }
 0xc3f   : > { %v15458_v13 = vpack.c.bf16 %v16756_v54, %v16755_v6  ;;  %v8742_v54 = vld [vmem:[#allocation4 + $0xf0] sm:$0xff] }
 0xc40   : > { %14392 = vmatmul.mubr.msk.f32.gmra.mrb[14].mxu1 %vm276_vm0, %v7961_v62 }
 0xc41   : > { %15449 = vmatpush3.bf16.msra.mxu1 %v17815_v60  ;;  %14402 = vmatprep.mubr.msk.f32.mxu1 %vm276_vm0, %v8064_v63  ;;  %v16760_v60 = vunpack.i.l.bf16 %v16759_v10  ;;  %v8750_v63 = vld [vmem:[#allocation6 + $0xe8] sm:$0xff]  ;;  %v8752_v10 = vld [vmem:[#allocation6 + $0xf8] sm:$0xff] }
 0xc42   : > { %15451 = vmatprep.subr.bf16.mxu1 %v15450_v0 }
 0xc43   : > { %v15462_v20 = vpack.c.bf16 %v16761_v14, %v16760_v60  ;;  %v8751_v14 = vld [vmem:[#allocation6 + $0xf0] sm:$0xff] }
 0xc44   : > { %14403 = vmatmul.mubr.msk.f32.vlgmr.msra.gmra.mrb[12].mxu1 %vm276_vm0, %v8065_v4  ;;  %v8743_v4 = vld [vmem:[#allocation4 + $0xf8] sm:$0xff] }
 0xc45   : > { %15453 = vmatpush3.bf16.msra.mxu1 %v15450_v0  ;;  %14405 = vmatprep.mubr.msk.f32.mxu1 %vm276_vm0, %v8066_v5 }
 0xc46   : > { %15455 = vmatprep.subr.bf16.mxu1 %v15454_v9 }
 0xc48   : > { %14406 = vmatmul.mubr.msk.f32.gmra.mrb[14].mxu1 %vm276_vm0, %v8067_v11 }
 0xc49   : > { %15457 = vmatpush3.bf16.msra.mxu1 %v15454_v9  ;;  %14416 = vmatprep.mubr.msk.f32.mxu1 %vm276_vm0, %v8178_v12 }
 0xc4a   : > { %15459 = vmatprep.subr.bf16.mxu1 %v15458_v13 }
 0xc4c   : > { %14417 = vmatmul.mubr.msk.f32.vlgmr.msra.gmra.mrb[12].mxu1 %vm276_vm0, %v8179_v16 }
 0xc4d   : > { %15461 = vmatpush3.bf16.msra.mxu1 %v15458_v13  ;;  %14419 = vmatprep.mubr.msk.f32.mxu1 %vm276_vm0, %v8180_v17 }
 0xc4e   : > { %15463 = vmatprep.subr.bf16.mxu1 %v15462_v20 }
 0xc50   : > { %14420 = vmatmul.mubr.msk.f32.gmra.mrb[14].mxu1 %vm276_vm0, %v8181_v22 }
 0xc51   : > { %15465 = vmatpush3.bf16.msra.mxu1 %v15462_v20  ;;  %14430 = vmatprep.mubr.msk.f32.mxu1 %vm276_vm0, %v8292_v23 }
 0xc52   : > { %15467 = vmatprep.subr.bf16.mxu1 %v15466_v24 }
 0xc54   : > { %14431 = vmatmul.mubr.msk.f32.vlgmr.msra.gmra.mrb[12].mxu1 %vm276_vm0, %v8293_v28 }
 0xc55   : > { %15469 = vmatpush3.bf16.msra.mxu1 %v15466_v24  ;;  %14433 = vmatprep.mubr.msk.f32.mxu1 %vm276_vm0, %v8294_v7 }
 0xc56   : > { %15471 = vmatprep.subr.bf16.mxu1 %v15470_v31 }
 0xc58   : > { %14434 = vmatmul.mubr.msk.f32.gmra.mrb[14].mxu1 %vm276_vm0, %v8295_v33 }
 0xc59   : > { %15473 = vmatpush3.bf16.msra.mxu1 %v15470_v31  ;;  %14444 = vmatprep.mubr.msk.f32.mxu1 %vm276_vm0, %v8406_v34 }
 0xc5a   : > { %15475 = vmatprep.subr.bf16.mxu1 %v15474_v35 }
 0xc5c   : > { %14445 = vmatmul.mubr.msk.f32.vlgmr.msra.gmra.mrb[12].mxu1 %vm276_vm0, %v8407_v39 }
 0xc5d   : > { %15477 = vmatpush3.bf16.msra.mxu1 %v15474_v35  ;;  %14447 = vmatprep.mubr.msk.f32.mxu1 %vm276_vm0, %v8408_v40 }
 0xc5e   : > { %15479 = vmatprep.subr.bf16.mxu1 %v15478_v38 }
 0xc60   : > { %14448 = vmatmul.mubr.msk.f32.gmra.mrb[14].mxu1 %vm276_vm0, %v8409_v45  ;;  %v8789_v45 = vld [vmem:[#allocation2 + $0x1130] sm:$0xff] }
 0xc61   : > { %15481 = vmatpush3.bf16.msra.mxu1 %v15478_v38  ;;  %14458 = vmatprep.mubr.msk.f32.mxu1 %vm276_vm0, %v8520_v46 }
 0xc62   : > { %15483 = vmatprep.subr.bf16.mxu1 %v15482_v47 }
 0xc64   : > { %14459 = vmatmul.mubr.msk.f32.vlgmr.msra.gmra.mrb[12].mxu1 %vm276_vm0, %v8521_v50  ;;  %v8790_v50 = vld [vmem:[#allocation2 + $0x1138] sm:$0xff] }
 0xc65   : > { %15485 = vmatpush3.bf16.msra.mxu1 %v15482_v47  ;;  %14461 = vmatprep.mubr.msk.f32.mxu1 %vm276_vm0, %v8522_v51  ;;  %v8774_v51 = vld [vmem:[#allocation2 + $0x1100] sm:$0xff] }
 0xc66   : > { %15487 = vmatprep.subr.bf16.mxu1 %v15486_v52 }
 0xc68   : > { %14462 = vmatmul.mubr.msk.f32.gmra.mrb[14].mxu1 %vm276_vm0, %v8523_v53 }
 0xc69   : > { %15489 = vmatpush3.bf16.msra.mxu1 %v15486_v52  ;;  %14472 = vmatprep.mubr.msk.f32.mxu1 %vm276_vm0, %v8634_v55 }
 0xc6c   : > { %14473 = vmatmul.mubr.msk.f32.vlgmr.msra.gmra.mrb[12].mxu1 %vm276_vm0, %v8635_v56 }
 0xc6d   : > { %14475 = vmatprep.mubr.msk.f32.mxu1 %vm276_vm0, %v8636_v57  ;;  %v8775_v57 = vld [vmem:[#allocation2 + $0x1108] sm:$0xff] }
 0xc70   : > { %14476 = vmatmul.mubr.msk.f32.gmra.mrb[14].mxu1 %vm276_vm0, %v8637_v58  ;;  %v8776_v58 = vld [vmem:[#allocation2 + $0x1110] sm:$0xff] }
 0xd3f   : > { %v14474_v62 = vpop.f32.mrb[12].mxu1 }
 0xd40   : > { %v8745_v0 = vmul.f32 %v14474_v62, %v8741_v59  ;;  %v8716_v1 = vpop.f32.mrb[13].mxu1 }
 0xd41   : > { %v8744_v3 = vmul.f32 %v8740_v61, %v8716_v1  ;;  %v8994_v1 = vld [vmem:[#allocation2 + $0x1140] sm:$0xff] }
 0xd42   : > { %v8754_v5 = vadd.f32 %v8750_v63, %v8745_v0  ;;  %v8777_v0 = vld [vmem:[#allocation2 + $0x1118] sm:$0xff] }
 0xd43   : > { %v8753_v6 = vadd.f32 %v8749_v2, %v8744_v3  ;;  %v14477_v9 = vpop.f32.mrb[14].mxu1 }
 0xd44   : > { %v8758_v11 = vmax.f32 %v8754_v5, 0.0  ;;  %v8747_v12 = vmul.f32 %v14477_v9, %v8743_v4  ;;  %v8726_v13 = vpop.f32.mrb[15].mxu1 }
 0xd45   : > { %v8757_v60 = vmax.f32 %v8753_v6, 0.0  ;;  %v8746_v15 = vmul.f32 %v8742_v54, %v8726_v13  ;;  %v8995_v54 = vld [vmem:[#allocation2 + $0x1148] sm:$0xff]  ;;  %v8996_v6 = vld [vmem:[#allocation2 + $0x1150] sm:$0xff]  ;;  %v8997_v13 = vld [vmem:[#allocation2 + $0x1158] sm:$0xff] }
 0xd46   : > { %v8762_v16 = vmul.f32 %v17427_v42, %v8758_v11  ;;  %v8756_v17 = vadd.f32 %v8752_v10, %v8747_v12 }
 0xd47   : > { %v8761_v18 = vmul.f32 %v17427_v42, %v8757_v60  ;;  %v8755_v19 = vadd.f32 %v8751_v14, %v8746_v15  ;;  %v9108_v14 = vld [vmem:[#allocation2 + $0x1160] sm:$0xff] }
 0xd48   : > { %v8760_v20 = vmax.f32 %v8756_v17, 0.0 }
 0xd49   : > { %v8759_v22 = vmax.f32 %v8755_v19, 0.0  ;;  %v16792_v23 = vpack.i.bf16 %v8762_v16, %v8761_v18  ;;  %v17887_v26 = vpack.c.bf16 %v8762_v16, %v8761_v18  ;;  %v9109_v18 = vld [vmem:[#allocation2 + $0x1168] sm:$0xff]  ;;  %v9110_v19 = vld [vmem:[#allocation2 + $0x1170] sm:$0xff] }
 0xd4a   : > { %v8764_v24 = vmul.f32 %v17427_v42, %v8760_v20 }
 0xd4b   : > { %v8763_v25 = vmul.f32 %v17427_v42, %v8759_v22  ;;  %16793 = vrot.lane.b32.xlu0 %v16792_v23, %s17177_s8 }
 0xd4d   : > { %v16797_v27 = vpack.i.bf16 %v8764_v24, %v8763_v25  ;;  %v17891_v28 = vpack.c.bf16 %v8764_v24, %v8763_v25  ;;  %v9111_v24 = vld [vmem:[#allocation2 + $0x1178] sm:$0xff]  ;;  %v9222_v25 = vld [vmem:[#allocation2 + $0x1180] sm:$0xff] }
 0xd4f   : > { %16803 = vrot.lane.b32.xlu0 %v16792_v23, %s17178_s9  ;;  %16798 = vrot.lane.b32.xlu1 %v16797_v27, %s17177_s8 }
 0xd53   : > { %16813 = vrot.lane.b32.xlu0 %v16792_v23, %s17179_s14  ;;  %16808 = vrot.lane.b32.xlu1 %v16797_v27, %s17178_s9 }
 0xd57   : > { %16823 = vrot.lane.b32.xlu0 %v16792_v23, %s17180_s18  ;;  %16818 = vrot.lane.b32.xlu1 %v16797_v27, %s17179_s14 }
 0xd5b   : > { %16833 = vrot.lane.b32.xlu0 %v16792_v23, %s17181_s20  ;;  %16828 = vrot.lane.b32.xlu1 %v16797_v27, %s17180_s18 }
 0xd5f   : > { %16843 = vrot.lane.b32.xlu0 %v16792_v23, %s17182_s23  ;;  %16838 = vrot.lane.b32.xlu1 %v16797_v27, %s17181_s20 }
 0xd63   : > { %16853 = vrot.lane.b32.xlu0 %v16792_v23, %s17183_s25  ;;  %16848 = vrot.lane.b32.xlu1 %v16797_v27, %s17182_s23 }
 0xd67   : > { %16863 = vrot.lane.b32.xlu0 %v16792_v23, %s17184_s19  ;;  %16858 = vrot.lane.b32.xlu1 %v16797_v27, %s17183_s25 }
 0xd6b   : > { %16873 = vrot.lane.b32.xlu0 %v16792_v23, %s17185_s26  ;;  %16868 = vrot.lane.b32.xlu1 %v16797_v27, %s17184_s19 }
 0xd6f   : > { %16883 = vrot.lane.b32.xlu0 %v16792_v23, %s17186_s27  ;;  %16878 = vrot.lane.b32.xlu1 %v16797_v27, %s17185_s26 }
 0xd73   : > { %16893 = vrot.lane.b32.xlu0 %v16792_v23, %s17187_s28  ;;  %16888 = vrot.lane.b32.xlu1 %v16797_v27, %s17186_s27 }
 0xd77   : > { %16903 = vrot.lane.b32.xlu0 %v16792_v23, %s17188_s29  ;;  %16898 = vrot.lane.b32.xlu1 %v16797_v27, %s17187_s28 }
 0xd7b   : > { %16908 = vrot.lane.b32.xlu1 %v16797_v27, %s17188_s29 }
 0xdbd   : > { %v16794_v7 = vpop.permute.xlu0 %16793 }
 0xdbe   : > { %v16796_v29 = vunpack.i.h.bf16 %v16794_v7  ;;  %v16795_v30 = vunpack.i.l.bf16 %v16794_v7 }
 0xdc0   : > { %v15490_v31 = vpack.c.bf16 %v16796_v29, %v16795_v30  ;;  %v9223_v30 = vld [vmem:[#allocation2 + $0x1188] sm:$0xff] }
 0xdc1   : > { %v16804_v32 = vpop.permute.xlu0 %16803  ;;  %v16799_v33 = vpop.permute.xlu1 %16798 }
 0xdc2   : > { %v16806_v34 = vunpack.i.h.bf16 %v16804_v32  ;;  %v16805_v35 = vunpack.i.l.bf16 %v16804_v32  ;;  %v16801_v8 = vunpack.i.h.bf16 %v16799_v33  ;;  %v16800_v36 = vunpack.i.l.bf16 %v16799_v33  ;;  %15491 = vmatprep.subr.bf16.mxu0 %v15490_v31  ;;  %v9225_v33 = vld [vmem:[#allocation2 + $0x1198] sm:$0xff] }
 0xdc3   : > { %15493 = vmatpush3.bf16.msra.mxu0 %v15490_v31  ;;  %v9224_v31 = vld [vmem:[#allocation2 + $0x1190] sm:$0xff] }
 0xdc4   : > { %v15494_v37 = vpack.c.bf16 %v16801_v8, %v16800_v36  ;;  %v15498_v40 = vpack.c.bf16 %v16806_v34, %v16805_v35  ;;  %v9336_v34 = vld [vmem:[#allocation2 + $0x11a0] sm:$0xff]  ;;  %v9337_v8 = vld [vmem:[#allocation2 + $0x11a8] sm:$0xff]  ;;  %v9338_v36 = vld [vmem:[#allocation2 + $0x11b0] sm:$0xff] }
 0xdc5   : > { %v16809_v39 = vpop.permute.xlu1 %16808  ;;  %v16814_v38 = vpop.permute.xlu0 %16813 }
 0xdc6   : > { %v16811_v41 = vunpack.i.h.bf16 %v16809_v39  ;;  %v16810_v43 = vunpack.i.l.bf16 %v16809_v39  ;;  %15495 = vmatprep.subr.bf16.mxu0 %v15494_v37  ;;  %v16816_v46 = vunpack.i.h.bf16 %v16814_v38  ;;  %v16815_v47 = vunpack.i.l.bf16 %v16814_v38 }
 0xdc7   : > { %15497 = vmatpush3.bf16.msra.mxu0 %v15494_v37 }
 0xdc8   : > { %15499 = vmatprep.subr.bf16.mxu0 %v15498_v40  ;;  %v15502_v48 = vpack.c.bf16 %v16811_v41, %v16810_v43  ;;  %v15506_v52 = vpack.c.bf16 %v16816_v46, %v16815_v47  ;;  %v9339_v41 = vld [vmem:[#allocation2 + $0x11b8] sm:$0xff]  ;;  %v9442_v43 = vld [vmem:[#allocation2 + $0x11c0] sm:$0xff]  ;;  %v9443_v47 = vld [vmem:[#allocation2 + $0x11c8] sm:$0xff] }
 0xdc9   : > { %v16819_v49 = vpop.permute.xlu1 %16818  ;;  %v16824_v56 = vpop.permute.xlu0 %16823 }
 0xdca   : > { %14487 = vmatmul.mubr.msk.f32.vlgmr.msra.gmra.mrb[20].mxu0 %vm276_vm0, %v8788_v44  ;;  %v16821_v53 = vunpack.i.h.bf16 %v16819_v49  ;;  %v16820_v55 = vunpack.i.l.bf16 %v16819_v49  ;;  %v16826_v59 = vunpack.i.h.bf16 %v16824_v56  ;;  %v16825_v61 = vunpack.i.l.bf16 %v16824_v56 }
 0xdcb   : > { %15501 = vmatpush3.bf16.msra.mxu0 %v15498_v40  ;;  %14489 = vmatprep.mubr.msk.f32.mxu0 %vm276_vm0, %v8789_v45 }
 0xdcc   : > { %15503 = vmatprep.subr.bf16.mxu0 %v15502_v48  ;;  %v15510_v62 = vpack.c.bf16 %v16821_v53, %v16820_v55  ;;  %v15514_v2 = vpack.c.bf16 %v16826_v59, %v16825_v61  ;;  %v9556_v53 = vld [vmem:[#allocation2 + $0x11e0] sm:$0xff]  ;;  %v9558_v59 = vld [vmem:[#allocation2 + $0x11f0] sm:$0xff] }
 0xdcd   : > { %v16829_v63 = vpop.permute.xlu1 %16828  ;;  %v16834_v5 = vpop.permute.xlu0 %16833 }
 0xdce   : > { %14490 = vmatmul.mubr.msk.f32.gmra.mrb[22].mxu0 %vm276_vm0, %v8790_v50  ;;  %v16831_v3 = vunpack.i.h.bf16 %v16829_v63  ;;  %v16830_v4 = vunpack.i.l.bf16 %v16829_v63  ;;  %v16836_v9 = vunpack.i.h.bf16 %v16834_v5  ;;  %v16835_v10 = vunpack.i.l.bf16 %v16834_v5 }
 0xdcf   : > { %15505 = vmatpush3.bf16.msra.mxu0 %v15502_v48  ;;  %14500 = vmatprep.mubr.msk.f32.mxu0 %vm276_vm0, %v8774_v51  ;;  %v9444_v48 = vld [vmem:[#allocation2 + $0x11d0] sm:$0xff] }
 0xdd0   : > { %15507 = vmatprep.subr.bf16.mxu0 %v15506_v52  ;;  %v15518_v11 = vpack.c.bf16 %v16831_v3, %v16830_v4  ;;  %v15522_v60 = vpack.c.bf16 %v16836_v9, %v16835_v10  ;;  %v9672_v9 = vld [vmem:[#allocation2 + $0x1210] sm:$0xff] }
 0xdd1   : > { %v16839_v12 = vpop.permute.xlu1 %16838  ;;  %v16844_v17 = vpop.permute.xlu0 %16843 }
 0xdd2   : > { %14501 = vmatmul.mubr.msk.f32.vlgmr.msra.gmra.mrb[20].mxu0 %vm276_vm0, %v8775_v57  ;;  %v16841_v15 = vunpack.i.h.bf16 %v16839_v12  ;;  %v16840_v16 = vunpack.i.l.bf16 %v16839_v12  ;;  %v16846_v20 = vunpack.i.h.bf16 %v16844_v17  ;;  %v16845_v21 = vunpack.i.l.bf16 %v16844_v17 }
 0xdd3   : > { %15509 = vmatpush3.bf16.msra.mxu0 %v15506_v52  ;;  %14503 = vmatprep.mubr.msk.f32.mxu0 %vm276_vm0, %v8776_v58  ;;  %v9445_v52 = vld [vmem:[#allocation2 + $0x11d8] sm:$0xff]  ;;  %v9557_v58 = vld [vmem:[#allocation2 + $0x11e8] sm:$0xff] }
 0xdd4   : > { %15511 = vmatprep.subr.bf16.mxu0 %v15510_v62  ;;  %v15526_v22 = vpack.c.bf16 %v16841_v15, %v16840_v16  ;;  %v15530_v27 = vpack.c.bf16 %v16846_v20, %v16845_v21  ;;  %v9786_v20 = vld [vmem:[#allocation2 + $0x1230] sm:$0xff] }
 0xdd5   : > { %v16849_v23 = vpop.permute.xlu1 %16848  ;;  %v16854_v35 = vpop.permute.xlu0 %16853 }
 0xdd6   : > { %14504 = vmatmul.mubr.msk.f32.gmra.mrb[22].mxu0 %vm276_vm0, %v8777_v0  ;;  %v16851_v7 = vunpack.i.h.bf16 %v16849_v23  ;;  %v16850_v29 = vunpack.i.l.bf16 %v16849_v23  ;;  %v16856_v37 = vunpack.i.h.bf16 %v16854_v35  ;;  %v16855_v39 = vunpack.i.l.bf16 %v16854_v35 }
 0xdd7   : > { %15513 = vmatpush3.bf16.msra.mxu0 %v15510_v62  ;;  %14514 = vmatprep.mubr.msk.f32.mxu0 %vm276_vm0, %v8994_v1  ;;  %v9559_v1 = vld [vmem:[#allocation2 + $0x11f8] sm:$0xff] }
 0xdd8   : > { %15515 = vmatprep.subr.bf16.mxu0 %v15514_v2  ;;  %v15534_v32 = vpack.c.bf16 %v16851_v7, %v16850_v29  ;;  %v15546_v38 = vpack.c.bf16 %v16856_v37, %v16855_v39  ;;  %v9901_v37 = vld [vmem:[#allocation2 + $0x1258] sm:$0xff]  ;;  %v10012_v39 = vld [vmem:[#allocation2 + $0x1260] sm:$0xff] }
 0xdd9   : > { %v16859_v40 = vpop.permute.xlu1 %16858  ;;  %v16864_v46 = vpop.permute.xlu0 %16863 }
 0xdda   : > { %14515 = vmatmul.mubr.msk.f32.vlgmr.msra.gmra.mrb[20].mxu0 %vm276_vm0, %v8995_v54  ;;  %v16861_v44 = vunpack.i.h.bf16 %v16859_v40  ;;  %v16860_v45 = vunpack.i.l.bf16 %v16859_v40  ;;  %v16865_v49 = vunpack.i.l.bf16 %v16864_v46 }
 0xddb   : > { %15517 = vmatpush3.bf16.msra.mxu0 %v15514_v2  ;;  %14517 = vmatprep.mubr.msk.f32.mxu0 %vm276_vm0, %v8996_v6  ;;  %v9670_v2 = vld [vmem:[#allocation2 + $0x1200] sm:$0xff]  ;;  %v9671_v6 = vld [vmem:[#allocation2 + $0x1208] sm:$0xff] }
 0xddc   : > { %15519 = vmatprep.subr.bf16.mxu0 %v15518_v11  ;;  %v15550_v50 = vpack.c.bf16 %v16861_v44, %v16860_v45  ;;  %v10014_v44 = vld [vmem:[#allocation2 + $0x1270] sm:$0xff] }
 0xddd   : > { %v16869_v51 = vpop.permute.xlu1 %16868  ;;  %v16874_v57 = vpop.permute.xlu0 %16873 }
 0xdde   : > { %14518 = vmatmul.mubr.msk.f32.gmra.mrb[22].mxu0 %vm276_vm0, %v8997_v13  ;;  %v16871_v56 = vunpack.i.h.bf16 %v16869_v51  ;;  %v16876_v61 = vunpack.i.h.bf16 %v16874_v57  ;;  %v16875_v62 = vunpack.i.l.bf16 %v16874_v57 }
 0xddf   : > { %15521 = vmatpush3.bf16.msra.mxu0 %v15518_v11  ;;  %14528 = vmatprep.mubr.msk.f32.mxu0 %vm276_vm0, %v9108_v14  ;;  %v9673_v14 = vld [vmem:[#allocation2 + $0x1218] sm:$0xff] }
 0xde0   : > { %15523 = vmatprep.subr.bf16.mxu0 %v15522_v60  ;;  %v15562_v3 = vpack.c.bf16 %v16876_v61, %v16875_v62  ;;  %v10234_v61 = vld [vmem:[#allocation4 + $0x110] sm:$0xff] }
 0xde1   : > { %v16879_v0 = vpop.permute.xlu1 %16878  ;;  %v16884_v54 = vpop.permute.xlu0 %16883 }
 0xde2   : > { %14529 = vmatmul.mubr.msk.f32.vlgmr.msra.gmra.mrb[20].mxu0 %vm276_vm0, %v9109_v18  ;;  %v16881_v4 = vunpack.i.h.bf16 %v16879_v0  ;;  %v16880_v5 = vunpack.i.l.bf16 %v16879_v0  ;;  %v16886_v10 = vunpack.i.h.bf16 %v16884_v54  ;;  %v16885_v11 = vunpack.i.l.bf16 %v16884_v54  ;;  %v10244_v0 = vld [vmem:[#allocation6 + $0x118] sm:$0xff] }
 0xde3   : > { %15525 = vmatpush3.bf16.msra.mxu0 %v15522_v60  ;;  %14531 = vmatprep.mubr.msk.f32.mxu0 %vm276_vm0, %v9110_v19  ;;  %v9784_v60 = vld [vmem:[#allocation2 + $0x1220] sm:$0xff]  ;;  %v9785_v19 = vld [vmem:[#allocation2 + $0x1228] sm:$0xff] }
 0xde4   : > { %15527 = vmatprep.subr.bf16.mxu0 %v15526_v22  ;;  %v15566_v12 = vpack.c.bf16 %v16881_v4, %v16880_v5  ;;  %v15570_v15 = vpack.c.bf16 %v16886_v10, %v16885_v11  ;;  %v10243_v4 = vld [vmem:[#allocation6 + $0x110] sm:$0xff] }
 0xde5   : > { %v16889_v13 = vpop.permute.xlu1 %16888  ;;  %v16894_v18 = vpop.permute.xlu0 %16893 }
 0xde6   : > { %14532 = vmatmul.mubr.msk.f32.gmra.mrb[22].mxu0 %vm276_vm0, %v9111_v24  ;;  %v16891_v16 = vunpack.i.h.bf16 %v16889_v13  ;;  %v16890_v17 = vunpack.i.l.bf16 %v16889_v13  ;;  %v16896_v21 = vunpack.i.h.bf16 %v16894_v18  ;;  %v10279_v13 = vld [vmem:[#allocation2 + $0x1340] sm:$0xff] }
 0xde7   : > { %15529 = vmatpush3.bf16.msra.mxu0 %v15526_v22  ;;  %14542 = vmatprep.mubr.msk.f32.mxu0 %vm276_vm0, %v9222_v25  ;;  %v16895_v22 = vunpack.i.l.bf16 %v16894_v18  ;;  %v9787_v25 = vld [vmem:[#allocation2 + $0x1238] sm:$0xff] }
 0xde8   : > { %15531 = vmatprep.subr.bf16.mxu0 %v15530_v27  ;;  %v15574_v23 = vpack.c.bf16 %v16891_v16, %v16890_v17  ;;  %14668 = vmatprep.mubr.msk.f32.mxu1 %vm276_vm0, %v10279_v13 }
 0xde9   : > { %v16899_v24 = vpop.permute.xlu1 %16898  ;;  %v15578_v7 = vpack.c.bf16 %v16896_v21, %v16895_v22 }
 0xdea   : > { %14543 = vmatmul.mubr.msk.f32.vlgmr.msra.gmra.mrb[20].mxu0 %vm276_vm0, %v9223_v30  ;;  %v16901_v29 = vunpack.i.h.bf16 %v16899_v24  ;;  %v16900_v30 = vunpack.i.l.bf16 %v16899_v24 }
 0xdeb   : > { %15533 = vmatpush3.bf16.msra.mxu0 %v15530_v27  ;;  %14545 = vmatprep.mubr.msk.f32.mxu0 %vm276_vm0, %v9224_v31  ;;  %v9898_v27 = vld [vmem:[#allocation2 + $0x1240] sm:$0xff]  ;;  %v16904_v31 = vpop.permute.xlu0 %16903 }
 0xdec   : > { %15535 = vmatprep.subr.bf16.mxu0 %v15534_v32  ;;  %v16905_v35 = vunpack.i.l.bf16 %v16904_v31 }
 0xdee   : > { %14546 = vmatmul.mubr.msk.f32.gmra.mrb[22].mxu0 %vm276_vm0, %v9225_v33  ;;  %v9900_v33 = vld [vmem:[#allocation2 + $0x1250] sm:$0xff] }
 0xdef   : > { %15537 = vmatpush3.bf16.msra.mxu0 %v15534_v32  ;;  %14556 = vmatprep.mubr.msk.f32.mxu0 %vm276_vm0, %v9336_v34  ;;  %v9899_v32 = vld [vmem:[#allocation2 + $0x1248] sm:$0xff]  ;;  %v16906_v34 = vunpack.i.h.bf16 %v16904_v31 }
 0xdf0   : > { %15539 = vmatprep.subr.bf16.mxu0 %v17887_v26 }
 0xdf1   : > { %v15586_v40 = vpack.c.bf16 %v16906_v34, %v16905_v35 }
 0xdf2   : > { %14557 = vmatmul.mubr.msk.f32.vlgmr.msra.gmra.mrb[20].mxu0 %vm276_vm0, %v9337_v8  ;;  %v15582_v8 = vpack.c.bf16 %v16901_v29, %v16900_v30 }
 0xdf3   : > { %15541 = vmatpush3.bf16.msra.mxu0 %v17887_v26  ;;  %14559 = vmatprep.mubr.msk.f32.mxu0 %vm276_vm0, %v9338_v36  ;;  %v16866_v26 = vunpack.i.h.bf16 %v16864_v46  ;;  %v16909_v36 = vpop.permute.xlu1 %16908  ;;  %v10015_v46 = vld [vmem:[#allocation2 + $0x1278] sm:$0xff] }
 0xdf4   : > { %15543 = vmatprep.subr.bf16.mxu0 %v17891_v28 }
 0xdf5   : > { %v15554_v55 = vpack.c.bf16 %v16866_v26, %v16865_v49  ;;  %v10128_v26 = vld [vmem:[#allocation2 + $0x1290] sm:$0xff]  ;;  %v10129_v49 = vld [vmem:[#allocation2 + $0x1298] sm:$0xff] }
 0xdf6   : > { %14560 = vmatmul.mubr.msk.f32.gmra.mrb[22].mxu0 %vm276_vm0, %v9339_v41  ;;  %v16911_v41 = vunpack.i.h.bf16 %v16909_v36 }
 0xdf7   : > { %15545 = vmatpush3.bf16.msra.mxu0 %v17891_v28  ;;  %14570 = vmatprep.mubr.msk.f32.mxu0 %vm276_vm0, %v9442_v43  ;;  %v16870_v28 = vunpack.i.l.bf16 %v16869_v51  ;;  %v16910_v43 = vunpack.i.l.bf16 %v16909_v36  ;;  %v10232_v51 = vld [vmem:[#allocation4 + $0x100] sm:$0xff]  ;;  %v10280_v36 = vld [vmem:[#allocation2 + $0x1348] sm:$0xff] }
 0xdf8   : > { %15547 = vmatprep.subr.bf16.mxu0 %v15546_v38 }
 0xdf9   : > { %v15558_v63 = vpack.c.bf16 %v16871_v56, %v16870_v28  ;;  %v15590_v45 = vpack.c.bf16 %v16911_v41, %v16910_v43  ;;  %v10241_v28 = vld [vmem:[#allocation6 + $0x100] sm:$0xff] }
 0xdfa   : > { %14571 = vmatmul.mubr.msk.f32.vlgmr.msra.gmra.mrb[20].mxu0 %vm276_vm0, %v9443_v47  ;;  %v10126_v47 = vld [vmem:[#allocation2 + $0x1280] sm:$0xff] }
 0xdfb   : > { %15549 = vmatpush3.bf16.msra.mxu0 %v15546_v38  ;;  %14573 = vmatprep.mubr.msk.f32.mxu0 %vm276_vm0, %v9444_v48  ;;  %v10013_v38 = vld [vmem:[#allocation2 + $0x1268] sm:$0xff] }
 0xdfc   : > { %15551 = vmatprep.subr.bf16.mxu0 %v15550_v50  ;;  %v10127_v48 = vld [vmem:[#allocation2 + $0x1288] sm:$0xff] }
 0xdfe   : > { %14574 = vmatmul.mubr.msk.f32.gmra.mrb[22].mxu0 %vm276_vm0, %v9445_v52 }
 0xdff   : > { %15553 = vmatpush3.bf16.msra.mxu0 %v15550_v50  ;;  %14584 = vmatprep.mubr.msk.f32.mxu0 %vm276_vm0, %v9556_v53  ;;  %v10233_v50 = vld [vmem:[#allocation4 + $0x108] sm:$0xff] }
 0xe00   : > { %15555 = vmatprep.subr.bf16.mxu0 %v15554_v55  ;;  %v10242_v53 = vld [vmem:[#allocation6 + $0x108] sm:$0xff] }
 0xe02   : > { %14585 = vmatmul.mubr.msk.f32.vlgmr.msra.gmra.mrb[20].mxu0 %vm276_vm0, %v9557_v58  ;;  %v10235_v58 = vld [vmem:[#allocation4 + $0x118] sm:$0xff] }
 0xe03   : > { %15557 = vmatpush3.bf16.msra.mxu0 %v15554_v55  ;;  %14587 = vmatprep.mubr.msk.f32.mxu0 %vm276_vm0, %v9558_v59 }
 0xe04   : > { %15559 = vmatprep.subr.bf16.mxu0 %v15558_v63 }
 0xe06   : > { %14588 = vmatmul.mubr.msk.f32.gmra.mrb[22].mxu0 %vm276_vm0, %v9559_v1 }
 0xe07   : > { %15561 = vmatpush3.bf16.msra.mxu0 %v15558_v63  ;;  %14598 = vmatprep.mubr.msk.f32.mxu0 %vm276_vm0, %v9670_v2 }
 0xe08   : > { %15563 = vmatprep.subr.bf16.mxu0 %v15562_v3 }
 0xe0a   : > { %14599 = vmatmul.mubr.msk.f32.vlgmr.msra.gmra.mrb[20].mxu0 %vm276_vm0, %v9671_v6 }
 0xe0b   : > { %15565 = vmatpush3.bf16.msra.mxu0 %v15562_v3  ;;  %14601 = vmatprep.mubr.msk.f32.mxu0 %vm276_vm0, %v9672_v9 }
 0xe0c   : > { %15567 = vmatprep.subr.bf16.mxu0 %v15566_v12 }
 0xe0e   : > { %14602 = vmatmul.mubr.msk.f32.gmra.mrb[22].mxu0 %vm276_vm0, %v9673_v14 }
 0xe0f   : > { %15569 = vmatpush3.bf16.msra.mxu0 %v15566_v12  ;;  %14612 = vmatprep.mubr.msk.f32.mxu0 %vm276_vm0, %v9784_v60 }
 0xe10   : > { %15571 = vmatprep.subr.bf16.mxu0 %v15570_v15 }
 0xe12   : > { %14613 = vmatmul.mubr.msk.f32.vlgmr.msra.gmra.mrb[20].mxu0 %vm276_vm0, %v9785_v19 }
 0xe13   : > { %15573 = vmatpush3.bf16.msra.mxu0 %v15570_v15  ;;  %14615 = vmatprep.mubr.msk.f32.mxu0 %vm276_vm0, %v9786_v20 }
 0xe14   : > { %15575 = vmatprep.subr.bf16.mxu0 %v15574_v23 }
 0xe16   : > { %14616 = vmatmul.mubr.msk.f32.gmra.mrb[22].mxu0 %vm276_vm0, %v9787_v25 }
 0xe17   : > { %15577 = vmatpush3.bf16.msra.mxu0 %v15574_v23  ;;  %14626 = vmatprep.mubr.msk.f32.mxu0 %vm276_vm0, %v9898_v27 }
 0xe18   : > { %15579 = vmatprep.subr.bf16.mxu0 %v15578_v7 }
 0xe1a   : > { %14627 = vmatmul.mubr.msk.f32.vlgmr.msra.gmra.mrb[20].mxu0 %vm276_vm0, %v9899_v32 }
 0xe1b   : > { %15581 = vmatpush3.bf16.msra.mxu0 %v15578_v7  ;;  %14629 = vmatprep.mubr.msk.f32.mxu0 %vm276_vm0, %v9900_v33 }
 0xe1c   : > { %15583 = vmatprep.subr.bf16.mxu0 %v15582_v8 }
 0xe1e   : > { %14630 = vmatmul.mubr.msk.f32.gmra.mrb[22].mxu0 %vm276_vm0, %v9901_v37  ;;  %v10281_v37 = vld [vmem:[#allocation2 + $0x1350] sm:$0xff] }
 0xe1f   : > { %15585 = vmatpush3.bf16.msra.mxu0 %v15582_v8  ;;  %14640 = vmatprep.mubr.msk.f32.mxu0 %vm276_vm0, %v10012_v39 }
 0xe20   : > { %15587 = vmatprep.subr.bf16.mxu0 %v15586_v40 }
 0xe22   : > { %14641 = vmatmul.mubr.msk.f32.vlgmr.msra.gmra.mrb[20].mxu0 %vm276_vm0, %v10013_v38  ;;  %v10282_v38 = vld [vmem:[#allocation2 + $0x1358] sm:$0xff] }
 0xe23   : > { %15589 = vmatpush3.bf16.msra.mxu0 %v15586_v40  ;;  %14643 = vmatprep.mubr.msk.f32.mxu0 %vm276_vm0, %v10014_v44  ;;  %v10266_v44 = vld [vmem:[#allocation2 + $0x1320] sm:$0xff] }
 0xe24   : > { %15591 = vmatprep.subr.bf16.mxu0 %v15590_v45 }
 0xe26   : > { %14644 = vmatmul.mubr.msk.f32.gmra.mrb[22].mxu0 %vm276_vm0, %v10015_v46 }
 0xe27   : > { %15593 = vmatpush3.bf16.msra.mxu0 %v15590_v45  ;;  %14654 = vmatprep.mubr.msk.f32.mxu0 %vm276_vm0, %v10126_v47 }
 0xe2a   : > { %14655 = vmatmul.mubr.msk.f32.vlgmr.msra.gmra.mrb[20].mxu0 %vm276_vm0, %v10127_v48 }
 0xe2b   : > { %14657 = vmatprep.mubr.msk.f32.mxu0 %vm276_vm0, %v10128_v26  ;;  %v10267_v26 = vld [vmem:[#allocation2 + $0x1328] sm:$0xff] }
 0xe2e   : > { %14658 = vmatmul.mubr.msk.f32.gmra.mrb[22].mxu0 %vm276_vm0, %v10129_v49  ;;  %v10268_v49 = vld [vmem:[#allocation2 + $0x1330] sm:$0xff] }
 0xefd   : > { %v14656_v52 = vpop.f32.mrb[20].mxu0 }
 0xefe   : > { %v10237_v55 = vmul.f32 %v14656_v52, %v10233_v50  ;;  %v10208_v56 = vpop.f32.mrb[21].mxu0 }
 0xeff   : > { %v10236_v57 = vmul.f32 %v10232_v51, %v10208_v56  ;;  %v10480_v56 = vld [vmem:[#allocation2 + $0x1360] sm:$0xff] }
 0xf00   : > { %v10246_v59 = vadd.f32 %v10242_v53, %v10237_v55  ;;  %v10269_v55 = vld [vmem:[#allocation2 + $0x1338] sm:$0xff] }
 0xf01   : > { %v10245_v62 = vadd.f32 %v10241_v28, %v10236_v57  ;;  %v14659_v63 = vpop.f32.mrb[22].mxu0 }
 0xf02   : > { %v10250_v1 = vmax.f32 %v10246_v59, 0.0  ;;  %v10239_v2 = vmul.f32 %v14659_v63, %v10235_v58  ;;  %v10218_v3 = vpop.f32.mrb[23].mxu0 }
 0xf03   : > { %v10249_v5 = vmax.f32 %v10245_v62, 0.0  ;;  %v10238_v54 = vmul.f32 %v10234_v61, %v10218_v3  ;;  %v10481_v61 = vld [vmem:[#allocation2 + $0x1368] sm:$0xff]  ;;  %v10482_v62 = vld [vmem:[#allocation2 + $0x1370] sm:$0xff]  ;;  %v10483_v3 = vld [vmem:[#allocation2 + $0x1378] sm:$0xff] }
 0xf04   : > { %v10254_v6 = vmul.f32 %v17427_v42, %v10250_v1  ;;  %v10248_v9 = vadd.f32 %v10244_v0, %v10239_v2 }
 0xf05   : > { %v10253_v10 = vmul.f32 %v17427_v42, %v10249_v5  ;;  %v10247_v11 = vadd.f32 %v10243_v4, %v10238_v54  ;;  %v10588_v4 = vld [vmem:[#allocation2 + $0x1380] sm:$0xff] }
 0xf06   : > { %v10252_v12 = vmax.f32 %v10248_v9, 0.0 }
 0xf07   : > { %v10251_v14 = vmax.f32 %v10247_v11, 0.0  ;;  %v16912_v60 = vpack.i.bf16 %v10254_v6, %v10253_v10  ;;  %v17974_v18 = vpack.c.bf16 %v10254_v6, %v10253_v10  ;;  %v10589_v10 = vld [vmem:[#allocation2 + $0x1388] sm:$0xff]  ;;  %v10590_v11 = vld [vmem:[#allocation2 + $0x1390] sm:$0xff] }
 0xf08   : > { %v10256_v15 = vmul.f32 %v17427_v42, %v10252_v12 }
 0xf09   : > { %v10255_v16 = vmul.f32 %v17427_v42, %v10251_v14  ;;  %16913 = vrot.lane.b32.xlu0 %v16912_v60, %s17190_s5 }
 0xf0b   : > { %v16917_v17 = vpack.i.bf16 %v10256_v15, %v10255_v16  ;;  %v17976_v19 = vpack.c.bf16 %v10256_v15, %v10255_v16  ;;  %v10591_v15 = vld [vmem:[#allocation2 + $0x1398] sm:$0xff]  ;;  %v10696_v16 = vld [vmem:[#allocation2 + $0x13a0] sm:$0xff] }
 0xf0d   : > { %16923 = vrot.lane.b32.xlu0 %v16912_v60, %s17191_s6  ;;  %16918 = vrot.lane.b32.xlu1 %v16917_v17, %s17190_s5 }
 0xf11   : > { %16933 = vrot.lane.b32.xlu0 %v16912_v60, %s17178_s9  ;;  %16928 = vrot.lane.b32.xlu1 %v16917_v17, %s17191_s6 }
 0xf15   : > { %16943 = vrot.lane.b32.xlu0 %v16912_v60, %s17177_s8  ;;  %16938 = vrot.lane.b32.xlu1 %v16917_v17, %s17178_s9 }
 0xf19   : > { %16953 = vrot.lane.b32.xlu0 %v16912_v60, %s17179_s14  ;;  %16948 = vrot.lane.b32.xlu1 %v16917_v17, %s17177_s8 }
 0xf1d   : > { %16963 = vrot.lane.b32.xlu0 %v16912_v60, %s17180_s18  ;;  %16958 = vrot.lane.b32.xlu1 %v16917_v17, %s17179_s14 }
 0xf21   : > { %16973 = vrot.lane.b32.xlu0 %v16912_v60, %s17181_s20  ;;  %16968 = vrot.lane.b32.xlu1 %v16917_v17, %s17180_s18 }
 0xf25   : > { %16983 = vrot.lane.b32.xlu0 %v16912_v60, %s17182_s23  ;;  %16978 = vrot.lane.b32.xlu1 %v16917_v17, %s17181_s20 }
 0xf29   : > { %16993 = vrot.lane.b32.xlu0 %v16912_v60, %s17183_s25  ;;  %16988 = vrot.lane.b32.xlu1 %v16917_v17, %s17182_s23 }
 0xf2d   : > { %17003 = vrot.lane.b32.xlu0 %v16912_v60, %s17184_s19  ;;  %16998 = vrot.lane.b32.xlu1 %v16917_v17, %s17183_s25 }
 0xf31   : > { %17013 = vrot.lane.b32.xlu0 %v16912_v60, %s17185_s26  ;;  %17008 = vrot.lane.b32.xlu1 %v16917_v17, %s17184_s19 }
 0xf35   : > { %17023 = vrot.lane.b32.xlu0 %v16912_v60, %s17186_s27  ;;  %17018 = vrot.lane.b32.xlu1 %v16917_v17, %s17185_s26 }
 0xf39   : > { %17033 = vrot.lane.b32.xlu0 %v16912_v60, %s17187_s28  ;;  %17028 = vrot.lane.b32.xlu1 %v16917_v17, %s17186_s27 }
 0xf3d   : > { %17043 = vrot.lane.b32.xlu0 %v16912_v60, %s17188_s29  ;;  %17038 = vrot.lane.b32.xlu1 %v16917_v17, %s17187_s28 }
 0xf41   : > { %17053 = vrot.lane.b32.xlu0 %v16912_v60, %s17192_s7  ;;  %17048 = vrot.lane.b32.xlu1 %v16917_v17, %s17188_s29 }
 0xf45   : > { %17063 = vrot.lane.b32.xlu0 %v16912_v60, %s17193_s10  ;;  %17058 = vrot.lane.b32.xlu1 %v16917_v17, %s17192_s7 }
 0xf49   : > { %17068 = vrot.lane.b32.xlu1 %v16917_v17, %s17193_s10 }
 0xf7b   : > { %v16914_v20 = vpop.permute.xlu0 %16913 }
 0xf7c   : > { %v16916_v21 = vunpack.i.h.bf16 %v16914_v20  ;;  %v16915_v22 = vunpack.i.l.bf16 %v16914_v20 }
 0xf7e   : > { %v15594_v23 = vpack.c.bf16 %v16916_v21, %v16915_v22 }
 0xf7f   : > { %v16924_v24 = vpop.permute.xlu0 %16923  ;;  %v16919_v25 = vpop.permute.xlu1 %16918 }
 0xf80   : > { %v16926_v27 = vunpack.i.h.bf16 %v16924_v24  ;;  %v16925_v7 = vunpack.i.l.bf16 %v16924_v24  ;;  %v16921_v29 = vunpack.i.h.bf16 %v16919_v25  ;;  %v16920_v30 = vunpack.i.l.bf16 %v16919_v25  ;;  %15595 = vmatprep.subr.bf16.mxu1 %v15594_v23  ;;  %v10698_v24 = vld [vmem:[#allocation2 + $0x13b0] sm:$0xff] }
 0xf81   : > { %15597 = vmatpush3.bf16.msra.mxu1 %v15594_v23  ;;  %v10697_v23 = vld [vmem:[#allocation2 + $0x13a8] sm:$0xff] }
 0xf82   : > { %v15598_v31 = vpack.c.bf16 %v16921_v29, %v16920_v30  ;;  %v15602_v33 = vpack.c.bf16 %v16926_v27, %v16925_v7  ;;  %v10699_v30 = vld [vmem:[#allocation2 + $0x13b8] sm:$0xff] }
 0xf83   : > { %v16929_v32 = vpop.permute.xlu1 %16928  ;;  %v16934_v8 = vpop.permute.xlu0 %16933 }
 0xf84   : > { %v16931_v34 = vunpack.i.h.bf16 %v16929_v32  ;;  %v16930_v35 = vunpack.i.l.bf16 %v16929_v32  ;;  %15599 = vmatprep.subr.bf16.mxu1 %v15598_v31  ;;  %v16936_v39 = vunpack.i.h.bf16 %v16934_v8  ;;  %v16935_v40 = vunpack.i.l.bf16 %v16934_v8  ;;  %v10805_v8 = vld [vmem:[#allocation2 + $0x13c8] sm:$0xff] }
 0xf85   : > { %15601 = vmatpush3.bf16.msra.mxu1 %v15598_v31  ;;  %v10804_v31 = vld [vmem:[#allocation2 + $0x13c0] sm:$0xff] }
 0xf86   : > { %15603 = vmatprep.subr.bf16.mxu1 %v15602_v33  ;;  %v15606_v41 = vpack.c.bf16 %v16931_v34, %v16930_v35  ;;  %v15610_v45 = vpack.c.bf16 %v16936_v39, %v16935_v40 }
 0xf87   : > { %v16939_v43 = vpop.permute.xlu1 %16938  ;;  %v16944_v48 = vpop.permute.xlu0 %16943 }
 0xf88   : > { %14669 = vmatmul.mubr.msk.f32.vlgmr.msra.gmra.mrb[16].mxu1 %vm276_vm0, %v10280_v36  ;;  %v16941_v46 = vunpack.i.h.bf16 %v16939_v43  ;;  %v16940_v47 = vunpack.i.l.bf16 %v16939_v43  ;;  %v16946_v50 = vunpack.i.h.bf16 %v16944_v48  ;;  %v16945_v51 = vunpack.i.l.bf16 %v16944_v48  ;;  %v10806_v36 = vld [vmem:[#allocation2 + $0x13d0] sm:$0xff]  ;;  %v10807_v43 = vld [vmem:[#allocation2 + $0x13d8] sm:$0xff] }
 0xf89   : > { %15605 = vmatpush3.bf16.msra.mxu1 %v15602_v33  ;;  %14671 = vmatprep.mubr.msk.f32.mxu1 %vm276_vm0, %v10281_v37  ;;  %v10914_v48 = vld [vmem:[#allocation2 + $0x13f0] sm:$0xff] }
 0xf8a   : > { %15607 = vmatprep.subr.bf16.mxu1 %v15606_v41  ;;  %v15614_v52 = vpack.c.bf16 %v16941_v46, %v16940_v47  ;;  %v15618_v28 = vpack.c.bf16 %v16946_v50, %v16945_v51  ;;  %v10913_v47 = vld [vmem:[#allocation2 + $0x13e8] sm:$0xff]  ;;  %v11020_v50 = vld [vmem:[#allocation2 + $0x1400] sm:$0xff] }
 0xf8b   : > { %v16949_v53 = vpop.permute.xlu1 %16948  ;;  %v16954_v59 = vpop.permute.xlu0 %16953 }
 0xf8c   : > { %14672 = vmatmul.mubr.msk.f32.gmra.mrb[18].mxu1 %vm276_vm0, %v10282_v38  ;;  %v16951_v57 = vunpack.i.h.bf16 %v16949_v53  ;;  %v16950_v58 = vunpack.i.l.bf16 %v16949_v53  ;;  %v16956_v63 = vunpack.i.h.bf16 %v16954_v59  ;;  %v16955_v0 = vunpack.i.l.bf16 %v16954_v59  ;;  %v10912_v38 = vld [vmem:[#allocation2 + $0x13e0] sm:$0xff]  ;;  %v11022_v53 = vld [vmem:[#allocation2 + $0x1410] sm:$0xff] }
 0xf8d   : > { %15609 = vmatpush3.bf16.msra.mxu1 %v15606_v41  ;;  %14682 = vmatprep.mubr.msk.f32.mxu1 %vm276_vm0, %v10266_v44 }
 0xf8e   : > { %15611 = vmatprep.subr.bf16.mxu1 %v15610_v45  ;;  %v15622_v1 = vpack.c.bf16 %v16951_v57, %v16950_v58  ;;  %v15626_v5 = vpack.c.bf16 %v16956_v63, %v16955_v0  ;;  %v11023_v57 = vld [vmem:[#allocation2 + $0x1418] sm:$0xff]  ;;  %v11120_v58 = vld [vmem:[#allocation2 + $0x1420] sm:$0xff]  ;;  %v11121_v0 = vld [vmem:[#allocation2 + $0x1428] sm:$0xff] }
 0xf8f   : > { %v16959_v2 = vpop.permute.xlu1 %16958  ;;  %v16964_v9 = vpop.permute.xlu0 %16963 }
 0xf90   : > { %14683 = vmatmul.mubr.msk.f32.vlgmr.msra.gmra.mrb[16].mxu1 %vm276_vm0, %v10267_v26  ;;  %v16961_v54 = vunpack.i.h.bf16 %v16959_v2  ;;  %v16960_v6 = vunpack.i.l.bf16 %v16959_v2  ;;  %v16966_v12 = vunpack.i.h.bf16 %v16964_v9  ;;  %v16965_v13 = vunpack.i.l.bf16 %v16964_v9 }
 0xf91   : > { %15613 = vmatpush3.bf16.msra.mxu1 %v15610_v45  ;;  %14685 = vmatprep.mubr.msk.f32.mxu1 %vm276_vm0, %v10268_v49  ;;  %v10915_v49 = vld [vmem:[#allocation2 + $0x13f8] sm:$0xff] }
 0xf92   : > { %15615 = vmatprep.subr.bf16.mxu1 %v15614_v52  ;;  %v15630_v14 = vpack.c.bf16 %v16961_v54, %v16960_v6  ;;  %v15634_v17 = vpack.c.bf16 %v16966_v12, %v16965_v13  ;;  %v11228_v54 = vld [vmem:[#allocation2 + $0x1440] sm:$0xff]  ;;  %v11230_v12 = vld [vmem:[#allocation2 + $0x1450] sm:$0xff] }
 0xf93   : > { %v16969_v60 = vpop.permute.xlu1 %16968  ;;  %v16974_v22 = vpop.permute.xlu0 %16973 }
 0xf94   : > { %14686 = vmatmul.mubr.msk.f32.gmra.mrb[20].mxu1 %vm276_vm0, %v10269_v55  ;;  %v16971_v20 = vunpack.i.h.bf16 %v16969_v60  ;;  %v16970_v21 = vunpack.i.l.bf16 %v16969_v60  ;;  %v16976_v25 = vunpack.i.h.bf16 %v16974_v22  ;;  %v16975_v27 = vunpack.i.l.bf16 %v16974_v22 }
 0xf95   : > { %15617 = vmatpush3.bf16.msra.mxu1 %v15614_v52  ;;  %14696 = vmatprep.mubr.msk.f32.mxu1 %vm276_vm0, %v10480_v56  ;;  %v11021_v52 = vld [vmem:[#allocation2 + $0x1408] sm:$0xff] }
 0xf96   : > { %15619 = vmatprep.subr.bf16.mxu1 %v15618_v28  ;;  %v15638_v7 = vpack.c.bf16 %v16971_v20, %v16970_v21  ;;  %v15642_v32 = vpack.c.bf16 %v16976_v25, %v16975_v27  ;;  %v11338_v25 = vld [vmem:[#allocation2 + $0x1470] sm:$0xff] }
 0xf97   : > { %v16979_v29 = vpop.permute.xlu1 %16978  ;;  %v16984_v35 = vpop.permute.xlu0 %16983 }
 0xf98   : > { %14697 = vmatmul.mubr.msk.f32.vlgmr.msra.gmra.mrb[16].mxu1 %vm276_vm0, %v10481_v61  ;;  %v16981_v33 = vunpack.i.h.bf16 %v16979_v29  ;;  %v16980_v34 = vunpack.i.l.bf16 %v16979_v29  ;;  %v16986_v37 = vunpack.i.h.bf16 %v16984_v35  ;;  %v16985_v39 = vunpack.i.l.bf16 %v16984_v35 }
 0xf99   : > { %15621 = vmatpush3.bf16.msra.mxu1 %v15618_v28  ;;  %14699 = vmatprep.mubr.msk.f32.mxu1 %vm276_vm0, %v10482_v62 }
 0xf9a   : > { %15623 = vmatprep.subr.bf16.mxu1 %v15622_v1  ;;  %v15646_v40 = vpack.c.bf16 %v16981_v33, %v16980_v34  ;;  %v15650_v44 = vpack.c.bf16 %v16986_v37, %v16985_v39  ;;  %v11446_v37 = vld [vmem:[#allocation2 + $0x1490] sm:$0xff] }
 0xf9b   : > { %v16989_v41 = vpop.permute.xlu1 %16988  ;;  %v16994_v51 = vpop.permute.xlu0 %16993 }
 0xf9c   : > { %14700 = vmatmul.mubr.msk.f32.gmra.mrb[22].mxu1 %vm276_vm0, %v10483_v3  ;;  %v16991_v45 = vunpack.i.h.bf16 %v16989_v41  ;;  %v16990_v46 = vunpack.i.l.bf16 %v16989_v41  ;;  %v16996_v55 = vunpack.i.h.bf16 %v16994_v51  ;;  %v16995_v56 = vunpack.i.l.bf16 %v16994_v51 }
 0xf9d   : > { %15625 = vmatpush3.bf16.msra.mxu1 %v15622_v1  ;;  %14710 = vmatprep.mubr.msk.f32.mxu1 %vm276_vm0, %v10588_v4  ;;  %v11122_v1 = vld [vmem:[#allocation2 + $0x1430] sm:$0xff] }
 0xf9e   : > { %15627 = vmatprep.subr.bf16.mxu1 %v15626_v5  ;;  %v15654_v26 = vpack.c.bf16 %v16991_v45, %v16990_v46  ;;  %v15666_v59 = vpack.c.bf16 %v16996_v55, %v16995_v56  ;;  %v11555_v55 = vld [vmem:[#allocation2 + $0x14b8] sm:$0xff]  ;;  %v11660_v56 = vld [vmem:[#allocation2 + $0x14c0] sm:$0xff] }
 0xf9f   : > { %v16999_v28 = vpop.permute.xlu1 %16998  ;;  %v17004_v63 = vpop.permute.xlu0 %17003 }
 0xfa0   : > { %14711 = vmatmul.mubr.msk.f32.vlgmr.msra.gmra.mrb[16].mxu1 %vm276_vm0, %v10589_v10  ;;  %v17001_v61 = vunpack.i.h.bf16 %v16999_v28  ;;  %v17000_v62 = vunpack.i.l.bf16 %v16999_v28  ;;  %v17005_v2 = vunpack.i.l.bf16 %v17004_v63 }
 0xfa1   : > { %15629 = vmatpush3.bf16.msra.mxu1 %v15626_v5  ;;  %14713 = vmatprep.mubr.msk.f32.mxu1 %vm276_vm0, %v10590_v11  ;;  %v11123_v5 = vld [vmem:[#allocation2 + $0x1438] sm:$0xff]  ;;  %v11229_v11 = vld [vmem:[#allocation2 + $0x1448] sm:$0xff] }
 0xfa2   : > { %15631 = vmatprep.subr.bf16.mxu1 %v15630_v14  ;;  %v15670_v3 = vpack.c.bf16 %v17001_v61, %v17000_v62  ;;  %v11661_v61 = vld [vmem:[#allocation2 + $0x14c8] sm:$0xff]  ;;  %v11662_v62 = vld [vmem:[#allocation2 + $0x14d0] sm:$0xff] }
 0xfa3   : > { %v17009_v4 = vpop.permute.xlu1 %17008  ;;  %v17014_v10 = vpop.permute.xlu0 %17013 }
 0xfa4   : > { %14714 = vmatmul.mubr.msk.f32.gmra.mrb[24].mxu1 %vm276_vm0, %v10591_v15  ;;  %v17011_v9 = vunpack.i.h.bf16 %v17009_v4  ;;  %v17016_v13 = vunpack.i.h.bf16 %v17014_v10 }
 0xfa5   : > { %15633 = vmatpush3.bf16.msra.mxu1 %v15630_v14  ;;  %14724 = vmatprep.mubr.msk.f32.mxu1 %vm276_vm0, %v10696_v16  ;;  %v17015_v14 = vunpack.i.l.bf16 %v17014_v10  ;;  %v11231_v16 = vld [vmem:[#allocation2 + $0x1458] sm:$0xff] }
 0xfa6   : > { %15635 = vmatprep.subr.bf16.mxu1 %v15634_v17 }
 0xfa7   : > { %v17019_v15 = vpop.permute.xlu1 %17018  ;;  %v15682_v20 = vpack.c.bf16 %v17016_v13, %v17015_v14  ;;  %v11771_v14 = vld [vmem:[#allocation2 + $0x14f8] sm:$0xff] }
 0xfa8   : > { %14725 = vmatmul.mubr.msk.f32.vlgmr.msra.gmra.mrb[16].mxu1 %vm276_vm0, %v10697_v23  ;;  %v17021_v21 = vunpack.i.h.bf16 %v17019_v15  ;;  %v17020_v22 = vunpack.i.l.bf16 %v17019_v15  ;;  %v17024_v23 = vpop.permute.xlu0 %17023 }
 0xfa9   : > { %15637 = vmatpush3.bf16.msra.mxu1 %v15634_v17  ;;  %14727 = vmatprep.mubr.msk.f32.mxu1 %vm276_vm0, %v10698_v24  ;;  %v11336_v17 = vld [vmem:[#allocation2 + $0x1460] sm:$0xff]  ;;  %v11337_v24 = vld [vmem:[#allocation2 + $0x1468] sm:$0xff]  ;;  %v17026_v27 = vunpack.i.h.bf16 %v17024_v23 }
 0xfaa   : > { %15639 = vmatprep.subr.bf16.mxu1 %v15638_v7  ;;  %v15686_v29 = vpack.c.bf16 %v17021_v21, %v17020_v22  ;;  %v11878_v21 = vld [vmem:[#allocation2 + $0x1510] sm:$0xff] }
 0xfac   : > { %14728 = vmatmul.mubr.msk.f32.gmra.mrb[26].mxu1 %vm276_vm0, %v10699_v30  ;;  %v17029_v30 = vpop.permute.xlu1 %17028 }
 0xfad   : > { %15641 = vmatpush3.bf16.msra.mxu1 %v15638_v7  ;;  %14738 = vmatprep.mubr.msk.f32.mxu1 %vm276_vm0, %v10804_v31  ;;  %v17025_v7 = vunpack.i.l.bf16 %v17024_v23  ;;  %v11339_v31 = vld [vmem:[#allocation2 + $0x1478] sm:$0xff]  ;;  %v17031_v34 = vunpack.i.h.bf16 %v17029_v30  ;;  %v17030_v35 = vunpack.i.l.bf16 %v17029_v30 }
 0xfae   : > { %15643 = vmatprep.subr.bf16.mxu1 %v15642_v32  ;;  %v11879_v23 = vld [vmem:[#allocation2 + $0x1518] sm:$0xff] }
 0xfaf   : > { %v15690_v33 = vpack.c.bf16 %v17026_v27, %v17025_v7  ;;  %v15694_v41 = vpack.c.bf16 %v17031_v34, %v17030_v35  ;;  %v11986_v27 = vld [vmem:[#allocation2 + $0x1530] sm:$0xff]  ;;  %v11987_v7 = vld [vmem:[#allocation2 + $0x1538] sm:$0xff] }
 0xfb0   : > { %14739 = vmatmul.mubr.msk.f32.vlgmr.msra.gmra.mrb[16].mxu1 %vm276_vm0, %v10805_v8  ;;  %v17034_v8 = vpop.permute.xlu0 %17033 }
 0xfb1   : > { %15645 = vmatpush3.bf16.msra.mxu1 %v15642_v32  ;;  %14741 = vmatprep.mubr.msk.f32.mxu1 %vm276_vm0, %v10806_v36  ;;  %v11444_v32 = vld [vmem:[#allocation2 + $0x1480] sm:$0xff]  ;;  %v11445_v36 = vld [vmem:[#allocation2 + $0x1488] sm:$0xff]  ;;  %v17036_v39 = vunpack.i.h.bf16 %v17034_v8 }
 0xfb2   : > { %15647 = vmatprep.subr.bf16.mxu1 %v15646_v40 }
 0xfb4   : > { %14742 = vmatmul.mubr.msk.f32.gmra.mrb[28].mxu1 %vm276_vm0, %v10807_v43  ;;  %v17039_v43 = vpop.permute.xlu1 %17038 }
 0xfb5   : > { %15649 = vmatpush3.bf16.msra.mxu1 %v15646_v40  ;;  %14752 = vmatprep.mubr.msk.f32.mxu1 %vm276_vm0, %v10912_v38  ;;  %v17035_v40 = vunpack.i.l.bf16 %v17034_v8  ;;  %v11447_v38 = vld [vmem:[#allocation2 + $0x1498] sm:$0xff]  ;;  %v17041_v46 = vunpack.i.h.bf16 %v17039_v43 }
 0xfb6   : > { %15651 = vmatprep.subr.bf16.mxu1 %v15650_v44 }
 0xfb7   : > { %v15698_v45 = vpack.c.bf16 %v17036_v39, %v17035_v40 }
 0xfb8   : > { %14753 = vmatmul.mubr.msk.f32.vlgmr.msra.gmra.mrb[16].mxu1 %vm276_vm0, %v10913_v47  ;;  %v17040_v47 = vunpack.i.l.bf16 %v17039_v43 }
 0xfb9   : > { %15653 = vmatpush3.bf16.msra.mxu1 %v15650_v44  ;;  %14755 = vmatprep.mubr.msk.f32.mxu1 %vm276_vm0, %v10914_v48  ;;  %v11552_v44 = vld [vmem:[#allocation2 + $0x14a0] sm:$0xff]  ;;  %v17044_v48 = vpop.permute.xlu0 %17043 }
 0xfba   : > { %15655 = vmatprep.subr.bf16.mxu1 %v15654_v26  ;;  %v17045_v51 = vunpack.i.l.bf16 %v17044_v48 }
 0xfbc   : > { %14756 = vmatmul.mubr.msk.f32.gmra.mrb[30].mxu1 %vm276_vm0, %v10915_v49  ;;  %v11554_v49 = vld [vmem:[#allocation2 + $0x14b0] sm:$0xff] }
 0xfbd   : > { %15657 = vmatpush3.bf16.msra.mxu1 %v15654_v26  ;;  %14766 = vmatprep.mubr.msk.f32.mxu1 %vm276_vm0, %v11020_v50  ;;  %v11553_v26 = vld [vmem:[#allocation2 + $0x14a8] sm:$0xff]  ;;  %v17046_v50 = vunpack.i.h.bf16 %v17044_v48 }
 0xfbe   : > { %15659 = vmatprep.subr.bf16.mxu1 %v17974_v18 }
 0xfbf   : > { %v15706_v28 = vpack.c.bf16 %v17046_v50, %v17045_v51 }
 0xfc0   : > { %14767 = vmatmul.mubr.msk.f32.vlgmr.msra.gmra.mrb[16].mxu1 %vm276_vm0, %v11021_v52  ;;  %v15702_v52 = vpack.c.bf16 %v17041_v46, %v17040_v47 }
 0xfc1   : > { %15661 = vmatpush3.bf16.msra.mxu1 %v17974_v18  ;;  %14769 = vmatprep.mubr.msk.f32.mxu1 %vm276_vm0, %v11022_v53  ;;  %v17006_v18 = vunpack.i.h.bf16 %v17004_v63  ;;  %v17049_v53 = vpop.permute.xlu1 %17048 }
 0xfc2   : > { %15663 = vmatprep.subr.bf16.mxu1 %v17976_v19 }
 0xfc3   : > { %v15674_v6 = vpack.c.bf16 %v17006_v18, %v17005_v2  ;;  %v11663_v2 = vld [vmem:[#allocation2 + $0x14d8] sm:$0xff] }
 0xfc4   : > { %14770 = vmatmul.mubr.msk.f32.gmra.mrb[32].mxu1 %vm276_vm0, %v11023_v57  ;;  %v17051_v57 = vunpack.i.h.bf16 %v17049_v53 }
 0xfc5   : > { %15665 = vmatpush3.bf16.msra.mxu1 %v17976_v19  ;;  %14780 = vmatprep.mubr.msk.f32.mxu1 %vm276_vm0, %v11120_v58  ;;  %v17010_v19 = vunpack.i.l.bf16 %v17009_v4  ;;  %v17050_v58 = vunpack.i.l.bf16 %v17049_v53  ;;  %v17059_v18 = vpop.permute.xlu1 %17058 }
 0xfc6   : > { %15667 = vmatprep.subr.bf16.mxu1 %v15666_v59 }
 0xfc7   : > { %v15678_v60 = vpack.c.bf16 %v17011_v9, %v17010_v19  ;;  %v11769_v9 = vld [vmem:[#allocation2 + $0x14e8] sm:$0xff]  ;;  %v11770_v19 = vld [vmem:[#allocation2 + $0x14f0] sm:$0xff] }
 0xfc8   : > { %14781 = vmatmul.mubr.msk.f32.vlgmr.msra.gmra.mrb[16].mxu1 %vm276_vm0, %v11121_v0 }
 0xfc9   : > { %15669 = vmatpush3.bf16.msra.mxu1 %v15666_v59  ;;  %14783 = vmatprep.mubr.msk.f32.mxu1 %vm276_vm0, %v11122_v1  ;;  %v17054_v59 = vpop.permute.xlu0 %17053  ;;  %v15710_v1 = vpack.c.bf16 %v17051_v57, %v17050_v58  ;;  %v17069_v13 = vpop.permute.xlu1 %17068 }
 0xfca   : > { %15671 = vmatprep.subr.bf16.mxu1 %v15670_v3  ;;  %v17056_v63 = vunpack.i.h.bf16 %v17054_v59  ;;  %v17055_v0 = vunpack.i.l.bf16 %v17054_v59 }
 0xfcc   : > { %14784 = vmatmul.mubr.msk.f32.gmra.mrb[34].mxu1 %vm276_vm0, %v11123_v5  ;;  %v15714_v4 = vpack.c.bf16 %v17056_v63, %v17055_v0  ;;  %v17061_v5 = vunpack.i.h.bf16 %v17059_v18  ;;  %v12087_v0 = vld [vmem:[#allocation6 + $0x120] sm:$0xff] }
 0xfcd   : > { %15673 = vmatpush3.bf16.msra.mxu1 %v15670_v3  ;;  %14794 = vmatprep.mubr.msk.f32.mxu1 %vm276_vm0, %v11228_v54  ;;  %v11768_v3 = vld [vmem:[#allocation2 + $0x14e0] sm:$0xff]  ;;  %v17060_v54 = vunpack.i.l.bf16 %v17059_v18 }
 0xfce   : > { %15675 = vmatprep.subr.bf16.mxu1 %v15674_v6 }
 0xfd0   : > { %14795 = vmatmul.mubr.msk.f32.vlgmr.msra.gmra.mrb[16].mxu1 %vm276_vm0, %v11229_v11 }
 0xfd1   : > { %15677 = vmatpush3.bf16.msra.mxu1 %v15674_v6  ;;  %14797 = vmatprep.mubr.msk.f32.mxu1 %vm276_vm0, %v11230_v12  ;;  %v17064_v6 = vpop.permute.xlu0 %17063  ;;  %v15718_v12 = vpack.c.bf16 %v17061_v5, %v17060_v54 }
 0xfd2   : > { %15679 = vmatprep.subr.bf16.mxu1 %v15678_v60  ;;  %v17066_v10 = vunpack.i.h.bf16 %v17064_v6  ;;  %v17065_v11 = vunpack.i.l.bf16 %v17064_v6 }
 0xfd4   : > { %14798 = vmatmul.mubr.msk.f32.gmra.mrb[36].mxu1 %vm276_vm0, %v11231_v16  ;;  %v15722_v15 = vpack.c.bf16 %v17066_v10, %v17065_v11  ;;  %v17071_v16 = vunpack.i.h.bf16 %v17069_v13 }
 0xfd5   : > { %15681 = vmatpush3.bf16.msra.mxu1 %v15678_v60  ;;  %14808 = vmatprep.mubr.msk.f32.mxu1 %vm276_vm0, %v11336_v17  ;;  %v11876_v60 = vld [vmem:[#allocation2 + $0x1500] sm:$0xff]  ;;  %v17070_v17 = vunpack.i.l.bf16 %v17069_v13 }
 0xfd6   : > { %15683 = vmatprep.subr.bf16.mxu1 %v15682_v20 }
 0xfd7   : > { %v15726_v22 = vpack.c.bf16 %v17071_v16, %v17070_v17 }
 0xfd8   : > { %14809 = vmatmul.mubr.msk.f32.vlgmr.msra.gmra.mrb[16].mxu1 %vm276_vm0, %v11337_v24  ;;  %v11984_v24 = vld [vmem:[#allocation2 + $0x1520] sm:$0xff] }
 0xfd9   : > { %15685 = vmatpush3.bf16.msra.mxu1 %v15682_v20  ;;  %14811 = vmatprep.mubr.msk.f32.mxu1 %vm276_vm0, %v11338_v25  ;;  %v11877_v20 = vld [vmem:[#allocation2 + $0x1508] sm:$0xff] }
 0xfda   : > { %15687 = vmatprep.subr.bf16.mxu1 %v15686_v29  ;;  %v11985_v25 = vld [vmem:[#allocation2 + $0x1528] sm:$0xff] }
 0xfdc   : > { %14812 = vmatmul.mubr.msk.f32.gmra.mrb[38].mxu1 %vm276_vm0, %v11339_v31 }
 0xfdd   : > { %15689 = vmatpush3.bf16.msra.mxu1 %v15686_v29  ;;  %14822 = vmatprep.mubr.msk.f32.mxu1 %vm276_vm0, %v11444_v32 }
 0xfde   : > { %15691 = vmatprep.subr.bf16.mxu1 %v15690_v33 }
 0xfe0   : > { %14823 = vmatmul.mubr.msk.f32.vlgmr.msra.gmra.mrb[16].mxu1 %vm276_vm0, %v11445_v36 }
 0xfe1   : > { %15693 = vmatpush3.bf16.msra.mxu1 %v15690_v33  ;;  %14825 = vmatprep.mubr.msk.f32.mxu1 %vm276_vm0, %v11446_v37 }
 0xfe2   : > { %15695 = vmatprep.subr.bf16.mxu1 %v15694_v41 }
 0xfe4   : > { %14826 = vmatmul.mubr.msk.f32.gmra.mrb[40].mxu1 %vm276_vm0, %v11447_v38 }
 0xfe5   : > { %15697 = vmatpush3.bf16.msra.mxu1 %v15694_v41  ;;  %14836 = vmatprep.mubr.msk.f32.mxu1 %vm276_vm0, %v11552_v44 }
 0xfe6   : > { %15699 = vmatprep.subr.bf16.mxu1 %v15698_v45 }
 0xfe8   : > { %14837 = vmatmul.mubr.msk.f32.vlgmr.msra.gmra.mrb[16].mxu1 %vm276_vm0, %v11553_v26 }
 0xfe9   : > { %15701 = vmatpush3.bf16.msra.mxu1 %v15698_v45  ;;  %14839 = vmatprep.mubr.msk.f32.mxu1 %vm276_vm0, %v11554_v49 }
 0xfea   : > { %15703 = vmatprep.subr.bf16.mxu1 %v15702_v52 }
 0xfec   : > { %14840 = vmatmul.mubr.msk.f32.gmra.mrb[42].mxu1 %vm276_vm0, %v11555_v55 }
 0xfed   : > { %15705 = vmatpush3.bf16.msra.mxu1 %v15702_v52  ;;  %14850 = vmatprep.mubr.msk.f32.mxu1 %vm276_vm0, %v11660_v56 }
 0xfee   : > { %15707 = vmatprep.subr.bf16.mxu1 %v15706_v28 }
 0xff0   : > { %14851 = vmatmul.mubr.msk.f32.vlgmr.msra.gmra.mrb[16].mxu1 %vm276_vm0, %v11661_v61  ;;  %v12084_v61 = vld [vmem:[#allocation4 + $0x120] sm:$0xff] }
 0xff1   : > { %15709 = vmatpush3.bf16.msra.mxu1 %v15706_v28  ;;  %14853 = vmatprep.mubr.msk.f32.mxu1 %vm276_vm0, %v11662_v62 }
 0xff2   : > { %15711 = vmatprep.subr.bf16.mxu1 %v15710_v1 }
 0xff4   : > { %14854 = vmatmul.mubr.msk.f32.gmra.mrb[44].mxu1 %vm276_vm0, %v11663_v2 }
 0xff5   : > { %15713 = vmatpush3.bf16.msra.mxu1 %v15710_v1  ;;  %14864 = vmatprep.mubr.msk.f32.mxu1 %vm276_vm0, %v11768_v3 }
 0xff6   : > { %15715 = vmatprep.subr.bf16.mxu1 %v15714_v4 }
 0xff8   : > { %14865 = vmatmul.mubr.msk.f32.vlgmr.msra.gmra.mrb[16].mxu1 %vm276_vm0, %v11769_v9 }
 0xff9   : > { %15717 = vmatpush3.bf16.msra.mxu1 %v15714_v4  ;;  %14867 = vmatprep.mubr.msk.f32.mxu1 %vm276_vm0, %v11770_v19 }
 0xffa   : > { %15719 = vmatprep.subr.bf16.mxu1 %v15718_v12 }
 0xffc   : > { %14868 = vmatmul.mubr.msk.f32.gmra.mrb[46].mxu1 %vm276_vm0, %v11771_v14 }
 0xffd   : > { %15721 = vmatpush3.bf16.msra.mxu1 %v15718_v12  ;;  %14878 = vmatprep.mubr.msk.f32.mxu1 %vm276_vm0, %v11876_v60 }
 0xffe   : > { %15723 = vmatprep.subr.bf16.mxu1 %v15722_v15 }
0x1000   : > { %14879 = vmatmul.mubr.msk.f32.vlgmr.msra.gmra.mrb[16].mxu1 %vm276_vm0, %v11877_v20 }
0x1001   : > { %15725 = vmatpush3.bf16.msra.mxu1 %v15722_v15  ;;  %14881 = vmatprep.mubr.msk.f32.mxu1 %vm276_vm0, %v11878_v21 }
0x1002   : > { %15727 = vmatprep.subr.bf16.mxu1 %v15726_v22 }
0x1004   : > { %14882 = vmatmul.mubr.msk.f32.gmra.mrb[48].mxu1 %vm276_vm0, %v11879_v23 }
0x1005   : > { %15729 = vmatpush3.bf16.msra.mxu1 %v15726_v22  ;;  %14892 = vmatprep.mubr.msk.f32.mxu1 %vm276_vm0, %v11984_v24 }
0x1008   : > { %14893 = vmatmul.mubr.msk.f32.vlgmr.msra.gmra.mrb[16].mxu1 %vm276_vm0, %v11985_v25 }
0x1009   : > { %14895 = vmatprep.mubr.msk.f32.mxu1 %vm276_vm0, %v11986_v27 }
0x100c   : > { %14896 = vmatmul.mubr.msk.f32.gmra.mrb[50].mxu1 %vm276_vm0, %v11987_v7 }
0x105f   : > { %v14673_v29 = vpop.f32.mrb[18].mxu1 }
0x1060   : > { %v10370_v30 = vpop.f32.mrb[19].mxu1 }
0x1067   : > { %v14687_v31 = vpop.f32.mrb[20].mxu1 }
0x1068   : > { %v10464_v32 = vpop.f32.mrb[21].mxu1 }
0x106f   : > { %v14701_v33 = vpop.f32.mrb[22].mxu1 }
0x1070   : > { %v10571_v34 = vpop.f32.mrb[23].mxu1 }
0x1077   : > { %v14715_v35 = vpop.f32.mrb[24].mxu1 }
0x1078   : > { %v10679_v8 = vpop.f32.mrb[25].mxu1 }
0x107f   : > { %v14729_v36 = vpop.f32.mrb[26].mxu1 }
0x1080   : > { %v10787_v37 = vpop.f32.mrb[27].mxu1 }
0x1087   : > { %v14743_v39 = vpop.f32.mrb[28].mxu1 }
0x1088   : > { %v10895_v40 = vpop.f32.mrb[29].mxu1 }
0x108f   : > { %v14757_v41 = vpop.f32.mrb[30].mxu1 }
0x1090   : > { %v11003_v43 = vpop.f32.mrb[31].mxu1 }
0x1097   : > { %v14771_v38 = vpop.f32.mrb[32].mxu1 }
0x1098   : > { %v11111_v44 = vpop.f32.mrb[33].mxu1 }
0x109f   : > { %v14785_v45 = vpop.f32.mrb[34].mxu1 }
0x10a0   : > { %v11211_v46 = vpop.f32.mrb[35].mxu1 }
0x10a7   : > { %v14799_v47 = vpop.f32.mrb[36].mxu1 }
0x10a8   : > { %v11319_v48 = vpop.f32.mrb[37].mxu1 }
0x10af   : > { %v14813_v26 = vpop.f32.mrb[38].mxu1 }
0x10b0   : > { %v11427_v49 = vpop.f32.mrb[39].mxu1 }
0x10b7   : > { %v14827_v50 = vpop.f32.mrb[40].mxu1 }
0x10b8   : > { %v11535_v51 = vpop.f32.mrb[41].mxu1 }
0x10bf   : > { %v14841_v52 = vpop.f32.mrb[42].mxu1 }
0x10c0   : > { %v11643_v53 = vpop.f32.mrb[43].mxu1 }
0x10c7   : > { %v14855_v55 = vpop.f32.mrb[44].mxu1 }
0x10c8   : > { %v11751_v56 = vpop.f32.mrb[45].mxu1 }
0x10cf   : > { %v14869_v28 = vpop.f32.mrb[46].mxu1 }
0x10d0   : > { %v11859_v57 = vpop.f32.mrb[47].mxu1 }
0x10d7   : > { %v14883_v58 = vpop.f32.mrb[48].mxu1 }
0x10d8   : > { %v11967_v59 = vpop.f32.mrb[49].mxu1 }
0x10db   : > { %v14894_v62 = vpop.f32.mrb[16].mxu1 }
0x10dc   : > { %v12066_v63 = vpop.f32.mrb[17].mxu1 }
0x10dd   : > { %v12085_v1 = vmul.f32 %v12084_v61, %v12066_v63 }
0x10df   : > { %v12088_v18 = vadd.f32 %v12087_v0, %v12085_v1  ;;  %v14897_v2 = vpop.f32.mrb[50].mxu1 }
0x10e0   : > { %v12075_v3 = vpop.f32.mrb[51].mxu1 }
0x10e1   : > { %v12089_v4 = vmax.f32 %v12088_v18, 0.0 }
0x10e3   : > { %v12090_v5 = vmul.f32 %v17427_v42, %v12089_v4 }
0x10e5   : > { %12091 = vst [vmem:[%s239_s13] sm:$0xff] %v12090_v5 }
0x10e6 PF: > { %s16_s15 = sadd.s32 1, %s17170_s15  }
0x10e7   : > { %p13_p5 = scmp.ge.s32.totalorder %s16_s15, 4  }
0x10e9   :  { %15 = sbr.rel (!%p13_p5) target bundleno = 2 (0x2), region = 200 }
0x10f0   :  { %12111 = vsyncpa [#allocation3], 1 }
0x10f1   :  { %12113 = vsyncpa [#allocation3 + $0x1], 1 }
0x10f2   :  { %12114 = vsyncpa [#allocation5], 1 }

</bundles_post_ra>
